<compile_context>
chip_gen: v6e
topology: v6e:2x2x1
jax: 0.10.0
libtpu: 0.0.40
codegen_flags: <defaults>
</compile_context>

<pallas_src>
import functools

import jax
import jax.numpy as jnp
from jax.experimental import pallas as pl
from jax.experimental.pallas import tpu as pltpu


# ----------------------------------------------------------------------------
# Flash-style causal attention kernel (ScaledDotProduct core)
# ----------------------------------------------------------------------------

_MASK_VALUE = -1e30  # large finite negative: exp() underflows to exactly 0.


def _flash_attn_kernel(qi_tab, ki_tab, last_tab,            # scalar prefetch
                       q_ref, k_ref, v_ref, o_ref,           # tiles
                       m_sc, l_sc, acc_sc, *, tq, tk):
    p = pl.program_id(1)
    qi = qi_tab[p]
    ki = ki_tab[p]
    is_last = last_tab[p]

    @pl.when(ki == 0)
    def _init():
        m_sc[...] = jnp.full_like(m_sc, _MASK_VALUE)
        l_sc[...] = jnp.zeros_like(l_sc)
        acc_sc[...] = jnp.zeros_like(acc_sc)

    q = q_ref[0]                      # (tq, D), scale already folded into Q
    k = k_ref[0]                      # (tk, D)
    v = v_ref[0]                      # (tk, D)

    # Q @ K^T without materialising a transpose: contract last dims.
    s = jax.lax.dot_general(q, k, (((1,), (1,)), ((), ())),
                            preferred_element_type=jnp.float32)   # (tq, tk)

    def update(scores):
        m_prev = m_sc[...]
        m_new = jnp.maximum(m_prev, jnp.max(scores, axis=-1, keepdims=True))
        alpha = jnp.exp(m_prev - m_new)
        probs = jnp.exp(scores - m_new)
        l_sc[...] = alpha * l_sc[...] + jnp.sum(probs, axis=-1, keepdims=True)
        acc_sc[...] = alpha * acc_sc[...] + jnp.dot(
            probs.astype(v.dtype), v, preferred_element_type=jnp.float32)
        m_sc[...] = m_new

    # Mask only the tiles that straddle the diagonal; strictly-below tiles
    # (the large majority) take the unmasked path.
    needs_mask = (ki + 1) * tk - 1 > qi * tq

    @pl.when(needs_mask)
    def _masked():
        row = qi * tq + jax.lax.broadcasted_iota(jnp.int32, (tq, tk), 0)
        col = ki * tk + jax.lax.broadcasted_iota(jnp.int32, (tq, tk), 1)
        update(jnp.where(col <= row, s, _MASK_VALUE))

    @pl.when(jnp.logical_not(needs_mask))
    def _unmasked():
        update(s)

    @pl.when(is_last == 1)
    def _finalize():
        inv_l = pl.reciprocal(l_sc[...], approx=True)      # EUP slot, not VALU
        o_ref[0] = (acc_sc[...] * inv_l).astype(o_ref.dtype)


def _choose_tile(S, target):
    """Largest tile <= target that divides S and is sublane-legal."""
    if S <= target:
        return S
    for t in range(min(target, S), 0, -1):
        if S % t == 0 and (t % 8 == 0 or t == S):
            return t
    return S


def flash_attention(q, k, v, *, sm_scale=1.0, block_q=256, block_k=512,
                    bf16_matmul=True, vmem_limit_bytes=32 * 1024 * 1024):
    """Causal attention: softmax(tril(Q K^T * sm_scale)) @ V.

    q, k, v: (B, S, D) with B = batch*heads.  Output dtype follows the
    (possibly bf16-cast) operand dtype.  The (B, S, S) probability tensor of
    the original ScaledDotProduct is never materialised (the module discards
    it).
    """
    B, S, D = q.shape
    assert k.shape == (B, S, D) and v.shape == (B, S, D)

    if sm_scale != 1.0:
        q = q * sm_scale                       # fold scale in q's dtype (f32)
    if bf16_matmul and q.dtype != jnp.bfloat16:
        q = q.astype(jnp.bfloat16)
        k = k.astype(jnp.bfloat16)
        v = v.astype(jnp.bfloat16)
    out_dtype = q.dtype

    tq = _choose_tile(S, block_q)
    tk = _choose_tile(S, block_k)
    nq, nk = S // tq, S // tk

    # Enumerate only lower-triangular (qi, ki) tile pairs (qi-major, ki inner).
    qi_list, ki_list, last_list = [], [], []
    for qi in range(nq):
        kmax = min(nk - 1, ((qi + 1) * tq - 1) // tk)
        for ki in range(kmax + 1):
            qi_list.append(qi)
            ki_list.append(ki)
            last_list.append(1 if ki == kmax else 0)
    n_pairs = len(qi_list)
    qi_tab = jnp.asarray(qi_list, jnp.int32)
    ki_tab = jnp.asarray(ki_list, jnp.int32)
    last_tab = jnp.asarray(last_list, jnp.int32)

    kernel = functools.partial(_flash_attn_kernel, tq=tq, tk=tk)

    q_spec = pl.BlockSpec((1, tq, D), lambda b, p, qt, kt, lt: (b, qt[p], 0))
    kv_spec = pl.BlockSpec((1, tk, D), lambda b, p, qt, kt, lt: (b, kt[p], 0))
    out_spec = pl.BlockSpec((1, tq, D), lambda b, p, qt, kt, lt: (b, qt[p], 0))

    return pl.pallas_call(
        kernel,
        out_shape=jax.ShapeDtypeStruct((B, S, D), out_dtype),
        grid_spec=pltpu.PrefetchScalarGridSpec(
            num_scalar_prefetch=3,
            grid=(B, n_pairs),
            in_specs=[q_spec, kv_spec, kv_spec],
            out_specs=out_spec,
            scratch_shapes=[pltpu.VMEM((tq, 1), jnp.float32),   # running max
                            pltpu.VMEM((tq, 1), jnp.float32),   # running sum
                            pltpu.VMEM((tq, D), jnp.float32)]), # accumulator
        compiler_params=pltpu.CompilerParams(
            dimension_semantics=("parallel", "arbitrary"),
            vmem_limit_bytes=vmem_limit_bytes),
    )(qi_tab, ki_tab, last_tab, q, k, v)


# ----------------------------------------------------------------------------
# LayerNorm kernel (optionally fused residual add)
# ----------------------------------------------------------------------------

def _layernorm_kernel(*refs, eps, has_residual):
    if has_residual:
        x_ref, r_ref, g_ref, b_ref, o_ref = refs
        x = x_ref[...] + r_ref[...]
    else:
        x_ref, g_ref, b_ref, o_ref = refs
        x = x_ref[...]
    mean = jnp.mean(x, axis=-1, keepdims=True)
    xc = x - mean
    var = jnp.mean(xc * xc, axis=-1, keepdims=True)
    inv = jax.lax.rsqrt(var + eps)
    o_ref[...] = (xc * inv) * g_ref[...] + b_ref[...]


def layer_norm(x, residual, gamma, beta, eps=1e-5, block_rows=512):
    """LayerNorm(x + residual) if residual is not None else LayerNorm(x)."""
    orig_shape = x.shape
    E = orig_shape[-1]
    x2 = x.reshape(-1, E).astype(jnp.float32)
    R = x2.shape[0]
    has_res = residual is not None
    r2 = residual.reshape(-1, E).astype(jnp.float32) if has_res else None

    rt = min(block_rows, R)
    n_blocks = (R + rt - 1) // rt
    Rp = n_blocks * rt
    pad = Rp - R
    if pad:
        x2 = jnp.pad(x2, ((0, pad), (0, 0)))
        if has_res:
            r2 = jnp.pad(r2, ((0, pad), (0, 0)))

    g2 = gamma.reshape(1, E).astype(jnp.float32)
    b2 = beta.reshape(1, E).astype(jnp.float32)

    row_spec = pl.BlockSpec((rt, E), lambda i: (i, 0))
    vec_spec = pl.BlockSpec((1, E), lambda i: (0, 0))
    in_specs = [row_spec] + ([row_spec] if has_res else []) + [vec_spec, vec_spec]
    args = (x2, r2, g2, b2) if has_res else (x2, g2, b2)

    out = pl.pallas_call(
        functools.partial(_layernorm_kernel, eps=eps, has_residual=has_res),
        out_shape=jax.ShapeDtypeStruct((Rp, E), jnp.float32),
        grid=(n_blocks,),
        in_specs=in_specs,
        out_specs=row_spec,
        compiler_params=pltpu.CompilerParams(
            dimension_semantics=("parallel",)),
    )(*args)
    if pad:
        out = out[:R]
    return out.reshape(orig_shape)


# ----------------------------------------------------------------------------
# Full LowRankFillMaskTextTransformer forward (JAX wrapper around the kernels)
# ----------------------------------------------------------------------------
# TODO(synk): token/positional embedding gathers, dense projections and the
# exact-erf GELU are left to XLA (no bespoke Pallas kernel for them).
# TODO(synk): nn.Dropout layers are treated as inference-mode identities.
# TODO(synk): the remaining head split/merge transposes around the attention
# kernel are done in bf16; fully removing them needs a block of 1 on the
# second-minor head axis of an (N,S,H,D) BlockSpec, which violates the (8,128)
# tiling rule for small head counts.


def init_params(key, num_tokens, embedding_size, num_heads, hidden_size,
                num_layers, bptt):
    E, Hd = embedding_size, hidden_size
    keys = jax.random.split(key, 4 + num_layers)

    def dense(k, shape, std=0.02):
        return jax.random.normal(k, shape, jnp.float32) * std

    params = {
        "tok_emb": dense(keys[0], (num_tokens + 1, E), std=1.0),
        "pos_emb": dense(keys[1], (bptt, E), std=1.0),
        "emb_ln_g": jnp.ones((E,), jnp.float32),
        "emb_ln_b": jnp.zeros((E,), jnp.float32),
        "layers": [],
    }
    for li in range(num_layers):
        lk = jax.random.split(keys[4 + li], 4)
        params["layers"].append({
            "w_qkv": dense(lk[0], (E, 3 * E)),
            "b_qkv": jnp.zeros((3 * E,), jnp.float32),
            "wo": dense(lk[1], (E, E)), "bo": jnp.zeros((E,), jnp.float32),
            "ln1_g": jnp.ones((E,), jnp.float32),
            "ln1_b": jnp.zeros((E,), jnp.float32),
            "w1": dense(lk[2], (E, Hd)), "b1": jnp.zeros((Hd,), jnp.float32),
            "w2": dense(lk[3], (Hd, E)), "b2": jnp.zeros((E,), jnp.float32),
            "ln2_g": jnp.ones((E,), jnp.float32),
            "ln2_b": jnp.zeros((E,), jnp.float32),
        })
    dk = jax.random.split(keys[2], 2)
    params.update({
        "dec_w1": dense(dk[0], (E, E)),
        "dec_b1": jnp.zeros((E,), jnp.float32),
        "dec_ln_g": jnp.ones((E,), jnp.float32),
        "dec_ln_b": jnp.zeros((E,), jnp.float32),
        "dec_w2": dense(dk[1], (E, num_tokens)),
        "dec_b2": jnp.zeros((num_tokens,), jnp.float32),
    })
    return params


def _encoder_layer(x, p, num_heads):
    N, S, E = x.shape
    D = E // num_heads

    # Fused QKV projection: one pass over x, 3x wider MXU N dimension.
    qkv = x @ p["w_qkv"] + p["b_qkv"]                  # (N, S, 3E) f32
    q, k, v = jnp.split(qkv, 3, axis=-1)

    # Fold 1/temperature into Q in f32 before the bf16 cast.
    q = q * (1.0 / (float(D) ** 0.5))
    q = q.astype(jnp.bfloat16)
    k = k.astype(jnp.bfloat16)
    v = v.astype(jnp.bfloat16)

    def to_batches(t):                                 # bf16 transpose (half traffic)
        return (t.reshape(N, S, num_heads, D)
                 .transpose(0, 2, 1, 3)
                 .reshape(N * num_heads, S, D))

    qh, kh, vh = to_batches(q), to_batches(k), to_batches(v)
    attn = flash_attention(qh, kh, vh)                 # (N*H, S, D) bf16
    attn = (attn.reshape(N, num_heads, S, D)
                .transpose(0, 2, 1, 3)
                .reshape(N, S, E)
                .astype(jnp.float32))
    attn_out = attn @ p["wo"] + p["bo"]

    x = layer_norm(x, attn_out, p["ln1_g"], p["ln1_b"])        # fused residual
    h = jax.nn.gelu(x @ p["w1"] + p["b1"], approximate=False)
    h = h @ p["w2"] + p["b2"]
    x = layer_norm(x, h, p["ln2_g"], p["ln2_b"])               # fused residual
    return x


def transformer_forward(params, tokens, mask_key, mask_rate, num_tokens,
                        num_heads):
    N, S = tokens.shape
    # Random fill-mask: replace tokens with the <mask> id (= num_tokens).
    bern = jax.random.bernoulli(mask_key, mask_rate, (N, S))
    src_tok = jnp.where(bern, num_tokens, tokens)

    # TransformerEmbedding.
    emb = params["tok_emb"][src_tok]                   # (N, S, E)
    pos = params["pos_emb"][:S]                        # (S, E)
    x = emb + pos[None, :, :]
    x = layer_norm(x, None, params["emb_ln_g"], params["emb_ln_b"])

    # Encoder stack.
    for lp in params["layers"]:
        x = _encoder_layer(x, lp, num_heads)

    # Decoder: linear2(norm1(gelu(linear1(x)))), logits produced directly in
    # (N, num_tokens, S) layout (no separate transpose of the largest tensor).
    h = jax.nn.gelu(x @ params["dec_w1"] + params["dec_b1"], approximate=False)
    h = layer_norm(h, None, params["dec_ln_g"], params["dec_ln_b"])
    logits = (jnp.einsum("nse,ev->nvs", h, params["dec_w2"])
              + params["dec_b2"][None, :, None])       # (N, num_tokens, S)
    return logits


# ----------------------------------------------------------------------------
# Reference + demo
# ----------------------------------------------------------------------------

def reference_causal_attention(q, k, v, temperature):
    scores = jnp.einsum("hqd,hkd->hqk", q, k) / temperature
    S = q.shape[1]
    causal = jnp.tril(jnp.ones((S, S), dtype=bool))
    scores = jnp.where(causal[None], scores, -jnp.inf)
    attn = jax.nn.softmax(scores, axis=-1)
    return jnp.einsum("hqk,hkd->hqd", attn, v)


if __name__ == "__main__":
    root = jax.random.PRNGKey(0)

    # --- standalone attention check: exercises triangular-pair enumeration,
    #     rectangular tiles, online softmax and diagonal-only masking. ---
    H, S, D = 4, 512, 64
    kq, kk, kv, root = jax.random.split(root, 4)
    q = jax.random.normal(kq, (H, S, D), jnp.float32)
    k = jax.random.normal(kk, (H, S, D), jnp.float32)
    v = jax.random.normal(kv, (H, S, D), jnp.float32)
    temp = float(D) ** 0.5
    scale = 1.0 / temp
    ref = reference_causal_attention(q, k, v, temp)

    out_f32 = jax.block_until_ready(
        flash_attention(q, k, v, sm_scale=scale, bf16_matmul=False))
    assert jnp.allclose(out_f32, ref, atol=1e-2, rtol=1e-2), \
        "f32 flash attention mismatch (default tiles)"

    out_multi = jax.block_until_ready(
        flash_attention(q, k, v, sm_scale=scale, bf16_matmul=False,
                        block_q=128, block_k=256))
    assert jnp.allclose(out_multi, ref, atol=1e-2, rtol=1e-2), \
        "f32 flash attention mismatch (multi k-tile)"

    out_bf16 = jax.block_until_ready(
        flash_attention(q, k, v, sm_scale=scale, bf16_matmul=True))
    assert jnp.allclose(out_bf16.astype(jnp.float32), ref,
                        atol=5e-2, rtol=5e-2), "bf16 flash attention mismatch"

    # --- full module forward at small shapes. ---
    N, S2 = 2, 16
    num_tokens, E, num_heads, hidden, num_layers = 50, 32, 2, 64, 2
    bptt = 32
    pkey, tkey, mkey = jax.random.split(root, 3)
    params = init_params(pkey, num_tokens, E, num_heads, hidden, num_layers,
                         bptt)
    tokens = jax.random.randint(tkey, (N, S2), 0, num_tokens, dtype=jnp.int32)

    logits = transformer_forward(params, tokens, mkey, 0.15, num_tokens,
                                 num_heads)
    logits = jax.block_until_ready(logits)
    assert logits.shape == (N, num_tokens, S2), logits.shape
    assert bool(jnp.isfinite(logits).all())

    print("KERNEL_OK")
</pallas_src>

<mosaic_0001>
module attributes {stable_mosaic.version = 11 : i64} {
  func.func @_flash_attn_kernel(%arg0: i32, %arg1: i32, %arg2: memref<2xi32, #tpu.memory_space<smem>>, %arg3: memref<2xi32, #tpu.memory_space<smem>>, %arg4: memref<2xi32, #tpu.memory_space<smem>>, %arg5: memref<1x256x64xf32, #tpu.memory_space<vmem>>, %arg6: memref<1x512x64xf32, #tpu.memory_space<vmem>>, %arg7: memref<1x512x64xf32, #tpu.memory_space<vmem>>, %arg8: memref<1x256x64xf32, #tpu.memory_space<vmem>>, %arg9: memref<256x1xf32, #tpu.memory_space<vmem>>, %arg10: memref<256x1xf32, #tpu.memory_space<vmem>>, %arg11: memref<256x64xf32, #tpu.memory_space<vmem>>) attributes {dimension_semantics = [#tpu.dimension_semantics<parallel>, #tpu.dimension_semantics<arbitrary>], iteration_bounds = array<i64: 4, 2>, scalar_prefetch = 3 : i64, scratch_operands = 3 : i64, tpu.core_type = #tpu.core_type<tc>, window_params = [{transform_indices = @transform_0, window_bounds = array<i64: 1, 256, 64>}, {transform_indices = @transform_1, window_bounds = array<i64: 1, 512, 64>}, {transform_indices = @transform_2, window_bounds = array<i64: 1, 512, 64>}, {transform_indices = @transform_3, window_bounds = array<i64: 1, 256, 64>}]} {
    %0 = arith.index_cast %arg1 : i32 to index
    %1 = memref.load %arg2[%0] : memref<2xi32, #tpu.memory_space<smem>>
    %2 = arith.index_cast %arg1 : i32 to index
    %3 = memref.load %arg3[%2] : memref<2xi32, #tpu.memory_space<smem>>
    %4 = arith.index_cast %arg1 : i32 to index
    %5 = memref.load %arg4[%4] : memref<2xi32, #tpu.memory_space<smem>>
    %c0_i32 = arith.constant 0 : i32
    %6 = arith.cmpi eq, %3, %c0_i32 : i32
    %7 = arith.extui %6 : i1 to i32
    %c0_i32_0 = arith.constant 0 : i32
    %8 = arith.cmpi ne, %7, %c0_i32_0 : i32
    scf.if %8 {
      %cst_14 = arith.constant -1.000000e+30 : f32
      %29 = vector.broadcast %cst_14 : f32 to vector<256x1xf32>
      %c0_15 = arith.constant 0 : index
      %c0_16 = arith.constant 0 : index
      %30 = vector.load %arg9[%c0_15, %c0_16] : memref<256x1xf32, #tpu.memory_space<vmem>>, vector<256x1xf32>
      tpu.vector_store %arg9[%c0_15, %c0_16], %29 {strides = array<i32>} : memref<256x1xf32, #tpu.memory_space<vmem>>, vector<256x1xf32>,
      %cst_17 = arith.constant 0.000000e+00 : f32
      %31 = vector.broadcast %cst_17 : f32 to vector<256x1xf32>
      %c0_18 = arith.constant 0 : index
      %c0_19 = arith.constant 0 : index
      %32 = vector.load %arg10[%c0_18, %c0_19] : memref<256x1xf32, #tpu.memory_space<vmem>>, vector<256x1xf32>
      tpu.vector_store %arg10[%c0_18, %c0_19], %31 {strides = array<i32>} : memref<256x1xf32, #tpu.memory_space<vmem>>, vector<256x1xf32>,
      %cst_20 = arith.constant 0.000000e+00 : f32
      %33 = vector.broadcast %cst_20 : f32 to vector<256x64xf32>
      %c0_21 = arith.constant 0 : index
      %c0_22 = arith.constant 0 : index
      %34 = vector.load %arg11[%c0_21, %c0_22] : memref<256x64xf32, #tpu.memory_space<vmem>>, vector<256x64xf32>
      tpu.vector_store %arg11[%c0_21, %c0_22], %33 {strides = array<i32>} : memref<256x64xf32, #tpu.memory_space<vmem>>, vector<256x64xf32>,
    } else {
    }
    %c0 = arith.constant 0 : index
    %c0_1 = arith.constant 0 : index
    %c0_2 = arith.constant 0 : index
    %9 = vector.load %arg5[%c0, %c0_1, %c0_2] : memref<1x256x64xf32, #tpu.memory_space<vmem>>, vector<1x256x64xf32>
    %10 = vector.shape_cast %9 : vector<1x256x64xf32> to vector<256x64xf32>
    %c0_3 = arith.constant 0 : index
    %c0_4 = arith.constant 0 : index
    %c0_5 = arith.constant 0 : index
    %11 = vector.load %arg6[%c0_3, %c0_4, %c0_5] : memref<1x512x64xf32, #tpu.memory_space<vmem>>, vector<1x512x64xf32>
    %12 = vector.shape_cast %11 : vector<1x512x64xf32> to vector<512x64xf32>
    %c0_6 = arith.constant 0 : index
    %c0_7 = arith.constant 0 : index
    %c0_8 = arith.constant 0 : index
    %13 = vector.load %arg7[%c0_6, %c0_7, %c0_8] : memref<1x512x64xf32, #tpu.memory_space<vmem>>, vector<1x512x64xf32>
    %14 = vector.shape_cast %13 : vector<1x512x64xf32> to vector<512x64xf32>
    %cst = arith.constant dense<0.000000e+00> : vector<256x512xf32>
    %15 = tpu.matmul %10, %12, %cst {dimension_numbers = #tpu.dot_dimension_numbers<[1], [1], [0], [0], [0, 0, 1, 0], [], []>} : vector<256x64xf32>, vector<512x64xf32>, vector<256x512xf32> -> vector<256x512xf32>
    %c1_i32 = arith.constant 1 : i32
    %16 = arith.addi %3, %c1_i32 : i32
    %c512_i32 = arith.constant 512 : i32
    %17 = arith.muli %16, %c512_i32 : i32
    %c1_i32_9 = arith.constant 1 : i32
    %18 = arith.subi %17, %c1_i32_9 : i32
    %c256_i32 = arith.constant 256 : i32
    %19 = arith.muli %1, %c256_i32 : i32
    %20 = arith.cmpi sgt, %18, %19 : i32
    %21 = arith.extui %20 : i1 to i32
    %c0_i32_10 = arith.constant 0 : i32
    %22 = arith.cmpi ne, %21, %c0_i32_10 : i32
    scf.if %22 {
      %c256_i32_14 = arith.constant 256 : i32
      %29 = arith.muli %1, %c256_i32_14 : i32
      %30 = tpu.iota {dimensions = array<i32: 0>} : vector<256x512xi32>
      %31 = vector.broadcast %29 : i32 to vector<256x512xi32>
      %32 = arith.addi %31, %30 : vector<256x512xi32>
      %c512_i32_15 = arith.constant 512 : i32
      %33 = arith.muli %3, %c512_i32_15 : i32
      %34 = tpu.iota {dimensions = array<i32: 1>} : vector<256x512xi32>
      %35 = vector.broadcast %33 : i32 to vector<256x512xi32>
      %36 = arith.addi %35, %34 : vector<256x512xi32>
      %37 = arith.cmpi sle, %36, %32 : vector<256x512xi32>
      %cst_16 = arith.constant -1.000000e+30 : f32
      %38 = vector.broadcast %cst_16 : f32 to vector<256x512xf32>
      %39 = arith.select %37, %15, %38 : vector<256x512xi1>, vector<256x512xf32>
      %c0_17 = arith.constant 0 : index
      %c0_18 = arith.constant 0 : index
      %40 = vector.load %arg9[%c0_17, %c0_18] : memref<256x1xf32, #tpu.memory_space<vmem>>, vector<256x1xf32>
      %cst_19 = arith.constant dense<0xFF800000> : vector<256xf32>
      %41 = vector.multi_reduction <maximumf>, %39, %cst_19 [1] : vector<256x512xf32> to vector<256xf32>
      %42 = vector.shape_cast %41 : vector<256xf32> to vector<256x1xf32>
      %43 = arith.maximumf %40, %42 : vector<256x1xf32>
      %44 = arith.subf %40, %43 : vector<256x1xf32>
      %45 = math.exp %44 : vector<256x1xf32>
      %46 = vector.broadcast %43 : vector<256x1xf32> to vector<256x512xf32>
      %47 = arith.subf %39, %46 : vector<256x512xf32>
      %48 = math.exp %47 : vector<256x512xf32>
      %c0_20 = arith.constant 0 : index
      %c0_21 = arith.constant 0 : index
      %49 = vector.load %arg10[%c0_20, %c0_21] : memref<256x1xf32, #tpu.memory_space<vmem>>, vector<256x1xf32>
      %50 = arith.mulf %45, %49 : vector<256x1xf32>
      %cst_22 = arith.constant dense<0.000000e+00> : vector<256xf32>
      %51 = vector.multi_reduction <add>, %48, %cst_22 [1] : vector<256x512xf32> to vector<256xf32>
      %52 = vector.shape_cast %51 : vector<256xf32> to vector<256x1xf32>
      %53 = arith.addf %50, %52 : vector<256x1xf32>
      %c0_23 = arith.constant 0 : index
      %c0_24 = arith.constant 0 : index
      %54 = vector.load %arg10[%c0_23, %c0_24] : memref<256x1xf32, #tpu.memory_space<vmem>>, vector<256x1xf32>
      tpu.vector_store %arg10[%c0_23, %c0_24], %53 {strides = array<i32>} : memref<256x1xf32, #tpu.memory_space<vmem>>, vector<256x1xf32>,
      %c0_25 = arith.constant 0 : index
      %c0_26 = arith.constant 0 : index
      %55 = vector.load %arg11[%c0_25, %c0_26] : memref<256x64xf32, #tpu.memory_space<vmem>>, vector<256x64xf32>
      %56 = vector.broadcast %45 : vector<256x1xf32> to vector<256x64xf32>
      %57 = arith.mulf %56, %55 : vector<256x64xf32>
      %cst_27 = arith.constant dense<0.000000e+00> : vector<256x64xf32>
      %58 = tpu.matmul %48, %14, %cst_27 {dimension_numbers = #tpu.dot_dimension_numbers<[1], [0], [0], [1], [0, 0, 1, 1], [], []>} : vector<256x512xf32>, vector<512x64xf32>, vector<256x64xf32> -> vector<256x64xf32>
      %59 = arith.addf %57, %58 : vector<256x64xf32>
      %c0_28 = arith.constant 0 : index
      %c0_29 = arith.constant 0 : index
      %60 = vector.load %arg11[%c0_28, %c0_29] : memref<256x64xf32, #tpu.memory_space<vmem>>, vector<256x64xf32>
      tpu.vector_store %arg11[%c0_28, %c0_29], %59 {strides = array<i32>} : memref<256x64xf32, #tpu.memory_space<vmem>>, vector<256x64xf32>,
      %c0_30 = arith.constant 0 : index
      %c0_31 = arith.constant 0 : index
      %61 = vector.load %arg9[%c0_30, %c0_31] : memref<256x1xf32, #tpu.memory_space<vmem>>, vector<256x1xf32>
      tpu.vector_store %arg9[%c0_30, %c0_31], %43 {strides = array<i32>} : memref<256x1xf32, #tpu.memory_space<vmem>>, vector<256x1xf32>,
    } else {
    }
    %true = arith.constant true
    %23 = arith.xori %20, %true : i1
    %24 = arith.extui %23 : i1 to i32
    %c0_i32_11 = arith.constant 0 : i32
    %25 = arith.cmpi ne, %24, %c0_i32_11 : i32
    scf.if %25 {
      %c0_14 = arith.constant 0 : index
      %c0_15 = arith.constant 0 : index
      %29 = vector.load %arg9[%c0_14, %c0_15] : memref<256x1xf32, #tpu.memory_space<vmem>>, vector<256x1xf32>
      %cst_16 = arith.constant dense<0xFF800000> : vector<256xf32>
      %30 = vector.multi_reduction <maximumf>, %15, %cst_16 [1] : vector<256x512xf32> to vector<256xf32>
      %31 = vector.shape_cast %30 : vector<256xf32> to vector<256x1xf32>
      %32 = arith.maximumf %29, %31 : vector<256x1xf32>
      %33 = arith.subf %29, %32 : vector<256x1xf32>
      %34 = math.exp %33 : vector<256x1xf32>
      %35 = vector.broadcast %32 : vector<256x1xf32> to vector<256x512xf32>
      %36 = arith.subf %15, %35 : vector<256x512xf32>
      %37 = math.exp %36 : vector<256x512xf32>
      %c0_17 = arith.constant 0 : index
      %c0_18 = arith.constant 0 : index
      %38 = vector.load %arg10[%c0_17, %c0_18] : memref<256x1xf32, #tpu.memory_space<vmem>>, vector<256x1xf32>
      %39 = arith.mulf %34, %38 : vector<256x1xf32>
      %cst_19 = arith.constant dense<0.000000e+00> : vector<256xf32>
      %40 = vector.multi_reduction <add>, %37, %cst_19 [1] : vector<256x512xf32> to vector<256xf32>
      %41 = vector.shape_cast %40 : vector<256xf32> to vector<256x1xf32>
      %42 = arith.addf %39, %41 : vector<256x1xf32>
      %c0_20 = arith.constant 0 : index
      %c0_21 = arith.constant 0 : index
      %43 = vector.load %arg10[%c0_20, %c0_21] : memref<256x1xf32, #tpu.memory_space<vmem>>, vector<256x1xf32>
      tpu.vector_store %arg10[%c0_20, %c0_21], %42 {strides = array<i32>} : memref<256x1xf32, #tpu.memory_space<vmem>>, vector<256x1xf32>,
      %c0_22 = arith.constant 0 : index
      %c0_23 = arith.constant 0 : index
      %44 = vector.load %arg11[%c0_22, %c0_23] : memref<256x64xf32, #tpu.memory_space<vmem>>, vector<256x64xf32>
      %45 = vector.broadcast %34 : vector<256x1xf32> to vector<256x64xf32>
      %46 = arith.mulf %45, %44 : vector<256x64xf32>
      %cst_24 = arith.constant dense<0.000000e+00> : vector<256x64xf32>
      %47 = tpu.matmul %37, %14, %cst_24 {dimension_numbers = #tpu.dot_dimension_numbers<[1], [0], [0], [1], [0, 0, 1, 1], [], []>} : vector<256x512xf32>, vector<512x64xf32>, vector<256x64xf32> -> vector<256x64xf32>
      %48 = arith.addf %46, %47 : vector<256x64xf32>
      %c0_25 = arith.constant 0 : index
      %c0_26 = arith.constant 0 : index
      %49 = vector.load %arg11[%c0_25, %c0_26] : memref<256x64xf32, #tpu.memory_space<vmem>>, vector<256x64xf32>
      tpu.vector_store %arg11[%c0_25, %c0_26], %48 {strides = array<i32>} : memref<256x64xf32, #tpu.memory_space<vmem>>, vector<256x64xf32>,
      %c0_27 = arith.constant 0 : index
      %c0_28 = arith.constant 0 : index
      %50 = vector.load %arg9[%c0_27, %c0_28] : memref<256x1xf32, #tpu.memory_space<vmem>>, vector<256x1xf32>
      tpu.vector_store %arg9[%c0_27, %c0_28], %32 {strides = array<i32>} : memref<256x1xf32, #tpu.memory_space<vmem>>, vector<256x1xf32>,
    } else {
    }
    %c1_i32_12 = arith.constant 1 : i32
    %26 = arith.cmpi eq, %5, %c1_i32_12 : i32
    %27 = arith.extui %26 : i1 to i32
    %c0_i32_13 = arith.constant 0 : i32
    %28 = arith.cmpi ne, %27, %c0_i32_13 : i32
    scf.if %28 {
      %c0_14 = arith.constant 0 : index
      %c0_15 = arith.constant 0 : index
      %29 = vector.load %arg10[%c0_14, %c0_15] : memref<256x1xf32, #tpu.memory_space<vmem>>, vector<256x1xf32>
      %30 = tpu.reciprocal %29 {approx = true} : vector<256x1xf32> -> vector<256x1xf32>
      %c0_16 = arith.constant 0 : index
      %c0_17 = arith.constant 0 : index
      %31 = vector.load %arg11[%c0_16, %c0_17] : memref<256x64xf32, #tpu.memory_space<vmem>>, vector<256x64xf32>
      %32 = vector.broadcast %30 : vector<256x1xf32> to vector<256x64xf32>
      %33 = arith.mulf %31, %32 : vector<256x64xf32>
      %c0_18 = arith.constant 0 : index
      %c0_19 = arith.constant 0 : index
      %c0_20 = arith.constant 0 : index
      %34 = vector.load %arg8[%c0_18, %c0_19, %c0_20] : memref<1x256x64xf32, #tpu.memory_space<vmem>>, vector<1x256x64xf32>
      %35 = vector.shape_cast %34 : vector<1x256x64xf32> to vector<256x64xf32>
      %36 = vector.shape_cast %33 : vector<256x64xf32> to vector<1x256x64xf32>
      tpu.vector_store %arg8[%c0_18, %c0_19, %c0_20], %36 {strides = array<i32>} : memref<1x256x64xf32, #tpu.memory_space<vmem>>, vector<1x256x64xf32>,
    } else {
    }
    return
  }
  func.func @transform_0(%arg0: i32, %arg1: i32, %arg2: memref<2xi32, #tpu.memory_space<smem>>, %arg3: memref<2xi32, #tpu.memory_space<smem>>, %arg4: memref<2xi32, #tpu.memory_space<smem>>) -> (i32, i32, i32) {
    %0 = arith.index_cast %arg1 : i32 to index
    %1 = memref.load %arg2[%0] : memref<2xi32, #tpu.memory_space<smem>>
    %c0_i32 = arith.constant 0 : i32
    %c0_i32_0 = arith.constant 0 : i32
    return %arg0, %1, %c0_i32 : i32, i32, i32
  }
  func.func @transform_1(%arg0: i32, %arg1: i32, %arg2: memref<2xi32, #tpu.memory_space<smem>>, %arg3: memref<2xi32, #tpu.memory_space<smem>>, %arg4: memref<2xi32, #tpu.memory_space<smem>>) -> (i32, i32, i32) {
    %0 = arith.index_cast %arg1 : i32 to index
    %1 = memref.load %arg3[%0] : memref<2xi32, #tpu.memory_space<smem>>
    %c0_i32 = arith.constant 0 : i32
    %c0_i32_0 = arith.constant 0 : i32
    return %arg0, %1, %c0_i32 : i32, i32, i32
  }
  func.func @transform_2(%arg0: i32, %arg1: i32, %arg2: memref<2xi32, #tpu.memory_space<smem>>, %arg3: memref<2xi32, #tpu.memory_space<smem>>, %arg4: memref<2xi32, #tpu.memory_space<smem>>) -> (i32, i32, i32) {
    %0 = arith.index_cast %arg1 : i32 to index
    %1 = memref.load %arg3[%0] : memref<2xi32, #tpu.memory_space<smem>>
    %c0_i32 = arith.constant 0 : i32
    %c0_i32_0 = arith.constant 0 : i32
    return %arg0, %1, %c0_i32 : i32, i32, i32
  }
  func.func @transform_3(%arg0: i32, %arg1: i32, %arg2: memref<2xi32, #tpu.memory_space<smem>>, %arg3: memref<2xi32, #tpu.memory_space<smem>>, %arg4: memref<2xi32, #tpu.memory_space<smem>>) -> (i32, i32, i32) {
    %0 = arith.index_cast %arg1 : i32 to index
    %1 = memref.load %arg2[%0] : memref<2xi32, #tpu.memory_space<smem>>
    %c0_i32 = arith.constant 0 : i32
    %c0_i32_0 = arith.constant 0 : i32
    return %arg0, %1, %c0_i32 : i32, i32, i32
  }
}

</mosaic_0001>

<bundles_post_ra>
// kernel: tpu_custom_call.1
= control target key start
LH: loop header
LB: loop body
LE: loop exit
PB: predicated region body
PF: predicated region fallthrough
CT: control target
= control target key end

     0   :  { %s11820_s0 = inlined_call_operand.vmem [shape: s32[2], index: 0, kind: input, shape index: {}]   ;;  %s11821_s3 = inlined_call_operand.vmem [shape: f32[4,512,64], index: 3, kind: input, shape index: {}]   ;;  %s11822_s4 = inlined_call_operand.vmem [shape: f32[4,512,64], index: 4, kind: input, shape index: {}]   ;;  %s11823_s5 = inlined_call_operand.vmem [shape: f32[4,512,64], index: 5, kind: input, shape index: {}]   ;;  %s11824_s6 = inlined_call_operand.vmem [shape: f32[4,512,64], index: 6, kind: output, shape index: {}]   ;;  %s11825_s1 = inlined_call_operand.vmem [shape: s32[2], index: 1, kind: input, shape index: {}]   ;;  %s11826_s2 = inlined_call_operand.vmem [shape: s32[2], index: 2, kind: input, shape index: {}]  }
   0x1   :  { %s11_s23 = sshll.u32 %s11820_s0, 4  ;;  %s15_s26 = sshll.u32 %s11825_s1, 4  ;;  %s12_s23 = int_to_ptr.vmem [resolvable:$true] %s11_s23  ;;  %s16_s26 = int_to_ptr.vmem [resolvable:$true] %s15_s26 }
   0x2   :  { %s7146_s27 = scalar_lea.vmem %s12_s23, 16  ;;  %p7151_p1 = scmp.lt.s32.totalorder %s12_s23, %s12_s23 }
   0x3   :  { %p7147_p0 = scmp.ne.s32.totalorder %s12_s23, %s7146_s27  ;;  %p7152_p2 = scmp.lt.s32.totalorder %s7146_s27, %s7146_s27 }
   0x5   :  { %p7153_p3 = por %p7152_p2, %p7151_p1 }
   0x7   :  { %p7154_p4 = pnand %p7153_p3, %p7147_p0 }
   0x9   :  { %7157 = shalt.err (!%p7154_p4)  }
   0xa   :  { %s7224_s28 = smov [#allocation6]   ;;  %s7158_s29 = scalar_lea.vmem %s16_s26, 16 }
   0xb   :  { %14 = dma.vmem_to_smem %s12_s23, 16, %s7224_s28, [#allocation5] }
   0xc   :  { %p7159_p5 = scmp.ne.s32.totalorder %s16_s26, %s7158_s29  ;;  %p7163_p6 = scmp.lt.s32.totalorder %s16_s26, %s16_s26 }
   0xd   :  { %p7164_p7 = scmp.lt.s32.totalorder %s7158_s29, %s7158_s29 }
   0xf   :  { %p7165_p8 = por %p7164_p7, %p7163_p6 }
  0x11   :  { %p7166_p9 = pnand %p7165_p8, %p7159_p5 }
  0x13   :  { %7169 = shalt.err (!%p7166_p9)  }
  0x14   :  { %s7225_s0 = smov [#allocation7]   ;;  %s19_s7 = sshll.u32 %s11826_s2, 4  ;;  %s20_s7 = int_to_ptr.vmem [resolvable:$true] %s19_s7 }
  0x15   :  { %18 = dma.vmem_to_smem %s16_s26, 16, %s7225_s0, [#allocation5] }
  0x16   :  { %s7170_s8 = scalar_lea.vmem %s20_s7, 16  ;;  %p7175_p11 = scmp.lt.s32.totalorder %s20_s7, %s20_s7 }
  0x17   :  { %p7171_p10 = scmp.ne.s32.totalorder %s20_s7, %s7170_s8  ;;  %p7176_p12 = scmp.lt.s32.totalorder %s7170_s8, %s7170_s8 }
  0x19   :  { %p7177_p13 = por %p7176_p12, %p7175_p11 }
  0x1b   :  { %p7178_p0 = pnand %p7177_p13, %p7171_p10 }
  0x1d   :  { %7181 = shalt.err (!%p7178_p0)  }
  0x1e   :  { %s7226_s9 = smov [#allocation8]  }
  0x1f   :  { %22 = dma.vmem_to_smem %s20_s7, 16, %s7226_s9, [#allocation5] }
  0x20   :  { %7202 = dma.done.wait [#allocation5], 48 }
  0x21   :  { %7203 = vsyncadd [#allocation5], 4294967248 }
  0x22   :  { %24 = sfence }
  0x23   :  { %s7278_s10 = smov 0   ;;  %s7280_s11 = smov 0  }
  0x24   :  { %s7282_s12 = smov 0   ;;  %s7284_s2 = smov 0  }
  0x25   :  { %s7286_s13 = smov 0  }
  0x26 LB: > { %s39_s14 = sadd.s32 1, %s7214_s12  ;;  %s42_s15 = sadd.s32 1, %s7218_s2  ;;  %s7222_s13 = sphi %s7286_s13, %s30_s13   ;;  %s7218_s2 = sphi %s7284_s2, %s13360_s2   ;;  %s7214_s12 = sphi %s7282_s12, %s13359_s12   ;;  %s7210_s11 = sphi %s7280_s11, %s13358_s11   ;;  %s7206_s10 = sphi %s7278_s10, %s13357_s10  }
  0x27   : > { %p40_p1 = scmp.ge.s32.totalorder %s39_s14, 2  ;;  %p6041_p2 = scmp.ge.s32.totalorder %s7222_s13, 1 }
  0x28   : > { %p223_p3 = scmp.lt.s32.totalorder %s7222_s13, 9 }
  0x29   : > { %s13362_s14 = smov (%p40_p1, %s39_s14), 0  ;;  %s13364_s15 = smov (!%p40_p1, %s42_s15), %s7218_s2 }
  0x2a   : > { %p224_p4 = pnand %p6041_p2, %p223_p3  ;;  %p44_p5 = scmp.ge.s32.totalorder %s13364_s15, 4 }
  0x2c   : > { %s13366_s15 = smov (%p44_p5, %s13364_s15), 0  ;;  %227 = sbr.rel (%p224_p4) target bundleno = 2115 (0x843), region = 32 }
  0x31   : > { %s277_s16 = sld [smem:[#allocation6 + %s7206_s10]]  ;;  %p279_p6 = scmp.lt.s32.totalorder %s7210_s11, 3 }
  0x32   : > { %s289_s17 = sld [smem:[#allocation7 + %s7206_s10]] }
  0x33   : > { %s13368_s11 = smov (!%p279_p6, %s7210_s11), 3  ;;  %s301_s18 = sld [smem:[#allocation7 + %s7206_s10]] }
  0x34   : > { %s313_s19 = sld [smem:[#allocation6 + %s7206_s10]]  ;;  %s6043_s20 = sshll.u32 %s13368_s11, 6 }
  0x35   : > { %s7308_s21 = sld [smem:[#allocation6 + %s7206_s10]] }
  0x36   : > { %s7310_s23 = sld [smem:[#allocation7 + %s7206_s10]] }
  0x37   : > { %s6042_s22 = sshll.u32 %s277_s16, 5  ;;  %s7312_s25 = sld [smem:[#allocation8 + %s7206_s10]] }
  0x38   : > { %p281_p7 = scmp.lt.s32.totalorder %s6042_s22, 63  ;;  %s6045_s24 = sshll.u32 %s289_s17, 6 }
  0x39   : > { %p293_p8 = scmp.lt.s32.totalorder %s6045_s24, 63  ;;  %s6048_s27 = sshll.u32 %s301_s18, 6 }
  0x3a   : > { %s13370_s22 = smov (!%p281_p7, %s6042_s22), 63  ;;  %p305_p9 = scmp.lt.s32.totalorder %s6048_s27, 63 }
  0x3b   : > { %s13372_s24 = smov (!%p293_p8, %s6045_s24), 63  ;;  %s284_s26 = sadd.s32 %s6043_s20, %s13370_s22 }
  0x3c   : > { %s6044_s28 = sshll.u32 %s284_s26, 3  ;;  %s296_s29 = sadd.s32 %s6043_s20, %s13372_s24 }
  0x3d   : > { %s7317_s30 = scalar_lea.vmem %s11821_s3, %s6044_s28  ;;  %s6047_s7 = sshll.u32 %s296_s29, 3 }
  0x3e   : > { %s7322_s11 = scalar_lea.vmem %s11822_s4, %s6047_s7  ;;  %s6051_s10 = sshll.u32 %s313_s19, 5 }
  0x3f   : > { %s13374_s27 = smov (!%p305_p9, %s6048_s27), 63  ;;  %p317_p10 = scmp.lt.s32.totalorder %s6051_s10, 63 }
  0x40   : > { %s308_s16 = sadd.s32 %s6043_s20, %s13374_s27  ;;  %p6054_p11 = scmp.ne.s32.totalorder %s7310_s23, 0 }
  0x41   : > { %s6050_s17 = sshll.u32 %s308_s16, 3  ;;  %s13376_s10 = smov (!%p317_p10, %s6051_s10), 63 }
  0x42   : > { %s7327_s24 = scalar_lea.vmem %s11823_s5, %s6050_s17  ;;  %s320_s26 = sadd.s32 %s6043_s20, %s13376_s10 }
  0x43   : > { %s6053_s28 = sshll.u32 %s320_s26, 3  ;;  %331 = sbr.rel (%p6054_p11) target bundleno = 121 (0x79), region = 36 }
  0x44   : > { %s7332_s1 = scalar_lea.vmem %s11824_s6, %s6053_s28 }
  0x48   : > { %vm332_vm0 = vcmask 7168   ;;  %vm397_vm1 = vcmask 523264   ;;  %v7227_v0 = vmov -1e+30   ;;  %v7228_v1 = vmov 0.0  }
  0x49   : > { %333 = vst.msk [vmem:[#allocation2] sm:$0xff] %vm332_vm0, %v7227_v0  ;;  %334 = vst.msk [vmem:[#allocation2 + $0x8] sm:$0xff] %vm332_vm0, %v7227_v0 }
  0x4a   : > { %335 = vst.msk [vmem:[#allocation2 + $0x10] sm:$0xff] %vm332_vm0, %v7227_v0  ;;  %336 = vst.msk [vmem:[#allocation2 + $0x18] sm:$0xff] %vm332_vm0, %v7227_v0 }
  0x4b   : > { %337 = vst.msk [vmem:[#allocation2 + $0x20] sm:$0xff] %vm332_vm0, %v7227_v0  ;;  %338 = vst.msk [vmem:[#allocation2 + $0x28] sm:$0xff] %vm332_vm0, %v7227_v0 }
  0x4c   : > { %339 = vst.msk [vmem:[#allocation2 + $0x30] sm:$0xff] %vm332_vm0, %v7227_v0  ;;  %340 = vst.msk [vmem:[#allocation2 + $0x38] sm:$0xff] %vm332_vm0, %v7227_v0 }
  0x4d   : > { %341 = vst.msk [vmem:[#allocation2 + $0x40] sm:$0xff] %vm332_vm0, %v7227_v0  ;;  %342 = vst.msk [vmem:[#allocation2 + $0x48] sm:$0xff] %vm332_vm0, %v7227_v0 }
  0x4e   : > { %343 = vst.msk [vmem:[#allocation2 + $0x50] sm:$0xff] %vm332_vm0, %v7227_v0  ;;  %344 = vst.msk [vmem:[#allocation2 + $0x58] sm:$0xff] %vm332_vm0, %v7227_v0 }
  0x4f   : > { %345 = vst.msk [vmem:[#allocation2 + $0x60] sm:$0xff] %vm332_vm0, %v7227_v0  ;;  %346 = vst.msk [vmem:[#allocation2 + $0x68] sm:$0xff] %vm332_vm0, %v7227_v0 }
  0x50   : > { %347 = vst.msk [vmem:[#allocation2 + $0x70] sm:$0xff] %vm332_vm0, %v7227_v0  ;;  %348 = vst.msk [vmem:[#allocation2 + $0x78] sm:$0xff] %vm332_vm0, %v7227_v0 }
  0x51   : > { %349 = vst.msk [vmem:[#allocation2 + $0x80] sm:$0xff] %vm332_vm0, %v7227_v0  ;;  %350 = vst.msk [vmem:[#allocation2 + $0x88] sm:$0xff] %vm332_vm0, %v7227_v0 }
  0x52   : > { %351 = vst.msk [vmem:[#allocation2 + $0x90] sm:$0xff] %vm332_vm0, %v7227_v0  ;;  %352 = vst.msk [vmem:[#allocation2 + $0x98] sm:$0xff] %vm332_vm0, %v7227_v0 }
  0x53   : > { %353 = vst.msk [vmem:[#allocation2 + $0xa0] sm:$0xff] %vm332_vm0, %v7227_v0  ;;  %354 = vst.msk [vmem:[#allocation2 + $0xa8] sm:$0xff] %vm332_vm0, %v7227_v0 }
  0x54   : > { %355 = vst.msk [vmem:[#allocation2 + $0xb0] sm:$0xff] %vm332_vm0, %v7227_v0  ;;  %356 = vst.msk [vmem:[#allocation2 + $0xb8] sm:$0xff] %vm332_vm0, %v7227_v0 }
  0x55   : > { %357 = vst.msk [vmem:[#allocation2 + $0xc0] sm:$0xff] %vm332_vm0, %v7227_v0  ;;  %358 = vst.msk [vmem:[#allocation2 + $0xc8] sm:$0xff] %vm332_vm0, %v7227_v0 }
  0x56   : > { %359 = vst.msk [vmem:[#allocation2 + $0xd0] sm:$0xff] %vm332_vm0, %v7227_v0  ;;  %360 = vst.msk [vmem:[#allocation2 + $0xd8] sm:$0xff] %vm332_vm0, %v7227_v0 }
  0x57   : > { %361 = vst.msk [vmem:[#allocation2 + $0xe0] sm:$0xff] %vm332_vm0, %v7227_v0  ;;  %362 = vst.msk [vmem:[#allocation2 + $0xe8] sm:$0xff] %vm332_vm0, %v7227_v0 }
  0x58   : > { %363 = vst.msk [vmem:[#allocation2 + $0xf0] sm:$0xff] %vm332_vm0, %v7227_v0  ;;  %364 = vst.msk [vmem:[#allocation2 + $0xf8] sm:$0xff] %vm332_vm0, %v7227_v0 }
  0x59   : > { %365 = vst.msk [vmem:[#allocation3] sm:$0xff] %vm332_vm0, %v7228_v1  ;;  %366 = vst.msk [vmem:[#allocation3 + $0x8] sm:$0xff] %vm332_vm0, %v7228_v1 }
  0x5a   : > { %367 = vst.msk [vmem:[#allocation3 + $0x10] sm:$0xff] %vm332_vm0, %v7228_v1  ;;  %368 = vst.msk [vmem:[#allocation3 + $0x18] sm:$0xff] %vm332_vm0, %v7228_v1 }
  0x5b   : > { %369 = vst.msk [vmem:[#allocation3 + $0x20] sm:$0xff] %vm332_vm0, %v7228_v1  ;;  %370 = vst.msk [vmem:[#allocation3 + $0x28] sm:$0xff] %vm332_vm0, %v7228_v1 }
  0x5c   : > { %371 = vst.msk [vmem:[#allocation3 + $0x30] sm:$0xff] %vm332_vm0, %v7228_v1  ;;  %372 = vst.msk [vmem:[#allocation3 + $0x38] sm:$0xff] %vm332_vm0, %v7228_v1 }
  0x5d   : > { %373 = vst.msk [vmem:[#allocation3 + $0x40] sm:$0xff] %vm332_vm0, %v7228_v1  ;;  %374 = vst.msk [vmem:[#allocation3 + $0x48] sm:$0xff] %vm332_vm0, %v7228_v1 }
  0x5e   : > { %375 = vst.msk [vmem:[#allocation3 + $0x50] sm:$0xff] %vm332_vm0, %v7228_v1  ;;  %376 = vst.msk [vmem:[#allocation3 + $0x58] sm:$0xff] %vm332_vm0, %v7228_v1 }
  0x5f   : > { %377 = vst.msk [vmem:[#allocation3 + $0x60] sm:$0xff] %vm332_vm0, %v7228_v1  ;;  %378 = vst.msk [vmem:[#allocation3 + $0x68] sm:$0xff] %vm332_vm0, %v7228_v1 }
  0x60   : > { %379 = vst.msk [vmem:[#allocation3 + $0x70] sm:$0xff] %vm332_vm0, %v7228_v1  ;;  %380 = vst.msk [vmem:[#allocation3 + $0x78] sm:$0xff] %vm332_vm0, %v7228_v1 }
  0x61   : > { %381 = vst.msk [vmem:[#allocation3 + $0x80] sm:$0xff] %vm332_vm0, %v7228_v1  ;;  %382 = vst.msk [vmem:[#allocation3 + $0x88] sm:$0xff] %vm332_vm0, %v7228_v1 }
  0x62   : > { %383 = vst.msk [vmem:[#allocation3 + $0x90] sm:$0xff] %vm332_vm0, %v7228_v1  ;;  %384 = vst.msk [vmem:[#allocation3 + $0x98] sm:$0xff] %vm332_vm0, %v7228_v1 }
  0x63   : > { %385 = vst.msk [vmem:[#allocation3 + $0xa0] sm:$0xff] %vm332_vm0, %v7228_v1  ;;  %386 = vst.msk [vmem:[#allocation3 + $0xa8] sm:$0xff] %vm332_vm0, %v7228_v1 }
  0x64   : > { %387 = vst.msk [vmem:[#allocation3 + $0xb0] sm:$0xff] %vm332_vm0, %v7228_v1  ;;  %388 = vst.msk [vmem:[#allocation3 + $0xb8] sm:$0xff] %vm332_vm0, %v7228_v1 }
  0x65   : > { %389 = vst.msk [vmem:[#allocation3 + $0xc0] sm:$0xff] %vm332_vm0, %v7228_v1  ;;  %390 = vst.msk [vmem:[#allocation3 + $0xc8] sm:$0xff] %vm332_vm0, %v7228_v1 }
  0x66   : > { %391 = vst.msk [vmem:[#allocation3 + $0xd0] sm:$0xff] %vm332_vm0, %v7228_v1  ;;  %392 = vst.msk [vmem:[#allocation3 + $0xd8] sm:$0xff] %vm332_vm0, %v7228_v1 }
  0x67   : > { %393 = vst.msk [vmem:[#allocation3 + $0xe0] sm:$0xff] %vm332_vm0, %v7228_v1  ;;  %394 = vst.msk [vmem:[#allocation3 + $0xe8] sm:$0xff] %vm332_vm0, %v7228_v1 }
  0x68   : > { %395 = vst.msk [vmem:[#allocation3 + $0xf0] sm:$0xff] %vm332_vm0, %v7228_v1  ;;  %396 = vst.msk [vmem:[#allocation3 + $0xf8] sm:$0xff] %vm332_vm0, %v7228_v1 }
  0x69   : > { %398 = vst.msk [vmem:[#allocation4] sm:$0xff] %vm397_vm1, %v7228_v1  ;;  %399 = vst.msk [vmem:[#allocation4 + $0x8] sm:$0xff] %vm397_vm1, %v7228_v1 }
  0x6a   : > { %400 = vst.msk [vmem:[#allocation4 + $0x10] sm:$0xff] %vm397_vm1, %v7228_v1  ;;  %401 = vst.msk [vmem:[#allocation4 + $0x18] sm:$0xff] %vm397_vm1, %v7228_v1 }
  0x6b   : > { %402 = vst.msk [vmem:[#allocation4 + $0x20] sm:$0xff] %vm397_vm1, %v7228_v1  ;;  %403 = vst.msk [vmem:[#allocation4 + $0x28] sm:$0xff] %vm397_vm1, %v7228_v1 }
  0x6c   : > { %404 = vst.msk [vmem:[#allocation4 + $0x30] sm:$0xff] %vm397_vm1, %v7228_v1  ;;  %405 = vst.msk [vmem:[#allocation4 + $0x38] sm:$0xff] %vm397_vm1, %v7228_v1 }
  0x6d   : > { %406 = vst.msk [vmem:[#allocation4 + $0x40] sm:$0xff] %vm397_vm1, %v7228_v1  ;;  %407 = vst.msk [vmem:[#allocation4 + $0x48] sm:$0xff] %vm397_vm1, %v7228_v1 }
  0x6e   : > { %408 = vst.msk [vmem:[#allocation4 + $0x50] sm:$0xff] %vm397_vm1, %v7228_v1  ;;  %409 = vst.msk [vmem:[#allocation4 + $0x58] sm:$0xff] %vm397_vm1, %v7228_v1 }
  0x6f   : > { %410 = vst.msk [vmem:[#allocation4 + $0x60] sm:$0xff] %vm397_vm1, %v7228_v1  ;;  %411 = vst.msk [vmem:[#allocation4 + $0x68] sm:$0xff] %vm397_vm1, %v7228_v1 }
  0x70   : > { %412 = vst.msk [vmem:[#allocation4 + $0x70] sm:$0xff] %vm397_vm1, %v7228_v1  ;;  %413 = vst.msk [vmem:[#allocation4 + $0x78] sm:$0xff] %vm397_vm1, %v7228_v1 }
  0x71   : > { %414 = vst.msk [vmem:[#allocation4 + $0x80] sm:$0xff] %vm397_vm1, %v7228_v1  ;;  %415 = vst.msk [vmem:[#allocation4 + $0x88] sm:$0xff] %vm397_vm1, %v7228_v1 }
  0x72   : > { %416 = vst.msk [vmem:[#allocation4 + $0x90] sm:$0xff] %vm397_vm1, %v7228_v1  ;;  %417 = vst.msk [vmem:[#allocation4 + $0x98] sm:$0xff] %vm397_vm1, %v7228_v1 }
  0x73   : > { %418 = vst.msk [vmem:[#allocation4 + $0xa0] sm:$0xff] %vm397_vm1, %v7228_v1  ;;  %419 = vst.msk [vmem:[#allocation4 + $0xa8] sm:$0xff] %vm397_vm1, %v7228_v1 }
  0x74   : > { %420 = vst.msk [vmem:[#allocation4 + $0xb0] sm:$0xff] %vm397_vm1, %v7228_v1  ;;  %421 = vst.msk [vmem:[#allocation4 + $0xb8] sm:$0xff] %vm397_vm1, %v7228_v1 }
  0x75   : > { %422 = vst.msk [vmem:[#allocation4 + $0xc0] sm:$0xff] %vm397_vm1, %v7228_v1  ;;  %423 = vst.msk [vmem:[#allocation4 + $0xc8] sm:$0xff] %vm397_vm1, %v7228_v1 }
  0x76   : > { %424 = vst.msk [vmem:[#allocation4 + $0xd0] sm:$0xff] %vm397_vm1, %v7228_v1  ;;  %425 = vst.msk [vmem:[#allocation4 + $0xd8] sm:$0xff] %vm397_vm1, %v7228_v1 }
  0x77   : > { %426 = vst.msk [vmem:[#allocation4 + $0xe0] sm:$0xff] %vm397_vm1, %v7228_v1  ;;  %427 = vst.msk [vmem:[#allocation4 + $0xe8] sm:$0xff] %vm397_vm1, %v7228_v1 }
  0x78   : > { %428 = vst.msk [vmem:[#allocation4 + $0xf0] sm:$0xff] %vm397_vm1, %v7228_v1  ;;  %429 = vst.msk [vmem:[#allocation4 + $0xf8] sm:$0xff] %vm397_vm1, %v7228_v1 }
  0x79 PF: > { %v493_v2 = vld [vmem:[%s7322_s11 + $0xf8] sm:$0xff]  ;;  %v7497_v3 = vld [vmem:[%s7327_s24] sm:$0xff]  ;;  %v7500_v4 = vld [vmem:[%s7327_s24 + $0x8] sm:$0xff]  ;;  %vm590_vm2 = vcmask 523264   ;;  %s6192_s19 = sshll.u32 %s7310_s23, 9  ;;  %s7988_s7 = sshll.u32 %s7308_s21, 8 }
  0x7a   : > { %12225 = vst [vmem:[#allocation10_spill] sm:$0xff] %v7497_v3  ;;  %12226 = vst [vmem:[#allocation11_spill] sm:$0xff] %v7500_v4  ;;  %v7503_v5 = vld [vmem:[%s7327_s24 + $0x10] sm:$0xff]  ;;  %v7506_v6 = vld [vmem:[%s7327_s24 + $0x18] sm:$0xff]  ;;  %6194 = vmatprep.subr.msk.mxu0 %vm590_vm2, %v493_v2  ;;  %s7984_s20 = sadd.s32 512, %s6192_s19 }
  0x7b   : > { %12227 = vst [vmem:[#allocation12_spill] sm:$0xff] %v7503_v5  ;;  %12228 = vst [vmem:[#allocation13_spill] sm:$0xff] %v7506_v6  ;;  %v7509_v7 = vld [vmem:[%s7327_s24 + $0x20] sm:$0xff]  ;;  %v7513_v8 = vld [vmem:[%s7327_s24 + $0x28] sm:$0xff]  ;;  %s6184_s27 = sadd.s32 4294967295, %s7984_s20 }
  0x7c   : > { %12229 = vst [vmem:[#allocation14_spill] sm:$0xff] %v7509_v7  ;;  %12230 = vst [vmem:[#allocation15_spill] sm:$0xff] %v7513_v8  ;;  %v7516_v9 = vld [vmem:[%s7327_s24 + $0x30] sm:$0xff]  ;;  %v7519_v10 = vld [vmem:[%s7327_s24 + $0x38] sm:$0xff]  ;;  %p6186_p12 = scmp.le.s32.totalorder %s6184_s27, %s7988_s7 }
  0x7d   : > { %12231 = vst [vmem:[#allocation16_spill] sm:$0xff] %v7516_v9  ;;  %12232 = vst [vmem:[#allocation17_spill] sm:$0xff] %v7519_v10  ;;  %v7522_v11 = vld [vmem:[%s7327_s24 + $0x40] sm:$0xff]  ;;  %v7525_v12 = vld [vmem:[%s7327_s24 + $0x48] sm:$0xff] }
  0x7e   : > { %12233 = vst [vmem:[#allocation18_spill] sm:$0xff] %v7522_v11  ;;  %12234 = vst [vmem:[#allocation19_spill] sm:$0xff] %v7525_v12  ;;  %v7528_v13 = vld [vmem:[%s7327_s24 + $0x50] sm:$0xff]  ;;  %v7531_v14 = vld [vmem:[%s7327_s24 + $0x58] sm:$0xff] }
  0x7f   : > { %12235 = vst [vmem:[#allocation20_spill] sm:$0xff] %v7528_v13  ;;  %12236 = vst [vmem:[#allocation21_spill] sm:$0xff] %v7531_v14  ;;  %v7534_v15 = vld [vmem:[%s7327_s24 + $0x60] sm:$0xff]  ;;  %v7537_v16 = vld [vmem:[%s7327_s24 + $0x68] sm:$0xff] }
  0x80   : > { %12237 = vst [vmem:[#allocation22_spill] sm:$0xff] %v7534_v15  ;;  %12238 = vst [vmem:[#allocation23_spill] sm:$0xff] %v7537_v16  ;;  %v7540_v17 = vld [vmem:[%s7327_s24 + $0x70] sm:$0xff]  ;;  %v7543_v18 = vld [vmem:[%s7327_s24 + $0x78] sm:$0xff] }
  0x81   : > { %12239 = vst [vmem:[#allocation24_spill] sm:$0xff] %v7540_v17  ;;  %12240 = vst [vmem:[#allocation25_spill] sm:$0xff] %v7543_v18  ;;  %v7546_v19 = vld [vmem:[%s7327_s24 + $0x80] sm:$0xff]  ;;  %v7549_v20 = vld [vmem:[%s7327_s24 + $0x88] sm:$0xff] }
  0x82   : > { %12241 = vst [vmem:[#allocation26_spill] sm:$0xff] %v7546_v19  ;;  %12242 = vst [vmem:[#allocation27_spill] sm:$0xff] %v7549_v20  ;;  %v7552_v21 = vld [vmem:[%s7327_s24 + $0x90] sm:$0xff]  ;;  %v7555_v22 = vld [vmem:[%s7327_s24 + $0x98] sm:$0xff] }
  0x83   : > { %12243 = vst [vmem:[#allocation28_spill] sm:$0xff] %v7552_v21  ;;  %12244 = vst [vmem:[#allocation29_spill] sm:$0xff] %v7555_v22  ;;  %v7558_v23 = vld [vmem:[%s7327_s24 + $0xa0] sm:$0xff]  ;;  %v7561_v24 = vld [vmem:[%s7327_s24 + $0xa8] sm:$0xff] }
  0x84   : > { %12245 = vst [vmem:[#allocation30_spill] sm:$0xff] %v7558_v23  ;;  %12246 = vst [vmem:[#allocation31_spill] sm:$0xff] %v7561_v24  ;;  %v7564_v25 = vld [vmem:[%s7327_s24 + $0xb0] sm:$0xff]  ;;  %v7567_v26 = vld [vmem:[%s7327_s24 + $0xb8] sm:$0xff] }
  0x85   : > { %12247 = vst [vmem:[#allocation32_spill] sm:$0xff] %v7564_v25  ;;  %12248 = vst [vmem:[#allocation33_spill] sm:$0xff] %v7567_v26  ;;  %v7570_v27 = vld [vmem:[%s7327_s24 + $0xc0] sm:$0xff]  ;;  %v7573_v28 = vld [vmem:[%s7327_s24 + $0xc8] sm:$0xff] }
  0x86   : > { %12249 = vst [vmem:[#allocation34_spill] sm:$0xff] %v7570_v27  ;;  %12250 = vst [vmem:[#allocation35_spill] sm:$0xff] %v7573_v28  ;;  %v7576_v29 = vld [vmem:[%s7327_s24 + $0xd0] sm:$0xff]  ;;  %v7579_v30 = vld [vmem:[%s7327_s24 + $0xd8] sm:$0xff] }
  0x87   : > { %12251 = vst [vmem:[#allocation36_spill] sm:$0xff] %v7576_v29  ;;  %12252 = vst [vmem:[#allocation37_spill] sm:$0xff] %v7579_v30  ;;  %v7582_v31 = vld [vmem:[%s7327_s24 + $0xe0] sm:$0xff]  ;;  %v7585_v32 = vld [vmem:[%s7327_s24 + $0xe8] sm:$0xff] }
  0x88   : > { %12253 = vst [vmem:[#allocation38_spill] sm:$0xff] %v7582_v31  ;;  %12254 = vst [vmem:[#allocation39_spill] sm:$0xff] %v7585_v32  ;;  %v7588_v33 = vld [vmem:[%s7327_s24 + $0xf0] sm:$0xff]  ;;  %v7591_v34 = vld [vmem:[%s7327_s24 + $0xf8] sm:$0xff] }
  0x89   : > { %12255 = vst [vmem:[#allocation40_spill] sm:$0xff] %v7588_v33  ;;  %12256 = vst [vmem:[#allocation41_spill] sm:$0xff] %v7591_v34  ;;  %v7594_v35 = vld [vmem:[%s7327_s24 + $0x100] sm:$0xff]  ;;  %v7597_v36 = vld [vmem:[%s7327_s24 + $0x108] sm:$0xff] }
  0x8a   : > { %12257 = vst [vmem:[#allocation42_spill] sm:$0xff] %v7594_v35  ;;  %12258 = vst [vmem:[#allocation43_spill] sm:$0xff] %v7597_v36  ;;  %v7600_v37 = vld [vmem:[%s7327_s24 + $0x110] sm:$0xff]  ;;  %v7603_v38 = vld [vmem:[%s7327_s24 + $0x118] sm:$0xff] }
  0x8b   : > { %12259 = vst [vmem:[#allocation44_spill] sm:$0xff] %v7600_v37  ;;  %12260 = vst [vmem:[#allocation45_spill] sm:$0xff] %v7603_v38  ;;  %v7606_v39 = vld [vmem:[%s7327_s24 + $0x120] sm:$0xff]  ;;  %v7609_v40 = vld [vmem:[%s7327_s24 + $0x128] sm:$0xff] }
  0x8c   : > { %12261 = vst [vmem:[#allocation46_spill] sm:$0xff] %v7606_v39  ;;  %12262 = vst [vmem:[#allocation47_spill] sm:$0xff] %v7609_v40  ;;  %v7612_v41 = vld [vmem:[%s7327_s24 + $0x130] sm:$0xff]  ;;  %v7615_v42 = vld [vmem:[%s7327_s24 + $0x138] sm:$0xff] }
  0x8d   : > { %12263 = vst [vmem:[#allocation48_spill] sm:$0xff] %v7612_v41  ;;  %12264 = vst [vmem:[#allocation49_spill] sm:$0xff] %v7615_v42  ;;  %v7618_v43 = vld [vmem:[%s7327_s24 + $0x140] sm:$0xff]  ;;  %v7621_v44 = vld [vmem:[%s7327_s24 + $0x148] sm:$0xff] }
  0x8e   : > { %12265 = vst [vmem:[#allocation50_spill] sm:$0xff] %v7618_v43  ;;  %12266 = vst [vmem:[#allocation51_spill] sm:$0xff] %v7621_v44  ;;  %v7624_v45 = vld [vmem:[%s7327_s24 + $0x150] sm:$0xff]  ;;  %v7627_v46 = vld [vmem:[%s7327_s24 + $0x158] sm:$0xff] }
  0x8f   : > { %12267 = vst [vmem:[#allocation52_spill] sm:$0xff] %v7624_v45  ;;  %12268 = vst [vmem:[#allocation53_spill] sm:$0xff] %v7627_v46  ;;  %v7630_v47 = vld [vmem:[%s7327_s24 + $0x160] sm:$0xff]  ;;  %v7633_v48 = vld [vmem:[%s7327_s24 + $0x168] sm:$0xff] }
  0x90   : > { %12269 = vst [vmem:[#allocation54_spill] sm:$0xff] %v7630_v47  ;;  %12270 = vst [vmem:[#allocation55_spill] sm:$0xff] %v7633_v48  ;;  %v7636_v49 = vld [vmem:[%s7327_s24 + $0x170] sm:$0xff]  ;;  %v7639_v50 = vld [vmem:[%s7327_s24 + $0x178] sm:$0xff] }
  0x91   : > { %12271 = vst [vmem:[#allocation56_spill] sm:$0xff] %v7636_v49  ;;  %12272 = vst [vmem:[#allocation57_spill] sm:$0xff] %v7639_v50  ;;  %v7642_v51 = vld [vmem:[%s7327_s24 + $0x180] sm:$0xff]  ;;  %v7645_v52 = vld [vmem:[%s7327_s24 + $0x188] sm:$0xff] }
  0x92   : > { %12273 = vst [vmem:[#allocation58_spill] sm:$0xff] %v7642_v51  ;;  %12274 = vst [vmem:[#allocation59_spill] sm:$0xff] %v7645_v52  ;;  %v7648_v53 = vld [vmem:[%s7327_s24 + $0x190] sm:$0xff]  ;;  %v7651_v54 = vld [vmem:[%s7327_s24 + $0x198] sm:$0xff] }
  0x93   : > { %12275 = vst [vmem:[#allocation60_spill] sm:$0xff] %v7648_v53  ;;  %12276 = vst [vmem:[#allocation61_spill] sm:$0xff] %v7651_v54  ;;  %v7654_v55 = vld [vmem:[%s7327_s24 + $0x1a0] sm:$0xff]  ;;  %v7657_v56 = vld [vmem:[%s7327_s24 + $0x1a8] sm:$0xff] }
  0x94   : > { %12277 = vst [vmem:[#allocation62_spill] sm:$0xff] %v7654_v55  ;;  %12278 = vst [vmem:[#allocation63_spill] sm:$0xff] %v7657_v56  ;;  %v7660_v57 = vld [vmem:[%s7327_s24 + $0x1b0] sm:$0xff]  ;;  %v7663_v58 = vld [vmem:[%s7327_s24 + $0x1b8] sm:$0xff] }
  0x95   : > { %12279 = vst [vmem:[#allocation64_spill] sm:$0xff] %v7660_v57  ;;  %12280 = vst [vmem:[#allocation65_spill] sm:$0xff] %v7663_v58  ;;  %v7666_v59 = vld [vmem:[%s7327_s24 + $0x1c0] sm:$0xff]  ;;  %v7669_v60 = vld [vmem:[%s7327_s24 + $0x1c8] sm:$0xff] }
  0x96   : > { %12281 = vst [vmem:[#allocation66_spill] sm:$0xff] %v7666_v59  ;;  %12282 = vst [vmem:[#allocation67_spill] sm:$0xff] %v7669_v60  ;;  %v7672_v61 = vld [vmem:[%s7327_s24 + $0x1d0] sm:$0xff]  ;;  %v7675_v62 = vld [vmem:[%s7327_s24 + $0x1d8] sm:$0xff] }
  0x97   : > { %12283 = vst [vmem:[#allocation68_spill] sm:$0xff] %v7672_v61  ;;  %12284 = vst [vmem:[#allocation69_spill] sm:$0xff] %v7675_v62  ;;  %v7678_v63 = vld [vmem:[%s7327_s24 + $0x1e0] sm:$0xff]  ;;  %v7681_v0 = vld [vmem:[%s7327_s24 + $0x1e8] sm:$0xff] }
  0x98   : > { %12285 = vst [vmem:[#allocation70_spill] sm:$0xff] %v7678_v63  ;;  %12286 = vst [vmem:[#allocation71_spill] sm:$0xff] %v7681_v0  ;;  %v7684_v1 = vld [vmem:[%s7327_s24 + $0x1f0] sm:$0xff]  ;;  %v7687_v2 = vld [vmem:[%s7327_s24 + $0x1f8] sm:$0xff] }
  0x99   : > { %12287 = vst [vmem:[#allocation72_spill] sm:$0xff] %v7684_v1  ;;  %12288 = vst [vmem:[#allocation73_spill] sm:$0xff] %v7687_v2  ;;  %v525_v51 = vld [vmem:[%s7322_s11 + $0x1f8] sm:$0xff]  ;;  %v492_v20 = vld [vmem:[%s7322_s11 + $0xf0] sm:$0xff] }
  0x9a   : > { %6290 = vmatprep.subr.msk.mxu1 %vm590_vm2, %v525_v51  ;;  %v477_v19 = vld [vmem:[%s7322_s11 + $0x78] sm:$0xff]  ;;  %v524_v53 = vld [vmem:[%s7322_s11 + $0x1f0] sm:$0xff]  ;;  %v491_v51 = vld [vmem:[%s7322_s11 + $0xe8] sm:$0xff] }
  0x9b   : > { %v509_v52 = vld [vmem:[%s7322_s11 + $0x178] sm:$0xff]  ;;  %6195 = vmatpush3.xpose.msk.msra.mxu0 %vm590_vm2, %v477_v19  ;;  %v476_v21 = vld [vmem:[%s7322_s11 + $0x70] sm:$0xff]  ;;  %v523_v22 = vld [vmem:[%s7322_s11 + $0x1e8] sm:$0xff] }
  0x9c   : > { %6291 = vmatpush3.xpose.msk.msra.mxu1 %vm590_vm2, %v509_v52  ;;  %6196 = vmatprep.subr.msk.mxu0 %vm590_vm2, %v492_v20  ;;  %v508_v54 = vld [vmem:[%s7322_s11 + $0x170] sm:$0xff]  ;;  %v475_v19 = vld [vmem:[%s7322_s11 + $0x68] sm:$0xff]  ;;  %v490_v52 = vld [vmem:[%s7322_s11 + $0xe0] sm:$0xff] }
  0x9d   : > { %6292 = vmatprep.subr.msk.mxu1 %vm590_vm2, %v524_v53  ;;  %v507_v20 = vld [vmem:[%s7322_s11 + $0x168] sm:$0xff]  ;;  %v522_v53 = vld [vmem:[%s7322_s11 + $0x1e0] sm:$0xff] }
  0x9e   : > { %v7736_v55 = vld [vmem:[%s7317_s30] sm:$0xff] }
  0x9f   : > { %6197 = vmatpush3.xpose.msk.msra.mxu0 %vm590_vm2, %v476_v21  ;;  %v474_v21 = vld [vmem:[%s7322_s11 + $0x60] sm:$0xff]  ;;  %6226 = vmatprep.mubr.msk.f32.mxu0 %vm590_vm2, %v7736_v55 }
  0xa0   : > { %6293 = vmatpush3.xpose.msk.msra.mxu1 %vm590_vm2, %v508_v54  ;;  %6198 = vmatprep.subr.msk.mxu0 %vm590_vm2, %v491_v51  ;;  %v506_v54 = vld [vmem:[%s7322_s11 + $0x160] sm:$0xff]  ;;  %v521_v51 = vld [vmem:[%s7322_s11 + $0x1d8] sm:$0xff] }
  0xa1   : > { %6294 = vmatprep.subr.msk.mxu1 %vm590_vm2, %v523_v22  ;;  %v489_v22 = vld [vmem:[%s7322_s11 + $0xd8] sm:$0xff]  ;;  %6322 = vmatprep.mubr.msk.f32.mxu1 %vm590_vm2, %v7736_v55 }
  0xa3   : > { %6199 = vmatpush3.xpose.msk.msra.mxu0 %vm590_vm2, %v475_v19  ;;  %v473_v19 = vld [vmem:[%s7322_s11 + $0x58] sm:$0xff] }
  0xa4   : > { %6295 = vmatpush3.xpose.msk.msra.mxu1 %vm590_vm2, %v507_v20  ;;  %6200 = vmatprep.subr.msk.mxu0 %vm590_vm2, %v490_v52  ;;  %v505_v20 = vld [vmem:[%s7322_s11 + $0x158] sm:$0xff]  ;;  %v488_v52 = vld [vmem:[%s7322_s11 + $0xd0] sm:$0xff] }
  0xa5   : > { %6296 = vmatprep.subr.msk.mxu1 %vm590_vm2, %v522_v53  ;;  %v520_v53 = vld [vmem:[%s7322_s11 + $0x1d0] sm:$0xff] }
  0xa7   : > { %6201 = vmatpush3.xpose.msk.msra.mxu0 %vm590_vm2, %v474_v21  ;;  %v472_v21 = vld [vmem:[%s7322_s11 + $0x50] sm:$0xff] }
  0xa8   : > { %6297 = vmatpush3.xpose.msk.msra.mxu1 %vm590_vm2, %v506_v54  ;;  %6202 = vmatprep.subr.msk.mxu0 %vm590_vm2, %v489_v22  ;;  %v504_v54 = vld [vmem:[%s7322_s11 + $0x150] sm:$0xff]  ;;  %v487_v22 = vld [vmem:[%s7322_s11 + $0xc8] sm:$0xff] }
  0xa9   : > { %6298 = vmatprep.subr.msk.mxu1 %vm590_vm2, %v521_v51  ;;  %v519_v51 = vld [vmem:[%s7322_s11 + $0x1c8] sm:$0xff] }
  0xab   : > { %6203 = vmatpush3.xpose.msk.msra.mxu0 %vm590_vm2, %v473_v19  ;;  %v471_v19 = vld [vmem:[%s7322_s11 + $0x48] sm:$0xff] }
  0xac   : > { %6299 = vmatpush3.xpose.msk.msra.mxu1 %vm590_vm2, %v505_v20  ;;  %6204 = vmatprep.subr.msk.mxu0 %vm590_vm2, %v488_v52  ;;  %v503_v20 = vld [vmem:[%s7322_s11 + $0x148] sm:$0xff]  ;;  %v486_v52 = vld [vmem:[%s7322_s11 + $0xc0] sm:$0xff] }
  0xad   : > { %6300 = vmatprep.subr.msk.mxu1 %vm590_vm2, %v520_v53  ;;  %v518_v53 = vld [vmem:[%s7322_s11 + $0x1c0] sm:$0xff] }
  0xaf   : > { %6205 = vmatpush3.xpose.msk.msra.mxu0 %vm590_vm2, %v472_v21  ;;  %v470_v21 = vld [vmem:[%s7322_s11 + $0x40] sm:$0xff] }
  0xb0   : > { %6301 = vmatpush3.xpose.msk.msra.mxu1 %vm590_vm2, %v504_v54  ;;  %6206 = vmatprep.subr.msk.mxu0 %vm590_vm2, %v487_v22  ;;  %v502_v54 = vld [vmem:[%s7322_s11 + $0x140] sm:$0xff]  ;;  %v485_v22 = vld [vmem:[%s7322_s11 + $0xb8] sm:$0xff] }
  0xb1   : > { %6302 = vmatprep.subr.msk.mxu1 %vm590_vm2, %v519_v51  ;;  %v517_v51 = vld [vmem:[%s7322_s11 + $0x1b8] sm:$0xff] }
  0xb3   : > { %6207 = vmatpush3.xpose.msk.msra.mxu0 %vm590_vm2, %v471_v19  ;;  %v469_v19 = vld [vmem:[%s7322_s11 + $0x38] sm:$0xff] }
  0xb4   : > { %6303 = vmatpush3.xpose.msk.msra.mxu1 %vm590_vm2, %v503_v20  ;;  %6208 = vmatprep.subr.msk.mxu0 %vm590_vm2, %v486_v52  ;;  %v501_v20 = vld [vmem:[%s7322_s11 + $0x138] sm:$0xff]  ;;  %v484_v52 = vld [vmem:[%s7322_s11 + $0xb0] sm:$0xff] }
  0xb5   : > { %6304 = vmatprep.subr.msk.mxu1 %vm590_vm2, %v518_v53  ;;  %v516_v53 = vld [vmem:[%s7322_s11 + $0x1b0] sm:$0xff] }
  0xb7   : > { %6209 = vmatpush3.xpose.msk.msra.mxu0 %vm590_vm2, %v470_v21  ;;  %v468_v21 = vld [vmem:[%s7322_s11 + $0x30] sm:$0xff] }
  0xb8   : > { %6305 = vmatpush3.xpose.msk.msra.mxu1 %vm590_vm2, %v502_v54  ;;  %6210 = vmatprep.subr.msk.mxu0 %vm590_vm2, %v485_v22  ;;  %v500_v54 = vld [vmem:[%s7322_s11 + $0x130] sm:$0xff]  ;;  %v483_v22 = vld [vmem:[%s7322_s11 + $0xa8] sm:$0xff] }
  0xb9   : > { %6306 = vmatprep.subr.msk.mxu1 %vm590_vm2, %v517_v51  ;;  %v515_v51 = vld [vmem:[%s7322_s11 + $0x1a8] sm:$0xff] }
  0xbb   : > { %6211 = vmatpush3.xpose.msk.msra.mxu0 %vm590_vm2, %v469_v19  ;;  %v467_v19 = vld [vmem:[%s7322_s11 + $0x28] sm:$0xff] }
  0xbc   : > { %6307 = vmatpush3.xpose.msk.msra.mxu1 %vm590_vm2, %v501_v20  ;;  %6212 = vmatprep.subr.msk.mxu0 %vm590_vm2, %v484_v52  ;;  %v499_v20 = vld [vmem:[%s7322_s11 + $0x128] sm:$0xff]  ;;  %v482_v52 = vld [vmem:[%s7322_s11 + $0xa0] sm:$0xff] }
  0xbd   : > { %6308 = vmatprep.subr.msk.mxu1 %vm590_vm2, %v516_v53  ;;  %v514_v53 = vld [vmem:[%s7322_s11 + $0x1a0] sm:$0xff] }
  0xbf   : > { %6213 = vmatpush3.xpose.msk.msra.mxu0 %vm590_vm2, %v468_v21  ;;  %v466_v21 = vld [vmem:[%s7322_s11 + $0x20] sm:$0xff] }
  0xc0   : > { %6309 = vmatpush3.xpose.msk.msra.mxu1 %vm590_vm2, %v500_v54  ;;  %6214 = vmatprep.subr.msk.mxu0 %vm590_vm2, %v483_v22  ;;  %v498_v54 = vld [vmem:[%s7322_s11 + $0x120] sm:$0xff]  ;;  %v481_v22 = vld [vmem:[%s7322_s11 + $0x98] sm:$0xff] }
  0xc1   : > { %6310 = vmatprep.subr.msk.mxu1 %vm590_vm2, %v515_v51  ;;  %v513_v51 = vld [vmem:[%s7322_s11 + $0x198] sm:$0xff] }
  0xc3   : > { %6215 = vmatpush3.xpose.msk.msra.mxu0 %vm590_vm2, %v467_v19  ;;  %v465_v19 = vld [vmem:[%s7322_s11 + $0x18] sm:$0xff] }
  0xc4   : > { %6311 = vmatpush3.xpose.msk.msra.mxu1 %vm590_vm2, %v499_v20  ;;  %6216 = vmatprep.subr.msk.mxu0 %vm590_vm2, %v482_v52  ;;  %v497_v20 = vld [vmem:[%s7322_s11 + $0x118] sm:$0xff]  ;;  %v480_v52 = vld [vmem:[%s7322_s11 + $0x90] sm:$0xff] }
  0xc5   : > { %6312 = vmatprep.subr.msk.mxu1 %vm590_vm2, %v514_v53  ;;  %v512_v53 = vld [vmem:[%s7322_s11 + $0x190] sm:$0xff] }
  0xc7   : > { %6217 = vmatpush3.xpose.msk.msra.mxu0 %vm590_vm2, %v466_v21  ;;  %v464_v21 = vld [vmem:[%s7322_s11 + $0x10] sm:$0xff] }
  0xc8   : > { %6313 = vmatpush3.xpose.msk.msra.mxu1 %vm590_vm2, %v498_v54  ;;  %6218 = vmatprep.subr.msk.mxu0 %vm590_vm2, %v481_v22  ;;  %v496_v54 = vld [vmem:[%s7322_s11 + $0x110] sm:$0xff]  ;;  %v479_v22 = vld [vmem:[%s7322_s11 + $0x88] sm:$0xff] }
  0xc9   : > { %6314 = vmatprep.subr.msk.mxu1 %vm590_vm2, %v513_v51  ;;  %v511_v51 = vld [vmem:[%s7322_s11 + $0x188] sm:$0xff] }
  0xcb   : > { %6219 = vmatpush3.xpose.msk.msra.mxu0 %vm590_vm2, %v465_v19  ;;  %v463_v19 = vld [vmem:[%s7322_s11 + $0x8] sm:$0xff] }
  0xcc   : > { %6315 = vmatpush3.xpose.msk.msra.mxu1 %vm590_vm2, %v497_v20  ;;  %6220 = vmatprep.subr.msk.mxu0 %vm590_vm2, %v480_v52  ;;  %v495_v20 = vld [vmem:[%s7322_s11 + $0x108] sm:$0xff]  ;;  %v478_v52 = vld [vmem:[%s7322_s11 + $0x80] sm:$0xff] }
  0xcd   : > { %6316 = vmatprep.subr.msk.mxu1 %vm590_vm2, %v512_v53  ;;  %v510_v53 = vld [vmem:[%s7322_s11 + $0x180] sm:$0xff] }
  0xcf   : > { %6221 = vmatpush3.xpose.msk.msra.mxu0 %vm590_vm2, %v464_v21  ;;  %v462_v21 = vld [vmem:[%s7322_s11] sm:$0xff] }
  0xd0   : > { %6317 = vmatpush3.xpose.msk.msra.mxu1 %vm590_vm2, %v496_v54  ;;  %6222 = vmatprep.subr.msk.mxu0 %vm590_vm2, %v479_v22  ;;  %v494_v54 = vld [vmem:[%s7322_s11 + $0x100] sm:$0xff]  ;;  %v431_v22 = vld [vmem:[%s7317_s30 + $0x8] sm:$0xff] }
  0xd1   : > { %6318 = vmatprep.subr.msk.mxu1 %vm590_vm2, %v511_v51  ;;  %v432_v51 = vld [vmem:[%s7317_s30 + $0x10] sm:$0xff] }
  0xd3   : > { %6223 = vmatpush3.xpose.msk.msra.mxu0 %vm590_vm2, %v463_v19  ;;  %v433_v19 = vld [vmem:[%s7317_s30 + $0x18] sm:$0xff] }
  0xd4   : > { %6319 = vmatpush3.xpose.msk.msra.mxu1 %vm590_vm2, %v495_v20  ;;  %6224 = vmatprep.subr.msk.mxu0 %vm590_vm2, %v478_v52  ;;  %v435_v20 = vld [vmem:[%s7317_s30 + $0x28] sm:$0xff]  ;;  %v436_v52 = vld [vmem:[%s7317_s30 + $0x30] sm:$0xff] }
  0xd5   : > { %6320 = vmatprep.subr.msk.mxu1 %vm590_vm2, %v510_v53  ;;  %v437_v53 = vld [vmem:[%s7317_s30 + $0x38] sm:$0xff] }
  0xd7   : > { %6225 = vmatpush3.xpose.msk.msra.mxu0 %vm590_vm2, %v462_v21  ;;  %v438_v21 = vld [vmem:[%s7317_s30 + $0x40] sm:$0xff] }
  0xd8   : > { %6321 = vmatpush3.xpose.msk.msra.mxu1 %vm590_vm2, %v494_v54  ;;  %v439_v54 = vld [vmem:[%s7317_s30 + $0x48] sm:$0xff] }
  0xda   : > { %6227 = vmatmul.mubr.msk.f32.vlgmr.msra.gmra.mxu0 %vm590_vm2, %v7736_v55 }
  0xdb   : > { %6323 = vmatmul.mubr.msk.f32.vlgmr.msra.gmra.mxu1 %vm590_vm2, %v7736_v55  ;;  %6228 = vmatprep.mubr.msk.f32.mxu0 %vm590_vm2, %v431_v22  ;;  %v434_v55 = vld [vmem:[%s7317_s30 + $0x20] sm:$0xff] }
  0xdc   : > { %6324 = vmatprep.mubr.msk.f32.mxu1 %vm590_vm2, %v431_v22 }
  0xde   : > { %6229 = vmatmul.mubr.msk.f32.gmra.mxu0 %vm590_vm2, %v431_v22 }
  0xdf   : > { %6325 = vmatmul.mubr.msk.f32.gmra.mxu1 %vm590_vm2, %v431_v22  ;;  %6230 = vmatprep.mubr.msk.f32.mxu0 %vm590_vm2, %v432_v51  ;;  %v440_v22 = vld [vmem:[%s7317_s30 + $0x50] sm:$0xff] }
  0xe0   : > { %6326 = vmatprep.mubr.msk.f32.mxu1 %vm590_vm2, %v432_v51 }
  0xe2   : > { %6231 = vmatmul.mubr.msk.f32.gmra.mxu0 %vm590_vm2, %v432_v51 }
  0xe3   : > { %6327 = vmatmul.mubr.msk.f32.gmra.mxu1 %vm590_vm2, %v432_v51  ;;  %6232 = vmatprep.mubr.msk.f32.mxu0 %vm590_vm2, %v433_v19  ;;  %v441_v51 = vld [vmem:[%s7317_s30 + $0x58] sm:$0xff] }
  0xe4   : > { %6328 = vmatprep.mubr.msk.f32.mxu1 %vm590_vm2, %v433_v19 }
  0xe6   : > { %6233 = vmatmul.mubr.msk.f32.gmra.mxu0 %vm590_vm2, %v433_v19 }
  0xe7   : > { %6329 = vmatmul.mubr.msk.f32.gmra.mxu1 %vm590_vm2, %v433_v19  ;;  %6234 = vmatprep.mubr.msk.f32.mxu0 %vm590_vm2, %v434_v55  ;;  %v442_v19 = vld [vmem:[%s7317_s30 + $0x60] sm:$0xff] }
  0xe8   : > { %6330 = vmatprep.mubr.msk.f32.mxu1 %vm590_vm2, %v434_v55 }
  0xea   : > { %6235 = vmatmul.mubr.msk.f32.gmra.mxu0 %vm590_vm2, %v434_v55 }
  0xeb   : > { %6331 = vmatmul.mubr.msk.f32.gmra.mxu1 %vm590_vm2, %v434_v55  ;;  %6236 = vmatprep.mubr.msk.f32.mxu0 %vm590_vm2, %v435_v20  ;;  %v443_v55 = vld [vmem:[%s7317_s30 + $0x68] sm:$0xff] }
  0xec   : > { %6332 = vmatprep.mubr.msk.f32.mxu1 %vm590_vm2, %v435_v20 }
  0xee   : > { %6237 = vmatmul.mubr.msk.f32.gmra.mxu0 %vm590_vm2, %v435_v20 }
  0xef   : > { %6333 = vmatmul.mubr.msk.f32.gmra.mxu1 %vm590_vm2, %v435_v20  ;;  %6238 = vmatprep.mubr.msk.f32.mxu0 %vm590_vm2, %v436_v52  ;;  %v444_v20 = vld [vmem:[%s7317_s30 + $0x70] sm:$0xff] }
  0xf0   : > { %6334 = vmatprep.mubr.msk.f32.mxu1 %vm590_vm2, %v436_v52 }
  0xf2   : > { %6239 = vmatmul.mubr.msk.f32.gmra.mxu0 %vm590_vm2, %v436_v52 }
  0xf3   : > { %6335 = vmatmul.mubr.msk.f32.gmra.mxu1 %vm590_vm2, %v436_v52  ;;  %6240 = vmatprep.mubr.msk.f32.mxu0 %vm590_vm2, %v437_v53  ;;  %v445_v52 = vld [vmem:[%s7317_s30 + $0x78] sm:$0xff] }
  0xf4   : > { %6336 = vmatprep.mubr.msk.f32.mxu1 %vm590_vm2, %v437_v53 }
  0xf6   : > { %6241 = vmatmul.mubr.msk.f32.gmra.mxu0 %vm590_vm2, %v437_v53 }
  0xf7   : > { %6337 = vmatmul.mubr.msk.f32.gmra.mxu1 %vm590_vm2, %v437_v53  ;;  %6242 = vmatprep.mubr.msk.f32.mxu0 %vm590_vm2, %v438_v21  ;;  %v446_v53 = vld [vmem:[%s7317_s30 + $0x80] sm:$0xff] }
  0xf8   : > { %6338 = vmatprep.mubr.msk.f32.mxu1 %vm590_vm2, %v438_v21 }
  0xfa   : > { %6243 = vmatmul.mubr.msk.f32.gmra.mxu0 %vm590_vm2, %v438_v21 }
  0xfb   : > { %6339 = vmatmul.mubr.msk.f32.gmra.mxu1 %vm590_vm2, %v438_v21  ;;  %6244 = vmatprep.mubr.msk.f32.mxu0 %vm590_vm2, %v439_v54  ;;  %v447_v21 = vld [vmem:[%s7317_s30 + $0x88] sm:$0xff] }
  0xfc   : > { %6340 = vmatprep.mubr.msk.f32.mxu1 %vm590_vm2, %v439_v54 }
  0xfe   : > { %6245 = vmatmul.mubr.msk.f32.gmra.mxu0 %vm590_vm2, %v439_v54 }
  0xff   : > { %6341 = vmatmul.mubr.msk.f32.gmra.mxu1 %vm590_vm2, %v439_v54  ;;  %6246 = vmatprep.mubr.msk.f32.mxu0 %vm590_vm2, %v440_v22  ;;  %v448_v54 = vld [vmem:[%s7317_s30 + $0x90] sm:$0xff] }
 0x100   : > { %6342 = vmatprep.mubr.msk.f32.mxu1 %vm590_vm2, %v440_v22 }
 0x102   : > { %6247 = vmatmul.mubr.msk.f32.gmra.mxu0 %vm590_vm2, %v440_v22 }
 0x103   : > { %6343 = vmatmul.mubr.msk.f32.gmra.mxu1 %vm590_vm2, %v440_v22  ;;  %6248 = vmatprep.mubr.msk.f32.mxu0 %vm590_vm2, %v441_v51  ;;  %v449_v22 = vld [vmem:[%s7317_s30 + $0x98] sm:$0xff] }
 0x104   : > { %6344 = vmatprep.mubr.msk.f32.mxu1 %vm590_vm2, %v441_v51 }
 0x106   : > { %6249 = vmatmul.mubr.msk.f32.gmra.mxu0 %vm590_vm2, %v441_v51 }
 0x107   : > { %6345 = vmatmul.mubr.msk.f32.gmra.mxu1 %vm590_vm2, %v441_v51  ;;  %6250 = vmatprep.mubr.msk.f32.mxu0 %vm590_vm2, %v442_v19  ;;  %v450_v51 = vld [vmem:[%s7317_s30 + $0xa0] sm:$0xff] }
 0x108   : > { %6346 = vmatprep.mubr.msk.f32.mxu1 %vm590_vm2, %v442_v19 }
 0x10a   : > { %6251 = vmatmul.mubr.msk.f32.gmra.mxu0 %vm590_vm2, %v442_v19 }
 0x10b   : > { %6347 = vmatmul.mubr.msk.f32.gmra.mxu1 %vm590_vm2, %v442_v19  ;;  %6252 = vmatprep.mubr.msk.f32.mxu0 %vm590_vm2, %v443_v55  ;;  %v451_v19 = vld [vmem:[%s7317_s30 + $0xa8] sm:$0xff] }
 0x10c   : > { %6348 = vmatprep.mubr.msk.f32.mxu1 %vm590_vm2, %v443_v55 }
 0x10e   : > { %6253 = vmatmul.mubr.msk.f32.gmra.mxu0 %vm590_vm2, %v443_v55 }
 0x10f   : > { %6349 = vmatmul.mubr.msk.f32.gmra.mxu1 %vm590_vm2, %v443_v55  ;;  %6254 = vmatprep.mubr.msk.f32.mxu0 %vm590_vm2, %v444_v20  ;;  %v452_v55 = vld [vmem:[%s7317_s30 + $0xb0] sm:$0xff] }
 0x110   : > { %6350 = vmatprep.mubr.msk.f32.mxu1 %vm590_vm2, %v444_v20 }
 0x112   : > { %6255 = vmatmul.mubr.msk.f32.gmra.mxu0 %vm590_vm2, %v444_v20 }
 0x113   : > { %6351 = vmatmul.mubr.msk.f32.gmra.mxu1 %vm590_vm2, %v444_v20  ;;  %6256 = vmatprep.mubr.msk.f32.mxu0 %vm590_vm2, %v445_v52  ;;  %v453_v20 = vld [vmem:[%s7317_s30 + $0xb8] sm:$0xff] }
 0x114   : > { %6352 = vmatprep.mubr.msk.f32.mxu1 %vm590_vm2, %v445_v52 }
 0x116   : > { %6257 = vmatmul.mubr.msk.f32.gmra.mxu0 %vm590_vm2, %v445_v52 }
 0x117   : > { %6353 = vmatmul.mubr.msk.f32.gmra.mxu1 %vm590_vm2, %v445_v52  ;;  %6258 = vmatprep.mubr.msk.f32.mxu0 %vm590_vm2, %v446_v53  ;;  %v454_v52 = vld [vmem:[%s7317_s30 + $0xc0] sm:$0xff] }
 0x118   : > { %6354 = vmatprep.mubr.msk.f32.mxu1 %vm590_vm2, %v446_v53 }
 0x11a   : > { %6259 = vmatmul.mubr.msk.f32.gmra.mxu0 %vm590_vm2, %v446_v53 }
 0x11b   : > { %6355 = vmatmul.mubr.msk.f32.gmra.mxu1 %vm590_vm2, %v446_v53  ;;  %6260 = vmatprep.mubr.msk.f32.mxu0 %vm590_vm2, %v447_v21  ;;  %v455_v53 = vld [vmem:[%s7317_s30 + $0xc8] sm:$0xff] }
 0x11c   : > { %6356 = vmatprep.mubr.msk.f32.mxu1 %vm590_vm2, %v447_v21 }
 0x11e   : > { %6261 = vmatmul.mubr.msk.f32.gmra.mxu0 %vm590_vm2, %v447_v21 }
 0x11f   : > { %6357 = vmatmul.mubr.msk.f32.gmra.mxu1 %vm590_vm2, %v447_v21  ;;  %6262 = vmatprep.mubr.msk.f32.mxu0 %vm590_vm2, %v448_v54  ;;  %v456_v21 = vld [vmem:[%s7317_s30 + $0xd0] sm:$0xff] }
 0x120   : > { %6358 = vmatprep.mubr.msk.f32.mxu1 %vm590_vm2, %v448_v54 }
 0x122   : > { %6263 = vmatmul.mubr.msk.f32.gmra.mxu0 %vm590_vm2, %v448_v54 }
 0x123   : > { %6359 = vmatmul.mubr.msk.f32.gmra.mxu1 %vm590_vm2, %v448_v54  ;;  %6264 = vmatprep.mubr.msk.f32.mxu0 %vm590_vm2, %v449_v22  ;;  %v457_v54 = vld [vmem:[%s7317_s30 + $0xd8] sm:$0xff] }
 0x124   : > { %6360 = vmatprep.mubr.msk.f32.mxu1 %vm590_vm2, %v449_v22 }
 0x126   : > { %6265 = vmatmul.mubr.msk.f32.gmra.mxu0 %vm590_vm2, %v449_v22 }
 0x127   : > { %6361 = vmatmul.mubr.msk.f32.gmra.mxu1 %vm590_vm2, %v449_v22  ;;  %6266 = vmatprep.mubr.msk.f32.mxu0 %vm590_vm2, %v450_v51  ;;  %v458_v22 = vld [vmem:[%s7317_s30 + $0xe0] sm:$0xff] }
 0x128   : > { %6362 = vmatprep.mubr.msk.f32.mxu1 %vm590_vm2, %v450_v51 }
 0x12a   : > { %6267 = vmatmul.mubr.msk.f32.gmra.mxu0 %vm590_vm2, %v450_v51 }
 0x12b   : > { %6363 = vmatmul.mubr.msk.f32.gmra.mxu1 %vm590_vm2, %v450_v51  ;;  %6268 = vmatprep.mubr.msk.f32.mxu0 %vm590_vm2, %v451_v19  ;;  %v459_v51 = vld [vmem:[%s7317_s30 + $0xe8] sm:$0xff] }
 0x12c   : > { %6364 = vmatprep.mubr.msk.f32.mxu1 %vm590_vm2, %v451_v19 }
 0x12e   : > { %6269 = vmatmul.mubr.msk.f32.gmra.mxu0 %vm590_vm2, %v451_v19 }
 0x12f   : > { %6365 = vmatmul.mubr.msk.f32.gmra.mxu1 %vm590_vm2, %v451_v19  ;;  %6270 = vmatprep.mubr.msk.f32.mxu0 %vm590_vm2, %v452_v55  ;;  %v460_v19 = vld [vmem:[%s7317_s30 + $0xf0] sm:$0xff] }
 0x130   : > { %6366 = vmatprep.mubr.msk.f32.mxu1 %vm590_vm2, %v452_v55 }
 0x132   : > { %6271 = vmatmul.mubr.msk.f32.gmra.mxu0 %vm590_vm2, %v452_v55 }
 0x133   : > { %6367 = vmatmul.mubr.msk.f32.gmra.mxu1 %vm590_vm2, %v452_v55  ;;  %6272 = vmatprep.mubr.msk.f32.mxu0 %vm590_vm2, %v453_v20  ;;  %v461_v55 = vld [vmem:[%s7317_s30 + $0xf8] sm:$0xff] }
 0x134   : > { %6368 = vmatprep.mubr.msk.f32.mxu1 %vm590_vm2, %v453_v20 }
 0x136   : > { %6273 = vmatmul.mubr.msk.f32.gmra.mxu0 %vm590_vm2, %v453_v20 }
 0x137   : > { %6369 = vmatmul.mubr.msk.f32.gmra.mxu1 %vm590_vm2, %v453_v20  ;;  %6274 = vmatprep.mubr.msk.f32.mxu0 %vm590_vm2, %v454_v52 }
 0x138   : > { %6370 = vmatprep.mubr.msk.f32.mxu1 %vm590_vm2, %v454_v52 }
 0x13a   : > { %6275 = vmatmul.mubr.msk.f32.gmra.mxu0 %vm590_vm2, %v454_v52 }
 0x13b   : > { %6371 = vmatmul.mubr.msk.f32.gmra.mxu1 %vm590_vm2, %v454_v52  ;;  %6276 = vmatprep.mubr.msk.f32.mxu0 %vm590_vm2, %v455_v53 }
 0x13c   : > { %6372 = vmatprep.mubr.msk.f32.mxu1 %vm590_vm2, %v455_v53 }
 0x13e   : > { %6277 = vmatmul.mubr.msk.f32.gmra.mxu0 %vm590_vm2, %v455_v53 }
 0x13f   : > { %6373 = vmatmul.mubr.msk.f32.gmra.mxu1 %vm590_vm2, %v455_v53  ;;  %6278 = vmatprep.mubr.msk.f32.mxu0 %vm590_vm2, %v456_v21 }
 0x140   : > { %6374 = vmatprep.mubr.msk.f32.mxu1 %vm590_vm2, %v456_v21 }
 0x142   : > { %6279 = vmatmul.mubr.msk.f32.gmra.mxu0 %vm590_vm2, %v456_v21 }
 0x143   : > { %6375 = vmatmul.mubr.msk.f32.gmra.mxu1 %vm590_vm2, %v456_v21  ;;  %6280 = vmatprep.mubr.msk.f32.mxu0 %vm590_vm2, %v457_v54 }
 0x144   : > { %6376 = vmatprep.mubr.msk.f32.mxu1 %vm590_vm2, %v457_v54 }
 0x146   : > { %6281 = vmatmul.mubr.msk.f32.gmra.mxu0 %vm590_vm2, %v457_v54 }
 0x147   : > { %6377 = vmatmul.mubr.msk.f32.gmra.mxu1 %vm590_vm2, %v457_v54  ;;  %6282 = vmatprep.mubr.msk.f32.mxu0 %vm590_vm2, %v458_v22 }
 0x148   : > { %6378 = vmatprep.mubr.msk.f32.mxu1 %vm590_vm2, %v458_v22 }
 0x14a   : > { %6283 = vmatmul.mubr.msk.f32.gmra.mxu0 %vm590_vm2, %v458_v22 }
 0x14b   : > { %6379 = vmatmul.mubr.msk.f32.gmra.mxu1 %vm590_vm2, %v458_v22  ;;  %6284 = vmatprep.mubr.msk.f32.mxu0 %vm590_vm2, %v459_v51 }
 0x14c   : > { %6380 = vmatprep.mubr.msk.f32.mxu1 %vm590_vm2, %v459_v51 }
 0x14e   : > { %6285 = vmatmul.mubr.msk.f32.gmra.mxu0 %vm590_vm2, %v459_v51 }
 0x14f   : > { %6381 = vmatmul.mubr.msk.f32.gmra.mxu1 %vm590_vm2, %v459_v51  ;;  %6286 = vmatprep.mubr.msk.f32.mxu0 %vm590_vm2, %v460_v19 }
 0x150   : > { %6382 = vmatprep.mubr.msk.f32.mxu1 %vm590_vm2, %v460_v19 }
 0x152   : > { %6287 = vmatmul.mubr.msk.f32.gmra.mxu0 %vm590_vm2, %v460_v19 }
 0x153   : > { %6383 = vmatmul.mubr.msk.f32.gmra.mxu1 %vm590_vm2, %v460_v19  ;;  %6288 = vmatprep.mubr.msk.f32.mxu0 %vm590_vm2, %v461_v55 }
 0x154   : > { %6384 = vmatprep.mubr.msk.f32.mxu1 %vm590_vm2, %v461_v55 }
 0x156   : > { %6289 = vmatmul.mubr.msk.f32.gmra.mxu0 %vm590_vm2, %v461_v55 }
 0x157   : > { %6385 = vmatmul.mubr.msk.f32.gmra.mxu1 %vm590_vm2, %v461_v55 }
 0x19a   : > { %v7990_v20 = vpop.f32.mrf.mxu0 }
 0x19b   : > { %12289 = vst [vmem:[#allocation74_spill] sm:$0xff] %v7990_v20  ;;  %v7992_v52 = vpop.f32.mrf.mxu1 }
 0x19c   : > { %12290 = vst [vmem:[#allocation75_spill] sm:$0xff] %v7992_v52  ;;  %v7994_v53 = vpop.f32.mrf.mxu0 }
 0x19d   : > { %12291 = vst [vmem:[#allocation76_spill] sm:$0xff] %v7994_v53  ;;  %v7996_v21 = vpop.f32.mrf.mxu1 }
 0x19e   : > { %12292 = vst [vmem:[#allocation77_spill] sm:$0xff] %v7996_v21  ;;  %v7998_v54 = vpop.f32.mrf.mxu0 }
 0x19f   : > { %12293 = vst [vmem:[#allocation78_spill] sm:$0xff] %v7998_v54  ;;  %v8000_v22 = vpop.f32.mrf.mxu1 }
 0x1a0   : > { %12294 = vst [vmem:[#allocation79_spill] sm:$0xff] %v8000_v22  ;;  %v8002_v51 = vpop.f32.mrf.mxu0 }
 0x1a1   : > { %12295 = vst [vmem:[#allocation80_spill] sm:$0xff] %v8002_v51  ;;  %v8004_v19 = vpop.f32.mrf.mxu1 }
 0x1a2   : > { %12296 = vst [vmem:[#allocation81_spill] sm:$0xff] %v8004_v19  ;;  %v8006_v55 = vpop.f32.mrf.mxu0 }
 0x1a3   : > { %12297 = vst [vmem:[#allocation82_spill] sm:$0xff] %v8006_v55  ;;  %v8008_v23 = vpop.f32.mrf.mxu1 }
 0x1a4   : > { %12298 = vst [vmem:[#allocation83_spill] sm:$0xff] %v8008_v23  ;;  %v8010_v56 = vpop.f32.mrf.mxu0 }
 0x1a5   : > { %12299 = vst [vmem:[#allocation84_spill] sm:$0xff] %v8010_v56  ;;  %v8012_v24 = vpop.f32.mrf.mxu1 }
 0x1a6   : > { %12300 = vst [vmem:[#allocation85_spill] sm:$0xff] %v8012_v24  ;;  %v8014_v57 = vpop.f32.mrf.mxu0 }
 0x1a7   : > { %12301 = vst [vmem:[#allocation86_spill] sm:$0xff] %v8014_v57  ;;  %v8016_v25 = vpop.f32.mrf.mxu1 }
 0x1a8   : > { %12302 = vst [vmem:[#allocation87_spill] sm:$0xff] %v8016_v25  ;;  %v8018_v58 = vpop.f32.mrf.mxu0 }
 0x1a9   : > { %12303 = vst [vmem:[#allocation88_spill] sm:$0xff] %v8018_v58  ;;  %v8020_v26 = vpop.f32.mrf.mxu1 }
 0x1aa   : > { %12304 = vst [vmem:[#allocation89_spill] sm:$0xff] %v8020_v26  ;;  %v8022_v59 = vpop.f32.mrf.mxu0 }
 0x1ab   : > { %12305 = vst [vmem:[#allocation90_spill] sm:$0xff] %v8022_v59  ;;  %v8024_v27 = vpop.f32.mrf.mxu1 }
 0x1ac   : > { %12306 = vst [vmem:[#allocation91_spill] sm:$0xff] %v8024_v27  ;;  %v8026_v60 = vpop.f32.mrf.mxu0 }
 0x1ad   : > { %12307 = vst [vmem:[#allocation92_spill] sm:$0xff] %v8026_v60  ;;  %v8028_v28 = vpop.f32.mrf.mxu1 }
 0x1ae   : > { %12308 = vst [vmem:[#allocation93_spill] sm:$0xff] %v8028_v28  ;;  %v8030_v61 = vpop.f32.mrf.mxu0 }
 0x1af   : > { %12309 = vst [vmem:[#allocation94_spill] sm:$0xff] %v8030_v61  ;;  %v8032_v29 = vpop.f32.mrf.mxu1 }
 0x1b0   : > { %12310 = vst [vmem:[#allocation95_spill] sm:$0xff] %v8032_v29  ;;  %v8034_v62 = vpop.f32.mrf.mxu0 }
 0x1b1   : > { %12311 = vst [vmem:[#allocation96_spill] sm:$0xff] %v8034_v62  ;;  %v8036_v30 = vpop.f32.mrf.mxu1 }
 0x1b2   : > { %12312 = vst [vmem:[#allocation97_spill] sm:$0xff] %v8036_v30  ;;  %v8038_v63 = vpop.f32.mrf.mxu0 }
 0x1b3   : > { %12313 = vst [vmem:[#allocation98_spill] sm:$0xff] %v8038_v63  ;;  %v8040_v31 = vpop.f32.mrf.mxu1 }
 0x1b4   : > { %12314 = vst [vmem:[#allocation99_spill] sm:$0xff] %v8040_v31  ;;  %v8042_v0 = vpop.f32.mrf.mxu0 }
 0x1b5   : > { %12315 = vst [vmem:[#allocation100_spill] sm:$0xff] %v8042_v0  ;;  %v8044_v32 = vpop.f32.mrf.mxu1 }
 0x1b6   : > { %12316 = vst [vmem:[#allocation101_spill] sm:$0xff] %v8044_v32  ;;  %v8046_v1 = vpop.f32.mrf.mxu0 }
 0x1b7   : > { %12317 = vst [vmem:[#allocation102_spill] sm:$0xff] %v8046_v1  ;;  %v8048_v33 = vpop.f32.mrf.mxu1 }
 0x1b8   : > { %12318 = vst [vmem:[#allocation103_spill] sm:$0xff] %v8048_v33  ;;  %v8050_v2 = vpop.f32.mrf.mxu0 }
 0x1b9   : > { %12319 = vst [vmem:[#allocation104_spill] sm:$0xff] %v8050_v2  ;;  %v8052_v34 = vpop.f32.mrf.mxu1 }
 0x1ba   : > { %12320 = vst [vmem:[#allocation105_spill] sm:$0xff] %v8052_v34  ;;  %v8054_v35 = vpop.f32.mrf.mxu0 }
 0x1bb   : > { %12321 = vst [vmem:[#allocation106_spill] sm:$0xff] %v8054_v35  ;;  %v8056_v3 = vpop.f32.mrf.mxu1 }
 0x1bc   : > { %12322 = vst [vmem:[#allocation107_spill] sm:$0xff] %v8056_v3  ;;  %v8058_v36 = vpop.f32.mrf.mxu0 }
 0x1bd   : > { %12323 = vst [vmem:[#allocation108_spill] sm:$0xff] %v8058_v36  ;;  %v8060_v4 = vpop.f32.mrf.mxu1 }
 0x1be   : > { %12324 = vst [vmem:[#allocation109_spill] sm:$0xff] %v8060_v4  ;;  %v8062_v37 = vpop.f32.mrf.mxu0 }
 0x1bf   : > { %12325 = vst [vmem:[#allocation110_spill] sm:$0xff] %v8062_v37  ;;  %v8064_v5 = vpop.f32.mrf.mxu1 }
 0x1c0   : > { %12326 = vst [vmem:[#allocation111_spill] sm:$0xff] %v8064_v5  ;;  %v8066_v38 = vpop.f32.mrf.mxu0 }
 0x1c1   : > { %12327 = vst [vmem:[#allocation112_spill] sm:$0xff] %v8066_v38  ;;  %v8068_v6 = vpop.f32.mrf.mxu1 }
 0x1c2   : > { %12328 = vst [vmem:[#allocation113_spill] sm:$0xff] %v8068_v6  ;;  %v8070_v39 = vpop.f32.mrf.mxu0 }
 0x1c3   : > { %12329 = vst [vmem:[#allocation114_spill] sm:$0xff] %v8070_v39  ;;  %v8072_v7 = vpop.f32.mrf.mxu1 }
 0x1c4   : > { %12330 = vst [vmem:[#allocation115_spill] sm:$0xff] %v8072_v7  ;;  %v8074_v40 = vpop.f32.mrf.mxu0 }
 0x1c5   : > { %12331 = vst [vmem:[#allocation116_spill] sm:$0xff] %v8074_v40  ;;  %v8076_v8 = vpop.f32.mrf.mxu1 }
 0x1c6   : > { %12332 = vst [vmem:[#allocation117_spill] sm:$0xff] %v8076_v8  ;;  %v8078_v41 = vpop.f32.mrf.mxu0 }
 0x1c7   : > { %12333 = vst [vmem:[#allocation118_spill] sm:$0xff] %v8078_v41  ;;  %v8080_v9 = vpop.f32.mrf.mxu1 }
 0x1c8   : > { %12334 = vst [vmem:[#allocation119_spill] sm:$0xff] %v8080_v9  ;;  %v8082_v42 = vpop.f32.mrf.mxu0 }
 0x1c9   : > { %12335 = vst [vmem:[#allocation120_spill] sm:$0xff] %v8082_v42  ;;  %v8084_v10 = vpop.f32.mrf.mxu1 }
 0x1ca   : > { %12336 = vst [vmem:[#allocation121_spill] sm:$0xff] %v8084_v10  ;;  %v8086_v43 = vpop.f32.mrf.mxu0 }
 0x1cb   : > { %12337 = vst [vmem:[#allocation122_spill] sm:$0xff] %v8086_v43  ;;  %v8088_v11 = vpop.f32.mrf.mxu1 }
 0x1cc   : > { %12338 = vst [vmem:[#allocation123_spill] sm:$0xff] %v8088_v11  ;;  %v8090_v44 = vpop.f32.mrf.mxu0 }
 0x1cd   : > { %12339 = vst [vmem:[#allocation124_spill] sm:$0xff] %v8090_v44  ;;  %v8092_v12 = vpop.f32.mrf.mxu1 }
 0x1ce   : > { %12340 = vst [vmem:[#allocation125_spill] sm:$0xff] %v8092_v12  ;;  %v8094_v45 = vpop.f32.mrf.mxu0 }
 0x1cf   : > { %12341 = vst [vmem:[#allocation126_spill] sm:$0xff] %v8094_v45  ;;  %v8096_v13 = vpop.f32.mrf.mxu1 }
 0x1d0   : > { %12342 = vst [vmem:[#allocation127_spill] sm:$0xff] %v8096_v13  ;;  %v8098_v46 = vpop.f32.mrf.mxu0 }
 0x1d1   : > { %12343 = vst [vmem:[#allocation128_spill] sm:$0xff] %v8098_v46  ;;  %v8100_v14 = vpop.f32.mrf.mxu1 }
 0x1d2   : > { %12344 = vst [vmem:[#allocation129_spill] sm:$0xff] %v8100_v14  ;;  %v8102_v47 = vpop.f32.mrf.mxu0 }
 0x1d3   : > { %12345 = vst [vmem:[#allocation130_spill] sm:$0xff] %v8102_v47  ;;  %v8104_v15 = vpop.f32.mrf.mxu1 }
 0x1d4   : > { %12346 = vst [vmem:[#allocation131_spill] sm:$0xff] %v8104_v15  ;;  %v8106_v48 = vpop.f32.mrf.mxu0 }
 0x1d5   : > { %12347 = vst [vmem:[#allocation132_spill] sm:$0xff] %v8106_v48  ;;  %v8108_v16 = vpop.f32.mrf.mxu1 }
 0x1d6   : > { %12348 = vst [vmem:[#allocation133_spill] sm:$0xff] %v8108_v16  ;;  %v8110_v49 = vpop.f32.mrf.mxu0 }
 0x1d7   : > { %12349 = vst [vmem:[#allocation134_spill] sm:$0xff] %v8110_v49  ;;  %v8112_v17 = vpop.f32.mrf.mxu1 }
 0x1d8   : > { %12350 = vst [vmem:[#allocation135_spill] sm:$0xff] %v8112_v17  ;;  %v8114_v50 = vpop.f32.mrf.mxu0 }
 0x1d9   : > { %12351 = vst [vmem:[#allocation136_spill] sm:$0xff] %v8114_v50  ;;  %v8116_v18 = vpop.f32.mrf.mxu1 }
 0x1da   : > { %12352 = vst [vmem:[#allocation137_spill] sm:$0xff] %v8116_v18  ;;  %v8118_v12 = vpop.f32.mrf.mxu0 }
 0x1db   : > { %12353 = vst [vmem:[#allocation138_spill] sm:$0xff] %v8118_v12  ;;  %v8120_v11 = vpop.f32.mrf.mxu1 }
 0x1dc   : > { %12354 = vst [vmem:[#allocation139_spill] sm:$0xff] %v8120_v11  ;;  %v8122_v44 = vpop.f32.mrf.mxu0 }
 0x1dd   : > { %12355 = vst [vmem:[#allocation140_spill] sm:$0xff] %v8122_v44  ;;  %v8124_v47 = vpop.f32.mrf.mxu1 }
 0x1de   : > { %12356 = vst [vmem:[#allocation141_spill] sm:$0xff] %v8124_v47  ;;  %v8126_v15 = vpop.f32.mrf.mxu0 }
 0x1df   : > { %12357 = vst [vmem:[#allocation142_spill] sm:$0xff] %v8126_v15  ;;  %v8128_v48 = vpop.f32.mrf.mxu1 }
 0x1e0   : > { %12358 = vst [vmem:[#allocation143_spill] sm:$0xff] %v8128_v48  ;;  %v8130_v16 = vpop.f32.mrf.mxu0 }
 0x1e1   : > { %12359 = vst [vmem:[#allocation144_spill] sm:$0xff] %v8130_v16  ;;  %v8132_v43 = vpop.f32.mrf.mxu1 }
 0x1e2   : > { %12360 = vst [vmem:[#allocation145_spill] sm:$0xff] %v8132_v43  ;;  %v8134_v8 = vpop.f32.mrf.mxu0 }
 0x1e3   : > { %12361 = vst [vmem:[#allocation146_spill] sm:$0xff] %v8134_v8  ;;  %v8136_v7 = vpop.f32.mrf.mxu1 }
 0x1e4   : > { %12362 = vst [vmem:[#allocation147_spill] sm:$0xff] %v8136_v7  ;;  %v8138_v40 = vpop.f32.mrf.mxu0 }
 0x1e5   : > { %12363 = vst [vmem:[#allocation148_spill] sm:$0xff] %v8138_v40  ;;  %v8140_v12 = vpop.f32.mrf.mxu1 }
 0x1e6   : > { %12364 = vst [vmem:[#allocation149_spill] sm:$0xff] %v8140_v12  ;;  %v8142_v11 = vpop.f32.mrf.mxu0 }
 0x1e7   : > { %12365 = vst [vmem:[#allocation150_spill] sm:$0xff] %v8142_v11  ;;  %v8144_v44 = vpop.f32.mrf.mxu1 }
 0x1e8   : > { %12366 = vst [vmem:[#allocation151_spill] sm:$0xff] %v8144_v44  ;;  %v8146_v47 = vpop.f32.mrf.mxu0 }
 0x1e9   : > { %12367 = vst [vmem:[#allocation152_spill] sm:$0xff] %v8146_v47  ;;  %v8148_v15 = vpop.f32.mrf.mxu1 }
 0x1ea   : > { %12368 = vst [vmem:[#allocation153_spill] sm:$0xff] %v8148_v15  ;;  %v8150_v48 = vpop.f32.mrf.mxu0 }
 0x1eb   : > { %12369 = vst [vmem:[#allocation154_spill] sm:$0xff] %v8150_v48  ;;  %v8152_v16 = vpop.f32.mrf.mxu1 }
 0x1ec   : > { %12370 = vst [vmem:[#allocation155_spill] sm:$0xff] %v8152_v16  ;;  %v8154_v43 = vpop.f32.mrf.mxu0 }
 0x1ed   : > { %12371 = vst [vmem:[#allocation156_spill] sm:$0xff] %v8154_v43  ;;  %v8156_v8 = vpop.f32.mrf.mxu1 }
 0x1ee   : > { %12372 = vst [vmem:[#allocation157_spill] sm:$0xff] %v8156_v8  ;;  %v8158_v7 = vpop.f32.mrf.mxu0 }
 0x1ef   : > { %12373 = vst [vmem:[#allocation158_spill] sm:$0xff] %v8158_v7  ;;  %v8160_v40 = vpop.f32.mrf.mxu1 }
 0x1f0   : > { %12374 = vst [vmem:[#allocation159_spill] sm:$0xff] %v8160_v40  ;;  %v8162_v12 = vpop.f32.mrf.mxu0 }
 0x1f1   : > { %12375 = vst [vmem:[#allocation160_spill] sm:$0xff] %v8162_v12  ;;  %v8164_v11 = vpop.f32.mrf.mxu1 }
 0x1f2   : > { %12376 = vst [vmem:[#allocation161_spill] sm:$0xff] %v8164_v11  ;;  %v8166_v44 = vpop.f32.mrf.mxu0 }
 0x1f3   : > { %12377 = vst [vmem:[#allocation162_spill] sm:$0xff] %v8166_v44  ;;  %v8168_v47 = vpop.f32.mrf.mxu1 }
 0x1f4   : > { %12378 = vst [vmem:[#allocation163_spill] sm:$0xff] %v8168_v47  ;;  %v8170_v15 = vpop.f32.mrf.mxu0 }
 0x1f5   : > { %12379 = vst [vmem:[#allocation164_spill] sm:$0xff] %v8170_v15  ;;  %v8172_v48 = vpop.f32.mrf.mxu1 }
 0x1f6   : > { %12380 = vst [vmem:[#allocation165_spill] sm:$0xff] %v8172_v48  ;;  %v8174_v16 = vpop.f32.mrf.mxu0 }
 0x1f7   : > { %12381 = vst [vmem:[#allocation166_spill] sm:$0xff] %v8174_v16  ;;  %v8176_v43 = vpop.f32.mrf.mxu1 }
 0x1f8   : > { %12382 = vst [vmem:[#allocation167_spill] sm:$0xff] %v8176_v43  ;;  %v8178_v8 = vpop.f32.mrf.mxu0 }
 0x1f9   : > { %12383 = vst [vmem:[#allocation168_spill] sm:$0xff] %v8178_v8  ;;  %v8180_v7 = vpop.f32.mrf.mxu1 }
 0x1fa   : > { %12384 = vst [vmem:[#allocation169_spill] sm:$0xff] %v8180_v7  ;;  %v8182_v40 = vpop.f32.mrf.mxu0 }
 0x1fb   : > { %12385 = vst [vmem:[#allocation170_spill] sm:$0xff] %v8182_v40  ;;  %v8184_v12 = vpop.f32.mrf.mxu1 }
 0x1fc   : > { %12386 = vst [vmem:[#allocation171_spill] sm:$0xff] %v8184_v12  ;;  %v8186_v11 = vpop.f32.mrf.mxu0 }
 0x1fd   : > { %12387 = vst [vmem:[#allocation172_spill] sm:$0xff] %v8186_v11  ;;  %v8188_v44 = vpop.f32.mrf.mxu1 }
 0x1fe   : > { %12388 = vst [vmem:[#allocation173_spill] sm:$0xff] %v8188_v44  ;;  %v8190_v47 = vpop.f32.mrf.mxu0 }
 0x1ff   : > { %12389 = vst [vmem:[#allocation174_spill] sm:$0xff] %v8190_v47  ;;  %v8192_v15 = vpop.f32.mrf.mxu1 }
 0x200   : > { %12390 = vst [vmem:[#allocation175_spill] sm:$0xff] %v8192_v15  ;;  %v8194_v48 = vpop.f32.mrf.mxu0 }
 0x201   : > { %12391 = vst [vmem:[#allocation176_spill] sm:$0xff] %v8194_v48  ;;  %v8196_v16 = vpop.f32.mrf.mxu1 }
 0x202   : > { %12392 = vst [vmem:[#allocation177_spill] sm:$0xff] %v8196_v16  ;;  %v8198_v43 = vpop.f32.mrf.mxu0 }
 0x203   : > { %12393 = vst [vmem:[#allocation178_spill] sm:$0xff] %v8198_v43  ;;  %v8200_v8 = vpop.f32.mrf.mxu1 }
 0x204   : > { %12394 = vst [vmem:[#allocation179_spill] sm:$0xff] %v8200_v8  ;;  %v8202_v7 = vpop.f32.mrf.mxu0 }
 0x205   : > { %12395 = vst [vmem:[#allocation180_spill] sm:$0xff] %v8202_v7  ;;  %v8204_v40 = vpop.f32.mrf.mxu1 }
 0x206   : > { %12396 = vst [vmem:[#allocation181_spill] sm:$0xff] %v8204_v40  ;;  %v8206_v12 = vpop.f32.mrf.mxu0 }
 0x207   : > { %12397 = vst [vmem:[#allocation182_spill] sm:$0xff] %v8206_v12  ;;  %v8208_v11 = vpop.f32.mrf.mxu1 }
 0x208   : > { %12398 = vst [vmem:[#allocation183_spill] sm:$0xff] %v8208_v11  ;;  %v8210_v44 = vpop.f32.mrf.mxu0 }
 0x209   : > { %12399 = vst [vmem:[#allocation184_spill] sm:$0xff] %v8210_v44  ;;  %v8212_v47 = vpop.f32.mrf.mxu1 }
 0x20a   : > { %12400 = vst [vmem:[#allocation185_spill] sm:$0xff] %v8212_v47  ;;  %v8214_v15 = vpop.f32.mrf.mxu0 }
 0x20b   : > { %12401 = vst [vmem:[#allocation186_spill] sm:$0xff] %v8214_v15  ;;  %v8216_v48 = vpop.f32.mrf.mxu1 }
 0x20c   : > { %12402 = vst [vmem:[#allocation187_spill] sm:$0xff] %v8216_v48  ;;  %v8218_v16 = vpop.f32.mrf.mxu0 }
 0x20d   : > { %12403 = vst [vmem:[#allocation188_spill] sm:$0xff] %v8218_v16  ;;  %v8220_v43 = vpop.f32.mrf.mxu1 }
 0x20e   : > { %12404 = vst [vmem:[#allocation189_spill] sm:$0xff] %v8220_v43  ;;  %v8222_v8 = vpop.f32.mrf.mxu0 }
 0x20f   : > { %12405 = vst [vmem:[#allocation190_spill] sm:$0xff] %v8222_v8  ;;  %v8224_v7 = vpop.f32.mrf.mxu1 }
 0x210   : > { %12406 = vst [vmem:[#allocation191_spill] sm:$0xff] %v8224_v7  ;;  %v8226_v40 = vpop.f32.mrf.mxu0 }
 0x211   : > { %12407 = vst [vmem:[#allocation192_spill] sm:$0xff] %v8226_v40  ;;  %v8228_v12 = vpop.f32.mrf.mxu1 }
 0x212   : > { %12408 = vst [vmem:[#allocation193_spill] sm:$0xff] %v8228_v12  ;;  %v8230_v11 = vpop.f32.mrf.mxu0 }
 0x213   : > { %12409 = vst [vmem:[#allocation194_spill] sm:$0xff] %v8230_v11  ;;  %v8232_v44 = vpop.f32.mrf.mxu1 }
 0x214   : > { %12410 = vst [vmem:[#allocation195_spill] sm:$0xff] %v8232_v44  ;;  %v8234_v47 = vpop.f32.mrf.mxu0 }
 0x215   : > { %12411 = vst [vmem:[#allocation196_spill] sm:$0xff] %v8234_v47  ;;  %v8236_v15 = vpop.f32.mrf.mxu1 }
 0x216   : > { %12412 = vst [vmem:[#allocation197_spill] sm:$0xff] %v8236_v15  ;;  %v8238_v48 = vpop.f32.mrf.mxu0  ;;  %1400 = sbr.rel (%p6186_p12) target bundleno = 1220 (0x4c4), region = 40 }
 0x217   : > { %12413 = vst [vmem:[#allocation198_spill] sm:$0xff] %v8238_v48  ;;  %v8240_v16 = vpop.f32.mrf.mxu1 }
 0x218   : > { %12414 = vst [vmem:[#allocation199_spill] sm:$0xff] %v8240_v16  ;;  %v8242_v43 = vpop.f32.mrf.mxu0 }
 0x219   : > { %12415 = vst [vmem:[#allocation200_spill] sm:$0xff] %v8242_v43  ;;  %v8244_v8 = vpop.f32.mrf.mxu1 }
 0x21a   : > { %12416 = vst [vmem:[#allocation201_spill] sm:$0xff] %v8244_v8 }
 0x21b   : > { %v1401_v11 = vlaneseq  ;;  %v8250_v44 = vstv %s7988_s7  ;;  %v1473_v48 = vstv %s6192_s19 }
 0x21d   : > { %v8252_v47 = vshrl.u32 %v1401_v11, 7  ;;  %v1469_v15 = vand.u32 127, %v1401_v11 }
 0x21f   : > { %v1435_v16 = vadd.s32 %v8250_v44, %v8252_v47  ;;  %v1470_v43 = vadd.s32 128, %v1469_v15  ;;  %v1471_v8 = vadd.s32 256, %v1469_v15  ;;  %v1472_v12 = vadd.s32 384, %v1469_v15 }
 0x220   : > { %v8258_v7 = vadd.s32 %v1473_v48, %v1469_v15  ;;  %v1403_v40 = vadd.s32 8, %v8252_v47  ;;  %v1404_v39 = vadd.s32 16, %v8252_v47  ;;  %v1405_v18 = vadd.s32 24, %v8252_v47 }
 0x221   : > { %v8263_v17 = vadd.s32 %v1473_v48, %v1470_v43  ;;  %v8265_v50 = vadd.s32 %v1473_v48, %v1471_v8  ;;  %v8267_v11 = vadd.s32 %v1473_v48, %v1472_v12  ;;  %v1406_v49 = vadd.s32 32, %v8252_v47 }
 0x222   : > { %vm1478_vm3 = vcmp.le.s32.totalorder %v8258_v7, %v1435_v16  ;;  %v1436_v14 = vadd.s32 %v8250_v44, %v1403_v40  ;;  %v1437_v15 = vadd.s32 %v8250_v44, %v1404_v39  ;;  %v1438_v13 = vadd.s32 %v8250_v44, %v1405_v18 }
 0x223   : > { %vm1479_vm4 = vcmp.le.s32.totalorder %v8263_v17, %v1435_v16  ;;  %vm1480_vm5 = vcmp.le.s32.totalorder %v8265_v50, %v1435_v16  ;;  %vm1481_vm6 = vcmp.le.s32.totalorder %v8267_v11, %v1435_v16  ;;  %v8278_v8 = vsel %vm1478_vm3, %v7990_v20, -1e+30 }
 0x224   : > { %v8281_v12 = vsel %vm1479_vm4, %v7994_v53, -1e+30  ;;  %v8284_v43 = vsel %vm1480_vm5, %v7992_v52, -1e+30  ;;  %v8287_v40 = vsel %vm1481_vm6, %v7996_v21, -1e+30  ;;  %vm1482_vm7 = vcmp.le.s32.totalorder %v8258_v7, %v1436_v14 }
 0x225   : > { %v1766_v18 = vmax.f32 %v8278_v8, %v8281_v12  ;;  %vm1483_vm8 = vcmp.le.s32.totalorder %v8263_v17, %v1436_v14  ;;  %vm1484_vm9 = vcmp.le.s32.totalorder %v8265_v50, %v1436_v14  ;;  %vm1485_vm10 = vcmp.le.s32.totalorder %v8267_v11, %v1436_v14 }
 0x226   : > { %v8296_v16 = vsel %vm1482_vm7, %v7998_v54, -1e+30  ;;  %v8299_v39 = vsel %vm1483_vm8, %v8002_v51, -1e+30  ;;  %v8302_v48 = vsel %vm1484_vm9, %v8000_v22, -1e+30  ;;  %vm1486_vm11 = vcmp.le.s32.totalorder %v8258_v7, %v1437_v15 }
 0x227   : > { %v1767_v21 = vmax.f32 %v1766_v18, %v8284_v43  ;;  %v8307_v52 = vsel %vm1485_vm10, %v8004_v19, -1e+30  ;;  %v1771_v20 = vmax.f32 %v8296_v16, %v8299_v39  ;;  %vm1487_vm12 = vcmp.le.s32.totalorder %v8263_v17, %v1437_v15 }
 0x228   : > { %vm1488_vm13 = vcmp.le.s32.totalorder %v8265_v50, %v1437_v15  ;;  %vm1489_vm14 = vcmp.le.s32.totalorder %v8267_v11, %v1437_v15  ;;  %v8315_v14 = vsel %vm1486_vm11, %v8006_v55, -1e+30  ;;  %v8318_v22 = vsel %vm1487_vm12, %v8010_v56, -1e+30 }
 0x229   : > { %v1768_v18 = vmax.f32 %v1767_v21, %v8287_v40  ;;  %v1772_v19 = vmax.f32 %v1771_v20, %v8302_v48  ;;  %v8323_v54 = vsel %vm1488_vm13, %v8008_v23, -1e+30  ;;  %v8326_v51 = vsel %vm1489_vm14, %v8012_v24, -1e+30 }
 0x22a   : > { %v1776_v53 = vmax.f32 %v8315_v14, %v8318_v22  ;;  %vm1490_vm15 = vcmp.le.s32.totalorder %v8258_v7, %v1438_v13  ;;  %vm1491_vm0 = vcmp.le.s32.totalorder %v8263_v17, %v1438_v13  ;;  %vm1492_vm1 = vcmp.le.s32.totalorder %v8265_v50, %v1438_v13 }
 0x22b   : > { %1769 = vmax.xlane.f32.xlu0 %v1768_v18  ;;  %v1773_v21 = vmax.f32 %v1772_v19, %v8307_v52  ;;  %vm1493_vm3 = vcmp.le.s32.totalorder %v8267_v11, %v1438_v13  ;;  %v8336_v20 = vsel %vm1490_vm15, %v8014_v57, -1e+30  ;;  %v8339_v15 = vsel %vm1491_vm0, %v8018_v58, -1e+30 }
 0x22c   : > { %12417 = vst [vmem:[#allocation202_spill] sm:$0xff] %v8339_v15  ;;  %v1777_v24 = vmax.f32 %v1776_v53, %v8323_v54  ;;  %v8343_v23 = vsel %vm1492_vm1, %v8016_v25, -1e+30  ;;  %v8346_v55 = vsel %vm1493_vm3, %v8020_v26, -1e+30  ;;  %v1781_v18 = vmax.f32 %v8336_v20, %v8339_v15 }
 0x22d   : > { %12418 = vst [vmem:[#allocation203_spill] sm:$0xff] %v8343_v23  ;;  %12419 = vst [vmem:[#allocation204_spill] sm:$0xff] %v8346_v55  ;;  %v1439_v19 = vadd.s32 %v8250_v44, %v1406_v49  ;;  %v1407_v13 = vadd.s32 40, %v8252_v47  ;;  %v1409_v57 = vadd.s32 56, %v8252_v47  ;;  %v1408_v58 = vadd.s32 48, %v8252_v47 }
 0x22e   : > { %v1778_v56 = vmax.f32 %v1777_v24, %v8326_v51  ;;  %v1782_v53 = vmax.f32 %v1781_v18, %v8343_v23  ;;  %v1411_v25 = vadd.s32 72, %v8252_v47  ;;  %v1413_v26 = vadd.s32 88, %v8252_v47 }
 0x22f   : > { %1774 = vmax.xlane.f32.xlu0 %v1773_v21  ;;  %vm1494_vm4 = vcmp.le.s32.totalorder %v8258_v7, %v1439_v19  ;;  %vm1495_vm5 = vcmp.le.s32.totalorder %v8263_v17, %v1439_v19  ;;  %vm1496_vm6 = vcmp.le.s32.totalorder %v8265_v50, %v1439_v19  ;;  %vm1497_vm7 = vcmp.le.s32.totalorder %v8267_v11, %v1439_v19 }
 0x230   : > { %1779 = vmax.xlane.f32.xlu1 %v1778_v56  ;;  %v1783_v49 = vmax.f32 %v1782_v53, %v8346_v55  ;;  %v8364_v24 = vsel %vm1494_vm4, %v8022_v59, -1e+30  ;;  %v8367_v18 = vsel %vm1495_vm5, %v8026_v60, -1e+30  ;;  %v8370_v23 = vsel %vm1496_vm6, %v8024_v27, -1e+30 }
 0x231   : > { %v8373_v21 = vsel %vm1497_vm7, %v8028_v28, -1e+30  ;;  %v1786_v15 = vmax.f32 %v8364_v24, %v8367_v18  ;;  %v1440_v19 = vadd.s32 %v8250_v44, %v1407_v13  ;;  %v1442_v56 = vadd.s32 %v8250_v44, %v1409_v57 }
 0x232   : > { %v1441_v53 = vadd.s32 %v8250_v44, %v1408_v58  ;;  %v1444_v59 = vadd.s32 %v8250_v44, %v1411_v25  ;;  %v1446_v60 = vadd.s32 %v8250_v44, %v1413_v26  ;;  %v1410_v55 = vadd.s32 64, %v8252_v47 }
 0x233   : > { %v1787_v27 = vmax.f32 %v1786_v15, %v8370_v23  ;;  %vm1498_vm8 = vcmp.le.s32.totalorder %v8258_v7, %v1440_v19  ;;  %vm1499_vm9 = vcmp.le.s32.totalorder %v8263_v17, %v1440_v19  ;;  %vm1500_vm10 = vcmp.le.s32.totalorder %v8265_v50, %v1440_v19 }
 0x234   : > { %1784 = vmax.xlane.f32.xlu1 %v1783_v49  ;;  %vm1501_vm11 = vcmp.le.s32.totalorder %v8267_v11, %v1440_v19  ;;  %v8389_v57 = vsel %vm1498_vm8, %v8030_v61, -1e+30  ;;  %v8392_v25 = vsel %vm1499_vm9, %v8034_v62, -1e+30  ;;  %v8395_v26 = vsel %vm1500_vm10, %v8032_v29, -1e+30 }
 0x235   : > { %v1788_v58 = vmax.f32 %v1787_v27, %v8373_v21  ;;  %v8399_v15 = vsel %vm1501_vm11, %v8036_v30, -1e+30  ;;  %v1791_v13 = vmax.f32 %v8389_v57, %v8392_v25  ;;  %vm1506_vm12 = vcmp.le.s32.totalorder %v8258_v7, %v1442_v56 }
 0x236   : > { %vm1507_vm13 = vcmp.le.s32.totalorder %v8263_v17, %v1442_v56  ;;  %vm1508_vm14 = vcmp.le.s32.totalorder %v8265_v50, %v1442_v56  ;;  %vm1509_vm15 = vcmp.le.s32.totalorder %v8267_v11, %v1442_v56  ;;  %v8408_v49 = vsel %vm1506_vm12, %v8046_v1, -1e+30 }
 0x237   : > { %1789 = vmax.xlane.f32.xlu0 %v1788_v58  ;;  %v1792_v27 = vmax.f32 %v1791_v13, %v8395_v26  ;;  %v8412_v19 = vsel %vm1507_vm13, %v8050_v2, -1e+30  ;;  %v8415_v30 = vsel %vm1508_vm14, %v8048_v33, -1e+30  ;;  %v8418_v28 = vsel %vm1509_vm15, %v8052_v34, -1e+30 }
 0x238   : > { %v1801_v29 = vmax.f32 %v8408_v49, %v8412_v19  ;;  %vm1502_vm0 = vcmp.le.s32.totalorder %v8258_v7, %v1441_v53  ;;  %vm1503_vm1 = vcmp.le.s32.totalorder %v8263_v17, %v1441_v53  ;;  %vm1504_vm3 = vcmp.le.s32.totalorder %v8265_v50, %v1441_v53 }
 0x239   : > { %v1793_v56 = vmax.f32 %v1792_v27, %v8399_v15  ;;  %vm1505_vm4 = vcmp.le.s32.totalorder %v8267_v11, %v1441_v53  ;;  %v8428_v58 = vsel %vm1502_vm0, %v8038_v63, -1e+30  ;;  %v8431_v13 = vsel %vm1503_vm1, %v8042_v0, -1e+30 }
 0x23a   : > { %v1802_v34 = vmax.f32 %v1801_v29, %v8415_v30  ;;  %v8435_v33 = vsel %vm1504_vm3, %v8040_v31, -1e+30  ;;  %v8438_v1 = vsel %vm1505_vm4, %v8044_v32, -1e+30  ;;  %v1796_v2 = vmax.f32 %v8428_v58, %v8431_v13 }
 0x23b   : > { %1794 = vmax.xlane.f32.xlu1 %v1793_v56  ;;  %vm1514_vm5 = vcmp.le.s32.totalorder %v8258_v7, %v1444_v59  ;;  %vm1515_vm6 = vcmp.le.s32.totalorder %v8263_v17, %v1444_v59  ;;  %vm1516_vm7 = vcmp.le.s32.totalorder %v8265_v50, %v1444_v59  ;;  %vm1517_vm8 = vcmp.le.s32.totalorder %v8267_v11, %v1444_v59 }
 0x23c   : > { %v1803_v29 = vmax.f32 %v1802_v34, %v8418_v28  ;;  %v1797_v53 = vmax.f32 %v1796_v2, %v8435_v33  ;;  %v8449_v27 = vsel %vm1514_vm5, %v8062_v37, -1e+30  ;;  %v8452_v32 = vsel %vm1515_vm6, %v8066_v38, -1e+30 }
 0x23d   : > { %12420 = vst [vmem:[#allocation205_spill] sm:$0xff] %v8449_v27  ;;  %12421 = vst [vmem:[#allocation206_spill] sm:$0xff] %v8452_v32  ;;  %v8455_v56 = vsel %vm1516_vm7, %v8064_v5, -1e+30  ;;  %v8458_v31 = vsel %vm1517_vm8, %v8068_v6, -1e+30  ;;  %v1811_v63 = vmax.f32 %v8449_v27, %v8452_v32  ;;  %vm1522_vm9 = vcmp.le.s32.totalorder %v8258_v7, %v1446_v60 }
 0x23e   : > { %12422 = vst [vmem:[#allocation207_spill] sm:$0xff] %v8455_v56  ;;  %12423 = vst [vmem:[#allocation208_spill] sm:$0xff] %v8458_v31  ;;  %v1798_v34 = vmax.f32 %v1797_v53, %v8438_v1  ;;  %vm1523_vm10 = vcmp.le.s32.totalorder %v8263_v17, %v1446_v60  ;;  %vm1524_vm11 = vcmp.le.s32.totalorder %v8265_v50, %v1446_v60  ;;  %v8469_v2 = vsel %vm1522_vm9, %v8078_v41, -1e+30  ;;  %v12647_v32 = vld [vmem:[#allocation198_spill] sm:$0xff] }
 0x23f   : > { %vm1525_vm12 = vcmp.le.s32.totalorder %v8267_v11, %v1446_v60  ;;  %1804 = vmax.xlane.f32.xlu1 %v1803_v29  ;;  %v1812_v59 = vmax.f32 %v1811_v63, %v8455_v56  ;;  %12424 = vst [vmem:[#allocation209_spill] sm:$0xff] %v8469_v2  ;;  %v8472_v6 = vsel %vm1523_vm10, %v8082_v42, -1e+30  ;;  %v8475_v5 = vsel %vm1524_vm11, %v8080_v9, -1e+30  ;;  %v9145_v56 = vld [vmem:[#allocation2 + $0x58] sm:$0xff] }
 0x240   : > { %12425 = vst [vmem:[#allocation210_spill] sm:$0xff] %v8472_v6  ;;  %12426 = vst [vmem:[#allocation211_spill] sm:$0xff] %v8475_v5  ;;  %1799 = vmax.xlane.f32.xlu0 %v1798_v34  ;;  %v8478_v53 = vsel %vm1525_vm12, %v8084_v10, -1e+30  ;;  %v1821_v37 = vmax.f32 %v8469_v2, %v8472_v6  ;;  %v1443_v60 = vadd.s32 %v8250_v44, %v1410_v55  ;;  %v1415_v63 = vadd.s32 104, %v8252_v47 }
 0x241   : > { %12427 = vst [vmem:[#allocation212_spill] sm:$0xff] %v8478_v53  ;;  %v1813_v29 = vmax.f32 %v1812_v59, %v8458_v31  ;;  %v1417_v41 = vadd.s32 120, %v8252_v47  ;;  %v1412_v42 = vadd.s32 80, %v8252_v47  ;;  %v1419_v9 = vadd.s32 136, %v8252_v47  ;;  %v12630_v31 = vld [vmem:[#allocation66_spill] sm:$0xff]  ;;  %12644 = vst [vmem:[#allocation298_spill] sm:$0xff] %v9145_v56 }
 0x242   : > { %v1822_v34 = vmax.f32 %v1821_v37, %v8475_v5  ;;  %vm1510_vm13 = vcmp.le.s32.totalorder %v8258_v7, %v1443_v60  ;;  %vm1511_vm14 = vcmp.le.s32.totalorder %v8263_v17, %v1443_v60  ;;  %vm1512_vm15 = vcmp.le.s32.totalorder %v8265_v50, %v1443_v60 }
 0x243   : > { %1814 = vmax.xlane.f32.xlu1 %v1813_v29  ;;  %vm1513_vm0 = vcmp.le.s32.totalorder %v8267_v11, %v1443_v60  ;;  %v8494_v55 = vsel %vm1510_vm13, %v8054_v35, -1e+30  ;;  %v8497_v59 = vsel %vm1511_vm14, %v8058_v36, -1e+30  ;;  %v8500_v10 = vsel %vm1512_vm15, %v8056_v3, -1e+30 }
 0x244   : > { %12428 = vst [vmem:[#allocation213_spill] sm:$0xff] %v8500_v10  ;;  %v1823_v37 = vmax.f32 %v1822_v34, %v8478_v53  ;;  %v8504_v38 = vsel %vm1513_vm0, %v8060_v4, -1e+30  ;;  %v1806_v0 = vmax.f32 %v8494_v55, %v8497_v59  ;;  %v1448_v29 = vadd.s32 %v8250_v44, %v1415_v63  ;;  %v12434_v34 = vld [vmem:[#allocation129_spill] sm:$0xff] }
 0x245   : > { %12429 = vst [vmem:[#allocation214_spill] sm:$0xff] %v8504_v38  ;;  %v1450_v60 = vadd.s32 %v8250_v44, %v1417_v41  ;;  %v1445_v35 = vadd.s32 %v8250_v44, %v1412_v42  ;;  %v1452_v36 = vadd.s32 %v8250_v44, %v1419_v9  ;;  %v1422_v61 = vadd.s32 160, %v8252_v47  ;;  %v12432_v9 = vld [vmem:[#allocation127_spill] sm:$0xff] }
 0x246   : > { %v1807_v3 = vmax.f32 %v1806_v0, %v8500_v10  ;;  %vm1530_vm1 = vcmp.le.s32.totalorder %v8258_v7, %v1448_v29  ;;  %vm1531_vm3 = vcmp.le.s32.totalorder %v8263_v17, %v1448_v29  ;;  %vm1532_vm4 = vcmp.le.s32.totalorder %v8265_v50, %v1448_v29  ;;  %v9204_v10 = vld [vmem:[#allocation2 + $0x68] sm:$0xff] }
 0x247   : > { %1824 = vmax.xlane.f32.xlu1 %v1823_v37  ;;  %vm1533_vm5 = vcmp.le.s32.totalorder %v8267_v11, %v1448_v29  ;;  %v8519_v63 = vsel %vm1530_vm1, %v8094_v45, -1e+30  ;;  %v8522_v41 = vsel %vm1531_vm3, %v8098_v46, -1e+30  ;;  %v8525_v42 = vsel %vm1532_vm4, %v12432_v9, -1e+30 }
 0x248   : > { %12430 = vst [vmem:[#allocation215_spill] sm:$0xff] %v8519_v63  ;;  %12431 = vst [vmem:[#allocation216_spill] sm:$0xff] %v8522_v41  ;;  %v1808_v0 = vmax.f32 %v1807_v3, %v8504_v38  ;;  %v8529_v4 = vsel %vm1533_vm5, %v12434_v34, -1e+30  ;;  %v1831_v62 = vmax.f32 %v8519_v63, %v8522_v41  ;;  %vm1538_vm6 = vcmp.le.s32.totalorder %v8258_v7, %v1450_v60  ;;  %v12436_v37 = vld [vmem:[#allocation134_spill] sm:$0xff]  ;;  %v12438_v9 = vld [vmem:[#allocation136_spill] sm:$0xff] }
 0x249   : > { %12433 = vst [vmem:[#allocation217_spill] sm:$0xff] %v8525_v42  ;;  %12435 = vst [vmem:[#allocation218_spill] sm:$0xff] %v8529_v4  ;;  %vm1539_vm7 = vcmp.le.s32.totalorder %v8263_v17, %v1450_v60  ;;  %vm1540_vm8 = vcmp.le.s32.totalorder %v8265_v50, %v1450_v60  ;;  %vm1541_vm9 = vcmp.le.s32.totalorder %v8267_v11, %v1450_v60  ;;  %v8538_v29 = vsel %vm1538_vm6, %v12436_v37, -1e+30  ;;  %v12440_v45 = vld [vmem:[#allocation135_spill] sm:$0xff]  ;;  %v12442_v41 = vld [vmem:[#allocation137_spill] sm:$0xff] }
 0x24a   : > { %12437 = vst [vmem:[#allocation219_spill] sm:$0xff] %v8538_v29  ;;  %1809 = vmax.xlane.f32.xlu0 %v1808_v0  ;;  %v1832_v3 = vmax.f32 %v1831_v62, %v8525_v42  ;;  %v8542_v34 = vsel %vm1539_vm7, %v12438_v9, -1e+30  ;;  %v8545_v46 = vsel %vm1540_vm8, %v12440_v45, -1e+30  ;;  %vm1518_vm10 = vcmp.le.s32.totalorder %v8258_v7, %v1445_v35  ;;  %v12444_v60 = vld [vmem:[#allocation114_spill] sm:$0xff] }
 0x24b   : > { %12439 = vst [vmem:[#allocation220_spill] sm:$0xff] %v8542_v34  ;;  %12441 = vst [vmem:[#allocation221_spill] sm:$0xff] %v8545_v46  ;;  %v8548_v63 = vsel %vm1541_vm9, %v12442_v41, -1e+30  ;;  %v1841_v53 = vmax.f32 %v8538_v29, %v8542_v34  ;;  %vm1519_vm11 = vcmp.le.s32.totalorder %v8263_v17, %v1445_v35  ;;  %vm1520_vm12 = vcmp.le.s32.totalorder %v8265_v50, %v1445_v35  ;;  %v12446_v45 = vld [vmem:[#allocation116_spill] sm:$0xff]  ;;  %v12448_v9 = vld [vmem:[#allocation115_spill] sm:$0xff] }
 0x24c   : > { %12443 = vst [vmem:[#allocation222_spill] sm:$0xff] %v8548_v63  ;;  %v1833_v62 = vmax.f32 %v1832_v3, %v8529_v4  ;;  %vm1521_vm13 = vcmp.le.s32.totalorder %v8267_v11, %v1445_v35  ;;  %v8558_v0 = vsel %vm1518_vm10, %v12444_v60, -1e+30  ;;  %v8561_v37 = vsel %vm1519_vm11, %v12446_v45, -1e+30  ;;  %v12450_v34 = vld [vmem:[#allocation117_spill] sm:$0xff] }
 0x24d   : > { %12445 = vst [vmem:[#allocation223_spill] sm:$0xff] %v8558_v0  ;;  %12447 = vst [vmem:[#allocation224_spill] sm:$0xff] %v8561_v37  ;;  %v1842_v41 = vmax.f32 %v1841_v53, %v8545_v46  ;;  %v8565_v29 = vsel %vm1520_vm12, %v12448_v9, -1e+30  ;;  %v8568_v42 = vsel %vm1521_vm13, %v12450_v34, -1e+30  ;;  %v1816_v5 = vmax.f32 %v8558_v0, %v8561_v37 }
 0x24e   : > { %12449 = vst [vmem:[#allocation225_spill] sm:$0xff] %v8565_v29  ;;  %12451 = vst [vmem:[#allocation226_spill] sm:$0xff] %v8568_v42  ;;  %1834 = vmax.xlane.f32.xlu1 %v1833_v62  ;;  %vm1546_vm14 = vcmp.le.s32.totalorder %v8258_v7, %v1452_v36  ;;  %vm1547_vm15 = vcmp.le.s32.totalorder %v8263_v17, %v1452_v36  ;;  %vm1548_vm0 = vcmp.le.s32.totalorder %v8265_v50, %v1452_v36  ;;  %v12452_v3 = vld [vmem:[#allocation142_spill] sm:$0xff]  ;;  %v12454_v34 = vld [vmem:[#allocation144_spill] sm:$0xff] }
 0x24f   : > { %vm1549_vm1 = vcmp.le.s32.totalorder %v8267_v11, %v1452_v36  ;;  %v1843_v35 = vmax.f32 %v1842_v41, %v8548_v63  ;;  %v1817_v53 = vmax.f32 %v1816_v5, %v8565_v29  ;;  %v8579_v60 = vsel %vm1546_vm14, %v12452_v3, -1e+30  ;;  %v12456_v9 = vld [vmem:[#allocation143_spill] sm:$0xff]  ;;  %v12458_v46 = vld [vmem:[#allocation145_spill] sm:$0xff]  ;;  %v12629_v0 = vld [vmem:[#allocation34_spill] sm:$0xff]  ;;  %12660 = vst [vmem:[#allocation303_spill] sm:$0xff] %v9204_v10 }
 0x250   : > { %12453 = vst [vmem:[#allocation227_spill] sm:$0xff] %v8579_v60  ;;  %v8582_v45 = vsel %vm1547_vm15, %v12454_v34, -1e+30  ;;  %v8585_v62 = vsel %vm1548_vm0, %v12456_v9, -1e+30  ;;  %v1455_v36 = vadd.s32 %v8250_v44, %v1422_v61  ;;  %v1414_v5 = vadd.s32 96, %v8252_v47 }
 0x251   : > { %12455 = vst [vmem:[#allocation228_spill] sm:$0xff] %v8582_v45  ;;  %12457 = vst [vmem:[#allocation229_spill] sm:$0xff] %v8585_v62  ;;  %v8588_v4 = vsel %vm1549_vm1, %v12458_v46, -1e+30  ;;  %v1851_v6 = vmax.f32 %v8579_v60, %v8582_v45  ;;  %v1818_v41 = vmax.f32 %v1817_v53, %v8568_v42  ;;  %v1423_v3 = vadd.s32 168, %v8252_v47  ;;  %v12460_v46 = vld [vmem:[#allocation154_spill] sm:$0xff] }
 0x252   : > { %12459 = vst [vmem:[#allocation230_spill] sm:$0xff] %v8588_v4  ;;  %v1416_v34 = vadd.s32 112, %v8252_v47  ;;  %1844 = vmax.xlane.f32.xlu1 %v1843_v35  ;;  %vm1558_vm3 = vcmp.le.s32.totalorder %v8258_v7, %v1455_v36  ;;  %vm1559_vm4 = vcmp.le.s32.totalorder %v8263_v17, %v1455_v36  ;;  %vm1560_vm5 = vcmp.le.s32.totalorder %v8265_v50, %v1455_v36  ;;  %v12462_v53 = vld [vmem:[#allocation156_spill] sm:$0xff]  ;;  %v12464_v45 = vld [vmem:[#allocation155_spill] sm:$0xff]  ;;  %v12466_v35 = vld [vmem:[#allocation157_spill] sm:$0xff] }
 0x253   : > { %v1852_v9 = vmax.f32 %v1851_v6, %v8585_v62  ;;  %1819 = vmax.xlane.f32.xlu0 %v1818_v41  ;;  %vm1561_vm6 = vcmp.le.s32.totalorder %v8267_v11, %v1455_v36  ;;  %v8603_v61 = vsel %vm1558_vm3, %v12460_v46, -1e+30  ;;  %v8606_v60 = vsel %vm1559_vm4, %v12462_v53, -1e+30  ;;  %v12651_v38 = vld [vmem:[#allocation62_spill] sm:$0xff] }
 0x254   : > { %12461 = vst [vmem:[#allocation231_spill] sm:$0xff] %v8603_v61  ;;  %12463 = vst [vmem:[#allocation232_spill] sm:$0xff] %v8606_v60  ;;  %v8609_v63 = vsel %vm1560_vm5, %v12464_v45, -1e+30  ;;  %v8613_v62 = vsel %vm1561_vm6, %v12466_v35, -1e+30  ;;  %v1866_v2 = vmax.f32 %v8603_v61, %v8606_v60  ;;  %v1447_v41 = vadd.s32 %v8250_v44, %v1414_v5 }
 0x255   : > { %12465 = vst [vmem:[#allocation233_spill] sm:$0xff] %v8609_v63  ;;  %v1853_v6 = vmax.f32 %v1852_v9, %v8588_v4  ;;  %12467 = vst [vmem:[#allocation234_spill] sm:$0xff] %v8613_v62  ;;  %v1456_v36 = vadd.s32 %v8250_v44, %v1423_v3  ;;  %v1449_v46 = vadd.s32 %v8250_v44, %v1416_v34  ;;  %v1424_v53 = vadd.s32 176, %v8252_v47  ;;  %v12468_v5 = vld [vmem:[#allocation122_spill] sm:$0xff]  ;;  %v12470_v3 = vld [vmem:[#allocation124_spill] sm:$0xff] }
 0x256   : > { %v1418_v42 = vadd.s32 128, %v8252_v47  ;;  %v1867_v45 = vmax.f32 %v1866_v2, %v8609_v63  ;;  %vm1526_vm7 = vcmp.le.s32.totalorder %v8258_v7, %v1447_v41  ;;  %vm1527_vm8 = vcmp.le.s32.totalorder %v8263_v17, %v1447_v41  ;;  %v12472_v35 = vld [vmem:[#allocation123_spill] sm:$0xff]  ;;  %v12474_v2 = vld [vmem:[#allocation125_spill] sm:$0xff] }
 0x257   : > { %1854 = vmax.xlane.f32.xlu1 %v1853_v6  ;;  %vm1528_vm9 = vcmp.le.s32.totalorder %v8265_v50, %v1447_v41  ;;  %vm1529_vm10 = vcmp.le.s32.totalorder %v8267_v11, %v1447_v41  ;;  %v8628_v9 = vsel %vm1526_vm7, %v12468_v5, -1e+30  ;;  %v8631_v34 = vsel %vm1527_vm8, %v12470_v3, -1e+30  ;;  %v12476_v41 = vld [vmem:[#allocation158_spill] sm:$0xff]  ;;  %v12478_v3 = vld [vmem:[#allocation160_spill] sm:$0xff] }
 0x258   : > { %12469 = vst [vmem:[#allocation235_spill] sm:$0xff] %v8628_v9  ;;  %12471 = vst [vmem:[#allocation236_spill] sm:$0xff] %v8631_v34  ;;  %v8634_v61 = vsel %vm1528_vm9, %v12472_v35, -1e+30  ;;  %v1868_v6 = vmax.f32 %v1867_v45, %v8613_v62  ;;  %v8638_v63 = vsel %vm1529_vm10, %v12474_v2, -1e+30  ;;  %v1826_v60 = vmax.f32 %v8628_v9, %v8631_v34 }
 0x259   : > { %12473 = vst [vmem:[#allocation237_spill] sm:$0xff] %v8634_v61  ;;  %12475 = vst [vmem:[#allocation238_spill] sm:$0xff] %v8638_v63  ;;  %vm1562_vm11 = vcmp.le.s32.totalorder %v8258_v7, %v1456_v36  ;;  %vm1563_vm12 = vcmp.le.s32.totalorder %v8263_v17, %v1456_v36  ;;  %vm1564_vm13 = vcmp.le.s32.totalorder %v8265_v50, %v1456_v36  ;;  %v12480_v2 = vld [vmem:[#allocation159_spill] sm:$0xff]  ;;  %v12482_v4 = vld [vmem:[#allocation161_spill] sm:$0xff] }
 0x25a   : > { %vm1565_vm14 = vcmp.le.s32.totalorder %v8267_v11, %v1456_v36  ;;  %v8647_v5 = vsel %vm1562_vm11, %v12476_v41, -1e+30  ;;  %v1827_v45 = vmax.f32 %v1826_v60, %v8634_v61  ;;  %v8651_v35 = vsel %vm1563_vm12, %v12478_v3, -1e+30  ;;  %v12484_v36 = vld [vmem:[#allocation130_spill] sm:$0xff]  ;;  %v12486_v41 = vld [vmem:[#allocation132_spill] sm:$0xff] }
 0x25b   : > { %12477 = vst [vmem:[#allocation239_spill] sm:$0xff] %v8647_v5  ;;  %1869 = vmax.xlane.f32.xlu1 %v1868_v6  ;;  %12479 = vst [vmem:[#allocation240_spill] sm:$0xff] %v8651_v35  ;;  %v8654_v62 = vsel %vm1564_vm13, %v12480_v2, -1e+30  ;;  %v8657_v34 = vsel %vm1565_vm14, %v12482_v4, -1e+30  ;;  %v1871_v9 = vmax.f32 %v8647_v5, %v8651_v35  ;;  %vm1534_vm15 = vcmp.le.s32.totalorder %v8258_v7, %v1449_v46 }
 0x25c   : > { %12481 = vst [vmem:[#allocation241_spill] sm:$0xff] %v8654_v62  ;;  %12483 = vst [vmem:[#allocation242_spill] sm:$0xff] %v8657_v34  ;;  %vm1535_vm0 = vcmp.le.s32.totalorder %v8263_v17, %v1449_v46  ;;  %vm1536_vm1 = vcmp.le.s32.totalorder %v8265_v50, %v1449_v46  ;;  %v1828_v60 = vmax.f32 %v1827_v45, %v8638_v63  ;;  %v8667_v6 = vsel %vm1534_vm15, %v12484_v36, -1e+30  ;;  %v12488_v2 = vld [vmem:[#allocation131_spill] sm:$0xff]  ;;  %v12490_v5 = vld [vmem:[#allocation133_spill] sm:$0xff] }
 0x25d   : > { %vm1537_vm3 = vcmp.le.s32.totalorder %v8267_v11, %v1449_v46  ;;  %12485 = vst [vmem:[#allocation243_spill] sm:$0xff] %v8667_v6  ;;  %v8670_v3 = vsel %vm1535_vm0, %v12486_v41, -1e+30  ;;  %v1872_v4 = vmax.f32 %v1871_v9, %v8654_v62  ;;  %v8674_v35 = vsel %vm1536_vm1, %v12488_v2, -1e+30 }
 0x25e   : > { %12487 = vst [vmem:[#allocation244_spill] sm:$0xff] %v8670_v3  ;;  %12489 = vst [vmem:[#allocation245_spill] sm:$0xff] %v8674_v35  ;;  %v8677_v61 = vsel %vm1537_vm3, %v12490_v5, -1e+30  ;;  %v1836_v29 = vmax.f32 %v8667_v6, %v8670_v3  ;;  %1829 = vmax.xlane.f32.xlu0 %v1828_v60  ;;  %v1457_v46 = vadd.s32 %v8250_v44, %v1424_v53  ;;  %v1425_v36 = vadd.s32 184, %v8252_v47  ;;  %v12492_v53 = vld [vmem:[#allocation162_spill] sm:$0xff] }
 0x25f   : > { %12491 = vst [vmem:[#allocation246_spill] sm:$0xff] %v8677_v61  ;;  %v1451_v45 = vadd.s32 %v8250_v44, %v1418_v42  ;;  %v1420_v41 = vadd.s32 144, %v8252_v47  ;;  %v1873_v9 = vmax.f32 %v1872_v4, %v8657_v34  ;;  %v1426_v62 = vadd.s32 192, %v8252_v47  ;;  %v12494_v4 = vld [vmem:[#allocation164_spill] sm:$0xff]  ;;  %v12496_v34 = vld [vmem:[#allocation163_spill] sm:$0xff]  ;;  %v12498_v3 = vld [vmem:[#allocation165_spill] sm:$0xff] }
 0x260   : > { %v1837_v2 = vmax.f32 %v1836_v29, %v8674_v35  ;;  %v1421_v5 = vadd.s32 152, %v8252_v47  ;;  %vm1566_vm4 = vcmp.le.s32.totalorder %v8258_v7, %v1457_v46  ;;  %vm1567_vm5 = vcmp.le.s32.totalorder %v8263_v17, %v1457_v46 }
 0x261   : > { %vm1568_vm6 = vcmp.le.s32.totalorder %v8265_v50, %v1457_v46  ;;  %vm1569_vm7 = vcmp.le.s32.totalorder %v8267_v11, %v1457_v46  ;;  %1874 = vmax.xlane.f32.xlu1 %v1873_v9  ;;  %v8695_v60 = vsel %vm1566_vm4, %v12492_v53, -1e+30  ;;  %v8698_v29 = vsel %vm1567_vm5, %v12494_v4, -1e+30  ;;  %v12500_v46 = vld [vmem:[#allocation138_spill] sm:$0xff]  ;;  %v12504_v53 = vld [vmem:[#allocation139_spill] sm:$0xff] }
 0x262   : > { %v1838_v42 = vmax.f32 %v1837_v2, %v8677_v61  ;;  %12493 = vst [vmem:[#allocation247_spill] sm:$0xff] %v8695_v60  ;;  %12495 = vst [vmem:[#allocation248_spill] sm:$0xff] %v8698_v29  ;;  %v8701_v35 = vsel %vm1568_vm6, %v12496_v34, -1e+30  ;;  %v8704_v6 = vsel %vm1569_vm7, %v12498_v3, -1e+30  ;;  %v1876_v63 = vmax.f32 %v8695_v60, %v8698_v29 }
 0x263   : > { %12497 = vst [vmem:[#allocation249_spill] sm:$0xff] %v8701_v35  ;;  %12499 = vst [vmem:[#allocation250_spill] sm:$0xff] %v8704_v6  ;;  %vm1542_vm8 = vcmp.le.s32.totalorder %v8258_v7, %v1451_v45  ;;  %vm1543_vm9 = vcmp.le.s32.totalorder %v8263_v17, %v1451_v45  ;;  %vm1544_vm10 = vcmp.le.s32.totalorder %v8265_v50, %v1451_v45  ;;  %v12502_v34 = vld [vmem:[#allocation140_spill] sm:$0xff]  ;;  %v12506_v60 = vld [vmem:[#allocation141_spill] sm:$0xff] }
 0x264   : > { %1839 = vmax.xlane.f32.xlu0 %v1838_v42  ;;  %vm1545_vm11 = vcmp.le.s32.totalorder %v8267_v11, %v1451_v45  ;;  %v8713_v9 = vsel %vm1542_vm8, %v12500_v46, -1e+30  ;;  %v8716_v2 = vsel %vm1543_vm9, %v12502_v34, -1e+30  ;;  %v1877_v3 = vmax.f32 %v1876_v63, %v8701_v35 }
 0x265   : > { %12501 = vst [vmem:[#allocation251_spill] sm:$0xff] %v8713_v9  ;;  %12503 = vst [vmem:[#allocation252_spill] sm:$0xff] %v8716_v2  ;;  %v8720_v4 = vsel %vm1544_vm10, %v12504_v53, -1e+30  ;;  %v8723_v29 = vsel %vm1545_vm11, %v12506_v60, -1e+30  ;;  %v1846_v42 = vmax.f32 %v8713_v9, %v8716_v2  ;;  %v1458_v61 = vadd.s32 %v8250_v44, %v1425_v36 }
 0x266   : > { %12505 = vst [vmem:[#allocation253_spill] sm:$0xff] %v8720_v4  ;;  %12507 = vst [vmem:[#allocation254_spill] sm:$0xff] %v8723_v29  ;;  %v1453_v45 = vadd.s32 %v8250_v44, %v1420_v41  ;;  %v1459_v46 = vadd.s32 %v8250_v44, %v1426_v62  ;;  %v1454_v34 = vadd.s32 %v8250_v44, %v1421_v5  ;;  %v1427_v53 = vadd.s32 200, %v8252_v47  ;;  %v12508_v36 = vld [vmem:[#allocation166_spill] sm:$0xff]  ;;  %v12510_v5 = vld [vmem:[#allocation168_spill] sm:$0xff] }
 0x267   : > { %v1878_v37 = vmax.f32 %v1877_v3, %v8704_v6  ;;  %v1847_v63 = vmax.f32 %v1846_v42, %v8720_v4  ;;  %v1428_v60 = vadd.s32 208, %v8252_v47  ;;  %vm1570_vm12 = vcmp.le.s32.totalorder %v8258_v7, %v1458_v61  ;;  %v12512_v42 = vld [vmem:[#allocation167_spill] sm:$0xff]  ;;  %v12514_v6 = vld [vmem:[#allocation169_spill] sm:$0xff] }
 0x268   : > { %vm1571_vm13 = vcmp.le.s32.totalorder %v8263_v17, %v1458_v61  ;;  %vm1572_vm14 = vcmp.le.s32.totalorder %v8265_v50, %v1458_v61  ;;  %vm1573_vm15 = vcmp.le.s32.totalorder %v8267_v11, %v1458_v61  ;;  %v8741_v41 = vsel %vm1570_vm12, %v12508_v36, -1e+30 }
 0x269   : > { %1879 = vmax.xlane.f32.xlu1 %v1878_v37  ;;  %v1848_v62 = vmax.f32 %v1847_v63, %v8723_v29  ;;  %12509 = vst [vmem:[#allocation255_spill] sm:$0xff] %v8741_v41  ;;  %v8744_v3 = vsel %vm1571_vm13, %v12510_v5, -1e+30  ;;  %v8747_v35 = vsel %vm1572_vm14, %v12512_v42, -1e+30  ;;  %vm1550_vm0 = vcmp.le.s32.totalorder %v8258_v7, %v1453_v45  ;;  %v12516_v37 = vld [vmem:[#allocation146_spill] sm:$0xff] }
 0x26a   : > { %12511 = vst [vmem:[#allocation256_spill] sm:$0xff] %v8744_v3  ;;  %12513 = vst [vmem:[#allocation257_spill] sm:$0xff] %v8747_v35  ;;  %v8750_v4 = vsel %vm1573_vm15, %v12514_v6, -1e+30  ;;  %v1881_v9 = vmax.f32 %v8741_v41, %v8744_v3  ;;  %vm1551_vm1 = vcmp.le.s32.totalorder %v8263_v17, %v1453_v45  ;;  %vm1552_vm3 = vcmp.le.s32.totalorder %v8265_v50, %v1453_v45  ;;  %v12518_v63 = vld [vmem:[#allocation148_spill] sm:$0xff]  ;;  %v12520_v5 = vld [vmem:[#allocation147_spill] sm:$0xff] }
 0x26b   : > { %12515 = vst [vmem:[#allocation258_spill] sm:$0xff] %v8750_v4  ;;  %1849 = vmax.xlane.f32.xlu0 %v1848_v62  ;;  %vm1553_vm4 = vcmp.le.s32.totalorder %v8267_v11, %v1453_v45  ;;  %v8759_v61 = vsel %vm1550_vm0, %v12516_v37, -1e+30  ;;  %v8762_v36 = vsel %vm1551_vm1, %v12518_v63, -1e+30  ;;  %v12522_v3 = vld [vmem:[#allocation149_spill] sm:$0xff]  ;;  %vm1574_vm5 = vcmp.le.s32.totalorder %v8258_v7, %v1459_v46 }
 0x26c   : > { %12517 = vst [vmem:[#allocation259_spill] sm:$0xff] %v8759_v61  ;;  %12519 = vst [vmem:[#allocation260_spill] sm:$0xff] %v8762_v36  ;;  %v1882_v6 = vmax.f32 %v1881_v9, %v8747_v35  ;;  %v8766_v42 = vsel %vm1552_vm3, %v12520_v5, -1e+30  ;;  %v8769_v41 = vsel %vm1553_vm4, %v12522_v3, -1e+30  ;;  %v1856_v62 = vmax.f32 %v8759_v61, %v8762_v36 }
 0x26d   : > { %12521 = vst [vmem:[#allocation261_spill] sm:$0xff] %v8766_v42  ;;  %12523 = vst [vmem:[#allocation262_spill] sm:$0xff] %v8769_v41  ;;  %vm1575_vm6 = vcmp.le.s32.totalorder %v8263_v17, %v1459_v46  ;;  %vm1576_vm7 = vcmp.le.s32.totalorder %v8265_v50, %v1459_v46  ;;  %vm1577_vm8 = vcmp.le.s32.totalorder %v8267_v11, %v1459_v46  ;;  %v12524_v37 = vld [vmem:[#allocation170_spill] sm:$0xff]  ;;  %v12526_v3 = vld [vmem:[#allocation172_spill] sm:$0xff] }
 0x26e   : > { %v1883_v45 = vmax.f32 %v1882_v6, %v8750_v4  ;;  %v1857_v9 = vmax.f32 %v1856_v62, %v8766_v42  ;;  %v8780_v63 = vsel %vm1574_vm5, %v12524_v37, -1e+30  ;;  %v8783_v5 = vsel %vm1575_vm6, %v12526_v3, -1e+30  ;;  %v12528_v35 = vld [vmem:[#allocation171_spill] sm:$0xff]  ;;  %v12530_v36 = vld [vmem:[#allocation173_spill] sm:$0xff] }
 0x26f   : > { %12525 = vst [vmem:[#allocation263_spill] sm:$0xff] %v8780_v63  ;;  %12527 = vst [vmem:[#allocation264_spill] sm:$0xff] %v8783_v5  ;;  %v8786_v61 = vsel %vm1576_vm7, %v12528_v35, -1e+30  ;;  %v8789_v29 = vsel %vm1577_vm8, %v12530_v36, -1e+30  ;;  %v1886_v2 = vmax.f32 %v8780_v63, %v8783_v5  ;;  %vm1554_vm9 = vcmp.le.s32.totalorder %v8258_v7, %v1454_v34 }
 0x270   : > { %12529 = vst [vmem:[#allocation265_spill] sm:$0xff] %v8786_v61  ;;  %12531 = vst [vmem:[#allocation266_spill] sm:$0xff] %v8789_v29  ;;  %1884 = vmax.xlane.f32.xlu1 %v1883_v45  ;;  %v1858_v46 = vmax.f32 %v1857_v9, %v8769_v41  ;;  %vm1555_vm10 = vcmp.le.s32.totalorder %v8263_v17, %v1454_v34  ;;  %vm1556_vm11 = vcmp.le.s32.totalorder %v8265_v50, %v1454_v34  ;;  %v12532_v6 = vld [vmem:[#allocation150_spill] sm:$0xff]  ;;  %v12534_v36 = vld [vmem:[#allocation152_spill] sm:$0xff] }
 0x271   : > { %vm1557_vm12 = vcmp.le.s32.totalorder %v8267_v11, %v1454_v34  ;;  %v1887_v35 = vmax.f32 %v1886_v2, %v8786_v61  ;;  %v8800_v62 = vsel %vm1554_vm9, %v12532_v6, -1e+30  ;;  %v8803_v37 = vsel %vm1555_vm10, %v12534_v36, -1e+30  ;;  %v12536_v3 = vld [vmem:[#allocation151_spill] sm:$0xff]  ;;  %v12538_v45 = vld [vmem:[#allocation153_spill] sm:$0xff] }
 0x272   : > { %12533 = vst [vmem:[#allocation267_spill] sm:$0xff] %v8800_v62  ;;  %12535 = vst [vmem:[#allocation268_spill] sm:$0xff] %v8803_v37  ;;  %v8806_v63 = vsel %vm1556_vm11, %v12536_v3, -1e+30  ;;  %1859 = vmax.xlane.f32.xlu0 %v1858_v46  ;;  %v8809_v9 = vsel %vm1557_vm12, %v12538_v45, -1e+30  ;;  %v1861_v5 = vmax.f32 %v8800_v62, %v8803_v37  ;;  %v1460_v34 = vadd.s32 %v8250_v44, %v1427_v53 }
 0x273   : > { %12537 = vst [vmem:[#allocation269_spill] sm:$0xff] %v8806_v63  ;;  %12539 = vst [vmem:[#allocation270_spill] sm:$0xff] %v8809_v9  ;;  %v1461_v2 = vadd.s32 %v8250_v44, %v1428_v60  ;;  %v1888_v6 = vmax.f32 %v1887_v35, %v8789_v29  ;;  %v1429_v61 = vadd.s32 216, %v8252_v47  ;;  %v1430_v36 = vadd.s32 224, %v8252_v47  ;;  %v12540_v53 = vld [vmem:[#allocation174_spill] sm:$0xff]  ;;  %v12542_v35 = vld [vmem:[#allocation176_spill] sm:$0xff] }
 0x274   : > { %v1431_v3 = vadd.s32 232, %v8252_v47  ;;  %v1862_v46 = vmax.f32 %v1861_v5, %v8806_v63  ;;  %vm1578_vm13 = vcmp.le.s32.totalorder %v8258_v7, %v1460_v34  ;;  %vm1579_vm14 = vcmp.le.s32.totalorder %v8263_v17, %v1460_v34  ;;  %v12544_v29 = vld [vmem:[#allocation175_spill] sm:$0xff]  ;;  %v12546_v63 = vld [vmem:[#allocation177_spill] sm:$0xff] }
 0x275   : > { %vm1580_vm15 = vcmp.le.s32.totalorder %v8265_v50, %v1460_v34  ;;  %1889 = vmax.xlane.f32.xlu1 %v1888_v6  ;;  %vm1581_vm0 = vcmp.le.s32.totalorder %v8267_v11, %v1460_v34  ;;  %v8825_v60 = vsel %vm1578_vm13, %v12540_v53, -1e+30  ;;  %v8828_v45 = vsel %vm1579_vm14, %v12542_v35, -1e+30  ;;  %v12548_v34 = vld [vmem:[#allocation178_spill] sm:$0xff]  ;;  %v12552_v53 = vld [vmem:[#allocation179_spill] sm:$0xff] }
 0x276   : > { %12541 = vst [vmem:[#allocation271_spill] sm:$0xff] %v8825_v60  ;;  %12543 = vst [vmem:[#allocation272_spill] sm:$0xff] %v8828_v45  ;;  %v8831_v4 = vsel %vm1580_vm15, %v12544_v29, -1e+30  ;;  %v1863_v5 = vmax.f32 %v1862_v46, %v8809_v9  ;;  %v8835_v42 = vsel %vm1581_vm0, %v12546_v63, -1e+30  ;;  %v1891_v41 = vmax.f32 %v8825_v60, %v8828_v45 }
 0x277   : > { %12545 = vst [vmem:[#allocation273_spill] sm:$0xff] %v8831_v4  ;;  %12547 = vst [vmem:[#allocation274_spill] sm:$0xff] %v8835_v42  ;;  %vm1582_vm1 = vcmp.le.s32.totalorder %v8258_v7, %v1461_v2  ;;  %vm1583_vm3 = vcmp.le.s32.totalorder %v8263_v17, %v1461_v2  ;;  %vm1584_vm4 = vcmp.le.s32.totalorder %v8265_v50, %v1461_v2  ;;  %v12550_v46 = vld [vmem:[#allocation180_spill] sm:$0xff] }
 0x278   : > { %vm1585_vm5 = vcmp.le.s32.totalorder %v8267_v11, %v1461_v2  ;;  %v8844_v6 = vsel %vm1582_vm1, %v12548_v34, -1e+30  ;;  %1864 = vmax.xlane.f32.xlu0 %v1863_v5  ;;  %v1892_v29 = vmax.f32 %v1891_v41, %v8831_v4  ;;  %v8848_v63 = vsel %vm1583_vm3, %v12550_v46, -1e+30  ;;  %v12554_v34 = vld [vmem:[#allocation181_spill] sm:$0xff] }
 0x279   : > { %12549 = vst [vmem:[#allocation275_spill] sm:$0xff] %v8844_v6  ;;  %12551 = vst [vmem:[#allocation276_spill] sm:$0xff] %v8848_v63  ;;  %v8851_v35 = vsel %vm1584_vm4, %v12552_v53, -1e+30  ;;  %v1896_v45 = vmax.f32 %v8844_v6, %v8848_v63  ;;  %v1462_v60 = vadd.s32 %v8250_v44, %v1429_v61  ;;  %v1463_v9 = vadd.s32 %v8250_v44, %v1430_v36  ;;  %v12556_v61 = vld [vmem:[#allocation182_spill] sm:$0xff] }
 0x27a   : > { %12553 = vst [vmem:[#allocation277_spill] sm:$0xff] %v8851_v35  ;;  %v1893_v2 = vmax.f32 %v1892_v29, %v8835_v42  ;;  %v8859_v37 = vsel %vm1585_vm5, %v12554_v34, -1e+30  ;;  %v1464_v41 = vadd.s32 %v8250_v44, %v1431_v3  ;;  %v7229_v46 = vmov 0   ;;  %v12558_v29 = vld [vmem:[#allocation184_spill] sm:$0xff]  ;;  %v12560_v3 = vld [vmem:[#allocation183_spill] sm:$0xff] }
 0x27b   : > { %12555 = vst [vmem:[#allocation278_spill] sm:$0xff] %v8859_v37  ;;  %v1897_v5 = vmax.f32 %v1896_v45, %v8851_v35  ;;  %vm1586_vm6 = vcmp.le.s32.totalorder %v8258_v7, %v1462_v60  ;;  %vm1587_vm7 = vcmp.le.s32.totalorder %v8263_v17, %v1462_v60  ;;  %vm1588_vm8 = vcmp.le.s32.totalorder %v8265_v50, %v1462_v60  ;;  %v12562_v35 = vld [vmem:[#allocation185_spill] sm:$0xff]  ;;  %v12626_v42 = vld [vmem:[#allocation67_spill] sm:$0xff] }
 0x27c   : > { %6436 = vset.pattern.permute.xlu1 %v7229_v46  ;;  %vm1589_vm9 = vcmp.le.s32.totalorder %v8267_v11, %v1462_v60  ;;  %v8868_v36 = vsel %vm1586_vm6, %v12556_v61, -1e+30  ;;  %v8871_v53 = vsel %vm1587_vm7, %v12558_v29, -1e+30  ;;  %v8874_v34 = vsel %vm1588_vm8, %v12560_v3, -1e+30  ;;  %6437 = vset.pattern.permute.xlu0 %v7229_v46 }
 0x27d   : > { %1894 = vmax.xlane.f32.xlu1 %v1893_v2  ;;  %12557 = vst [vmem:[#allocation279_spill] sm:$0xff] %v8868_v36  ;;  %12559 = vst [vmem:[#allocation280_spill] sm:$0xff] %v8871_v53  ;;  %v1898_v45 = vmax.f32 %v1897_v5, %v8859_v37  ;;  %v8878_v6 = vsel %vm1589_vm9, %v12562_v35, -1e+30  ;;  %v1901_v2 = vmax.f32 %v8868_v36, %v8871_v53  ;;  %v12564_v60 = vld [vmem:[#allocation186_spill] sm:$0xff]  ;;  %v12566_v5 = vld [vmem:[#allocation188_spill] sm:$0xff] }
 0x27e   : > { %12561 = vst [vmem:[#allocation281_spill] sm:$0xff] %v8874_v34  ;;  %12563 = vst [vmem:[#allocation282_spill] sm:$0xff] %v8878_v6  ;;  %vm1590_vm10 = vcmp.le.s32.totalorder %v8258_v7, %v1463_v9  ;;  %vm1591_vm11 = vcmp.le.s32.totalorder %v8263_v17, %v1463_v9  ;;  %vm1592_vm12 = vcmp.le.s32.totalorder %v8265_v50, %v1463_v9  ;;  %v12568_v35 = vld [vmem:[#allocation187_spill] sm:$0xff]  ;;  %vm2854_vm3 = vcmask 7168   ;;  %v12622_v36 = vld [vmem:[#allocation36_spill] sm:$0xff] }
 0x27f   : > { %vm1593_vm13 = vcmp.le.s32.totalorder %v8267_v11, %v1463_v9  ;;  %v8887_v61 = vsel %vm1590_vm10, %v12564_v60, -1e+30  ;;  %v1902_v46 = vmax.f32 %v1901_v2, %v8874_v34  ;;  %v8891_v29 = vsel %vm1591_vm11, %v12566_v5, -1e+30  ;;  %v12570_v60 = vld [vmem:[#allocation189_spill] sm:$0xff]  ;;  %v12572_v5 = vld [vmem:[#allocation190_spill] sm:$0xff] }
 0x280   : > { %12565 = vst [vmem:[#allocation283_spill] sm:$0xff] %v8887_v61  ;;  %12567 = vst [vmem:[#allocation284_spill] sm:$0xff] %v8891_v29  ;;  %v8894_v3 = vsel %vm1592_vm12, %v12568_v35, -1e+30  ;;  %v1906_v37 = vmax.f32 %v8887_v61, %v8891_v29  ;;  %vm1594_vm14 = vcmp.le.s32.totalorder %v8258_v7, %v1464_v41  ;;  %vm1595_vm15 = vcmp.le.s32.totalorder %v8263_v17, %v1464_v41  ;;  %v12574_v35 = vld [vmem:[#allocation192_spill] sm:$0xff]  ;;  %v12576_v61 = vld [vmem:[#allocation191_spill] sm:$0xff] }
 0x281   : > { %12569 = vst [vmem:[#allocation285_spill] sm:$0xff] %v8894_v3  ;;  %1899 = vmax.xlane.f32.xlu1 %v1898_v45  ;;  %vm1596_vm0 = vcmp.le.s32.totalorder %v8265_v50, %v1464_v41  ;;  %v1903_v9 = vmax.f32 %v1902_v46, %v8878_v6  ;;  %v8903_v2 = vsel %vm1593_vm13, %v12570_v60, -1e+30  ;;  %v8906_v34 = vsel %vm1594_vm14, %v12572_v5, -1e+30  ;;  %v12578_v5 = vld [vmem:[#allocation193_spill] sm:$0xff] }
 0x282   : > { %12571 = vst [vmem:[#allocation286_spill] sm:$0xff] %v8903_v2  ;;  %12573 = vst [vmem:[#allocation287_spill] sm:$0xff] %v8906_v34  ;;  %v8909_v63 = vsel %vm1595_vm15, %v12574_v35, -1e+30  ;;  %v1907_v45 = vmax.f32 %v1906_v37, %v8894_v3  ;;  %vm1597_vm1 = vcmp.le.s32.totalorder %v8267_v11, %v1464_v41  ;;  %v8914_v29 = vsel %vm1596_vm0, %v12576_v61, -1e+30 }
 0x283   : > { %12575 = vst [vmem:[#allocation288_spill] sm:$0xff] %v8909_v63  ;;  %12577 = vst [vmem:[#allocation289_spill] sm:$0xff] %v8914_v29  ;;  %v1911_v53 = vmax.f32 %v8906_v34, %v8909_v63  ;;  %v8921_v6 = vsel %vm1597_vm1, %v12578_v5, -1e+30  ;;  %v12086_v37 = vmov 0.0   ;;  %v12580_v41 = vld [vmem:[#allocation25_spill] sm:$0xff] }
 0x284   : > { %v1908_v46 = vmax.f32 %v1907_v45, %v8903_v2  ;;  %12579 = vst [vmem:[#allocation290_spill] sm:$0xff] %v8921_v6  ;;  %3111 = vmatprep.subr.mxu0 %v12086_v37  ;;  %3336 = vmatprep.subr.mxu1 %v12086_v37  ;;  %v12581_v61 = vld [vmem:[#allocation57_spill] sm:$0xff]  ;;  %v12584_v45 = vld [vmem:[#allocation23_spill] sm:$0xff]  ;;  %v12587_v5 = vld [vmem:[#allocation54_spill] sm:$0xff]  ;;  %v1432_v34 = vadd.s32 240, %v8252_v47  ;;  %v1433_v4 = vadd.s32 248, %v8252_v47 }
 0x285   : > { %1904 = vmax.xlane.f32.xlu1 %v1903_v9  ;;  %v1912_v60 = vmax.f32 %v1911_v53, %v8914_v29  ;;  %3112 = vmatpush1.msra.mxu0 %v12580_v41  ;;  %v12582_v53 = vld [vmem:[#allocation24_spill] sm:$0xff]  ;;  %v12589_v41 = vld [vmem:[#allocation53_spill] sm:$0xff]  ;;  %v12619_v3 = vld [vmem:[#allocation70_spill] sm:$0xff] }
 0x286   : > { %3337 = vmatpush1.msra.mxu1 %v12581_v61  ;;  %3113 = vmatprep.subr.mxu0 %v12086_v37  ;;  %v12583_v9 = vld [vmem:[#allocation56_spill] sm:$0xff]  ;;  %v9038_v2 = vld [vmem:[#allocation2 + $0x20] sm:$0xff]  ;;  %v9073_v62 = vadd.s32 %v8250_v44, %v1432_v34  ;;  %v12633_v47 = vld [vmem:[#allocation65_spill] sm:$0xff] }
 0x287   : > { %v1913_v35 = vmax.f32 %v1912_v60, %v8921_v6  ;;  %3338 = vmatprep.subr.mxu1 %v12086_v37  ;;  %3114 = vmatpush1.msra.mxu0 %v12582_v53  ;;  %v12586_v60 = vld [vmem:[#allocation22_spill] sm:$0xff]  ;;  %v12590_v61 = vld [vmem:[#allocation20_spill] sm:$0xff]  ;;  %v12616_v6 = vld [vmem:[#allocation39_spill] sm:$0xff] }
 0x288   : > { %3339 = vmatpush1.msra.mxu1 %v12583_v9  ;;  %3115 = vmatprep.subr.mxu0 %v12086_v37  ;;  %v12591_v53 = vld [vmem:[#allocation52_spill] sm:$0xff]  ;;  %v12592_v9 = vld [vmem:[#allocation19_spill] sm:$0xff]  ;;  %vm1598_vm4 = vcmp.le.s32.totalorder %v8258_v7, %v9073_v62  ;;  %vm1599_vm5 = vcmp.le.s32.totalorder %v8263_v17, %v9073_v62  ;;  %vm1600_vm6 = vcmp.le.s32.totalorder %v8265_v50, %v9073_v62 }
 0x289   : > { %1909 = vmax.xlane.f32.xlu1 %v1908_v46  ;;  %3340 = vmatprep.subr.mxu1 %v12086_v37  ;;  %v12585_v46 = vld [vmem:[#allocation55_spill] sm:$0xff]  ;;  %v12615_v29 = vld [vmem:[#allocation72_spill] sm:$0xff]  ;;  %vm1601_vm9 = vcmp.le.s32.totalorder %v8267_v11, %v9073_v62 }
 0x28a   : > { %3116 = vmatpush1.msra.mxu0 %v12584_v45  ;;  %3341 = vmatpush1.msra.mxu1 %v12585_v46  ;;  %v12593_v45 = vld [vmem:[#allocation51_spill] sm:$0xff]  ;;  %v12594_v46 = vld [vmem:[#allocation18_spill] sm:$0xff] }
 0x28b   : > { %3117 = vmatprep.subr.mxu0 %v12086_v37  ;;  %3342 = vmatprep.subr.mxu1 %v12086_v37 }
 0x28c   : > { %3118 = vmatpush1.msra.mxu0 %v12586_v60  ;;  %3343 = vmatpush1.msra.mxu1 %v12587_v5  ;;  %v12595_v60 = vld [vmem:[#allocation50_spill] sm:$0xff]  ;;  %v12596_v5 = vld [vmem:[#allocation17_spill] sm:$0xff] }
 0x28d   : > { %1914 = vmax.xlane.f32.xlu1 %v1913_v35  ;;  %3119 = vmatprep.subr.mxu0 %v12086_v37  ;;  %v12588_v35 = vld [vmem:[#allocation21_spill] sm:$0xff] }
 0x28e   : > { %3344 = vmatprep.subr.mxu1 %v12086_v37  ;;  %3120 = vmatpush1.msra.mxu0 %v12588_v35  ;;  %v12597_v35 = vld [vmem:[#allocation49_spill] sm:$0xff] }
 0x28f   : > { %3345 = vmatpush1.msra.mxu1 %v12589_v41  ;;  %3121 = vmatprep.subr.mxu0 %v12086_v37  ;;  %v12598_v41 = vld [vmem:[#allocation16_spill] sm:$0xff] }
 0x290   : > { %3346 = vmatprep.subr.mxu1 %v12086_v37  ;;  %3122 = vmatpush1.msra.mxu0 %v12590_v61  ;;  %v12599_v61 = vld [vmem:[#allocation48_spill] sm:$0xff] }
 0x291   : > { %3347 = vmatpush1.msra.mxu1 %v12591_v53  ;;  %3123 = vmatprep.subr.mxu0 %v12086_v37  ;;  %v12600_v53 = vld [vmem:[#allocation15_spill] sm:$0xff] }
 0x292   : > { %3348 = vmatprep.subr.mxu1 %v12086_v37  ;;  %3124 = vmatpush1.msra.mxu0 %v12592_v9  ;;  %v12601_v9 = vld [vmem:[#allocation47_spill] sm:$0xff] }
 0x293   : > { %3349 = vmatpush1.msra.mxu1 %v12593_v45  ;;  %3125 = vmatprep.subr.mxu0 %v12086_v37  ;;  %v12602_v45 = vld [vmem:[#allocation14_spill] sm:$0xff] }
 0x294   : > { %3350 = vmatprep.subr.mxu1 %v12086_v37  ;;  %3126 = vmatpush1.msra.mxu0 %v12594_v46  ;;  %v12603_v46 = vld [vmem:[#allocation46_spill] sm:$0xff] }
 0x295   : > { %3351 = vmatpush1.msra.mxu1 %v12595_v60  ;;  %3127 = vmatprep.subr.mxu0 %v12086_v37  ;;  %v12604_v60 = vld [vmem:[#allocation13_spill] sm:$0xff] }
 0x296   : > { %3352 = vmatprep.subr.mxu1 %v12086_v37  ;;  %3128 = vmatpush1.msra.mxu0 %v12596_v5  ;;  %v12605_v5 = vld [vmem:[#allocation45_spill] sm:$0xff] }
 0x297   : > { %3353 = vmatpush1.msra.mxu1 %v12597_v35  ;;  %3129 = vmatprep.subr.mxu0 %v12086_v37  ;;  %v12606_v35 = vld [vmem:[#allocation12_spill] sm:$0xff] }
 0x298   : > { %3354 = vmatprep.subr.mxu1 %v12086_v37  ;;  %3130 = vmatpush1.msra.mxu0 %v12598_v41  ;;  %v12607_v41 = vld [vmem:[#allocation44_spill] sm:$0xff] }
 0x299   : > { %3355 = vmatpush1.msra.mxu1 %v12599_v61  ;;  %3131 = vmatprep.subr.mxu0 %v12086_v37  ;;  %v8982_v61 = vld [vmem:[#allocation2] sm:$0xff] }
 0x29a   : > { %3356 = vmatprep.subr.mxu1 %v12086_v37  ;;  %3132 = vmatpush1.msra.mxu0 %v12600_v53  ;;  %v12608_v53 = vld [vmem:[#allocation11_spill] sm:$0xff] }
 0x29b   : > { %3357 = vmatpush1.msra.mxu1 %v12601_v9  ;;  %3133 = vmatprep.subr.mxu0 %v12086_v37  ;;  %v12609_v9 = vld [vmem:[#allocation43_spill] sm:$0xff] }
 0x29c   : > { %3358 = vmatprep.subr.mxu1 %v12086_v37  ;;  %3134 = vmatpush1.msra.mxu0 %v12602_v45 }
 0x29d   : > { %3359 = vmatpush1.msra.mxu1 %v12603_v46  ;;  %3135 = vmatprep.subr.mxu0 %v12086_v37  ;;  %v12610_v46 = vld [vmem:[#allocation10_spill] sm:$0xff] }
 0x29e   : > { %3360 = vmatprep.subr.mxu1 %v12086_v37  ;;  %3136 = vmatpush1.msra.mxu0 %v12604_v60  ;;  %v12611_v60 = vld [vmem:[#allocation42_spill] sm:$0xff] }
 0x29f   : > { %3361 = vmatpush1.msra.mxu1 %v12605_v5  ;;  %3137 = vmatprep.subr.mxu0 %v12086_v37 }
 0x2a0   : > { %3362 = vmatprep.subr.mxu1 %v12086_v37  ;;  %3138 = vmatpush1.msra.mxu0 %v12606_v35  ;;  %v8995_v35 = vld [vmem:[#allocation2 + $0x8] sm:$0xff] }
 0x2a1   : > { %3363 = vmatpush1.msra.mxu1 %v12607_v41  ;;  %3139 = vmatprep.subr.mxu0 %v12086_v37  ;;  %v12612_v41 = vld [vmem:[#allocation41_spill] sm:$0xff] }
 0x2a2   : > { %3364 = vmatprep.subr.mxu1 %v12086_v37  ;;  %3140 = vmatpush1.msra.mxu0 %v12608_v53  ;;  %v12613_v53 = vld [vmem:[#allocation73_spill] sm:$0xff] }
 0x2a3   : > { %3365 = vmatpush1.msra.mxu1 %v12609_v9  ;;  %3141 = vmatprep.subr.mxu0 %v12086_v37 }
 0x2a4   : > { %3366 = vmatprep.subr.mxu1 %v12086_v37  ;;  %3142 = vmatpush1.msra.mxu0 %v12610_v46 }
 0x2a5   : > { %3367 = vmatpush1.msra.mxu1 %v12611_v60  ;;  %3143 = vmatprep.subr.mxu0 %v12086_v37  ;;  %v12614_v60 = vld [vmem:[#allocation40_spill] sm:$0xff] }
 0x2a6   : > { %3368 = vmatprep.subr.mxu1 %v12086_v37  ;;  %3144 = vmatpush2.msra.mxu0 %v12612_v41 }
 0x2a7   : > { %3369 = vmatpush2.msra.mxu1 %v12613_v53  ;;  %3145 = vmatprep.subr.mxu0 %v12086_v37 }
 0x2a8   : > { %3370 = vmatprep.subr.mxu1 %v12086_v37  ;;  %3146 = vmatpush2.msra.mxu0 %v12614_v60  ;;  %v12624_v60 = vld [vmem:[#allocation68_spill] sm:$0xff] }
 0x2a9   : > { %3371 = vmatpush2.msra.mxu1 %v12615_v29  ;;  %3147 = vmatprep.subr.mxu0 %v12086_v37  ;;  %v12617_v29 = vld [vmem:[#allocation71_spill] sm:$0xff] }
 0x2aa   : > { %3372 = vmatprep.subr.mxu1 %v12086_v37  ;;  %3148 = vmatpush2.msra.mxu0 %v12616_v6 }
 0x2ab   : > { %3373 = vmatpush2.msra.mxu1 %v12617_v29  ;;  %3149 = vmatprep.subr.mxu0 %v12086_v37  ;;  %v12620_v29 = vld [vmem:[#allocation37_spill] sm:$0xff] }
 0x2ac   : > { %3374 = vmatprep.subr.mxu1 %v12086_v37 }
 0x2ad   : > { %3375 = vmatpush2.msra.mxu1 %v12619_v3 }
 0x2ae   : > { %3376 = vmatprep.subr.mxu1 %v12086_v37 }
 0x2b4   : > { %v1770_v45 = vpop.xlane.xlu0 %1769 }
 0x2b5   : > { %v8991_v5 = vmax.f32 %v8982_v61, %v1770_v45  ;;  %v9004_v45 = vld [vmem:[#allocation2 + $0x10] sm:$0xff] }
 0x2b7   : > { %3625 = vst.msk [vmem:[#allocation2] sm:$0xff] %vm2854_vm3, %v8991_v5  ;;  %2056 = vperm.xlu1 %6436, %v8991_v5  }
 0x2b8   : > { %v1775_v46 = vpop.xlane.xlu0 %1774 }
 0x2b9   : > { %v9010_v41 = vmax.f32 %v8995_v35, %v1775_v46  ;;  %v1780_v53 = vpop.xlane.xlu1 %1779  ;;  %v9024_v46 = vld [vmem:[#allocation2 + $0x18] sm:$0xff] }
 0x2ba   : > { %v9015_v9 = vmax.f32 %v9004_v45, %v1780_v53  ;;  %v12618_v53 = vld [vmem:[#allocation38_spill] sm:$0xff] }
 0x2bb   : > { %3626 = vst.msk [vmem:[#allocation2 + $0x8] sm:$0xff] %vm2854_vm3, %v9010_v41  ;;  %2061 = vperm.xlu0 %6437, %v9010_v41   ;;  %3150 = vmatpush2.msra.mxu0 %v12618_v53  ;;  %v12621_v53 = vld [vmem:[#allocation69_spill] sm:$0xff] }
 0x2bc   : > { %3627 = vst.msk [vmem:[#allocation2 + $0x10] sm:$0xff] %vm2854_vm3, %v9015_v9  ;;  %3151 = vmatprep.subr.mxu0 %v12086_v37  ;;  %3377 = vmatpush2.msra.mxu1 %v12621_v53  ;;  %v9077_v53 = vld [vmem:[#allocation2 + $0x38] sm:$0xff] }
 0x2bd   : > { %v1785_v6 = vpop.xlane.xlu1 %1784  ;;  %3152 = vmatpush2.msra.mxu0 %v12620_v29  ;;  %3378 = vmatprep.subr.mxu1 %v12086_v37  ;;  %v9056_v29 = vld [vmem:[#allocation2 + $0x28] sm:$0xff]  ;;  %12628 = vst [vmem:[#allocation293_spill] sm:$0xff] %v9077_v53 }
 0x2be   : > { %v9036_v63 = vmax.f32 %v9024_v46, %v1785_v6  ;;  %3153 = vmatprep.subr.mxu0 %v12086_v37  ;;  %12623 = vst [vmem:[#allocation291_spill] sm:$0xff] %v9056_v29  ;;  %3379 = vmatpush2.msra.mxu1 %v12624_v60 }
 0x2bf   : > { %2066 = vperm.xlu0 %6437, %v9015_v9   ;;  %3154 = vmatpush2.msra.mxu0 %v12622_v36  ;;  %v12625_v36 = vld [vmem:[#allocation35_spill] sm:$0xff] }
 0x2c0   : > { %3628 = vst.msk [vmem:[#allocation2 + $0x18] sm:$0xff] %vm2854_vm3, %v9036_v63  ;;  %v1790_v3 = vpop.xlane.xlu0 %1789  ;;  %3155 = vmatprep.subr.mxu0 %v12086_v37  ;;  %3380 = vmatprep.subr.mxu1 %v12086_v37 }
 0x2c1   : > { %v9051_v6 = vmax.f32 %v9038_v2, %v1790_v3  ;;  %3156 = vmatpush2.msra.mxu0 %v12625_v36  ;;  %3381 = vmatpush2.msra.mxu1 %v12626_v42  ;;  %v9086_v42 = vld [vmem:[#allocation2 + $0x30] sm:$0xff] }
 0x2c2   : > { %3157 = vmatprep.subr.mxu0 %v12086_v37  ;;  %3382 = vmatprep.subr.mxu1 %v12086_v37 }
 0x2c3   : > { %2071 = vperm.xlu0 %6437, %v9036_v63   ;;  %3629 = vst.msk [vmem:[#allocation2 + $0x20] sm:$0xff] %vm2854_vm3, %v9051_v6  ;;  %3158 = vmatpush2.msra.mxu0 %v12629_v0  ;;  %v12631_v0 = vld [vmem:[#allocation33_spill] sm:$0xff] }
 0x2c4   : > { %v1795_v3 = vpop.xlane.xlu1 %1794  ;;  %3383 = vmatpush2.msra.mxu1 %v12630_v31  ;;  %3159 = vmatprep.subr.mxu0 %v12086_v37 }
 0x2c5   : > { %v9070_v60 = vmax.f32 %v9056_v29, %v1795_v3  ;;  %v9090_v3 = vadd.s32 %v8250_v44, %v1433_v4  ;;  %3384 = vmatprep.subr.mxu1 %v12086_v37  ;;  %3160 = vmatpush2.msra.mxu0 %v12631_v0  ;;  %v9106_v4 = vld [vmem:[#allocation2 + $0x48] sm:$0xff] }
 0x2c6   : > { %3385 = vmatpush2.msra.mxu1 %v12633_v47  ;;  %3161 = vmatprep.subr.mxu0 %v12086_v37  ;;  %12634 = vst [vmem:[#allocation295_spill] sm:$0xff] %v9106_v4  ;;  %v12636_v47 = vld [vmem:[#allocation64_spill] sm:$0xff] }
 0x2c7   : > { %12627 = vst [vmem:[#allocation292_spill] sm:$0xff] %v9070_v60  ;;  %3630 = vst.msk [vmem:[#allocation2 + $0x28] sm:$0xff] %vm2854_vm3, %v9070_v60  ;;  %2076 = vperm.xlu0 %6437, %v9051_v6   ;;  %3386 = vmatprep.subr.mxu1 %v12086_v37  ;;  %v12639_v37 = vld [vmem:[#allocation196_spill] sm:$0xff]  ;;  %vm1602_vm7 = vcmp.le.s32.totalorder %v8258_v7, %v9090_v3  ;;  %vm1603_vm8 = vcmp.le.s32.totalorder %v8263_v17, %v9090_v3  ;;  %v12645_v17 = vld [vmem:[#allocation30_spill] sm:$0xff] }
 0x2c8   : > { %v1805_v34 = vpop.xlane.xlu1 %1804  ;;  %3387 = vmatpush2.msra.mxu1 %v12636_v47  ;;  %v9132_v47 = vsel %vm1599_vm5, %v12639_v37, -1e+30  ;;  %v9164_v27 = vsel %vm1602_vm7, %v12647_v32, -1e+30  ;;  %v12649_v37 = vld [vmem:[#allocation200_spill] sm:$0xff]  ;;  %vm1604_vm10 = vcmp.le.s32.totalorder %v8265_v50, %v9090_v3  ;;  %v12653_v32 = vld [vmem:[#allocation29_spill] sm:$0xff]  ;;  %vm1605_vm11 = vcmp.le.s32.totalorder %v8267_v11, %v9090_v3 }
 0x2c9   : > { %v9095_v31 = vmax.f32 %v9077_v53, %v1805_v34  ;;  %v1800_v36 = vpop.xlane.xlu0 %1799  ;;  %v12635_v34 = vld [vmem:[#allocation32_spill] sm:$0xff]  ;;  %12640 = vst [vmem:[#allocation297_spill] sm:$0xff] %v9132_v47  ;;  %12648 = vst [vmem:[#allocation299_spill] sm:$0xff] %v9164_v27 }
 0x2ca   : > { %v9104_v44 = vmax.f32 %v9086_v42, %v1800_v36  ;;  %3162 = vmatpush2.msra.mxu0 %v12635_v34  ;;  %v12637_v34 = vld [vmem:[#allocation194_spill] sm:$0xff]  ;;  %v12641_v36 = vmov 0.0  }
 0x2cb   : > { %12632 = vst [vmem:[#allocation294_spill] sm:$0xff] %v9095_v31  ;;  %3632 = vst.msk [vmem:[#allocation2 + $0x38] sm:$0xff] %vm2854_vm3, %v9095_v31  ;;  %2081 = vperm.xlu0 %6437, %v9070_v60   ;;  %v9126_v0 = vsel %vm1598_vm4, %v12637_v34, -1e+30  ;;  %3163 = vmatprep.subr.mxu0 %v12641_v36  ;;  %v12642_v34 = vld [vmem:[#allocation31_spill] sm:$0xff] }
 0x2cc   : > { %3631 = vst.msk [vmem:[#allocation2 + $0x30] sm:$0xff] %vm2854_vm3, %v9104_v44  ;;  %v1815_v29 = vpop.xlane.xlu1 %1814  ;;  %12638 = vst [vmem:[#allocation296_spill] sm:$0xff] %v9126_v0  ;;  %3388 = vmatprep.subr.mxu1 %v12641_v36  ;;  %3164 = vmatpush2.msra.mxu0 %v12642_v34  ;;  %v12643_v60 = vld [vmem:[#allocation63_spill] sm:$0xff]  ;;  %v1916_v7 = vmax.f32 %v9126_v0, %v9132_v47  ;;  %v12658_v0 = vld [vmem:[#allocation28_spill] sm:$0xff] }
 0x2cd   : > { %v9137_v53 = vmax.f32 %v9106_v4, %v1815_v29  ;;  %3389 = vmatpush2.msra.mxu1 %v12643_v60  ;;  %3165 = vmatprep.subr.mxu0 %v12641_v36  ;;  %v12646_v60 = vld [vmem:[#allocation195_spill] sm:$0xff]  ;;  %v9167_v4 = vsel %vm1603_vm8, %v12649_v37, -1e+30  ;;  %v12654_v37 = vld [vmem:[#allocation61_spill] sm:$0xff] }
 0x2ce   : > { %3390 = vmatprep.subr.mxu1 %v12641_v36  ;;  %3166 = vmatpush2.msra.mxu0 %v12645_v17  ;;  %v9161_v34 = vsel %vm1600_vm6, %v12646_v60, -1e+30  ;;  %12650 = vst [vmem:[#allocation300_spill] sm:$0xff] %v9167_v4  ;;  %v9174_v17 = vld [vmem:[#allocation2 + $0x40] sm:$0xff]  ;;  %v1921_v50 = vmax.f32 %v9164_v27, %v9167_v4 }
 0x2cf   : > { %3634 = vst.msk [vmem:[#allocation2 + $0x48] sm:$0xff] %vm2854_vm3, %v9137_v53  ;;  %2086 = vperm.xlu0 %6437, %v9104_v44   ;;  %3391 = vmatpush2.msra.mxu1 %v12651_v38  ;;  %v12656_v38 = vld [vmem:[#allocation199_spill] sm:$0xff]  ;;  %v12668_v4 = vld [vmem:[#allocation58_spill] sm:$0xff] }
 0x2d0   : > { %v1825_v29 = vpop.xlane.xlu1 %1824  ;;  %3167 = vmatprep.subr.mxu0 %v12641_v36  ;;  %3392 = vmatprep.subr.mxu1 %v12641_v36 }
 0x2d1   : > { %v9172_v47 = vmax.f32 %v9145_v56, %v1825_v29  ;;  %3168 = vmatpush2.msra.mxu0 %v12653_v32  ;;  %3393 = vmatpush2.msra.mxu1 %v12654_v37  ;;  %v1917_v29 = vmax.f32 %v1916_v7, %v9161_v34  ;;  %v12655_v32 = vld [vmem:[#allocation197_spill] sm:$0xff]  ;;  %v9200_v56 = vsel %vm1604_vm10, %v12656_v38, -1e+30  ;;  %v12661_v38 = vld [vmem:[#allocation27_spill] sm:$0xff] }
 0x2d2   : > { %3169 = vmatprep.subr.mxu0 %v12641_v36  ;;  %3394 = vmatprep.subr.mxu1 %v12641_v36  ;;  %v9197_v37 = vsel %vm1601_vm9, %v12655_v32, -1e+30  ;;  %12657 = vst [vmem:[#allocation302_spill] sm:$0xff] %v9200_v56  ;;  %v1922_v11 = vmax.f32 %v1921_v50, %v9200_v56  ;;  %v12664_v32 = vld [vmem:[#allocation201_spill] sm:$0xff]  ;;  %v9235_v50 = vld [vmem:[#allocation2 + $0x50] sm:$0xff]  ;;  %v9245_v56 = vld [vmem:[#allocation2 + $0x88] sm:$0xff] }
 0x2d3   : > { %12652 = vst [vmem:[#allocation301_spill] sm:$0xff] %v9172_v47  ;;  %3636 = vst.msk [vmem:[#allocation2 + $0x58] sm:$0xff] %vm2854_vm3, %v9172_v47  ;;  %2091 = vperm.xlu0 %6437, %v9095_v31   ;;  %v1810_v62 = vpop.xlane.xlu0 %1809  ;;  %3170 = vmatpush2.msra.mxu0 %v12658_v0  ;;  %v12659_v31 = vld [vmem:[#allocation60_spill] sm:$0xff]  ;;  %v12662_v0 = vld [vmem:[#allocation59_spill] sm:$0xff]  ;;  %v9224_v7 = vsel %vm1605_vm11, %v12664_v32, -1e+30 }
 0x2d4   : > { %v9194_v60 = vmax.f32 %v9174_v17, %v1810_v62  ;;  %3395 = vmatpush2.msra.mxu1 %v12659_v31  ;;  %3171 = vmatprep.subr.mxu0 %v12641_v36  ;;  %v1918_v62 = vmax.f32 %v1917_v29, %v9197_v37  ;;  %12665 = vst [vmem:[#allocation305_spill] sm:$0xff] %v9224_v7  ;;  %12669 = vst [vmem:[#allocation307_spill] sm:$0xff] %v9235_v50 }
 0x2d5   : > { %3396 = vmatprep.subr.mxu1 %v12641_v36  ;;  %3172 = vmatpush2.msra.mxu0 %v12661_v38  ;;  %v12666_v38 = vld [vmem:[#allocation26_spill] sm:$0xff]  ;;  %12672 = vst [vmem:[#allocation310_spill] sm:$0xff] %v9245_v56 }
 0x2d6   : > { %3633 = vst.msk [vmem:[#allocation2 + $0x40] sm:$0xff] %vm2854_vm3, %v9194_v60  ;;  %3397 = vmatpush2.msra.mxu1 %v12662_v0  ;;  %3173 = vmatprep.subr.mxu0 %v12641_v36  ;;  %v9228_v0 = vld [vmem:[#allocation2 + $0x78] sm:$0xff] }
 0x2d7   : > { %v1835_v31 = vpop.xlane.xlu1 %1834  ;;  %2096 = vperm.xlu0 %6437, %v9194_v60   ;;  %3398 = vmatprep.subr.mxu1 %v12641_v36  ;;  %12667 = vst [vmem:[#allocation306_spill] sm:$0xff] %v9228_v0  ;;  %v1923_v36 = vmax.f32 %v1922_v11, %v9224_v7 }
 0x2d8   : > { %v9221_v3 = vmax.f32 %v9204_v10, %v1835_v31  ;;  %3174 = vmatpush2.msra.mxu0 %v12666_v38  ;;  %3399 = vmatpush2.msra.mxu1 %v12668_v4  ;;  %v9284_v10 = vld [vmem:[#allocation2 + $0x70] sm:$0xff] }
 0x2d9   : > { %12679 = vst [vmem:[#allocation317_spill] sm:$0xff] %v9284_v10 }
 0x2da   : > { %12663 = vst [vmem:[#allocation304_spill] sm:$0xff] %v9221_v3  ;;  %3638 = vst.msk [vmem:[#allocation2 + $0x68] sm:$0xff] %vm2854_vm3, %v9221_v3 }
 0x2db   : > { %v1845_v31 = vpop.xlane.xlu1 %1844  ;;  %1919 = vmax.xlane.f32.xlu1 %v1918_v62  ;;  %2101 = vperm.xlu0 %6437, %v9137_v53  }
 0x2dc   : > { %v9240_v32 = vmax.f32 %v9228_v0, %v1845_v31  ;;  %v1820_v38 = vpop.xlane.xlu0 %1819 }
 0x2dd   : > { %v9243_v4 = vmax.f32 %v9235_v50, %v1820_v38  ;;  %v9259_v38 = vld [vmem:[#allocation2 + $0xa0] sm:$0xff] }
 0x2de   : > { %12670 = vst [vmem:[#allocation308_spill] sm:$0xff] %v9240_v32  ;;  %3640 = vst.msk [vmem:[#allocation2 + $0x78] sm:$0xff] %vm2854_vm3, %v9240_v32 }
 0x2df   : > { %12671 = vst [vmem:[#allocation309_spill] sm:$0xff] %v9243_v4  ;;  %3635 = vst.msk [vmem:[#allocation2 + $0x50] sm:$0xff] %vm2854_vm3, %v9243_v4  ;;  %1924 = vmax.xlane.f32.xlu1 %v1923_v36  ;;  %2106 = vperm.xlu0 %6437, %v9243_v4   ;;  %v9269_v36 = vld [vmem:[#allocation2 + $0x60] sm:$0xff] }
 0x2e0   : > { %v1855_v11 = vpop.xlane.xlu1 %1854  ;;  %12674 = vst [vmem:[#allocation312_spill] sm:$0xff] %v9259_v38  ;;  %12676 = vst [vmem:[#allocation314_spill] sm:$0xff] %v9269_v36 }
 0x2e1   : > { %v9257_v31 = vmax.f32 %v9245_v56, %v1855_v11  ;;  %v9278_v56 = vld [vmem:[#allocation2 + $0xa8] sm:$0xff] }
 0x2e2   : > { %12678 = vst [vmem:[#allocation316_spill] sm:$0xff] %v9278_v56 }
 0x2e3   : > { %12673 = vst [vmem:[#allocation311_spill] sm:$0xff] %v9257_v31  ;;  %3642 = vst.msk [vmem:[#allocation2 + $0x88] sm:$0xff] %vm2854_vm3, %v9257_v31  ;;  %2111 = vperm.xlu0 %6437, %v9172_v47   ;;  %v9347_v47 = vld [vmem:[#allocation2 + $0x98] sm:$0xff] }
 0x2e4   : > { %v1870_v0 = vpop.xlane.xlu1 %1869  ;;  %12692 = vst [vmem:[#allocation330_spill] sm:$0xff] %v9347_v47 }
 0x2e5   : > { %v9267_v62 = vmax.f32 %v9259_v38, %v1870_v0 }
 0x2e7   : > { %12675 = vst [vmem:[#allocation313_spill] sm:$0xff] %v9267_v62  ;;  %3645 = vst.msk [vmem:[#allocation2 + $0xa0] sm:$0xff] %vm2854_vm3, %v9267_v62  ;;  %v1830_v4 = vpop.xlane.xlu0 %1829 }
 0x2e8   : > { %v9276_v29 = vmax.f32 %v9269_v36, %v1830_v4  ;;  %v9305_v4 = vld [vmem:[#allocation2 + $0x80] sm:$0xff] }
 0x2e9   : > { %12683 = vst [vmem:[#allocation321_spill] sm:$0xff] %v9305_v4 }
 0x2ea   : > { %12677 = vst [vmem:[#allocation315_spill] sm:$0xff] %v9276_v29  ;;  %3637 = vst.msk [vmem:[#allocation2 + $0x60] sm:$0xff] %vm2854_vm3, %v9276_v29  ;;  %v1875_v0 = vpop.xlane.xlu1 %1874  ;;  %2116 = vperm.xlu0 %6437, %v9276_v29  }
 0x2eb   : > { %v9288_v11 = vmax.f32 %v9278_v56, %v1875_v0  ;;  %v9302_v0 = vld [vmem:[#allocation2 + $0xb0] sm:$0xff] }
 0x2ec   : > { %12682 = vst [vmem:[#allocation320_spill] sm:$0xff] %v9302_v0 }
 0x2ed   : > { %12680 = vst [vmem:[#allocation318_spill] sm:$0xff] %v9288_v11  ;;  %v1840_v38 = vpop.xlane.xlu0 %1839  ;;  %3646 = vst.msk [vmem:[#allocation2 + $0xa8] sm:$0xff] %vm2854_vm3, %v9288_v11 }
 0x2ee   : > { %v9295_v50 = vmax.f32 %v9284_v10, %v1840_v38  ;;  %2121 = vperm.xlu0 %6437, %v9221_v3  }
 0x2f0   : > { %12681 = vst [vmem:[#allocation319_spill] sm:$0xff] %v9295_v50  ;;  %3639 = vst.msk [vmem:[#allocation2 + $0x70] sm:$0xff] %vm2854_vm3, %v9295_v50  ;;  %2126 = vperm.xlu1 %6436, %v9295_v50  }
 0x2f2   : > { %v1880_v29 = vpop.xlane.xlu1 %1879  ;;  %2131 = vperm.xlu0 %6437, %v9240_v32   ;;  %v9325_v32 = vld [vmem:[#allocation2 + $0x90] sm:$0xff] }
 0x2f3   : > { %v9308_v56 = vmax.f32 %v9302_v0, %v1880_v29  ;;  %v9322_v29 = vld [vmem:[#allocation2 + $0xb8] sm:$0xff]  ;;  %12687 = vst [vmem:[#allocation325_spill] sm:$0xff] %v9325_v32 }
 0x2f4   : > { %v1850_v38 = vpop.xlane.xlu0 %1849  ;;  %12686 = vst [vmem:[#allocation324_spill] sm:$0xff] %v9322_v29 }
 0x2f5   : > { %12684 = vst [vmem:[#allocation322_spill] sm:$0xff] %v9308_v56  ;;  %3647 = vst.msk [vmem:[#allocation2 + $0xb0] sm:$0xff] %vm2854_vm3, %v9308_v56  ;;  %v9316_v36 = vmax.f32 %v9305_v4, %v1850_v38  ;;  %v9338_v4 = vld [vmem:[#allocation2 + $0xc0] sm:$0xff] }
 0x2f6   : > { %12690 = vst [vmem:[#allocation328_spill] sm:$0xff] %v9338_v4 }
 0x2f7   : > { %12685 = vst [vmem:[#allocation323_spill] sm:$0xff] %v9316_v36  ;;  %3641 = vst.msk [vmem:[#allocation2 + $0x80] sm:$0xff] %vm2854_vm3, %v9316_v36  ;;  %2136 = vperm.xlu0 %6437, %v9316_v36  }
 0x2f9   : > { %v1885_v10 = vpop.xlane.xlu1 %1884 }
 0x2fa   : > { %v9328_v3 = vmax.f32 %v9322_v29, %v1885_v10  ;;  %v9379_v29 = vld [vmem:[#allocation2 + $0xd8] sm:$0xff] }
 0x2fb   : > { %v1860_v0 = vpop.xlane.xlu0 %1859  ;;  %2141 = vperm.xlu0 %6437, %v9257_v31   ;;  %12698 = vst [vmem:[#allocation336_spill] sm:$0xff] %v9379_v29 }
 0x2fc   : > { %12688 = vst [vmem:[#allocation326_spill] sm:$0xff] %v9328_v3  ;;  %3648 = vst.msk [vmem:[#allocation2 + $0xb8] sm:$0xff] %vm2854_vm3, %v9328_v3  ;;  %v9336_v50 = vmax.f32 %v9325_v32, %v1860_v0  ;;  %v9357_v32 = vld [vmem:[#allocation2 + $0xc8] sm:$0xff] }
 0x2fd   : > { %12694 = vst [vmem:[#allocation332_spill] sm:$0xff] %v9357_v32 }
 0x2fe   : > { %12689 = vst [vmem:[#allocation327_spill] sm:$0xff] %v9336_v50  ;;  %3643 = vst.msk [vmem:[#allocation2 + $0x90] sm:$0xff] %vm2854_vm3, %v9336_v50  ;;  %v1890_v10 = vpop.xlane.xlu1 %1889 }
 0x2ff   : > { %v9345_v31 = vmax.f32 %v9338_v4, %v1890_v10  ;;  %2146 = vperm.xlu0 %6437, %v9336_v50   ;;  %v9368_v50 = vld [vmem:[#allocation2 + $0xd0] sm:$0xff] }
 0x300   : > { %12696 = vst [vmem:[#allocation334_spill] sm:$0xff] %v9368_v50 }
 0x301   : > { %12691 = vst [vmem:[#allocation329_spill] sm:$0xff] %v9345_v31  ;;  %3649 = vst.msk [vmem:[#allocation2 + $0xc0] sm:$0xff] %vm2854_vm3, %v9345_v31  ;;  %v1865_v38 = vpop.xlane.xlu0 %1864 }
 0x302   : > { %v9355_v36 = vmax.f32 %v9347_v47, %v1865_v38 }
 0x303   : > { %2156 = vperm.xlu0 %6437, %v9267_v62  }
 0x304   : > { %12693 = vst [vmem:[#allocation331_spill] sm:$0xff] %v9355_v36  ;;  %3644 = vst.msk [vmem:[#allocation2 + $0x98] sm:$0xff] %vm2854_vm3, %v9355_v36  ;;  %2151 = vperm.xlu1 %6436, %v9355_v36  }
 0x306   : > { %v1895_v0 = vpop.xlane.xlu1 %1894 }
 0x307   : > { %v9366_v4 = vmax.f32 %v9357_v32, %v1895_v0  ;;  %2166 = vperm.xlu0 %6437, %v9308_v56   ;;  %v9390_v32 = vld [vmem:[#allocation2 + $0xe0] sm:$0xff] }
 0x308   : > { %2161 = vperm.xlu1 %6436, %v9288_v11   ;;  %12700 = vst [vmem:[#allocation338_spill] sm:$0xff] %v9390_v32 }
 0x309   : > { %12695 = vst [vmem:[#allocation333_spill] sm:$0xff] %v9366_v4  ;;  %3650 = vst.msk [vmem:[#allocation2 + $0xc8] sm:$0xff] %vm2854_vm3, %v9366_v4 }
 0x30a   : > { %v1900_v10 = vpop.xlane.xlu1 %1899 }
 0x30b   : > { %v9377_v62 = vmax.f32 %v9368_v50, %v1900_v10  ;;  %2176 = vperm.xlu0 %6437, %v9345_v31   ;;  %v9401_v31 = vld [vmem:[#allocation2 + $0xe8] sm:$0xff] }
 0x30c   : > { %2171 = vperm.xlu1 %6436, %v9328_v3   ;;  %12702 = vst [vmem:[#allocation340_spill] sm:$0xff] %v9401_v31 }
 0x30d   : > { %12697 = vst [vmem:[#allocation335_spill] sm:$0xff] %v9377_v62  ;;  %3651 = vst.msk [vmem:[#allocation2 + $0xd0] sm:$0xff] %vm2854_vm3, %v9377_v62 }
 0x30e   : > { %v1905_v38 = vpop.xlane.xlu1 %1904 }
 0x30f   : > { %v9388_v56 = vmax.f32 %v9379_v29, %v1905_v38  ;;  %2186 = vperm.xlu0 %6437, %v9377_v62   ;;  %v12704_v38 = vsub.f32 %v8982_v61, %v8991_v5  ;;  %v12709_v61 = vsub.f32 %v9086_v42, %v9104_v44 }
 0x310   : > { %2181 = vperm.xlu1 %6436, %v9366_v4  }
 0x311   : > { %12699 = vst [vmem:[#allocation337_spill] sm:$0xff] %v9388_v56  ;;  %3652 = vst.msk [vmem:[#allocation2 + $0xd8] sm:$0xff] %vm2854_vm3, %v9388_v56  ;;  %v2002_v5 = vmul.f32 1.442695, %v12709_v61 }
 0x312   : > { %v1910_v0 = vpop.xlane.xlu1 %1909 }
 0x313   : > { %v9399_v50 = vmax.f32 %v9390_v32, %v1910_v0  ;;  %v1990_v32 = vmul.f32 1.442695, %v12704_v38  ;;  %v12707_v0 = vsub.f32 %v9024_v46, %v9036_v63 }
 0x314   : > { %2191 = vperm.xlu1 %6436, %v9388_v56   ;;  %v12705_v56 = vsub.f32 %v8995_v35, %v9010_v41 }
 0x315   : > { %12701 = vst [vmem:[#allocation339_spill] sm:$0xff] %v9399_v50  ;;  %3653 = vst.msk [vmem:[#allocation2 + $0xe0] sm:$0xff] %vm2854_vm3, %v9399_v50  ;;  %2196 = vperm.xlu0 %6437, %v9399_v50   ;;  %6438 = vpow2.f32 %v1990_v32 }
 0x316   : > { %v1915_v10 = vpop.xlane.xlu1 %1914  ;;  %v1992_v50 = vmul.f32 1.442695, %v12705_v56 }
 0x317   : > { %v9410_v62 = vmax.f32 %v9401_v31, %v1915_v10  ;;  %v12706_v10 = vsub.f32 %v9004_v45, %v9015_v9  ;;  %v1996_v31 = vmul.f32 1.442695, %v12707_v0 }
 0x318   : > { %6440 = vpow2.f32 %v1992_v50 }
 0x319   : > { %12703 = vst [vmem:[#allocation341_spill] sm:$0xff] %v9410_v62  ;;  %3654 = vst.msk [vmem:[#allocation2 + $0xe8] sm:$0xff] %vm2854_vm3, %v9410_v62  ;;  %2201 = vperm.xlu1 %6436, %v9410_v62   ;;  %v1994_v29 = vmul.f32 1.442695, %v12706_v10  ;;  %v12708_v62 = vsub.f32 %v9038_v2, %v9051_v6 }
 0x31b   : > { %v1998_v4 = vmul.f32 1.442695, %v12708_v62  ;;  %6442 = vpow2.f32 %v1994_v29 }
 0x31c   : > { %6444 = vpow2.f32 %v1996_v31 }
 0x31d   : > { %6446 = vpow2.f32 %v1998_v4 }
 0x31e   : > { %6448 = vpow2.f32 %v2002_v5 }
 0x332   : > { %v2057_v56 = vpop.permute.xlu1 %2056 }
 0x333   : > { %v2214_v35 = vsub.f32 %v8278_v8, %v2057_v56  ;;  %v2215_v9 = vsub.f32 %v8281_v12, %v2057_v56  ;;  %v2216_v45 = vsub.f32 %v8284_v43, %v2057_v56  ;;  %v2217_v63 = vsub.f32 %v8287_v40, %v2057_v56 }
 0x335   : > { %v2342_v41 = vmul.f32 1.442695, %v2214_v35  ;;  %v2344_v46 = vmul.f32 1.442695, %v2215_v9  ;;  %v2346_v2 = vmul.f32 1.442695, %v2216_v45 }
 0x336   : > { %v2348_v6 = vmul.f32 1.442695, %v2217_v63  ;;  %v2062_v50 = vpop.permute.xlu0 %2061  ;;  %v12714_v35 = vld [vmem:[#allocation203_spill] sm:$0xff]  ;;  %v12715_v9 = vld [vmem:[#allocation204_spill] sm:$0xff] }
 0x337   : > { %6450 = vpow2.f32 %v2342_v41  ;;  %v2218_v42 = vsub.f32 %v8296_v16, %v2062_v50  ;;  %v2219_v44 = vsub.f32 %v8299_v39, %v2062_v50  ;;  %v2220_v8 = vsub.f32 %v8302_v48, %v2062_v50  ;;  %v9447_v48 = vpop.eup %6438 }
 0x338   : > { %6452 = vpow2.f32 %v2344_v46  ;;  %v2221_v12 = vsub.f32 %v8307_v52, %v2062_v50  ;;  %12710 = vst [vmem:[#allocation342_spill] sm:$0xff] %v9447_v48  ;;  %v9449_v10 = vpop.eup %6440 }
 0x339   : > { %6454 = vpow2.f32 %v2346_v2  ;;  %v2350_v43 = vmul.f32 1.442695, %v2218_v42  ;;  %v2352_v40 = vmul.f32 1.442695, %v2219_v44  ;;  %v2354_v32 = vmul.f32 1.442695, %v2220_v8  ;;  %v9451_v56 = vpop.eup %6442 }
 0x33a   : > { %6456 = vpow2.f32 %v2348_v6  ;;  %v2356_v62 = vmul.f32 1.442695, %v2221_v12  ;;  %v2067_v31 = vpop.permute.xlu0 %2066  ;;  %12711 = vst [vmem:[#allocation343_spill] sm:$0xff] %v9449_v10  ;;  %12712 = vst [vmem:[#allocation344_spill] sm:$0xff] %v9451_v56  ;;  %v9457_v63 = vpop.eup %6444 }
 0x33b   : > { %6458 = vpow2.f32 %v2350_v43  ;;  %v2222_v4 = vsub.f32 %v8315_v14, %v2067_v31  ;;  %v2223_v29 = vsub.f32 %v8318_v22, %v2067_v31  ;;  %v2224_v16 = vsub.f32 %v8323_v54, %v2067_v31  ;;  %v12713_v54 = vld [vmem:[#allocation202_spill] sm:$0xff]  ;;  %v9459_v6 = vpop.eup %6446 }
 0x33c   : > { %6460 = vpow2.f32 %v2352_v40  ;;  %v2225_v39 = vsub.f32 %v8326_v51, %v2067_v31  ;;  %12716 = vst [vmem:[#allocation202_spill] sm:$0xff] %v9457_v63  ;;  %12717 = vst [vmem:[#allocation203_spill] sm:$0xff] %v9459_v6  ;;  %v9461_v44 = vpop.eup %6448 }
 0x33d   : > { %6462 = vpow2.f32 %v2354_v32  ;;  %v2358_v52 = vmul.f32 1.442695, %v2222_v4  ;;  %v2360_v38 = vmul.f32 1.442695, %v2223_v29  ;;  %v2362_v0 = vmul.f32 1.442695, %v2224_v16 }
 0x33e   : > { %6464 = vpow2.f32 %v2356_v62  ;;  %v2364_v61 = vmul.f32 1.442695, %v2225_v39  ;;  %v2072_v5 = vpop.permute.xlu0 %2071  ;;  %12718 = vst [vmem:[#allocation204_spill] sm:$0xff] %v9461_v44 }
 0x33f   : > { %6466 = vpow2.f32 %v2358_v52  ;;  %v2226_v22 = vsub.f32 %v8336_v20, %v2072_v5  ;;  %v2227_v14 = vsub.f32 %v12713_v54, %v2072_v5  ;;  %v2228_v51 = vsub.f32 %v12714_v35, %v2072_v5 }
 0x340   : > { %6468 = vpow2.f32 %v2360_v38  ;;  %v2229_v45 = vsub.f32 %v12715_v9, %v2072_v5 }
 0x341   : > { %6470 = vpow2.f32 %v2362_v0  ;;  %v2366_v41 = vmul.f32 1.442695, %v2226_v22  ;;  %v2368_v46 = vmul.f32 1.442695, %v2227_v14  ;;  %v2370_v2 = vmul.f32 1.442695, %v2228_v51 }
 0x342   : > { %6472 = vpow2.f32 %v2364_v61  ;;  %v2372_v50 = vmul.f32 1.442695, %v2229_v45  ;;  %v2077_v42 = vpop.permute.xlu0 %2076 }
 0x343   : > { %6474 = vpow2.f32 %v2366_v41  ;;  %v2230_v20 = vsub.f32 %v8364_v24, %v2077_v42  ;;  %v2231_v8 = vsub.f32 %v8367_v18, %v2077_v42  ;;  %v2232_v12 = vsub.f32 %v8370_v23, %v2077_v42 }
 0x344   : > { %v6451_v43 = vpop.eup %6450  ;;  %6476 = vpow2.f32 %v2368_v46  ;;  %v2233_v40 = vsub.f32 %v8373_v21, %v2077_v42 }
 0x345   : > { %v6453_v32 = vpop.eup %6452  ;;  %6478 = vpow2.f32 %v2370_v2  ;;  %v2374_v62 = vmul.f32 1.442695, %v2230_v20  ;;  %v2376_v31 = vmul.f32 1.442695, %v2231_v8  ;;  %v2378_v4 = vmul.f32 1.442695, %v2232_v12 }
 0x346   : > { %v6455_v29 = vpop.eup %6454  ;;  %6480 = vpow2.f32 %v2372_v50  ;;  %v2380_v16 = vmul.f32 1.442695, %v2233_v40  ;;  %3175 = vmatprep.mubr.f32.mxu0 %v6453_v32  ;;  %v2082_v39 = vpop.permute.xlu0 %2081  ;;  %v2662_v52 = vadd.f32 %v6453_v32, %v6451_v43 }
 0x347   : > { %v6457_v24 = vpop.eup %6456  ;;  %6482 = vpow2.f32 %v2374_v62  ;;  %3176 = vmatmul.mubr.f32.vlgmr.msra.gmra.mxu0 %v6451_v43  ;;  %v2234_v23 = vsub.f32 %v8389_v57, %v2082_v39  ;;  %v2235_v18 = vsub.f32 %v8392_v25, %v2082_v39  ;;  %v2236_v21 = vsub.f32 %v8395_v26, %v2082_v39 }
 0x348   : > { %v6459_v38 = vpop.eup %6458  ;;  %6484 = vpow2.f32 %v2376_v31  ;;  %3400 = vmatprep.mubr.f32.mxu1 %v6457_v24  ;;  %v2237_v0 = vsub.f32 %v8399_v15, %v2082_v39  ;;  %v2663_v61 = vadd.f32 %v6455_v29, %v2662_v52 }
 0x349   : > { %v6461_v5 = vpop.eup %6460  ;;  %6486 = vpow2.f32 %v2378_v4  ;;  %3401 = vmatmul.mubr.f32.vlgmr.msra.gmra.mxu1 %v6455_v29  ;;  %v2382_v22 = vmul.f32 1.442695, %v2234_v23  ;;  %v2384_v54 = vmul.f32 1.442695, %v2235_v18  ;;  %v2386_v14 = vmul.f32 1.442695, %v2236_v21 }
 0x34a   : > { %v6463_v35 = vpop.eup %6462  ;;  %6488 = vpow2.f32 %v2380_v16  ;;  %v2388_v51 = vmul.f32 1.442695, %v2237_v0  ;;  %3180 = vmatprep.mubr.f32.mxu0 %v6461_v5  ;;  %v2087_v57 = vpop.permute.xlu0 %2086  ;;  %v9471_v25 = vadd.f32 %v6457_v24, %v2663_v61  ;;  %v2667_v26 = vadd.f32 %v6461_v5, %v6459_v38  ;;  %v12719_v61 = vld [vmem:[#allocation213_spill] sm:$0xff] }
 0x34b   : > { %v6465_v9 = vpop.eup %6464  ;;  %6490 = vpow2.f32 %v2382_v22  ;;  %3181 = vmatmul.mubr.f32.gmra.mxu0 %v6459_v38  ;;  %v2238_v15 = vsub.f32 %v8428_v58, %v2087_v57  ;;  %v2239_v45 = vsub.f32 %v8431_v13, %v2087_v57  ;;  %v2240_v41 = vsub.f32 %v8435_v33, %v2087_v57 }
 0x34c   : > { %v6467_v46 = vpop.eup %6466  ;;  %6492 = vpow2.f32 %v2384_v54  ;;  %3405 = vmatprep.mubr.f32.mxu1 %v6465_v9  ;;  %v2241_v2 = vsub.f32 %v8438_v1, %v2087_v57  ;;  %v2668_v50 = vadd.f32 %v6463_v35, %v2667_v26  ;;  %v12720_v54 = vld [vmem:[#allocation214_spill] sm:$0xff] }
 0x34d   : > { %v6469_v42 = vpop.eup %6468  ;;  %6494 = vpow2.f32 %v2386_v14  ;;  %3406 = vmatmul.mubr.f32.gmra.mxu1 %v6463_v35  ;;  %v2390_v20 = vmul.f32 1.442695, %v2238_v15  ;;  %v2392_v8 = vmul.f32 1.442695, %v2239_v45  ;;  %v2394_v12 = vmul.f32 1.442695, %v2240_v41 }
 0x34e   : > { %v6471_v43 = vpop.eup %6470  ;;  %6496 = vpow2.f32 %v2388_v51  ;;  %v2396_v40 = vmul.f32 1.442695, %v2241_v2  ;;  %3185 = vmatprep.mubr.f32.mxu0 %v6469_v42  ;;  %v2092_v58 = vpop.permute.xlu0 %2091  ;;  %v2672_v13 = vadd.f32 %v6469_v42, %v6467_v46  ;;  %v9477_v32 = vadd.f32 %v6465_v9, %v2668_v50  ;;  %v12721_v2 = vld [vmem:[#allocation205_spill] sm:$0xff]  ;;  %v12722_v42 = vld [vmem:[#allocation206_spill] sm:$0xff] }
 0x34f   : > { %v6473_v33 = vpop.eup %6472  ;;  %6498 = vpow2.f32 %v2390_v20  ;;  %3186 = vmatmul.mubr.f32.gmra.mxu0 %v6467_v46  ;;  %v2242_v1 = vsub.f32 %v8408_v49, %v2092_v58  ;;  %v2243_v62 = vsub.f32 %v8412_v19, %v2092_v58  ;;  %v2244_v31 = vsub.f32 %v8415_v30, %v2092_v58 }
 0x350   : > { %v6475_v4 = vpop.eup %6474  ;;  %6500 = vpow2.f32 %v2392_v8  ;;  %3410 = vmatprep.mubr.f32.mxu1 %v6473_v33  ;;  %v2245_v29 = vsub.f32 %v8418_v28, %v2092_v58  ;;  %v2673_v16 = vadd.f32 %v6471_v43, %v2672_v13  ;;  %v12723_v8 = vld [vmem:[#allocation207_spill] sm:$0xff] }
 0x351   : > { %v6477_v39 = vpop.eup %6476  ;;  %6502 = vpow2.f32 %v2394_v12  ;;  %3411 = vmatmul.mubr.f32.gmra.mxu1 %v6471_v43  ;;  %v2398_v52 = vmul.f32 1.442695, %v2242_v1  ;;  %v2400_v24 = vmul.f32 1.442695, %v2243_v62  ;;  %v2402_v23 = vmul.f32 1.442695, %v2244_v31 }
 0x352   : > { %v6479_v18 = vpop.eup %6478  ;;  %6504 = vpow2.f32 %v2396_v40  ;;  %v2404_v21 = vmul.f32 1.442695, %v2245_v29  ;;  %3190 = vmatprep.mubr.f32.mxu0 %v6477_v39  ;;  %v2097_v49 = vpop.permute.xlu0 %2096  ;;  %v9483_v19 = vadd.f32 %v6473_v33, %v2673_v16  ;;  %v2677_v30 = vadd.f32 %v6477_v39, %v6475_v4  ;;  %v12724_v40 = vld [vmem:[#allocation208_spill] sm:$0xff] }
 0x353   : > { %v6481_v38 = vpop.eup %6480  ;;  %6506 = vpow2.f32 %v2398_v52  ;;  %3191 = vmatmul.mubr.f32.gmra.mxu0 %v6475_v4  ;;  %v2246_v28 = vsub.f32 %v8494_v55, %v2097_v49  ;;  %v2247_v0 = vsub.f32 %v8497_v59, %v2097_v49  ;;  %v2248_v5 = vsub.f32 %v12719_v61, %v2097_v49 }
 0x354   : > { %v6483_v22 = vpop.eup %6482  ;;  %6508 = vpow2.f32 %v2400_v24  ;;  %3415 = vmatprep.mubr.f32.mxu1 %v6481_v38  ;;  %v2249_v14 = vsub.f32 %v12720_v54, %v2097_v49  ;;  %v2678_v35 = vadd.f32 %v6479_v18, %v2677_v30  ;;  %v12727_v30 = vld [vmem:[#allocation225_spill] sm:$0xff] }
 0x355   : > { %v6485_v51 = vpop.eup %6484  ;;  %6510 = vpow2.f32 %v2402_v23  ;;  %3416 = vmatmul.mubr.f32.gmra.mxu1 %v6479_v18  ;;  %v2406_v57 = vmul.f32 1.442695, %v2246_v28  ;;  %v2408_v26 = vmul.f32 1.442695, %v2247_v0  ;;  %v2410_v9 = vmul.f32 1.442695, %v2248_v5 }
 0x356   : > { %v6487_v15 = vpop.eup %6486  ;;  %6512 = vpow2.f32 %v2404_v21  ;;  %v2412_v45 = vmul.f32 1.442695, %v2249_v14  ;;  %3195 = vmatprep.mubr.f32.mxu0 %v6485_v51  ;;  %v2102_v55 = vpop.permute.xlu0 %2101  ;;  %v9489_v59 = vadd.f32 %v6481_v38, %v2678_v35  ;;  %v2682_v41 = vadd.f32 %v6485_v51, %v6483_v22  ;;  %v12725_v23 = vld [vmem:[#allocation223_spill] sm:$0xff]  ;;  %v12726_v21 = vld [vmem:[#allocation224_spill] sm:$0xff]  ;;  %v12728_v0 = vld [vmem:[#allocation226_spill] sm:$0xff] }
 0x357   : > { %v6489_v46 = vpop.eup %6488  ;;  %6514 = vpow2.f32 %v2406_v57  ;;  %3196 = vmatmul.mubr.f32.gmra.mxu0 %v6483_v22  ;;  %v2250_v50 = vsub.f32 %v12721_v2, %v2102_v55  ;;  %v2251_v20 = vsub.f32 %v12722_v42, %v2102_v55  ;;  %v2252_v12 = vsub.f32 %v12723_v8, %v2102_v55  ;;  %v12732_v8 = vld [vmem:[#allocation212_spill] sm:$0xff] }
 0x358   : > { %v6491_v43 = vpop.eup %6490  ;;  %6516 = vpow2.f32 %v2408_v26  ;;  %3420 = vmatprep.mubr.f32.mxu1 %v6489_v46  ;;  %v2253_v58 = vsub.f32 %v12724_v40, %v2102_v55  ;;  %v2683_v13 = vadd.f32 %v6487_v15, %v2682_v41  ;;  %v12729_v55 = vld [vmem:[#allocation209_spill] sm:$0xff] }
 0x359   : > { %v6493_v33 = vpop.eup %6492  ;;  %6518 = vpow2.f32 %v2410_v9  ;;  %3421 = vmatmul.mubr.f32.gmra.mxu1 %v6487_v15  ;;  %v2414_v1 = vmul.f32 1.442695, %v2250_v50  ;;  %v2416_v62 = vmul.f32 1.442695, %v2251_v20  ;;  %v2418_v31 = vmul.f32 1.442695, %v2252_v12 }
 0x35a   : > { %v6495_v4 = vpop.eup %6494  ;;  %6520 = vpow2.f32 %v2412_v45  ;;  %v2420_v29 = vmul.f32 1.442695, %v2253_v58  ;;  %3200 = vmatprep.mubr.f32.mxu0 %v6493_v33  ;;  %v2107_v16 = vpop.permute.xlu0 %2106  ;;  %v2687_v39 = vadd.f32 %v6493_v33, %v6491_v43  ;;  %v9495_v52 = vadd.f32 %v6489_v46, %v2683_v13  ;;  %v12730_v46 = vld [vmem:[#allocation210_spill] sm:$0xff]  ;;  %v12731_v50 = vld [vmem:[#allocation211_spill] sm:$0xff] }
 0x35b   : > { %v6497_v24 = vpop.eup %6496  ;;  %6522 = vpow2.f32 %v2414_v1  ;;  %3201 = vmatmul.mubr.f32.gmra.mxu0 %v6491_v43  ;;  %v2254_v18 = vsub.f32 %v12725_v23, %v2107_v16  ;;  %v2255_v49 = vsub.f32 %v12726_v21, %v2107_v16  ;;  %v2256_v38 = vsub.f32 %v12727_v30, %v2107_v16 }
 0x35c   : > { %v6499_v28 = vpop.eup %6498  ;;  %6524 = vpow2.f32 %v2416_v62  ;;  %3425 = vmatprep.mubr.f32.mxu1 %v6497_v24  ;;  %v2257_v61 = vsub.f32 %v12728_v0, %v2107_v16  ;;  %v2688_v5 = vadd.f32 %v6495_v4, %v2687_v39  ;;  %v12734_v39 = vld [vmem:[#allocation291_spill] sm:$0xff] }
 0x35d   : > { %v6501_v22 = vpop.eup %6500  ;;  %6526 = vpow2.f32 %v2418_v31  ;;  %3426 = vmatmul.mubr.f32.gmra.mxu1 %v6495_v4  ;;  %v2422_v54 = vmul.f32 1.442695, %v2254_v18  ;;  %v2424_v14 = vmul.f32 1.442695, %v2255_v49  ;;  %v2426_v35 = vmul.f32 1.442695, %v2256_v38 }
 0x35e   : > { %v6503_v51 = vpop.eup %6502  ;;  %6528 = vpow2.f32 %v2420_v29  ;;  %v2428_v57 = vmul.f32 1.442695, %v2257_v61  ;;  %3205 = vmatprep.mubr.f32.mxu0 %v6501_v22  ;;  %v2112_v26 = vpop.permute.xlu0 %2111  ;;  %v9501_v9 = vadd.f32 %v6497_v24, %v2688_v5  ;;  %v2692_v15 = vadd.f32 %v6501_v22, %v6499_v28  ;;  %v9507_v31 = vld [vmem:[#allocation2 + $0xf0] sm:$0xff] }
 0x35f   : > { %v6505_v45 = vpop.eup %6504  ;;  %6530 = vpow2.f32 %v2422_v54  ;;  %3206 = vmatmul.mubr.f32.gmra.mxu0 %v6499_v28  ;;  %v2258_v41 = vsub.f32 %v12729_v55, %v2112_v26  ;;  %v2259_v2 = vsub.f32 %v12730_v46, %v2112_v26  ;;  %v2260_v42 = vsub.f32 %v12731_v50, %v2112_v26  ;;  %12733 = vst [vmem:[#allocation213_spill] sm:$0xff] %v9507_v31  ;;  %v12735_v24 = vld [vmem:[#allocation292_spill] sm:$0xff]  ;;  %v12739_v54 = vld [vmem:[#allocation235_spill] sm:$0xff] }
 0x360   : > { %v6507_v20 = vpop.eup %6506  ;;  %6532 = vpow2.f32 %v2424_v14  ;;  %3430 = vmatprep.mubr.f32.mxu1 %v6505_v45  ;;  %v2261_v12 = vsub.f32 %v12732_v8, %v2112_v26  ;;  %v2693_v43 = vadd.f32 %v6503_v51, %v2692_v15  ;;  %v12736_v23 = vsub.f32 %v12734_v39, %v12735_v24  ;;  %v9525_v15 = vld [vmem:[#allocation2 + $0xf8] sm:$0xff]  ;;  %v12749_v24 = vld [vmem:[#allocation216_spill] sm:$0xff]  ;;  %v12777_v55 = vld [vmem:[#allocation259_spill] sm:$0xff] }
 0x361   : > { %v6509_v40 = vpop.eup %6508  ;;  %6534 = vpow2.f32 %v2426_v35  ;;  %3431 = vmatmul.mubr.f32.gmra.mxu1 %v6503_v51  ;;  %v2430_v58 = vmul.f32 1.442695, %v2258_v41  ;;  %v2432_v13 = vmul.f32 1.442695, %v2259_v2  ;;  %v2434_v33 = vmul.f32 1.442695, %v2260_v42 }
 0x362   : > { %v6511_v1 = vpop.eup %6510  ;;  %6536 = vpow2.f32 %v2428_v57  ;;  %v2436_v62 = vmul.f32 1.442695, %v2261_v12  ;;  %3210 = vmatprep.mubr.f32.mxu0 %v6509_v40  ;;  %v2697_v4 = vadd.f32 %v6509_v40, %v6507_v20  ;;  %v9509_v29 = vadd.f32 %v6505_v45, %v2693_v43  ;;  %v12740_v35 = vld [vmem:[#allocation236_spill] sm:$0xff]  ;;  %v12741_v57 = vld [vmem:[#allocation237_spill] sm:$0xff]  ;;  %12742 = vst [vmem:[#allocation205_spill] sm:$0xff] %v9525_v15  ;;  %v12745_v40 = vld [vmem:[#allocation294_spill] sm:$0xff] }
 0x363   : > { %v6513_v16 = vpop.eup %6512  ;;  %v2000_v18 = vmul.f32 1.442695, %v12736_v23  ;;  %6538 = vpow2.f32 %v2430_v58  ;;  %3211 = vmatmul.mubr.f32.gmra.mxu0 %v6507_v20  ;;  %v12737_v28 = vsub.f32 %v9174_v17, %v9194_v60  ;;  %v12743_v60 = vld [vmem:[#allocation238_spill] sm:$0xff]  ;;  %v12744_v43 = vld [vmem:[#allocation293_spill] sm:$0xff] }
 0x364   : > { %v6515_v21 = vpop.eup %6514  ;;  %6540 = vpow2.f32 %v2432_v13  ;;  %3435 = vmatprep.mubr.f32.mxu1 %v6513_v16  ;;  %v1920_v49 = vpop.xlane.xlu1 %1919  ;;  %v2698_v30 = vadd.f32 %v6511_v1, %v2697_v4  ;;  %v12746_v58 = vsub.f32 %v12744_v43, %v12745_v40  ;;  %v12754_v43 = vld [vmem:[#allocation243_spill] sm:$0xff] }
 0x365   : > { %v6517_v38 = vpop.eup %6516  ;;  %v2006_v0 = vmul.f32 1.442695, %v12737_v28  ;;  %6542 = vpow2.f32 %v2434_v33  ;;  %3436 = vmatmul.mubr.f32.gmra.mxu1 %v6511_v1  ;;  %v2117_v61 = vpop.permute.xlu0 %2116  ;;  %v9518_v5 = vmax.f32 %v9507_v31, %v1920_v49  ;;  %v12786_v31 = vld [vmem:[#allocation234_spill] sm:$0xff] }
 0x366   : > { %v9520_v22 = vpop.eup %6518  ;;  %6544 = vpow2.f32 %v2436_v62  ;;  %v2262_v14 = vsub.f32 %v12739_v54, %v2117_v61  ;;  %v2263_v51 = vsub.f32 %v12740_v35, %v2117_v61  ;;  %v2264_v26 = vsub.f32 %v12741_v57, %v2117_v61  ;;  %3215 = vmatprep.mubr.f32.mxu0 %v6517_v38 }
 0x367   : > { %12738 = vst [vmem:[#allocation214_spill] sm:$0xff] %v9518_v5  ;;  %v9527_v17 = vpop.eup %6520  ;;  %6546 = vpow2.f32 %v2000_v18  ;;  %v2265_v45 = vsub.f32 %v12743_v60, %v2117_v61  ;;  %3655 = vst.msk [vmem:[#allocation2 + $0xf0] sm:$0xff] %vm2854_vm3, %v9518_v5  ;;  %3216 = vmatmul.mubr.f32.gmra.mxu0 %v6515_v21  ;;  %2206 = vperm.xlu0 %6437, %v9518_v5   ;;  %v9535_v41 = vadd.f32 %v6513_v16, %v2698_v30  ;;  %v12748_v16 = vld [vmem:[#allocation215_spill] sm:$0xff]  ;;  %v12750_v18 = vld [vmem:[#allocation217_spill] sm:$0xff] }
 0x368   : > { %v6523_v46 = vpop.eup %6522  ;;  %v2438_v2 = vmul.f32 1.442695, %v2262_v14  ;;  %v2440_v50 = vmul.f32 1.442695, %v2263_v51  ;;  %v2442_v42 = vmul.f32 1.442695, %v2264_v26  ;;  %3440 = vmatprep.mubr.f32.mxu1 %v9527_v17  ;;  %v1925_v20 = vpop.xlane.xlu1 %1924  ;;  %v9538_v8 = vadd.f32 %v6517_v38, %v6515_v21 }
 0x369   : > { %v6525_v12 = vpop.eup %6524  ;;  %v2004_v13 = vmul.f32 1.442695, %v12746_v58  ;;  %6548 = vpow2.f32 %v2006_v0  ;;  %v2444_v33 = vmul.f32 1.442695, %v2265_v45  ;;  %3441 = vmatmul.mubr.f32.gmra.mxu1 %v9520_v22  ;;  %v2122_v1 = vpop.permute.xlu0 %2121  ;;  %v9545_v62 = vmax.f32 %v9525_v15, %v1925_v20  ;;  %v12751_v30 = vld [vmem:[#allocation218_spill] sm:$0xff]  ;;  %v12785_v5 = vld [vmem:[#allocation231_spill] sm:$0xff] }
 0x36a   : > { %v6527_v4 = vpop.eup %6526  ;;  %6550 = vpow2.f32 %v2438_v2  ;;  %v2266_v39 = vsub.f32 %v12748_v16, %v2122_v1  ;;  %v2267_v23 = vsub.f32 %v12749_v24, %v2122_v1  ;;  %v2268_v21 = vsub.f32 %v12750_v18, %v2122_v1  ;;  %3220 = vmatprep.mubr.f32.mxu0 %v6525_v12  ;;  %v12757_v16 = vld [vmem:[#allocation244_spill] sm:$0xff]  ;;  %v12758_v18 = vld [vmem:[#allocation245_spill] sm:$0xff] }
 0x36b   : > { %12747 = vst [vmem:[#allocation206_spill] sm:$0xff] %v9545_v62  ;;  %v9550_v49 = vpop.eup %6528  ;;  %6552 = vpow2.f32 %v2440_v50  ;;  %v2269_v38 = vsub.f32 %v12751_v30, %v2122_v1  ;;  %3656 = vst.msk [vmem:[#allocation2 + $0xf8] sm:$0xff] %vm2854_vm3, %v9545_v62  ;;  %3221 = vmatmul.mubr.f32.gmra.mxu0 %v6523_v46  ;;  %2926 = vperm.xlu0 %6437, %v9449_v10   ;;  %v2707_v0 = vadd.f32 %v6525_v12, %v6523_v46  ;;  %v12752_v46 = vld [vmem:[#allocation220_spill] sm:$0xff] }
 0x36c   : > { %v9558_v61 = vpop.eup %6530  ;;  %6554 = vpow2.f32 %v2442_v42  ;;  %v2446_v54 = vmul.f32 1.442695, %v2266_v39  ;;  %v2448_v14 = vmul.f32 1.442695, %v2267_v23  ;;  %3445 = vmatprep.mubr.f32.mxu1 %v9550_v49  ;;  %2211 = vperm.xlu1 %6436, %v9545_v62   ;;  %v2450_v51 = vmul.f32 1.442695, %v2268_v21  ;;  %v2127_v26 = vpop.permute.xlu1 %2126 }
 0x36d   : > { %v9562_v35 = vpop.eup %6532  ;;  %6556 = vpow2.f32 %v2444_v33  ;;  %3446 = vmatmul.mubr.f32.gmra.mxu1 %v6527_v4  ;;  %v9564_v57 = vpop.permute.xlu0 %2131  ;;  %v2452_v45 = vmul.f32 1.442695, %v2269_v38  ;;  %v12753_v42 = vld [vmem:[#allocation222_spill] sm:$0xff]  ;;  %v2270_v40 = vsub.f32 %v12754_v43, %v2127_v26  ;;  %v2271_v39 = vsub.f32 %v12757_v16, %v2127_v26 }
 0x36e   : > { %v9566_v60 = vpop.eup %6534  ;;  %6558 = vpow2.f32 %v2004_v13  ;;  %v2275_v2 = vsub.f32 %v12752_v46, %v9564_v57  ;;  %3225 = vmatprep.mubr.f32.mxu0 %v9562_v35  ;;  %v2277_v20 = vsub.f32 %v12753_v42, %v9564_v57  ;;  %v12755_v13 = vld [vmem:[#allocation295_spill] sm:$0xff]  ;;  %v2272_v21 = vsub.f32 %v12758_v18, %v2127_v26 }
 0x36f   : > { %v9571_v50 = vpop.eup %6536  ;;  %6560 = vpow2.f32 %v2446_v54  ;;  %2941 = vperm.xlu0 %6437, %v9459_v6   ;;  %3226 = vmatmul.mubr.f32.gmra.mxu0 %v9558_v61  ;;  %v12756_v33 = vsub.f32 %v12755_v13, %v9137_v53 }
 0x370   : > { %v6539_v12 = vpop.eup %6538  ;;  %6562 = vpow2.f32 %v2448_v14  ;;  %2921 = vperm.xlu1 %6436, %v9447_v48   ;;  %3450 = vmatprep.mubr.f32.mxu1 %v9571_v50  ;;  %v2464_v23 = vmul.f32 1.442695, %v2275_v2  ;;  %v2468_v54 = vmul.f32 1.442695, %v2277_v20  ;;  %v12759_v14 = vld [vmem:[#allocation246_spill] sm:$0xff]  ;;  %v12762_v20 = vld [vmem:[#allocation219_spill] sm:$0xff] }
 0x371   : > { %v6541_v58 = vpop.eup %6540  ;;  %v2008_v1 = vmul.f32 1.442695, %v12756_v33  ;;  %6564 = vpow2.f32 %v2450_v51  ;;  %3451 = vmatmul.mubr.f32.gmra.mxu1 %v9566_v60  ;;  %v2273_v46 = vsub.f32 %v12759_v14, %v2127_v26  ;;  %v2454_v51 = vmul.f32 1.442695, %v2270_v40  ;;  %v12763_v33 = vld [vmem:[#allocation252_spill] sm:$0xff] }
 0x372   : > { %v6543_v24 = vpop.eup %6542  ;;  %6566 = vpow2.f32 %v2452_v45  ;;  %v9586_v30 = vpop.permute.xlu0 %2136  ;;  %3230 = vmatprep.mubr.f32.mxu0 %v6541_v58  ;;  %v2708_v45 = vadd.f32 %v6527_v4, %v2707_v0  ;;  %v2456_v2 = vmul.f32 1.442695, %v2271_v39  ;;  %v2717_v42 = vadd.f32 %v6541_v58, %v6539_v12 }
 0x373   : > { %v6545_v38 = vpop.eup %6544  ;;  %2951 = vperm.xlu0 %6437, %v9461_v44   ;;  %3231 = vmatmul.mubr.f32.gmra.mxu0 %v6539_v12  ;;  %6568 = vpow2.f32 %v2008_v1  ;;  %v2274_v13 = vsub.f32 %v12762_v20, %v9564_v57  ;;  %v2458_v26 = vmul.f32 1.442695, %v2272_v21  ;;  %v2279_v16 = vsub.f32 %v12763_v33, %v9586_v30  ;;  %v12764_v12 = vld [vmem:[#allocation221_spill] sm:$0xff]  ;;  %v12765_v21 = vld [vmem:[#allocation254_spill] sm:$0xff] }
 0x374   : > { %v9590_v53 = vpop.eup %6546  ;;  %2931 = vperm.xlu1 %6436, %v9451_v56   ;;  %3455 = vmatprep.mubr.f32.mxu1 %v6545_v38  ;;  %6570 = vpow2.f32 %v2464_v23  ;;  %v2460_v40 = vmul.f32 1.442695, %v2273_v46  ;;  %v9601_v4 = vadd.f32 %v9550_v49, %v2708_v45  ;;  %v2276_v58 = vsub.f32 %v12764_v12, %v9564_v57  ;;  %v12766_v57 = vld [vmem:[#allocation251_spill] sm:$0xff] }
 0x375   : > { %12760 = vst [vmem:[#allocation207_spill] sm:$0xff] %v9590_v53  ;;  %3456 = vmatmul.mubr.f32.gmra.mxu1 %v6543_v24  ;;  %6572 = vpow2.f32 %v2468_v54  ;;  %v2718_v39 = vadd.f32 %v6543_v24, %v2717_v42  ;;  %v2281_v54 = vsub.f32 %v12765_v21, %v9586_v30  ;;  %v2703_v49 = vadd.f32 %v9520_v22, %v9538_v8 }
 0x376   : > { %v9593_v43 = vpop.eup %6548  ;;  %6574 = vpow2.f32 %v2454_v51  ;;  %v2142_v1 = vpop.permute.xlu0 %2141  ;;  %v2462_v46 = vmul.f32 1.442695, %v2274_v13  ;;  %v2278_v51 = vsub.f32 %v12766_v57, %v9586_v30  ;;  %v2472_v45 = vmul.f32 1.442695, %v2279_v16 }
 0x377   : > { %12761 = vst [vmem:[#allocation208_spill] sm:$0xff] %v9593_v43  ;;  %v6551_v18 = vpop.eup %6550  ;;  %2961 = vperm.xlu0 %6437, %v9593_v43   ;;  %6576 = vpow2.f32 %v2456_v2  ;;  %v12768_v2 = vld [vmem:[#allocation228_spill] sm:$0xff]  ;;  %v9620_v20 = vadd.f32 %v6545_v38, %v2718_v39  ;;  %v9623_v22 = vadd.f32 %v9527_v17, %v2703_v49  ;;  %v2466_v13 = vmul.f32 1.442695, %v2276_v58  ;;  %v12770_v39 = vld [vmem:[#allocation227_spill] sm:$0xff]  ;;  %v12771_v49 = vld [vmem:[#allocation230_spill] sm:$0xff] }
 0x378   : > { %v6553_v0 = vpop.eup %6552  ;;  %2936 = vperm.xlu1 %6436, %v9457_v63   ;;  %6578 = vpow2.f32 %v2458_v26  ;;  %v2283_v42 = vsub.f32 %v12768_v2, %v2142_v1  ;;  %v12769_v26 = vld [vmem:[#allocation253_spill] sm:$0xff]  ;;  %v9635_v38 = vadd.f32 %v9562_v35, %v9558_v61  ;;  %v2470_v58 = vmul.f32 1.442695, %v2278_v51 }
 0x379   : > { %v9606_v23 = vpop.eup %6554  ;;  %3235 = vmatprep.mubr.f32.mxu0 %v6553_v0  ;;  %6580 = vpow2.f32 %v2460_v40  ;;  %v2280_v33 = vsub.f32 %v12769_v26, %v9586_v30  ;;  %v2476_v40 = vmul.f32 1.442695, %v2281_v54  ;;  %v9637_v12 = vadd.f32 %v6553_v0, %v6551_v18 }
 0x37a   : > { %v9612_v14 = vpop.eup %6556  ;;  %3236 = vmatmul.mubr.f32.gmra.mxu0 %v6551_v18  ;;  %6582 = vpow2.f32 %v2462_v46  ;;  %v2282_v21 = vsub.f32 %v12770_v39, %v2142_v1  ;;  %v2285_v57 = vsub.f32 %v12771_v49, %v2142_v1  ;;  %v2480_v54 = vmul.f32 1.442695, %v2283_v42  ;;  %v12772_v18 = vld [vmem:[#allocation229_spill] sm:$0xff]  ;;  %v12774_v42 = vld [vmem:[#allocation267_spill] sm:$0xff] }
 0x37b   : > { %v9616_v24 = vpop.eup %6558  ;;  %3460 = vmatprep.mubr.f32.mxu1 %v9612_v14  ;;  %6584 = vpow2.f32 %v2472_v45  ;;  %v2474_v61 = vmul.f32 1.442695, %v2280_v33  ;;  %v2284_v0 = vsub.f32 %v12772_v18, %v2142_v1  ;;  %v2147_v45 = vpop.permute.xlu0 %2146  ;;  %v12775_v1 = vld [vmem:[#allocation268_spill] sm:$0xff] }
 0x37c   : > { %12767 = vst [vmem:[#allocation223_spill] sm:$0xff] %v9616_v24  ;;  %v9625_v8 = vpop.eup %6560  ;;  %3461 = vmatmul.mubr.f32.gmra.mxu1 %v9606_v23  ;;  %2946 = vperm.xlu1 %6436, %v9590_v53   ;;  %6586 = vpow2.f32 %v2466_v13  ;;  %v2478_v51 = vmul.f32 1.442695, %v2282_v21  ;;  %v2484_v26 = vmul.f32 1.442695, %v2285_v57  ;;  %v12776_v18 = vld [vmem:[#allocation260_spill] sm:$0xff]  ;;  %v2286_v28 = vsub.f32 %v12777_v55, %v2147_v45 }
 0x37d   : > { %v9631_v16 = vpop.eup %6562  ;;  %6588 = vpow2.f32 %v2476_v40  ;;  %v2482_v49 = vmul.f32 1.442695, %v2284_v0 }
 0x37e   : > { %v9639_v17 = vpop.eup %6564  ;;  %3240 = vmatprep.mubr.f32.mxu0 %v9631_v16  ;;  %6590 = vpow2.f32 %v2470_v58  ;;  %v2287_v58 = vsub.f32 %v12776_v18, %v2147_v45  ;;  %v12779_v18 = vld [vmem:[#allocation261_spill] sm:$0xff] }
 0x37f   : > { %v9643_v30 = vpop.eup %6566  ;;  %3241 = vmatmul.mubr.f32.gmra.mxu0 %v9625_v8  ;;  %v2152_v35 = vpop.permute.xlu1 %2151  ;;  %6592 = vpow2.f32 %v2480_v54  ;;  %v12778_v54 = vld [vmem:[#allocation262_spill] sm:$0xff]  ;;  %v2288_v44 = vsub.f32 %v12779_v18, %v2147_v45 }
 0x380   : > { %3465 = vmatprep.mubr.f32.mxu1 %v9643_v30  ;;  %2956 = vperm.xlu1 %6436, %v9616_v24   ;;  %v9651_v46 = vpop.eup %6568  ;;  %v2290_v13 = vsub.f32 %v12774_v42, %v2152_v35  ;;  %6594 = vpow2.f32 %v2474_v61  ;;  %v2291_v39 = vsub.f32 %v12775_v1, %v2152_v35  ;;  %v2289_v61 = vsub.f32 %v12778_v54, %v2147_v45  ;;  %v12782_v45 = vld [vmem:[#allocation239_spill] sm:$0xff] }
 0x381   : > { %3466 = vmatmul.mubr.f32.gmra.mxu1 %v9639_v17  ;;  %12773 = vst [vmem:[#allocation224_spill] sm:$0xff] %v9651_v46  ;;  %v9653_v2 = vpop.eup %6570  ;;  %6596 = vpow2.f32 %v2478_v51  ;;  %v12780_v51 = vld [vmem:[#allocation270_spill] sm:$0xff]  ;;  %v2488_v6 = vmul.f32 1.442695, %v2287_v58  ;;  %v2486_v54 = vmul.f32 1.442695, %v2286_v28 }
 0x382   : > { %v9656_v33 = vpop.eup %6572  ;;  %v2494_v57 = vmul.f32 1.442695, %v2290_v13  ;;  %6598 = vpow2.f32 %v2484_v26  ;;  %v2496_v1 = vmul.f32 1.442695, %v2291_v39  ;;  %v2293_v55 = vsub.f32 %v12780_v51, %v2152_v35  ;;  %v12781_v13 = vld [vmem:[#allocation269_spill] sm:$0xff]  ;;  %v12783_v51 = vld [vmem:[#allocation240_spill] sm:$0xff] }
 0x383   : > { %v9660_v40 = vpop.eup %6574  ;;  %6600 = vpow2.f32 %v2482_v49  ;;  %v9672_v43 = vpop.permute.xlu1 %2161  ;;  %v2292_v26 = vsub.f32 %v12781_v13, %v2152_v35  ;;  %v2492_v18 = vmul.f32 1.442695, %v2289_v61  ;;  %v2490_v35 = vmul.f32 1.442695, %v2288_v44 }
 0x384   : > { %2966 = vperm.xlu1 %6436, %v9651_v46   ;;  %v9663_v21 = vpop.eup %6576  ;;  %v2157_v46 = vpop.permute.xlu0 %2156  ;;  %6602 = vpow2.f32 %v2494_v57  ;;  %v2298_v49 = vsub.f32 %v12782_v45, %v9672_v43  ;;  %v2299_v10 = vsub.f32 %v12783_v51, %v9672_v43  ;;  %v2500_v13 = vmul.f32 1.442695, %v2293_v55  ;;  %v12784_v57 = vld [vmem:[#allocation232_spill] sm:$0xff] }
 0x385   : > { %v9666_v42 = vpop.eup %6578  ;;  %3245 = vmatprep.mubr.f32.mxu0 %v9663_v21  ;;  %6604 = vpow2.f32 %v2496_v1  ;;  %v2295_v24 = vsub.f32 %v12784_v57, %v2157_v46  ;;  %v2498_v45 = vmul.f32 1.442695, %v2292_v26  ;;  %v2294_v1 = vsub.f32 %v12785_v5, %v2157_v46  ;;  %v12787_v26 = vld [vmem:[#allocation233_spill] sm:$0xff] }
 0x386   : > { %v9670_v0 = vpop.eup %6580  ;;  %3246 = vmatmul.mubr.f32.gmra.mxu0 %v9660_v40  ;;  %6606 = vpow2.f32 %v2488_v6  ;;  %v2510_v44 = vmul.f32 1.442695, %v2298_v49  ;;  %v2297_v53 = vsub.f32 %v12786_v31, %v2157_v46  ;;  %v2512_v55 = vmul.f32 1.442695, %v2299_v10  ;;  %v12788_v49 = vld [vmem:[#allocation242_spill] sm:$0xff]  ;;  %v12789_v31 = vld [vmem:[#allocation241_spill] sm:$0xff] }
 0x387   : > { %3470 = vmatprep.mubr.f32.mxu1 %v9670_v0  ;;  %3250 = vmatprep.mubr.f32.mxu0 %v9653_v2  ;;  %v9681_v39 = vpop.eup %6582  ;;  %6608 = vpow2.f32 %v2486_v54  ;;  %v9705_v57 = vpop.permute.xlu1 %2171  ;;  %v2296_v54 = vsub.f32 %v12787_v26, %v2157_v46  ;;  %v2504_v63 = vmul.f32 1.442695, %v2295_v24  ;;  %v2300_v10 = vsub.f32 %v12789_v31, %v9672_v43  ;;  %v12790_v26 = vld [vmem:[#allocation255_spill] sm:$0xff]  ;;  %v12791_v24 = vld [vmem:[#allocation256_spill] sm:$0xff] }
 0x388   : > { %3471 = vmatmul.mubr.f32.gmra.mxu1 %v9666_v42  ;;  %v9686_v58 = vpop.eup %6584  ;;  %6610 = vpow2.f32 %v2492_v18  ;;  %v2301_v18 = vsub.f32 %v12788_v49, %v9672_v43  ;;  %v2167_v56 = vpop.permute.xlu0 %2166  ;;  %v2508_v62 = vmul.f32 1.442695, %v2297_v53  ;;  %v12792_v31 = vld [vmem:[#allocation248_spill] sm:$0xff]  ;;  %v12793_v53 = vld [vmem:[#allocation247_spill] sm:$0xff] }
 0x389   : > { %3475 = vmatprep.mubr.f32.mxu1 %v9656_v33  ;;  %v9691_v28 = vpop.eup %6586  ;;  %6612 = vpow2.f32 %v2490_v35  ;;  %v2502_v35 = vmul.f32 1.442695, %v2294_v1  ;;  %v2506_v49 = vmul.f32 1.442695, %v2296_v54  ;;  %v2303_v48 = vsub.f32 %v12792_v31, %v2167_v56  ;;  %v12794_v54 = vld [vmem:[#allocation250_spill] sm:$0xff]  ;;  %v12795_v31 = vld [vmem:[#allocation249_spill] sm:$0xff] }
 0x38a   : > { %3251 = vmatmul.mubr.f32.gmra.mxu0 %v9681_v39  ;;  %v9695_v61 = vpop.eup %6588  ;;  %6614 = vpow2.f32 %v2500_v13  ;;  %v2306_v13 = vsub.f32 %v12790_v26, %v9705_v57  ;;  %v2516_v1 = vmul.f32 1.442695, %v2301_v18  ;;  %v2302_v26 = vsub.f32 %v12793_v53, %v2167_v56 }
 0x38b   : > { %3255 = vmatprep.mubr.f32.mxu0 %v9686_v58  ;;  %v9699_v51 = vpop.eup %6590  ;;  %6616 = vpow2.f32 %v2498_v45  ;;  %v2307_v45 = vsub.f32 %v12791_v24, %v9705_v57  ;;  %v2305_v24 = vsub.f32 %v12794_v54, %v2167_v56  ;;  %v2304_v11 = vsub.f32 %v12795_v31, %v2167_v56  ;;  %v12798_v56 = vld [vmem:[#allocation271_spill] sm:$0xff] }
 0x38c   : > { %3476 = vmatmul.mubr.f32.gmra.mxu1 %v9691_v28  ;;  %v9703_v6 = vpop.eup %6592  ;;  %6618 = vpow2.f32 %v2510_v44  ;;  %v2514_v44 = vmul.f32 1.442695, %v2300_v10  ;;  %v2520_v36 = vmul.f32 1.442695, %v2303_v48  ;;  %v2518_v54 = vmul.f32 1.442695, %v2302_v26 }
 0x38d   : > { %3480 = vmatprep.mubr.f32.mxu1 %v9695_v61  ;;  %v9709_v5 = vpop.eup %6594  ;;  %6620 = vpow2.f32 %v2512_v55  ;;  %v2526_v55 = vmul.f32 1.442695, %v2306_v13  ;;  %v2528_v18 = vmul.f32 1.442695, %v2307_v45  ;;  %v2177_v45 = vpop.permute.xlu0 %2176  ;;  %v2524_v31 = vmul.f32 1.442695, %v2305_v24 }
 0x38e   : > { %3256 = vmatmul.mubr.f32.gmra.mxu0 %v9699_v51  ;;  %v9717_v46 = vpop.eup %6596  ;;  %6622 = vpow2.f32 %v2504_v63  ;;  %v9736_v63 = vpop.permute.xlu1 %2181 }
 0x38f   : > { %3260 = vmatprep.mubr.f32.mxu0 %v9703_v6  ;;  %v9721_v15 = vpop.eup %6598  ;;  %6624 = vpow2.f32 %v2502_v35  ;;  %v12796_v35 = vld [vmem:[#allocation258_spill] sm:$0xff] }
 0x390   : > { %3481 = vmatmul.mubr.f32.gmra.mxu1 %v9709_v5  ;;  %v9726_v43 = vpop.eup %6600  ;;  %6626 = vpow2.f32 %v2508_v62  ;;  %v2309_v53 = vsub.f32 %v12796_v35, %v9705_v57  ;;  %v12797_v62 = vld [vmem:[#allocation257_spill] sm:$0xff] }
 0x391   : > { %3485 = vmatprep.mubr.f32.mxu1 %v9721_v15  ;;  %v9734_v3 = vpop.eup %6602  ;;  %6628 = vpow2.f32 %v2506_v49  ;;  %v2308_v13 = vsub.f32 %v12797_v62, %v9705_v57  ;;  %v2522_v57 = vmul.f32 1.442695, %v2304_v11  ;;  %v12800_v62 = vld [vmem:[#allocation264_spill] sm:$0xff] }
 0x392   : > { %3261 = vmatmul.mubr.f32.gmra.mxu0 %v9717_v46  ;;  %v9739_v10 = vpop.eup %6604  ;;  %6630 = vpow2.f32 %v2516_v1  ;;  %v2314_v1 = vsub.f32 %v12798_v56, %v9736_v63  ;;  %v2311_v24 = vsub.f32 %v12800_v62, %v2177_v45 }
 0x393   : > { %6632 = vpow2.f32 %v2514_v44  ;;  %v12799_v44 = vld [vmem:[#allocation272_spill] sm:$0xff]  ;;  %v2530_v11 = vmul.f32 1.442695, %v2308_v13 }
 0x394   : > { %3486 = vmatmul.mubr.f32.gmra.mxu1 %v9726_v43  ;;  %6634 = vpow2.f32 %v2526_v55  ;;  %v2315_v35 = vsub.f32 %v12799_v44, %v9736_v63  ;;  %v2532_v55 = vmul.f32 1.442695, %v2309_v53  ;;  %v12801_v44 = vld [vmem:[#allocation263_spill] sm:$0xff]  ;;  %v12802_v53 = vld [vmem:[#allocation266_spill] sm:$0xff] }
 0x395   : > { %6636 = vpow2.f32 %v2528_v18  ;;  %v2723_v18 = vadd.f32 %v9606_v23, %v9637_v12  ;;  %v2310_v47 = vsub.f32 %v12801_v44, %v2177_v45  ;;  %v2313_v62 = vsub.f32 %v12802_v53, %v2177_v45 }
 0x396   : > { %2665 = vadd.xlane.f32.xlu0 %v9471_v25  ;;  %v9743_v25 = vpop.eup %6606  ;;  %6638 = vpow2.f32 %v2520_v36  ;;  %v2544_v13 = vmul.f32 1.442695, %v2315_v35  ;;  %v12805_v35 = vld [vmem:[#allocation273_spill] sm:$0xff] }
 0x397   : > { %v9748_v49 = vpop.eup %6608  ;;  %3265 = vmatprep.mubr.f32.mxu0 %v9743_v25  ;;  %6640 = vpow2.f32 %v2518_v54  ;;  %v9780_v23 = vadd.f32 %v9612_v14, %v2723_v18  ;;  %v9784_v54 = vpop.permute.xlu1 %2191  ;;  %v2536_v18 = vmul.f32 1.442695, %v2311_v24  ;;  %v2534_v53 = vmul.f32 1.442695, %v2310_v47  ;;  %v12807_v47 = vld [vmem:[#allocation280_spill] sm:$0xff] }
 0x398   : > { %v9753_v48 = vpop.eup %6610  ;;  %3266 = vmatmul.mubr.f32.gmra.mxu0 %v9748_v49  ;;  %6642 = vpow2.f32 %v2524_v31 }
 0x399   : > { %v9760_v26 = vpop.eup %6612  ;;  %3490 = vmatprep.mubr.f32.mxu1 %v9753_v48  ;;  %3270 = vmatprep.mubr.f32.mxu0 %v9739_v10  ;;  %6644 = vpow2.f32 %v2522_v57  ;;  %v2316_v57 = vsub.f32 %v12805_v35, %v9736_v63 }
 0x39a   : > { %2675 = vadd.xlane.f32.xlu0 %v9483_v19  ;;  %v2713_v19 = vadd.f32 %v9566_v60, %v9635_v38  ;;  %v9767_v56 = vpop.eup %6614  ;;  %3491 = vmatmul.mubr.f32.gmra.mxu1 %v9760_v26  ;;  %v2542_v38 = vmul.f32 1.442695, %v2314_v1  ;;  %v2732_v1 = vadd.f32 %v9663_v21, %v9660_v40  ;;  %6646 = vpow2.f32 %v2532_v55  ;;  %v12806_v55 = vld [vmem:[#allocation279_spill] sm:$0xff] }
 0x39b   : > { %v9775_v60 = vpop.eup %6616  ;;  %3495 = vmatprep.mubr.f32.mxu1 %v9767_v56  ;;  %6648 = vpow2.f32 %v2530_v11  ;;  %v2322_v24 = vsub.f32 %v12806_v55, %v9784_v54  ;;  %v2546_v35 = vmul.f32 1.442695, %v2316_v57  ;;  %v9830_v57 = vpop.permute.xlu1 %2201 }
 0x39c   : > { %v9773_v36 = vadd.f32 %v9571_v50, %v2713_v19  ;;  %v9782_v12 = vpop.eup %6618  ;;  %3271 = vmatmul.mubr.f32.gmra.mxu0 %v9734_v3  ;;  %v12804_v19 = vld [vmem:[#allocation274_spill] sm:$0xff]  ;;  %v2733_v40 = vadd.f32 %v9666_v42, %v2732_v1  ;;  %6650 = vpow2.f32 %v2542_v38  ;;  %v12808_v1 = vld [vmem:[#allocation276_spill] sm:$0xff] }
 0x39d   : > { %v9790_v31 = vpop.eup %6620  ;;  %v2317_v14 = vsub.f32 %v12804_v19, %v9736_v63  ;;  %6652 = vpow2.f32 %v2544_v13  ;;  %v2323_v63 = vsub.f32 %v12807_v47, %v9784_v54 }
 0x39e   : > { %2680 = vadd.xlane.f32.xlu0 %v9489_v59  ;;  %v12803_v59 = vld [vmem:[#allocation265_spill] sm:$0xff]  ;;  %v9794_v44 = vpop.eup %6622  ;;  %3496 = vmatmul.mubr.f32.gmra.mxu1 %v9775_v60  ;;  %6654 = vpow2.f32 %v2536_v18  ;;  %v12810_v18 = vld [vmem:[#allocation278_spill] sm:$0xff] }
 0x39f   : > { %v2312_v50 = vsub.f32 %v12803_v59, %v2177_v45  ;;  %v2187_v45 = vpop.permute.xlu0 %2186  ;;  %v9801_v21 = vpop.eup %6624  ;;  %v2540_v59 = vmul.f32 1.442695, %v2313_v62  ;;  %3275 = vmatprep.mubr.f32.mxu0 %v9794_v44  ;;  %v2548_v38 = vmul.f32 1.442695, %v2317_v14  ;;  %6656 = vpow2.f32 %v2534_v53  ;;  %v12811_v53 = vld [vmem:[#allocation277_spill] sm:$0xff] }
 0x3a0   : > { %v9806_v11 = vpop.eup %6626  ;;  %3276 = vmatmul.mubr.f32.gmra.mxu0 %v9801_v21  ;;  %v2319_v62 = vsub.f32 %v12808_v1, %v2187_v45  ;;  %v2558_v14 = vmul.f32 1.442695, %v2322_v24  ;;  %v2560_v1 = vmul.f32 1.442695, %v2323_v63 }
 0x3a1   : > { %v2538_v19 = vmul.f32 1.442695, %v2312_v50  ;;  %v9814_v42 = vpop.eup %6628  ;;  %3500 = vmatprep.mubr.f32.mxu1 %v9806_v11  ;;  %3280 = vmatprep.mubr.f32.mxu0 %v9790_v31  ;;  %v12809_v50 = vld [vmem:[#allocation275_spill] sm:$0xff]  ;;  %6658 = vpow2.f32 %v2540_v59  ;;  %v12812_v59 = vld [vmem:[#allocation282_spill] sm:$0xff] }
 0x3a2   : > { %2690 = vadd.xlane.f32.xlu0 %v9501_v9  ;;  %v9812_v9 = vadd.f32 %v9670_v0, %v2733_v40  ;;  %v9819_v13 = vpop.eup %6630  ;;  %v2318_v55 = vsub.f32 %v12809_v50, %v2187_v45  ;;  %3501 = vmatmul.mubr.f32.gmra.mxu1 %v9814_v42  ;;  %v2321_v40 = vsub.f32 %v12810_v18, %v2187_v45 }
 0x3a3   : > { %v9824_v0 = vpop.eup %6632  ;;  %3505 = vmatprep.mubr.f32.mxu1 %v9819_v13  ;;  %6660 = vpow2.f32 %v2538_v19  ;;  %v2320_v50 = vsub.f32 %v12811_v53, %v2187_v45  ;;  %v9833_v7 = vpop.permute.xlu0 %2196  ;;  %v2325_v63 = vsub.f32 %v12812_v59, %v9784_v54  ;;  %v2552_v19 = vmul.f32 1.442695, %v2319_v62  ;;  %v12813_v45 = vld [vmem:[#allocation281_spill] sm:$0xff]  ;;  %v12815_v62 = vld [vmem:[#allocation284_spill] sm:$0xff] }
 0x3a4   : > { %v9828_v47 = vpop.eup %6634  ;;  %3281 = vmatmul.mubr.f32.gmra.mxu0 %v9782_v12  ;;  %6662 = vpow2.f32 %v2548_v38  ;;  %v2324_v53 = vsub.f32 %v12813_v45, %v9784_v54  ;;  %v2550_v27 = vmul.f32 1.442695, %v2318_v55  ;;  %v2556_v38 = vmul.f32 1.442695, %v2321_v40  ;;  %v12816_v45 = vld [vmem:[#allocation286_spill] sm:$0xff] }
 0x3a5   : > { %v9839_v24 = vpop.eup %6636  ;;  %6664 = vpow2.f32 %v2546_v35  ;;  %v2327_v59 = vsub.f32 %v12815_v62, %v9833_v7  ;;  %v2554_v54 = vmul.f32 1.442695, %v2320_v50  ;;  %v2737_v55 = vadd.f32 %v9681_v39, %v9653_v2  ;;  %v12818_v2 = vld [vmem:[#allocation283_spill] sm:$0xff] }
 0x3a6   : > { %2700 = vadd.xlane.f32.xlu0 %v9535_v41  ;;  %v2727_v41 = vadd.f32 %v9631_v16, %v9625_v8  ;;  %v9843_v18 = vpop.eup %6638  ;;  %3506 = vmatmul.mubr.f32.gmra.mxu1 %v9824_v0  ;;  %6666 = vpow2.f32 %v2558_v14  ;;  %v12814_v8 = vld [vmem:[#allocation287_spill] sm:$0xff]  ;;  %v2564_v40 = vmul.f32 1.442695, %v2325_v63  ;;  %v2562_v50 = vmul.f32 1.442695, %v2324_v53 }
 0x3a7   : > { %v2330_v16 = vsub.f32 %v12814_v8, %v9830_v57  ;;  %3285 = vmatprep.mubr.f32.mxu0 %v9843_v18  ;;  %6668 = vpow2.f32 %v2560_v1  ;;  %v2329_v8 = vsub.f32 %v12816_v45, %v9833_v7  ;;  %v2326_v39 = vsub.f32 %v12818_v2, %v9833_v7 }
 0x3a8   : > { %2670 = vadd.xlane.f32.xlu1 %v9477_v32  ;;  %v9849_v32 = vpop.eup %6640  ;;  %6670 = vpow2.f32 %v2552_v19  ;;  %v12819_v19 = vld [vmem:[#allocation285_spill] sm:$0xff]  ;;  %v2568_v45 = vmul.f32 1.442695, %v2327_v59 }
 0x3a9   : > { %v9856_v35 = vpop.eup %6642  ;;  %3286 = vmatmul.mubr.f32.gmra.mxu0 %v9849_v32  ;;  %6672 = vpow2.f32 %v2550_v27  ;;  %v2574_v63 = vmul.f32 1.442695, %v2330_v16  ;;  %v2328_v62 = vsub.f32 %v12819_v19, %v9833_v7  ;;  %v2747_v16 = vadd.f32 %v9717_v46, %v9703_v6  ;;  %v12820_v7 = vld [vmem:[#allocation290_spill] sm:$0xff] }
 0x3aa   : > { %2710 = vadd.xlane.f32.xlu0 %v9601_v4  ;;  %v2728_v4 = vadd.f32 %v9639_v17, %v2727_v41  ;;  %v9863_v14 = vpop.eup %6644  ;;  %3510 = vmatprep.mubr.f32.mxu1 %v9856_v35  ;;  %6674 = vpow2.f32 %v2556_v38  ;;  %v2333_v59 = vsub.f32 %v12820_v7, %v9830_v57 }
 0x3ab   : > { %3290 = vmatprep.mubr.f32.mxu0 %v9839_v24  ;;  %v9869_v1 = vpop.eup %6646  ;;  %3511 = vmatmul.mubr.f32.gmra.mxu1 %v9863_v14  ;;  %6676 = vpow2.f32 %v2554_v54  ;;  %v2566_v54 = vmul.f32 1.442695, %v2326_v39  ;;  %v2570_v46 = vmul.f32 1.442695, %v2328_v62  ;;  %v2767_v39 = vadd.f32 %v9790_v31, %v9782_v12 }
 0x3ac   : > { %2685 = vadd.xlane.f32.xlu1 %v9495_v52  ;;  %v12817_v52 = vld [vmem:[#allocation288_spill] sm:$0xff]  ;;  %v9877_v41 = vpop.eup %6648  ;;  %3515 = vmatprep.mubr.f32.mxu1 %v9869_v1  ;;  %v2729_v27 = vadd.f32 %v9643_v30, %v2728_v4  ;;  %6678 = vpow2.f32 %v2564_v40  ;;  %v12821_v30 = vld [vmem:[#allocation289_spill] sm:$0xff]  ;;  %v2748_v40 = vadd.f32 %v9726_v43, %v2747_v16  ;;  %v2742_v62 = vadd.f32 %v9699_v51, %v9686_v58 }
 0x3ad   : > { %v2331_v17 = vsub.f32 %v12817_v52, %v9830_v57  ;;  %v9882_v53 = vpop.eup %6650  ;;  %3291 = vmatmul.mubr.f32.gmra.mxu0 %v9828_v47  ;;  %v2572_v52 = vmul.f32 1.442695, %v2329_v8  ;;  %6680 = vpow2.f32 %v2562_v50  ;;  %v2757_v8 = vadd.f32 %v9739_v10, %v9734_v3 }
 0x3ae   : > { %2720 = vadd.xlane.f32.xlu0 %v9620_v20  ;;  %v2738_v20 = vadd.f32 %v9691_v28, %v2737_v55  ;;  %v9890_v38 = vpop.eup %6652  ;;  %v2332_v28 = vsub.f32 %v12821_v30, %v9830_v57  ;;  %6682 = vpow2.f32 %v2568_v45  ;;  %v2580_v50 = vmul.f32 1.442695, %v2333_v59 }
 0x3af   : > { %v9894_v2 = vpop.eup %6654  ;;  %3516 = vmatmul.mubr.f32.gmra.mxu1 %v9877_v41  ;;  %v2576_v6 = vmul.f32 1.442695, %v2331_v17  ;;  %6684 = vpow2.f32 %v2574_v63  ;;  %v2749_v43 = vadd.f32 %v9721_v15, %v2748_v40  ;;  %v2758_v10 = vadd.f32 %v9775_v60, %v2757_v8 }
 0x3b0   : > { %2695 = vadd.xlane.f32.xlu1 %v9509_v29  ;;  %v9897_v29 = vpop.eup %6656  ;;  %3295 = vmatprep.mubr.f32.mxu0 %v9894_v2  ;;  %v2739_v55 = vadd.f32 %v9656_v33, %v2738_v20  ;;  %6686 = vpow2.f32 %v2572_v52  ;;  %v2578_v33 = vmul.f32 1.442695, %v2332_v28  ;;  %v2768_v60 = vadd.f32 %v9824_v0, %v2767_v39 }
 0x3b1   : > { %v9902_v4 = vpop.eup %6658  ;;  %3296 = vmatmul.mubr.f32.gmra.mxu0 %v9897_v29  ;;  %6688 = vpow2.f32 %v2566_v54  ;;  %v2759_v15 = vadd.f32 %v9767_v56, %v2758_v10  ;;  %v2777_v12 = vadd.f32 %v9839_v24, %v9828_v47  ;;  %v2743_v51 = vadd.f32 %v9709_v5, %v2742_v62 }
 0x3b2   : > { %2730 = vadd.xlane.f32.xlu0 %v2729_v27  ;;  %v9910_v57 = vpop.eup %6660  ;;  %3520 = vmatprep.mubr.f32.mxu1 %v9902_v4  ;;  %6690 = vpow2.f32 %v2576_v6  ;;  %v2769_v47 = vadd.f32 %v9819_v13, %v2768_v60  ;;  %v2787_v27 = vadd.f32 %v9890_v38, %v9882_v53 }
 0x3b3   : > { %3300 = vmatprep.mubr.f32.mxu0 %v9890_v38  ;;  %v9914_v17 = vpop.eup %6662  ;;  %3521 = vmatmul.mubr.f32.gmra.mxu1 %v9910_v57  ;;  %6692 = vpow2.f32 %v2570_v46  ;;  %v2778_v24 = vadd.f32 %v9877_v41, %v2777_v12  ;;  %v2744_v5 = vadd.f32 %v9695_v61, %v2743_v51  ;;  %v12827_v12 = vld [vmem:[#allocation305_spill] sm:$0xff] }
 0x3b4   : > { %2705 = vadd.xlane.f32.xlu1 %v9623_v22  ;;  %v6665_v22 = vpop.eup %6664  ;;  %3525 = vmatprep.mubr.f32.mxu1 %v9914_v17  ;;  %6694 = vpow2.f32 %v2580_v50 }
 0x3b5   : > { %v6667_v3 = vpop.eup %6666  ;;  %3301 = vmatmul.mubr.f32.gmra.mxu0 %v9882_v53  ;;  %6696 = vpow2.f32 %v2578_v33  ;;  %v2779_v41 = vadd.f32 %v9869_v1, %v2778_v24  ;;  %v2788_v53 = vadd.f32 %v6665_v22, %v2787_v27 }
 0x3b6   : > { %2740 = vadd.xlane.f32.xlu0 %v2739_v55  ;;  %v6669_v63 = vpop.eup %6668 }
 0x3b7   : > { %v9924_v19 = vpop.eup %6670  ;;  %3526 = vmatmul.mubr.f32.gmra.mxu1 %v6665_v22  ;;  %v2797_v38 = vadd.f32 %v6669_v63, %v6667_v3 }
 0x3b8   : > { %2715 = vadd.xlane.f32.xlu1 %v9773_v36  ;;  %v9928_v45 = vpop.eup %6672  ;;  %3305 = vmatprep.mubr.f32.mxu0 %v9924_v19 }
 0x3b9   : > { %v9931_v36 = vpop.eup %6674  ;;  %3306 = vmatmul.mubr.f32.gmra.mxu0 %v9928_v45  ;;  %v2792_v46 = vadd.f32 %v9928_v45, %v9924_v19  ;;  %v12824_v19 = vld [vmem:[#allocation299_spill] sm:$0xff]  ;;  %v12825_v45 = vld [vmem:[#allocation300_spill] sm:$0xff] }
 0x3ba   : > { %2750 = vadd.xlane.f32.xlu0 %v2749_v43  ;;  %v9939_v31 = vpop.eup %6676  ;;  %3530 = vmatprep.mubr.f32.mxu1 %v9931_v36 }
 0x3bb   : > { %3310 = vmatprep.mubr.f32.mxu0 %v6669_v63  ;;  %v6679_v58 = vpop.eup %6678  ;;  %3531 = vmatmul.mubr.f32.gmra.mxu1 %v9939_v31 }
 0x3bc   : > { %2725 = vadd.xlane.f32.xlu1 %v9780_v23  ;;  %v2752_v23 = vadd.f32 %v9748_v49, %v9743_v25  ;;  %v6681_v56 = vpop.eup %6680  ;;  %3535 = vmatprep.mubr.f32.mxu1 %v6679_v58  ;;  %v2762_v49 = vadd.f32 %v9801_v21, %v9794_v44  ;;  %v2772_v44 = vadd.f32 %v9849_v32, %v9843_v18 }
 0x3bd   : > { %v6683_v0 = vpop.eup %6682  ;;  %3311 = vmatmul.mubr.f32.gmra.mxu0 %v6667_v3  ;;  %v2789_v21 = vadd.f32 %v9914_v17, %v2788_v53  ;;  %v2798_v1 = vadd.f32 %v6681_v56, %v2797_v38  ;;  %v12823_v17 = vld [vmem:[#allocation297_spill] sm:$0xff] }
 0x3be   : > { %2760 = vadd.xlane.f32.xlu0 %v2759_v15  ;;  %v6685_v20 = vpop.eup %6684  ;;  %3315 = vmatprep.mubr.f32.mxu0 %v6683_v0  ;;  %v2753_v25 = vadd.f32 %v9760_v26, %v2752_v23  ;;  %v2763_v26 = vadd.f32 %v9814_v42, %v2762_v49  ;;  %v2773_v28 = vadd.f32 %v9863_v14, %v2772_v44  ;;  %v12826_v15 = vld [vmem:[#allocation302_spill] sm:$0xff] }
 0x3bf   : > { %v6687_v16 = vpop.eup %6686  ;;  %3536 = vmatmul.mubr.f32.gmra.mxu1 %v6681_v56  ;;  %v2799_v42 = vadd.f32 %v6679_v58, %v2798_v1  ;;  %v2793_v14 = vadd.f32 %v9939_v31, %v2792_v46  ;;  %v12828_v49 = vld [vmem:[#allocation298_spill] sm:$0xff]  ;;  %v12841_v46 = vld [vmem:[#allocation311_spill] sm:$0xff] }
 0x3c0   : > { %2735 = vadd.xlane.f32.xlu1 %v9812_v9  ;;  %v6689_v9 = vpop.eup %6688  ;;  %3540 = vmatprep.mubr.f32.mxu1 %v6687_v16  ;;  %v2754_v61 = vadd.f32 %v9753_v48, %v2753_v25  ;;  %v2764_v30 = vadd.f32 %v9806_v11, %v2763_v26  ;;  %v2782_v48 = vadd.f32 %v9897_v29, %v9894_v2  ;;  %v12834_v1 = vld [vmem:[#allocation306_spill] sm:$0xff] }
 0x3c1   : > { %v6691_v13 = vpop.eup %6690  ;;  %3316 = vmatmul.mubr.f32.gmra.mxu0 %v6689_v9  ;;  %v2774_v32 = vadd.f32 %v9856_v35, %v2773_v28  ;;  %v2802_v40 = vadd.f32 %v6689_v9, %v6683_v0  ;;  %v2794_v2 = vadd.f32 %v9931_v36, %v2793_v14  ;;  %v12829_v9 = vld [vmem:[#allocation301_spill] sm:$0xff]  ;;  %v12837_v28 = vld [vmem:[#allocation307_spill] sm:$0xff]  ;;  %v2887_v14 = vld [vmem:[#allocation4] sm:$0xff] }
 0x3c2   : > { %2770 = vadd.xlane.f32.xlu0 %v2769_v47  ;;  %v6693_v7 = vpop.eup %6692  ;;  %3320 = vmatprep.mubr.f32.mxu0 %v6691_v13  ;;  %v2807_v52 = vadd.f32 %v6691_v13, %v6685_v20  ;;  %v2783_v6 = vadd.f32 %v9910_v57, %v2782_v48  ;;  %v12822_v57 = vld [vmem:[#allocation296_spill] sm:$0xff]  ;;  %v12830_v13 = vsub.f32 %v12828_v49, %v12829_v9  ;;  %v12838_v48 = vld [vmem:[#allocation309_spill] sm:$0xff]  ;;  %v12856_v9 = vld [vmem:[#allocation323_spill] sm:$0xff] }
 0x3c3   : > { %v6695_v59 = vpop.eup %6694  ;;  %3541 = vmatmul.mubr.f32.gmra.mxu1 %v6693_v7  ;;  %v2803_v29 = vadd.f32 %v6693_v7, %v2802_v40  ;;  %v12855_v49 = vld [vmem:[#allocation321_spill] sm:$0xff] }
 0x3c4   : > { %2745 = vadd.xlane.f32.xlu1 %v2744_v5  ;;  %3545 = vmatprep.mubr.f32.mxu1 %v6695_v59  ;;  %v6697_v54 = vpop.eup %6696  ;;  %v2784_v11 = vadd.f32 %v9902_v4, %v2783_v6  ;;  %v12840_v6 = vld [vmem:[#allocation310_spill] sm:$0xff] }
 0x3c5   : > { %3321 = vmatmul.mubr.f32.gmra.mxu0 %v6685_v20  ;;  %v2808_v18 = vadd.f32 %v6697_v54, %v2807_v52  ;;  %v2804_v8 = vadd.f32 %v6687_v16, %v2803_v29  ;;  %v12835_v52 = vld [vmem:[#allocation308_spill] sm:$0xff]  ;;  %v12844_v29 = vld [vmem:[#allocation315_spill] sm:$0xff] }
 0x3c6   : > { %2780 = vadd.xlane.f32.xlu0 %v2779_v41  ;;  %v2012_v41 = vmul.f32 1.442695, %v12830_v13  ;;  %v12857_v13 = vsub.f32 %v12855_v49, %v12856_v9 }
 0x3c7   : > { %3546 = vmatmul.mubr.f32.gmra.mxu1 %v6697_v54  ;;  %v2809_v55 = vadd.f32 %v6695_v59, %v2808_v18  ;;  %v12831_v59 = vld [vmem:[#allocation303_spill] sm:$0xff]  ;;  %v12836_v54 = vsub.f32 %v12834_v1, %v12835_v52  ;;  %v2890_v52 = vld [vmem:[#allocation4 + $0x18] sm:$0xff] }
 0x3c8   : > { %2755 = vadd.xlane.f32.xlu1 %v2754_v61  ;;  %v12832_v61 = vld [vmem:[#allocation304_spill] sm:$0xff] }
 0x3c9   : > { %v12833_v26 = vsub.f32 %v12831_v59, %v12832_v61 }
 0x3ca   : > { %2790 = vadd.xlane.f32.xlu0 %v2789_v21 }
 0x3cb   : > { %v2016_v44 = vmul.f32 1.442695, %v12833_v26  ;;  %v12858_v26 = vld [vmem:[#allocation324_spill] sm:$0xff] }
 0x3cc   : > { %2765 = vadd.xlane.f32.xlu1 %v2764_v30  ;;  %v2020_v30 = vmul.f32 1.442695, %v12836_v54 }
 0x3ce   : > { %2800 = vadd.xlane.f32.xlu0 %v2799_v42  ;;  %v12839_v42 = vsub.f32 %v12837_v28, %v12838_v48 }
 0x3d0   : > { %2775 = vadd.xlane.f32.xlu1 %v2774_v32  ;;  %v2010_v18 = vmul.f32 1.442695, %v12839_v42  ;;  %v12861_v42 = vld [vmem:[#allocation325_spill] sm:$0xff] }
 0x3d2   : > { %2810 = vadd.xlane.f32.xlu0 %v2809_v55  ;;  %v12842_v55 = vsub.f32 %v12840_v6, %v12841_v46 }
 0x3d4   : > { %2785 = vadd.xlane.f32.xlu1 %v2784_v11  ;;  %v2024_v11 = vmul.f32 1.442695, %v12842_v55 }
 0x3d8   : > { %2795 = vadd.xlane.f32.xlu1 %v2794_v2  ;;  %v12843_v2 = vld [vmem:[#allocation314_spill] sm:$0xff] }
 0x3dc   : > { %2805 = vadd.xlane.f32.xlu1 %v2804_v8  ;;  %v12845_v8 = vsub.f32 %v12843_v2, %v12844_v29  ;;  %v12864_v29 = vld [vmem:[#allocation332_spill] sm:$0xff] }
 0x3e2   : > { %v2207_v35 = vpop.permute.xlu0 %2206 }
 0x3e3   : > { %v2334_v50 = vsub.f32 %v12822_v57, %v2207_v35  ;;  %v2335_v22 = vsub.f32 %v12823_v17, %v2207_v35  ;;  %v2336_v33 = vsub.f32 %v9161_v34, %v2207_v35  ;;  %v2337_v3 = vsub.f32 %v9197_v37, %v2207_v35 }
 0x3e4   : > { %v2014_v35 = vmul.f32 1.442695, %v12845_v8  ;;  %v12865_v8 = vld [vmem:[#allocation333_spill] sm:$0xff] }
 0x3e5   : > { %v2582_v4 = vmul.f32 1.442695, %v2334_v50  ;;  %v2584_v43 = vmul.f32 1.442695, %v2335_v22  ;;  %v2586_v10 = vmul.f32 1.442695, %v2336_v33 }
 0x3e6   : > { %v2588_v39 = vmul.f32 1.442695, %v2337_v3  ;;  %v2927_v17 = vpop.permute.xlu0 %2926  ;;  %v12846_v3 = vld [vmem:[#allocation330_spill] sm:$0xff] }
 0x3e7   : > { %6698 = vpow2.f32 %v2582_v4  ;;  %v2212_v63 = vpop.permute.xlu1 %2211  ;;  %v12847_v4 = vld [vmem:[#allocation331_spill] sm:$0xff] }
 0x3e8   : > { %6700 = vpow2.f32 %v2584_v43  ;;  %v2338_v62 = vsub.f32 %v12824_v19, %v2212_v63  ;;  %v2339_v36 = vsub.f32 %v12825_v45, %v2212_v63  ;;  %v2340_v60 = vsub.f32 %v12826_v15, %v2212_v63  ;;  %v12849_v15 = vld [vmem:[#allocation317_spill] sm:$0xff] }
 0x3e9   : > { %6702 = vpow2.f32 %v2586_v10  ;;  %v2341_v31 = vsub.f32 %v12827_v12, %v2212_v63  ;;  %v12848_v43 = vsub.f32 %v12846_v3, %v12847_v4  ;;  %v12867_v4 = vld [vmem:[#allocation312_spill] sm:$0xff] }
 0x3ea   : > { %6704 = vpow2.f32 %v2588_v39  ;;  %v2590_v34 = vmul.f32 1.442695, %v2338_v62  ;;  %v2592_v58 = vmul.f32 1.442695, %v2339_v36  ;;  %v2594_v37 = vmul.f32 1.442695, %v2340_v60 }
 0x3eb   : > { %v2596_v51 = vmul.f32 1.442695, %v2341_v31  ;;  %v2922_v32 = vpop.permute.xlu1 %2921  ;;  %v2028_v10 = vmul.f32 1.442695, %v12848_v43  ;;  %v2888_v39 = vld [vmem:[#allocation4 + $0x8] sm:$0xff]  ;;  %v12868_v43 = vld [vmem:[#allocation313_spill] sm:$0xff] }
 0x3ec   : > { %6706 = vpow2.f32 %v2590_v34  ;;  %v3079_v22 = vmul.f32 %v2922_v32, %v2887_v14  ;;  %v12850_v60 = vld [vmem:[#allocation319_spill] sm:$0xff] }
 0x3ed   : > { %6708 = vpow2.f32 %v2592_v58  ;;  %v12851_v12 = vsub.f32 %v12849_v15, %v12850_v60 }
 0x3ee   : > { %6710 = vpow2.f32 %v2594_v37  ;;  %v3080_v37 = vmul.f32 %v2927_v17, %v2888_v39 }
 0x3ef   : > { %6712 = vpow2.f32 %v2596_v51  ;;  %v2932_v45 = vpop.permute.xlu1 %2931  ;;  %v2018_v31 = vmul.f32 1.442695, %v12851_v12  ;;  %v12870_v12 = vld [vmem:[#allocation336_spill] sm:$0xff] }
 0x3f0   : > { %6714 = vpow2.f32 %v2012_v41  ;;  %v2022_v41 = vmul.f32 1.442695, %v12857_v13 }
 0x3f1   : > { %6716 = vpow2.f32 %v2016_v44  ;;  %v12859_v44 = vld [vmem:[#allocation326_spill] sm:$0xff] }
 0x3f2   : > { %6718 = vpow2.f32 %v2020_v30 }
 0x3f3   : > { %6720 = vpow2.f32 %v2010_v18  ;;  %v2937_v59 = vpop.permute.xlu1 %2936  ;;  %v12862_v18 = vld [vmem:[#allocation327_spill] sm:$0xff] }
 0x3f4   : > { %v6699_v23 = vpop.eup %6698  ;;  %6722 = vpow2.f32 %v2024_v11  ;;  %v12863_v32 = vsub.f32 %v12861_v42, %v12862_v18  ;;  %v2600_v42 = vld [vmem:[#allocation3 + $0x10] sm:$0xff] }
 0x3f5   : > { %v6701_v56 = vpop.eup %6700  ;;  %6724 = vpow2.f32 %v2014_v35  ;;  %v12866_v35 = vsub.f32 %v12864_v29, %v12865_v8  ;;  %v12880_v18 = vld [vmem:[#allocation328_spill] sm:$0xff] }
 0x3f6   : > { %v6703_v0 = vpop.eup %6702  ;;  %3325 = vmatprep.mubr.f32.mxu0 %v6701_v56  ;;  %v2812_v47 = vadd.f32 %v6701_v56, %v6699_v23  ;;  %v12853_v56 = vld [vmem:[#allocation318_spill] sm:$0xff]  ;;  %6726 = vpow2.f32 %v2028_v10  ;;  %v2026_v6 = vmul.f32 1.442695, %v12863_v32  ;;  %v12869_v10 = vsub.f32 %v12867_v4, %v12868_v43  ;;  %v12881_v32 = vld [vmem:[#allocation329_spill] sm:$0xff] }
 0x3f7   : > { %v6705_v24 = vpop.eup %6704  ;;  %3326 = vmatmul.mubr.f32.gmra.mxu0 %v6699_v23  ;;  %v12852_v23 = vld [vmem:[#allocation316_spill] sm:$0xff]  ;;  %6728 = vpow2.f32 %v2018_v31  ;;  %v2947_v15 = vpop.permute.xlu1 %2946  ;;  %v12871_v31 = vld [vmem:[#allocation337_spill] sm:$0xff] }
 0x3f8   : > { %3550 = vmatprep.mubr.f32.mxu1 %v6705_v24  ;;  %v2813_v27 = vadd.f32 %v6703_v0, %v2812_v47  ;;  %v2030_v39 = vmul.f32 1.442695, %v12869_v10  ;;  %v2894_v4 = vld [vmem:[#allocation4 + $0x38] sm:$0xff] }
 0x3f9   : > { %v6707_v20 = vpop.eup %6706  ;;  %3551 = vmatmul.mubr.f32.gmra.mxu1 %v6703_v0  ;;  %v12854_v0 = vsub.f32 %v12852_v23, %v12853_v56 }
 0x3fa   : > { %v6709_v16 = vpop.eup %6708  ;;  %v2814_v5 = vadd.f32 %v6705_v24, %v2813_v27  ;;  %v2889_v24 = vld [vmem:[#allocation4 + $0x10] sm:$0xff] }
 0x3fb   : > { %v6711_v25 = vpop.eup %6710  ;;  %3330 = vmatprep.mubr.f32.mxu0 %v6709_v16  ;;  %v2817_v53 = vadd.f32 %v6709_v16, %v6707_v20  ;;  %v2032_v47 = vmul.f32 1.442695, %v12854_v0 }
 0x3fc   : > { %v6713_v38 = vpop.eup %6712  ;;  %3331 = vmatmul.mubr.f32.gmra.mxu0 %v6707_v20  ;;  %2815 = vadd.xlane.f32.xlu1 %v2814_v5  ;;  %v2942_v5 = vpop.permute.xlu0 %2941 }
 0x3fd   : > { %3555 = vmatprep.mubr.f32.mxu1 %v6713_v38  ;;  %v2818_v7 = vadd.f32 %v6711_v25, %v2817_v53  ;;  %v10001_v62 = vpop.eup %6714  ;;  %6730 = vpow2.f32 %v2032_v47 }
 0x3fe   : > { %3556 = vmatmul.mubr.f32.gmra.mxu1 %v6711_v25  ;;  %v10011_v16 = vpop.eup %6716  ;;  %6732 = vpow2.f32 %v2022_v41 }
 0x3ff   : > { %v2819_v21 = vadd.f32 %v6713_v38, %v2818_v7  ;;  %v3081_v7 = vmul.f32 %v2932_v45, %v2889_v24  ;;  %v10021_v28 = vpop.eup %6718  ;;  %v2598_v24 = vld [vmem:[#allocation3] sm:$0xff] }
 0x400   : > { %v10027_v11 = vpop.eup %6720  ;;  %v2952_v14 = vpop.permute.xlu0 %2951 }
 0x401   : > { %2820 = vadd.xlane.f32.xlu0 %v2819_v21  ;;  %v12860_v21 = vsub.f32 %v12858_v26, %v12859_v44  ;;  %v2893_v26 = vld [vmem:[#allocation4 + $0x30] sm:$0xff] }
 0x402   : > { %v3085_v8 = vmul.f32 %v2952_v14, %v2893_v26 }
 0x403   : > { %v2036_v1 = vmul.f32 1.442695, %v12860_v21 }
 0x404   : > { %v10049_v0 = vpop.permute.xlu0 %2961 }
 0x405   : > { %6734 = vpow2.f32 %v2036_v1  ;;  %v12879_v1 = vld [vmem:[#allocation342_spill] sm:$0xff] }
 0x406   : > { %6736 = vpow2.f32 %v2026_v6  ;;  %v12882_v6 = vsub.f32 %v12880_v18, %v12881_v32  ;;  %v2896_v18 = vld [vmem:[#allocation4 + $0x48] sm:$0xff] }
 0x407   : > { %v3177_v40 = vpop.f32.mrf.mxu0 }
 0x409   : > { %v3402_v57 = vpop.f32.mrf.mxu1  ;;  %v3179_v50 = vpop.f32.mrf.mxu0 }
 0x40a   : > { %v3403_v33 = vadd.f32 %v3402_v57, %v3177_v40  ;;  %v3082_v40 = vmul.f32 %v2937_v59, %v2890_v52  ;;  %v2040_v57 = vmul.f32 1.442695, %v12866_v35  ;;  %v2891_v50 = vld [vmem:[#allocation4 + $0x20] sm:$0xff]  ;;  %v2630_v52 = vmul.f32 %v12879_v1, %v2598_v24  ;;  %v2957_v35 = vpop.permute.xlu1 %2956 }
 0x40b   : > { %v3404_v63 = vpop.f32.mrf.mxu1  ;;  %v3182_v19 = vpop.f32.mrf.mxu0 }
 0x40c   : > { %v3561_v36 = vadd.f32 %v3403_v33, %v3079_v22  ;;  %v10034_v33 = vpop.eup %6722  ;;  %6738 = vpow2.f32 %v2040_v57 }
 0x40d   : > { %v3407_v34 = vpop.f32.mrf.mxu1  ;;  %v3184_v58 = vpop.f32.mrf.mxu0  ;;  %2976 = vperm.xlu1 %6436, %v10001_v62   ;;  %6740 = vpow2.f32 %v2030_v39  ;;  %v12886_v39 = vld [vmem:[#allocation344_spill] sm:$0xff] }
 0x40e   : > { %3593 = vst.msk [vmem:[#allocation4] sm:$0xff] %vm590_vm2, %v3561_v36  ;;  %v3408_v51 = vadd.f32 %v3407_v34, %v3182_v19  ;;  %v10040_v45 = vpop.eup %6724  ;;  %v3083_v36 = vmul.f32 %v2942_v5, %v2891_v50  ;;  %v12872_v34 = vsub.f32 %v12870_v12, %v12871_v31  ;;  %v12883_v50 = vld [vmem:[#allocation205_spill] sm:$0xff]  ;;  %v12888_v12 = vld [vmem:[#allocation335_spill] sm:$0xff] }
 0x40f   : > { %v3409_v27 = vpop.f32.mrf.mxu1  ;;  %v3187_v20 = vpop.f32.mrf.mxu0 }
 0x410   : > { %v3562_v25 = vadd.f32 %v3408_v51, %v3080_v37  ;;  %v2044_v58 = vmul.f32 1.442695, %v12872_v34  ;;  %v2892_v37 = vld [vmem:[#allocation4 + $0x28] sm:$0xff]  ;;  %v10047_v56 = vpop.eup %6726  ;;  %v12873_v27 = vld [vmem:[#allocation320_spill] sm:$0xff] }
 0x411   : > { %v3412_v53 = vpop.f32.mrf.mxu1  ;;  %v3189_v38 = vpop.f32.mrf.mxu0  ;;  %2986 = vperm.xlu1 %6436, %v10011_v16   ;;  %v3084_v41 = vmul.f32 %v2947_v15, %v2892_v37  ;;  %v2601_v15 = vld [vmem:[#allocation3 + $0x18] sm:$0xff] }
 0x412   : > { %3594 = vst.msk [vmem:[#allocation4 + $0x8] sm:$0xff] %vm590_vm2, %v3562_v25  ;;  %v3413_v61 = vadd.f32 %v3412_v53, %v3187_v20  ;;  %v12874_v20 = vld [vmem:[#allocation322_spill] sm:$0xff]  ;;  %v10055_v13 = vpop.eup %6728  ;;  %6742 = vpow2.f32 %v2044_v58  ;;  %v12876_v38 = vld [vmem:[#allocation340_spill] sm:$0xff] }
 0x413   : > { %v3414_v54 = vpop.f32.mrf.mxu1  ;;  %v3192_v30 = vpop.f32.mrf.mxu0  ;;  %v12875_v5 = vsub.f32 %v12873_v27, %v12874_v20  ;;  %v2895_v27 = vld [vmem:[#allocation4 + $0x40] sm:$0xff] }
 0x414   : > { %v3563_v48 = vadd.f32 %v3413_v61, %v3081_v7  ;;  %v12877_v7 = vld [vmem:[#allocation341_spill] sm:$0xff]  ;;  %v10063_v54 = vpop.eup %6730 }
 0x415   : > { %v3417_v46 = vpop.f32.mrf.mxu1  ;;  %v3194_v55 = vpop.f32.mrf.mxu0  ;;  %2996 = vperm.xlu1 %6436, %v10021_v28   ;;  %v2034_v25 = vmul.f32 1.442695, %v12875_v5  ;;  %v12878_v59 = vsub.f32 %v12876_v38, %v12877_v7  ;;  %v2603_v38 = vld [vmem:[#allocation3 + $0x28] sm:$0xff]  ;;  %v12891_v7 = vld [vmem:[#allocation338_spill] sm:$0xff] }
 0x416   : > { %3595 = vst.msk [vmem:[#allocation4 + $0x10] sm:$0xff] %vm590_vm2, %v3563_v48  ;;  %v3418_v2 = vadd.f32 %v3417_v46, %v3192_v30  ;;  %v2038_v46 = vmul.f32 1.442695, %v12882_v6  ;;  %v10069_v29 = vpop.eup %6732 }
 0x417   : > { %v3419_v17 = vpop.f32.mrf.mxu1  ;;  %2971 = vperm.xlu0 %6437, %v10027_v11   ;;  %v3197_v22 = vpop.f32.mrf.mxu0  ;;  %v2048_v61 = vmul.f32 1.442695, %v12878_v59  ;;  %6744 = vpow2.f32 %v2034_v25  ;;  %v12890_v25 = vld [vmem:[#allocation202_spill] sm:$0xff]  ;;  %v12892_v59 = vld [vmem:[#allocation339_spill] sm:$0xff] }
 0x418   : > { %v3564_v3 = vadd.f32 %v3418_v2, %v3082_v40  ;;  %v12884_v17 = vld [vmem:[#allocation206_spill] sm:$0xff] }
 0x419   : > { %v3422_v63 = vpop.f32.mrf.mxu1  ;;  %v3199_v19 = vpop.f32.mrf.mxu0  ;;  %3006 = vperm.xlu1 %6436, %v10034_v33   ;;  %6746 = vpow2.f32 %v2048_v61  ;;  %v12893_v61 = vsub.f32 %v12891_v7, %v12892_v59 }
 0x41a   : > { %3596 = vst.msk [vmem:[#allocation4 + $0x18] sm:$0xff] %vm590_vm2, %v3564_v3  ;;  %v3423_v60 = vadd.f32 %v3422_v63, %v3197_v22  ;;  %v12885_v22 = vsub.f32 %v12883_v50, %v12884_v17  ;;  %v2632_v63 = vmul.f32 %v12886_v39, %v2600_v42  ;;  %v10078_v19 = vpop.eup %6734  ;;  %6748 = vpow2.f32 %v2038_v46  ;;  %v12894_v46 = vld [vmem:[#allocation207_spill] sm:$0xff] }
 0x41b   : > { %v3424_v51 = vpop.f32.mrf.mxu1  ;;  %2981 = vperm.xlu0 %6437, %v10040_v45   ;;  %v3202_v23 = vpop.f32.mrf.mxu0  ;;  %v2046_v26 = vmul.f32 1.442695, %v12893_v61 }
 0x41c   : > { %v3565_v47 = vadd.f32 %v3423_v60, %v3083_v36  ;;  %v2052_v3 = vmul.f32 1.442695, %v12885_v22  ;;  %v12887_v60 = vld [vmem:[#allocation334_spill] sm:$0xff] }
 0x41d   : > { %v3427_v49 = vpop.f32.mrf.mxu1  ;;  %v3204_v9 = vpop.f32.mrf.mxu0  ;;  %3016 = vperm.xlu1 %6436, %v10047_v56   ;;  %v12889_v31 = vsub.f32 %v12887_v60, %v12888_v12 }
 0x41e   : > { %3597 = vst.msk [vmem:[#allocation4 + $0x20] sm:$0xff] %vm590_vm2, %v3565_v47  ;;  %v3428_v53 = vadd.f32 %v3427_v49, %v3202_v23  ;;  %v10084_v23 = vpop.eup %6736  ;;  %v3086_v47 = vmul.f32 %v2957_v35, %v2894_v4  ;;  %6750 = vpow2.f32 %v2052_v3  ;;  %v2633_v49 = vmul.f32 %v12890_v25, %v2601_v15  ;;  %v2605_v35 = vld [vmem:[#allocation3 + $0x38] sm:$0xff] }
 0x41f   : > { %v3429_v44 = vpop.f32.mrf.mxu1  ;;  %2991 = vperm.xlu0 %6437, %v10055_v13   ;;  %v3207_v21 = vpop.f32.mrf.mxu0  ;;  %v2042_v34 = vmul.f32 1.442695, %v12889_v31 }
 0x420   : > { %v3566_v30 = vadd.f32 %v3428_v53, %v3084_v41  ;;  %v2666_v48 = vpop.xlane.xlu0 %2665  ;;  %v10090_v9 = vpop.eup %6738 }
 0x421   : > { %v3432_v55 = vpop.f32.mrf.mxu1  ;;  %v2822_v40 = vadd.f32 %v2666_v48, %v2630_v52  ;;  %v3209_v2 = vpop.f32.mrf.mxu0  ;;  %3026 = vperm.xlu1 %6436, %v10063_v54   ;;  %6752 = vpow2.f32 %v2042_v34 }
 0x422   : > { %3598 = vst.msk [vmem:[#allocation4 + $0x28] sm:$0xff] %vm590_vm2, %v3566_v30  ;;  %v3433_v57 = vadd.f32 %v3432_v55, %v3207_v21  ;;  %v10096_v52 = vpop.eup %6740  ;;  %v3087_v30 = vmul.f32 %v10049_v0, %v2895_v27  ;;  %v2967_v48 = vpop.permute.xlu1 %2966  ;;  %v2635_v55 = vmul.f32 %v12894_v46, %v2603_v38  ;;  %6754 = vpow2.f32 %v2046_v26  ;;  %v12895_v0 = vld [vmem:[#allocation213_spill] sm:$0xff]  ;;  %v12900_v38 = vld [vmem:[#allocation224_spill] sm:$0xff]  ;;  %v12901_v26 = vld [vmem:[#allocation203_spill] sm:$0xff] }
 0x423   : > { %2855 = vst.msk [vmem:[#allocation3] sm:$0xff] %vm2854_vm3, %v2822_v40  ;;  %v3434_v43 = vpop.f32.mrf.mxu1  ;;  %3001 = vperm.xlu0 %6437, %v10069_v29   ;;  %v3212_v10 = vpop.f32.mrf.mxu0  ;;  %v3088_v39 = vmul.f32 %v2967_v48, %v2896_v18  ;;  %v2604_v18 = vld [vmem:[#allocation3 + $0x30] sm:$0xff] }
 0x424   : > { %v3567_v14 = vadd.f32 %v3433_v57, %v3085_v8  ;;  %v2676_v36 = vpop.xlane.xlu0 %2675  ;;  %v10103_v40 = vpop.eup %6742  ;;  %v12896_v57 = vld [vmem:[#allocation214_spill] sm:$0xff]  ;;  %v2599_v43 = vld [vmem:[#allocation3 + $0x8] sm:$0xff] }
 0x425   : > { %v3437_v58 = vpop.f32.mrf.mxu1  ;;  %v2824_v37 = vadd.f32 %v2676_v36, %v2632_v63  ;;  %v3214_v51 = vpop.f32.mrf.mxu0  ;;  %3036 = vperm.xlu1 %6436, %v10078_v19   ;;  %v12897_v50 = vsub.f32 %v12895_v0, %v12896_v57  ;;  %v12898_v36 = vld [vmem:[#allocation223_spill] sm:$0xff]  ;;  %v12902_v0 = vld [vmem:[#allocation204_spill] sm:$0xff] }
 0x426   : > { %3599 = vst.msk [vmem:[#allocation4 + $0x30] sm:$0xff] %vm590_vm2, %v3567_v14  ;;  %v3438_v24 = vadd.f32 %v3437_v58, %v3212_v10  ;;  %v10109_v10 = vpop.eup %6744  ;;  %v2637_v15 = vmul.f32 %v12898_v36, %v2605_v35  ;;  %v12899_v58 = vld [vmem:[#allocation343_spill] sm:$0xff]  ;;  %v2636_v57 = vmul.f32 %v12902_v0, %v2604_v18  ;;  %v12903_v36 = vld [vmem:[#allocation208_spill] sm:$0xff] }
 0x427   : > { %2857 = vst.msk [vmem:[#allocation3 + $0x10] sm:$0xff] %vm2854_vm3, %v2824_v37  ;;  %v3439_v20 = vpop.f32.mrf.mxu1  ;;  %3011 = vperm.xlu0 %6437, %v10084_v23   ;;  %v3217_v5 = vpop.f32.mrf.mxu0  ;;  %v2050_v17 = vmul.f32 1.442695, %v12897_v50  ;;  %v2631_v37 = vmul.f32 %v12899_v58, %v2599_v43  ;;  %v2607_v51 = vld [vmem:[#allocation3 + $0x48] sm:$0xff] }
 0x428   : > { %v3568_v41 = vadd.f32 %v3438_v24, %v3086_v47  ;;  %v2681_v53 = vpop.xlane.xlu0 %2680  ;;  %v10115_v12 = vpop.eup %6746  ;;  %v2602_v20 = vld [vmem:[#allocation3 + $0x20] sm:$0xff]  ;;  %v2639_v7 = vmul.f32 %v12900_v38, %v2607_v51 }
 0x429   : > { %v3442_v44 = vpop.f32.mrf.mxu1  ;;  %v2825_v21 = vadd.f32 %v2681_v53, %v2633_v49  ;;  %v3219_v1 = vpop.f32.mrf.mxu0  ;;  %3046 = vperm.xlu1 %6436, %v10090_v9   ;;  %6756 = vpow2.f32 %v2050_v17 }
 0x42a   : > { %3600 = vst.msk [vmem:[#allocation4 + $0x38] sm:$0xff] %vm590_vm2, %v3568_v41  ;;  %v3443_v42 = vadd.f32 %v3442_v44, %v3217_v5  ;;  %v10119_v5 = vpop.eup %6748  ;;  %v2634_v44 = vmul.f32 %v12901_v26, %v2602_v20  ;;  %v2609_v1 = vld [vmem:[#allocation3 + $0x58] sm:$0xff]  ;;  %v2615_v26 = vld [vmem:[#allocation3 + $0x88] sm:$0xff] }
 0x42b   : > { %2858 = vst.msk [vmem:[#allocation3 + $0x18] sm:$0xff] %vm2854_vm3, %v2825_v21  ;;  %v3444_v32 = vpop.f32.mrf.mxu1  ;;  %3021 = vperm.xlu0 %6437, %v10096_v52   ;;  %v3222_v6 = vpop.f32.mrf.mxu0 }
 0x42c   : > { %v3569_v2 = vadd.f32 %v3443_v42, %v3087_v30  ;;  %v2691_v8 = vpop.xlane.xlu0 %2690  ;;  %v10127_v59 = vpop.eup %6750 }
 0x42d   : > { %v3447_v22 = vpop.f32.mrf.mxu1  ;;  %v2827_v3 = vadd.f32 %v2691_v8, %v2635_v55  ;;  %3056 = vperm.xlu1 %6436, %v10103_v40   ;;  %v3224_v4 = vpop.f32.mrf.mxu0  ;;  %v2641_v8 = vmul.f32 %v10001_v62, %v2609_v1 }
 0x42e   : > { %3601 = vst.msk [vmem:[#allocation4 + $0x40] sm:$0xff] %vm590_vm2, %v3569_v2  ;;  %v3448_v63 = vadd.f32 %v3447_v22, %v3222_v6  ;;  %v10132_v32 = vpop.eup %6752  ;;  %v2611_v22 = vld [vmem:[#allocation3 + $0x68] sm:$0xff] }
 0x42f   : > { %2860 = vst.msk [vmem:[#allocation3 + $0x28] sm:$0xff] %vm2854_vm3, %v2827_v3  ;;  %3031 = vperm.xlu0 %6437, %v10109_v10   ;;  %v3449_v14 = vpop.f32.mrf.mxu1  ;;  %v3227_v60 = vpop.f32.mrf.mxu0  ;;  %v2606_v3 = vld [vmem:[#allocation3 + $0x40] sm:$0xff] }
 0x430   : > { %v3570_v31 = vadd.f32 %v3448_v63, %v3088_v39  ;;  %v2701_v34 = vpop.xlane.xlu0 %2700  ;;  %v10141_v4 = vpop.eup %6754  ;;  %v2643_v14 = vmul.f32 %v10011_v16, %v2611_v22  ;;  %v2619_v22 = vld [vmem:[#allocation3 + $0xa8] sm:$0xff] }
 0x431   : > { %v2829_v47 = vadd.f32 %v2701_v34, %v2637_v15  ;;  %v2671_v24 = vpop.xlane.xlu1 %2670  ;;  %v3452_v27 = vpop.f32.mrf.mxu1  ;;  %3066 = vperm.xlu1 %6436, %v10115_v12   ;;  %v2638_v15 = vmul.f32 %v12903_v36, %v2606_v3  ;;  %v2614_v3 = vld [vmem:[#allocation3 + $0x80] sm:$0xff] }
 0x432   : > { %3602 = vst.msk [vmem:[#allocation4 + $0x48] sm:$0xff] %vm590_vm2, %v3570_v31  ;;  %v2823_v25 = vadd.f32 %v2671_v24, %v2631_v37  ;;  %v10122_v49 = vadd.f32 %v3452_v27, %v3227_v60  ;;  %v3229_v41 = vpop.f32.mrf.mxu0  ;;  %v2613_v24 = vld [vmem:[#allocation3 + $0x78] sm:$0xff]  ;;  %v2608_v27 = vld [vmem:[#allocation3 + $0x50] sm:$0xff] }
 0x433   : > { %2862 = vst.msk [vmem:[#allocation3 + $0x38] sm:$0xff] %vm2854_vm3, %v2829_v47  ;;  %3041 = vperm.xlu0 %6437, %v10119_v5   ;;  %v3454_v53 = vpop.f32.mrf.mxu1  ;;  %v2645_v41 = vmul.f32 %v10021_v28, %v2613_v24 }
 0x434   : > { %2856 = vst.msk [vmem:[#allocation3 + $0x8] sm:$0xff] %vm2854_vm3, %v2823_v25  ;;  %v2711_v61 = vpop.xlane.xlu0 %2710  ;;  %v3232_v21 = vpop.f32.mrf.mxu0  ;;  %v2640_v53 = vmul.f32 %v10027_v11, %v2608_v27 }
 0x435   : > { %v2831_v30 = vadd.f32 %v2711_v61, %v2639_v7  ;;  %v2686_v48 = vpop.xlane.xlu1 %2685  ;;  %v3457_v42 = vpop.f32.mrf.mxu1  ;;  %3076 = vperm.xlu1 %6436, %v10127_v59  }
 0x436   : > { %v2826_v6 = vadd.f32 %v2686_v48, %v2634_v44  ;;  %v10134_v46 = vadd.f32 %v3457_v42, %v3232_v21  ;;  %v3234_v55 = vpop.f32.mrf.mxu0  ;;  %v10150_v58 = vpop.eup %6756  ;;  %v2610_v44 = vld [vmem:[#allocation3 + $0x60] sm:$0xff]  ;;  %v2647_v48 = vmul.f32 %v10034_v33, %v2615_v26 }
 0x437   : > { %2864 = vst.msk [vmem:[#allocation3 + $0x48] sm:$0xff] %vm2854_vm3, %v2831_v30  ;;  %3051 = vperm.xlu0 %6437, %v10132_v32   ;;  %v3459_v2 = vpop.f32.mrf.mxu1  ;;  %v2642_v42 = vmul.f32 %v10040_v45, %v2610_v44  ;;  %v2617_v55 = vld [vmem:[#allocation3 + $0x98] sm:$0xff]  ;;  %v2618_v26 = vld [vmem:[#allocation3 + $0xa0] sm:$0xff] }
 0x438   : > { %2859 = vst.msk [vmem:[#allocation3 + $0x20] sm:$0xff] %vm2854_vm3, %v2826_v6  ;;  %v2721_v35 = vpop.xlane.xlu0 %2720  ;;  %v2612_v2 = vld [vmem:[#allocation3 + $0x70] sm:$0xff] }
 0x439   : > { %v2833_v50 = vadd.f32 %v2721_v35, %v2641_v8  ;;  %v2696_v17 = vpop.xlane.xlu1 %2695 }
 0x43a   : > { %v2828_v43 = vadd.f32 %v2696_v17, %v2636_v57  ;;  %v3237_v39 = vpop.f32.mrf.mxu0  ;;  %v2649_v57 = vmul.f32 %v10047_v56, %v2617_v55  ;;  %v2651_v56 = vmul.f32 %v10063_v54, %v2619_v22 }
 0x43b   : > { %2866 = vst.msk [vmem:[#allocation3 + $0x58] sm:$0xff] %vm2854_vm3, %v2833_v50  ;;  %3061 = vperm.xlu0 %6437, %v10141_v4   ;;  %v2644_v50 = vmul.f32 %v10055_v13, %v2612_v2  ;;  %v2646_v13 = vmul.f32 %v10069_v29, %v2614_v3 }
 0x43c   : > { %2861 = vst.msk [vmem:[#allocation3 + $0x30] sm:$0xff] %vm2854_vm3, %v2828_v43  ;;  %v3462_v62 = vpop.f32.mrf.mxu1  ;;  %v3239_v63 = vpop.f32.mrf.mxu0 }
 0x43d   : > { %v10148_v60 = vadd.f32 %v3462_v62, %v3237_v39  ;;  %v2731_v31 = vpop.xlane.xlu0 %2730  ;;  %v2706_v34 = vpop.xlane.xlu1 %2705 }
 0x43e   : > { %v3464_v37 = vpop.f32.mrf.mxu1  ;;  %v2835_v51 = vadd.f32 %v2731_v31, %v2643_v14  ;;  %v2830_v47 = vadd.f32 %v2706_v34, %v2638_v15 }
 0x43f   : > { %v3242_v20 = vpop.f32.mrf.mxu0  ;;  %3071 = vperm.xlu0 %6437, %v10150_v58   ;;  %v2621_v37 = vld [vmem:[#allocation3 + $0xb8] sm:$0xff] }
 0x440   : > { %2868 = vst.msk [vmem:[#allocation3 + $0x68] sm:$0xff] %vm2854_vm3, %v2835_v51  ;;  %2863 = vst.msk [vmem:[#allocation3 + $0x40] sm:$0xff] %vm2854_vm3, %v2830_v47  ;;  %v2616_v51 = vld [vmem:[#allocation3 + $0x90] sm:$0xff]  ;;  %v2653_v54 = vmul.f32 %v10078_v19, %v2621_v37 }
 0x441   : > { %v3467_v16 = vpop.f32.mrf.mxu1  ;;  %v3244_v25 = vpop.f32.mrf.mxu0  ;;  %v2648_v29 = vmul.f32 %v10084_v23, %v2616_v51  ;;  %v2650_v23 = vmul.f32 %v10096_v52, %v2618_v26  ;;  %v2626_v51 = vld [vmem:[#allocation3 + $0xe0] sm:$0xff] }
 0x442   : > { %v10157_v38 = vadd.f32 %v3467_v16, %v3242_v20  ;;  %v2741_v7 = vpop.xlane.xlu0 %2740  ;;  %v2716_v61 = vpop.xlane.xlu1 %2715 }
 0x443   : > { %v3469_v21 = vpop.f32.mrf.mxu1  ;;  %v2837_v1 = vadd.f32 %v2741_v7, %v2645_v41  ;;  %v2832_v30 = vadd.f32 %v2716_v61, %v2640_v53  ;;  %v2623_v61 = vld [vmem:[#allocation3 + $0xc8] sm:$0xff] }
 0x444   : > { %v2655_v19 = vmul.f32 %v10090_v9, %v2623_v61  ;;  %v2627_v9 = vld [vmem:[#allocation3 + $0xe8] sm:$0xff] }
 0x445   : > { %2870 = vst.msk [vmem:[#allocation3 + $0x78] sm:$0xff] %vm2854_vm3, %v2837_v1  ;;  %2865 = vst.msk [vmem:[#allocation3 + $0x50] sm:$0xff] %vm2854_vm3, %v2832_v30 }
 0x446   : > { %v2751_v28 = vpop.xlane.xlu0 %2750  ;;  %v2726_v18 = vpop.xlane.xlu1 %2725 }
 0x447   : > { %v2839_v11 = vadd.f32 %v2751_v28, %v2647_v48  ;;  %v2834_v6 = vadd.f32 %v2726_v18, %v2642_v42  ;;  %v3247_v8 = vpop.f32.mrf.mxu0 }
 0x448   : > { %v3472_v35 = vpop.f32.mrf.mxu1 }
 0x449   : > { %2872 = vst.msk [vmem:[#allocation3 + $0x88] sm:$0xff] %vm2854_vm3, %v2839_v11  ;;  %2867 = vst.msk [vmem:[#allocation3 + $0x60] sm:$0xff] %vm2854_vm3, %v2834_v6  ;;  %v3249_v0 = vpop.f32.mrf.mxu0  ;;  %v10167_v33 = vadd.f32 %v3472_v35, %v3247_v8  ;;  %v2625_v11 = vld [vmem:[#allocation3 + $0xd8] sm:$0xff]  ;;  %v2620_v6 = vld [vmem:[#allocation3 + $0xb0] sm:$0xff] }
 0x44a   : > { %v2761_v45 = vpop.xlane.xlu0 %2760  ;;  %v2736_v17 = vpop.xlane.xlu1 %2735  ;;  %v2657_v35 = vmul.f32 %v10103_v40, %v2625_v11  ;;  %v2652_v0 = vmul.f32 %v10109_v10, %v2620_v6 }
 0x44b   : > { %v3474_v43 = vpop.f32.mrf.mxu1  ;;  %v3252_v39 = vpop.f32.mrf.mxu0  ;;  %v2841_v62 = vadd.f32 %v2761_v45, %v2649_v57  ;;  %v2836_v63 = vadd.f32 %v2736_v17, %v2644_v50  ;;  %v2622_v45 = vld [vmem:[#allocation3 + $0xc0] sm:$0xff] }
 0x44d   : > { %v3477_v14 = vpop.f32.mrf.mxu1  ;;  %v3254_v36 = vpop.f32.mrf.mxu0  ;;  %2874 = vst.msk [vmem:[#allocation3 + $0x98] sm:$0xff] %vm2854_vm3, %v2841_v62  ;;  %2869 = vst.msk [vmem:[#allocation3 + $0x70] sm:$0xff] %vm2854_vm3, %v2836_v63  ;;  %v2654_v62 = vmul.f32 %v10119_v5, %v2622_v45 }
 0x44e   : > { %v10173_v15 = vadd.f32 %v3477_v14, %v3252_v39  ;;  %v2771_v31 = vpop.xlane.xlu0 %2770  ;;  %v2746_v34 = vpop.xlane.xlu1 %2745  ;;  %v2659_v39 = vmul.f32 %v10115_v12, %v2627_v9  ;;  %v2624_v14 = vld [vmem:[#allocation3 + $0xd0] sm:$0xff] }
 0x44f   : > { %v3479_v47 = vpop.f32.mrf.mxu1  ;;  %v3257_v24 = vpop.f32.mrf.mxu0  ;;  %v2843_v27 = vadd.f32 %v2771_v31, %v2651_v56  ;;  %v2838_v20 = vadd.f32 %v2746_v34, %v2646_v13  ;;  %v2656_v12 = vmul.f32 %v10132_v32, %v2624_v14 }
 0x451   : > { %v3482_v16 = vpop.f32.mrf.mxu1  ;;  %v3259_v25 = vpop.f32.mrf.mxu0  ;;  %2876 = vst.msk [vmem:[#allocation3 + $0xa8] sm:$0xff] %vm2854_vm3, %v2843_v27  ;;  %2871 = vst.msk [vmem:[#allocation3 + $0x80] sm:$0xff] %vm2854_vm3, %v2838_v20 }
 0x452   : > { %v10179_v41 = vadd.f32 %v3482_v16, %v3257_v24  ;;  %v2781_v53 = vpop.xlane.xlu0 %2780  ;;  %v2756_v7 = vpop.xlane.xlu1 %2755  ;;  %v2658_v25 = vmul.f32 %v10141_v4, %v2626_v51 }
 0x453   : > { %v3484_v44 = vpop.f32.mrf.mxu1  ;;  %v10181_v21 = vpop.f32.mrf.mxu0  ;;  %v2845_v1 = vadd.f32 %v2781_v53, %v2653_v54  ;;  %v2840_v30 = vadd.f32 %v2756_v7, %v2648_v29 }
 0x455   : > { %v10183_v48 = vpop.f32.mrf.mxu1  ;;  %v3264_v42 = vpop.f32.mrf.mxu0  ;;  %2878 = vst.msk [vmem:[#allocation3 + $0xb8] sm:$0xff] %vm2854_vm3, %v2845_v1  ;;  %2873 = vst.msk [vmem:[#allocation3 + $0x90] sm:$0xff] %vm2854_vm3, %v2840_v30 }
 0x456   : > { %v2791_v28 = vpop.xlane.xlu0 %2790  ;;  %v2766_v18 = vpop.xlane.xlu1 %2765 }
 0x457   : > { %v3489_v55 = vpop.f32.mrf.mxu1  ;;  %v2847_v2 = vadd.f32 %v2791_v28, %v2655_v19  ;;  %v2842_v8 = vadd.f32 %v2766_v18, %v2650_v23 }
 0x458   : > { %v3267_v52 = vpop.f32.mrf.mxu0 }
 0x459   : > { %2880 = vst.msk [vmem:[#allocation3 + $0xc8] sm:$0xff] %vm2854_vm3, %v2847_v2  ;;  %2875 = vst.msk [vmem:[#allocation3 + $0xa0] sm:$0xff] %vm2854_vm3, %v2842_v8 }
 0x45a   : > { %v2801_v57 = vpop.xlane.xlu0 %2800  ;;  %v2776_v50 = vpop.xlane.xlu1 %2775 }
 0x45b   : > { %v2849_v17 = vadd.f32 %v2801_v57, %v2657_v35  ;;  %v2844_v22 = vadd.f32 %v2776_v50, %v2652_v0  ;;  %v3492_v3 = vpop.f32.mrf.mxu1  ;;  %v3269_v43 = vpop.f32.mrf.mxu0 }
 0x45c   : > { %v10197_v40 = vadd.f32 %v3492_v3, %v3267_v52 }
 0x45d   : > { %2882 = vst.msk [vmem:[#allocation3 + $0xd8] sm:$0xff] %vm2854_vm3, %v2849_v17  ;;  %2877 = vst.msk [vmem:[#allocation3 + $0xb0] sm:$0xff] %vm2854_vm3, %v2844_v22  ;;  %v3494_v36 = vpop.f32.mrf.mxu1  ;;  %v10199_v56 = vpop.f32.mrf.mxu0  ;;  %v2628_v22 = vld [vmem:[#allocation3 + $0xf0] sm:$0xff] }
 0x45e   : > { %v2811_v10 = vpop.xlane.xlu0 %2810  ;;  %v2786_v63 = vpop.xlane.xlu1 %2785 }
 0x45f   : > { %v2851_v13 = vadd.f32 %v2811_v10, %v2659_v39  ;;  %v2846_v31 = vadd.f32 %v2786_v63, %v2654_v62  ;;  %v10201_v34 = vpop.f32.mrf.mxu1  ;;  %v3274_v37 = vpop.f32.mrf.mxu0  ;;  %v2660_v10 = vmul.f32 %v10150_v58, %v2628_v22 }
 0x460   : > { %v2629_v37 = vld [vmem:[#allocation3 + $0xf8] sm:$0xff] }
 0x461   : > { %2884 = vst.msk [vmem:[#allocation3 + $0xe8] sm:$0xff] %vm2854_vm3, %v2851_v13  ;;  %2879 = vst.msk [vmem:[#allocation3 + $0xc0] sm:$0xff] %vm2854_vm3, %v2846_v31  ;;  %v3499_v47 = vpop.f32.mrf.mxu1  ;;  %v3277_v24 = vpop.f32.mrf.mxu0  ;;  %v2898_v31 = vld [vmem:[#allocation4 + $0x58] sm:$0xff] }
 0x462   : > { %v2796_v5 = vpop.xlane.xlu1 %2795 }
 0x463   : > { %v2848_v27 = vadd.f32 %v2796_v5, %v2656_v12  ;;  %v3502_v20 = vpop.f32.mrf.mxu1  ;;  %v3279_v16 = vpop.f32.mrf.mxu0 }
 0x464   : > { %v10208_v54 = vadd.f32 %v3502_v20, %v3277_v24  ;;  %v2661_v20 = vmul.f32 %v10127_v59, %v2629_v37  ;;  %v2900_v16 = vld [vmem:[#allocation4 + $0x68] sm:$0xff] }
 0x465   : > { %2881 = vst.msk [vmem:[#allocation3 + $0xd0] sm:$0xff] %vm2854_vm3, %v2848_v27  ;;  %v3504_v53 = vpop.f32.mrf.mxu1  ;;  %v10210_v7 = vpop.f32.mrf.mxu0 }
 0x466   : > { %v2806_v29 = vpop.xlane.xlu1 %2805 }
 0x467   : > { %v2850_v61 = vadd.f32 %v2806_v29, %v2658_v25  ;;  %v10212_v26 = vpop.f32.mrf.mxu1  ;;  %v3284_v32 = vpop.f32.mrf.mxu0 }
 0x469   : > { %2883 = vst.msk [vmem:[#allocation3 + $0xe0] sm:$0xff] %vm2854_vm3, %v2850_v61  ;;  %v3509_v44 = vpop.f32.mrf.mxu1  ;;  %v10215_v1 = vpop.f32.mrf.mxu0 }
 0x46a   : > { %v2902_v44 = vld [vmem:[#allocation4 + $0x78] sm:$0xff] }
 0x46b   : > { %v10217_v30 = vpop.f32.mrf.mxu1  ;;  %v3289_v42 = vpop.f32.mrf.mxu0 }
 0x46d   : > { %v3514_v19 = vpop.f32.mrf.mxu1  ;;  %v10219_v4 = vpop.f32.mrf.mxu0 }
 0x46e   : > { %v2897_v19 = vld [vmem:[#allocation4 + $0x50] sm:$0xff] }
 0x46f   : > { %v10221_v23 = vpop.f32.mrf.mxu1  ;;  %v3294_v28 = vpop.f32.mrf.mxu0 }
 0x471   : > { %v3519_v18 = vpop.f32.mrf.mxu1  ;;  %v10223_v11 = vpop.f32.mrf.mxu0 }
 0x473   : > { %v10225_v6 = vpop.f32.mrf.mxu1  ;;  %v3299_v55 = vpop.f32.mrf.mxu0 }
 0x475   : > { %v3524_v2 = vpop.f32.mrf.mxu1  ;;  %v10227_v8 = vpop.f32.mrf.mxu0 }
 0x476   : > { %v2904_v2 = vld [vmem:[#allocation4 + $0x88] sm:$0xff] }
 0x477   : > { %v10229_v35 = vpop.f32.mrf.mxu1  ;;  %v3304_v0 = vpop.f32.mrf.mxu0 }
 0x478   : > { %v2899_v0 = vld [vmem:[#allocation4 + $0x60] sm:$0xff] }
 0x479   : > { %v3529_v57 = vpop.f32.mrf.mxu1  ;;  %v10231_v50 = vpop.f32.mrf.mxu0 }
 0x47b   : > { %v10233_v9 = vpop.f32.mrf.mxu1  ;;  %v3309_v45 = vpop.f32.mrf.mxu0 }
 0x47d   : > { %v3534_v52 = vpop.f32.mrf.mxu1  ;;  %v10235_v17 = vpop.f32.mrf.mxu0 }
 0x47e   : > { %v3488_v52 = vadd.f32 %v10183_v48, %v10181_v21 }
 0x47f   : > { %v10237_v3 = vpop.f32.mrf.mxu1  ;;  %v3314_v43 = vpop.f32.mrf.mxu0 }
 0x481   : > { %v3539_v39 = vpop.f32.mrf.mxu1  ;;  %v10239_v62 = vpop.f32.mrf.mxu0 }
 0x482   : > { %v2906_v39 = vld [vmem:[#allocation4 + $0x98] sm:$0xff] }
 0x483   : > { %v10242_v14 = vpop.f32.mrf.mxu1  ;;  %v3319_v36 = vpop.f32.mrf.mxu0 }
 0x485   : > { %v2816_v63 = vpop.xlane.xlu1 %2815  ;;  %v3544_v12 = vpop.f32.mrf.mxu1 }
 0x486   : > { %v2852_v13 = vadd.f32 %v2816_v63, %v2660_v10  ;;  %v10244_v5 = vpop.f32.mrf.mxu0  ;;  %v2901_v63 = vld [vmem:[#allocation4 + $0x70] sm:$0xff]  ;;  %v2903_v12 = vld [vmem:[#allocation4 + $0x80] sm:$0xff] }
 0x487   : > { %v10247_v47 = vpop.f32.mrf.mxu1 }
 0x488   : > { %2885 = vst.msk [vmem:[#allocation3 + $0xf0] sm:$0xff] %vm2854_vm3, %v2852_v13  ;;  %v3324_v24 = vpop.f32.mrf.mxu0 }
 0x489   : > { %v2977_v51 = vpop.permute.xlu1 %2976  ;;  %v3549_v25 = vpop.f32.mrf.mxu1 }
 0x48a   : > { %v3090_v27 = vmul.f32 %v2977_v51, %v2898_v31  ;;  %v2821_v58 = vpop.xlane.xlu0 %2820  ;;  %v2908_v31 = vld [vmem:[#allocation4 + $0xa8] sm:$0xff] }
 0x48b   : > { %v2853_v53 = vadd.f32 %v2821_v58, %v2661_v20  ;;  %v2910_v20 = vld [vmem:[#allocation4 + $0xb8] sm:$0xff] }
 0x48c   : > { %v3572_v29 = vadd.f32 %v10134_v46, %v3090_v27 }
 0x48d   : > { %v2987_v61 = vpop.permute.xlu1 %2986  ;;  %2886 = vst.msk [vmem:[#allocation3 + $0xf8] sm:$0xff] %vm2854_vm3, %v2853_v53 }
 0x48e   : > { %3604 = vst.msk [vmem:[#allocation4 + $0x58] sm:$0xff] %vm590_vm2, %v3572_v29  ;;  %v3092_v32 = vmul.f32 %v2987_v61, %v2900_v16  ;;  %v2905_v16 = vld [vmem:[#allocation4 + $0x90] sm:$0xff]  ;;  %v2912_v61 = vld [vmem:[#allocation4 + $0xc8] sm:$0xff] }
 0x490   : > { %v3574_v42 = vadd.f32 %v10157_v38, %v3092_v32 }
 0x491   : > { %v2997_v28 = vpop.permute.xlu1 %2996 }
 0x492   : > { %3606 = vst.msk [vmem:[#allocation4 + $0x68] sm:$0xff] %vm590_vm2, %v3574_v42  ;;  %v3094_v59 = vmul.f32 %v2997_v28, %v2902_v44  ;;  %v2972_v18 = vpop.permute.xlu0 %2971  ;;  %v2907_v44 = vld [vmem:[#allocation4 + $0xa0] sm:$0xff] }
 0x493   : > { %v3089_v55 = vmul.f32 %v2972_v18, %v2897_v19 }
 0x494   : > { %v3576_v46 = vadd.f32 %v10173_v15, %v3094_v59  ;;  %v2914_v59 = vld [vmem:[#allocation4 + $0xd8] sm:$0xff] }
 0x495   : > { %v3571_v57 = vadd.f32 %v10122_v49, %v3089_v55  ;;  %v3007_v45 = vpop.permute.xlu1 %3006  ;;  %v3498_v49 = vadd.f32 %v10201_v34, %v10199_v56  ;;  %v2909_v55 = vld [vmem:[#allocation4 + $0xb0] sm:$0xff] }
 0x496   : > { %3608 = vst.msk [vmem:[#allocation4 + $0x78] sm:$0xff] %vm590_vm2, %v3576_v46  ;;  %v3096_v38 = vmul.f32 %v3007_v45, %v2904_v2  ;;  %v2982_v22 = vpop.permute.xlu0 %2981  ;;  %v2916_v45 = vld [vmem:[#allocation4 + $0xe8] sm:$0xff] }
 0x497   : > { %3603 = vst.msk [vmem:[#allocation4 + $0x50] sm:$0xff] %vm590_vm2, %v3571_v57  ;;  %v3091_v43 = vmul.f32 %v2982_v22, %v2899_v0 }
 0x498   : > { %v3578_v10 = vadd.f32 %v3488_v52, %v3096_v38  ;;  %v2911_v38 = vld [vmem:[#allocation4 + $0xc0] sm:$0xff] }
 0x499   : > { %v3573_v36 = vadd.f32 %v10148_v60, %v3091_v43  ;;  %v3017_v15 = vpop.permute.xlu1 %3016  ;;  %v3508_v60 = vadd.f32 %v10212_v26, %v10210_v7 }
 0x49a   : > { %3610 = vst.msk [vmem:[#allocation4 + $0x88] sm:$0xff] %vm590_vm2, %v3578_v10  ;;  %v3098_v13 = vmul.f32 %v3017_v15, %v2906_v39  ;;  %v2992_v21 = vpop.permute.xlu0 %2991  ;;  %v3523_v39 = vadd.f32 %v10225_v6, %v10223_v11  ;;  %v2913_v10 = vld [vmem:[#allocation4 + $0xd0] sm:$0xff]  ;;  %v3533_v15 = vadd.f32 %v10233_v9, %v10231_v50  ;;  %v3543_v11 = vadd.f32 %v10242_v14, %v10239_v62 }
 0x49b   : > { %3605 = vst.msk [vmem:[#allocation4 + $0x60] sm:$0xff] %vm590_vm2, %v3573_v36  ;;  %v3093_v48 = vmul.f32 %v2992_v21, %v2901_v63 }
 0x49c   : > { %v3580_v37 = vadd.f32 %v3498_v49, %v3098_v13 }
 0x49d   : > { %v3575_v51 = vadd.f32 %v10167_v33, %v3093_v48  ;;  %v3027_v24 = vpop.permute.xlu1 %3026  ;;  %v3518_v33 = vadd.f32 %v10221_v23, %v10219_v4  ;;  %v2917_v48 = vld [vmem:[#allocation4 + $0xf0] sm:$0xff] }
 0x49e   : > { %3612 = vst.msk [vmem:[#allocation4 + $0x98] sm:$0xff] %vm590_vm2, %v3580_v37  ;;  %v3100_v27 = vmul.f32 %v3027_v24, %v2908_v31  ;;  %v3002_v56 = vpop.permute.xlu0 %3001 }
 0x49f   : > { %3607 = vst.msk [vmem:[#allocation4 + $0x70] sm:$0xff] %vm590_vm2, %v3575_v51  ;;  %v3095_v34 = vmul.f32 %v3002_v56, %v2903_v12 }
 0x4a0   : > { %v3582_v58 = vadd.f32 %v3508_v60, %v3100_v27  ;;  %v2918_v60 = vld [vmem:[#allocation4 + $0xf8] sm:$0xff] }
 0x4a1   : > { %v3577_v25 = vadd.f32 %v10179_v41, %v3095_v34  ;;  %v3037_v29 = vpop.permute.xlu1 %3036  ;;  %v3528_v41 = vadd.f32 %v10229_v35, %v10227_v8  ;;  %v3513_v35 = vadd.f32 %v10217_v30, %v10215_v1 }
 0x4a2   : > { %3614 = vst.msk [vmem:[#allocation4 + $0xa8] sm:$0xff] %vm590_vm2, %v3582_v58  ;;  %v3102_v53 = vmul.f32 %v3037_v29, %v2910_v20  ;;  %v3012_v7 = vpop.permute.xlu0 %3011 }
 0x4a3   : > { %3609 = vst.msk [vmem:[#allocation4 + $0x80] sm:$0xff] %vm590_vm2, %v3577_v25  ;;  %v3097_v26 = vmul.f32 %v3012_v7, %v2905_v16 }
 0x4a4   : > { %v3584_v32 = vadd.f32 %v3518_v33, %v3102_v53 }
 0x4a5   : > { %v3579_v42 = vadd.f32 %v10197_v40, %v3097_v26  ;;  %v3047_v19 = vpop.permute.xlu1 %3046  ;;  %v3538_v40 = vadd.f32 %v10237_v3, %v10235_v17 }
 0x4a6   : > { %3616 = vst.msk [vmem:[#allocation4 + $0xb8] sm:$0xff] %vm590_vm2, %v3584_v32  ;;  %v3104_v28 = vmul.f32 %v3047_v19, %v2912_v61  ;;  %v3022_v4 = vpop.permute.xlu0 %3021 }
 0x4a7   : > { %3611 = vst.msk [vmem:[#allocation4 + $0x90] sm:$0xff] %vm590_vm2, %v3579_v42  ;;  %v3099_v23 = vmul.f32 %v3022_v4, %v2907_v44 }
 0x4a8   : > { %v3586_v18 = vadd.f32 %v3528_v41, %v3104_v28 }
 0x4a9   : > { %v3581_v2 = vadd.f32 %v10208_v54, %v3099_v23  ;;  %v3057_v46 = vpop.permute.xlu1 %3056  ;;  %v3548_v54 = vadd.f32 %v10247_v47, %v10244_v5  ;;  %v2915_v47 = vld [vmem:[#allocation4 + $0xe0] sm:$0xff] }
 0x4aa   : > { %3618 = vst.msk [vmem:[#allocation4 + $0xc8] sm:$0xff] %vm590_vm2, %v3586_v18  ;;  %v3106_v0 = vmul.f32 %v3057_v46, %v2914_v59  ;;  %v3032_v8 = vpop.permute.xlu0 %3031 }
 0x4ab   : > { %3613 = vst.msk [vmem:[#allocation4 + $0xa0] sm:$0xff] %vm590_vm2, %v3581_v2  ;;  %v3101_v57 = vmul.f32 %v3032_v8, %v2909_v55 }
 0x4ac   : > { %v3588_v52 = vadd.f32 %v3538_v40, %v3106_v0 }
 0x4ad   : > { %v3583_v22 = vadd.f32 %v3513_v35, %v3101_v57  ;;  %v3067_v43 = vpop.permute.xlu1 %3066 }
 0x4ae   : > { %3620 = vst.msk [vmem:[#allocation4 + $0xd8] sm:$0xff] %vm590_vm2, %v3588_v52  ;;  %v3108_v17 = vmul.f32 %v3067_v43, %v2916_v45  ;;  %v3042_v3 = vpop.permute.xlu0 %3041 }
 0x4af   : > { %3615 = vst.msk [vmem:[#allocation4 + $0xb0] sm:$0xff] %vm590_vm2, %v3583_v22  ;;  %v3103_v1 = vmul.f32 %v3042_v3, %v2911_v38 }
 0x4b0   : > { %v3590_v30 = vadd.f32 %v3548_v54, %v3108_v17 }
 0x4b1   : > { %v3585_v63 = vadd.f32 %v3523_v39, %v3103_v1  ;;  %v3077_v27 = vpop.permute.xlu1 %3076 }
 0x4b2   : > { %3622 = vst.msk [vmem:[#allocation4 + $0xe8] sm:$0xff] %vm590_vm2, %v3590_v30  ;;  %v3052_v36 = vpop.permute.xlu0 %3051  ;;  %v3110_v14 = vmul.f32 %v3077_v27, %v2918_v60 }
 0x4b3   : > { %3617 = vst.msk [vmem:[#allocation4 + $0xc0] sm:$0xff] %vm590_vm2, %v3585_v63  ;;  %v3105_v5 = vmul.f32 %v3052_v36, %v2913_v10 }
 0x4b5   : > { %v3587_v49 = vadd.f32 %v3533_v15, %v3105_v5 }
 0x4b6   : > { %v3062_v13 = vpop.permute.xlu0 %3061 }
 0x4b7   : > { %3619 = vst.msk [vmem:[#allocation4 + $0xd0] sm:$0xff] %vm590_vm2, %v3587_v49  ;;  %v3107_v6 = vmul.f32 %v3062_v13, %v2915_v47  ;;  %v3327_v21 = vpop.f32.mrf.mxu0 }
 0x4b9   : > { %v3589_v31 = vadd.f32 %v3543_v11, %v3107_v6  ;;  %v3552_v37 = vpop.f32.mrf.mxu1  ;;  %v3329_v12 = vpop.f32.mrf.mxu0 }
 0x4ba   : > { %v3072_v51 = vpop.permute.xlu0 %3071  ;;  %v3553_v50 = vadd.f32 %v3552_v37, %v3327_v21 }
 0x4bb   : > { %3621 = vst.msk [vmem:[#allocation4 + $0xe0] sm:$0xff] %vm590_vm2, %v3589_v31  ;;  %v3554_v9 = vpop.f32.mrf.mxu1  ;;  %v3109_v24 = vmul.f32 %v3072_v51, %v2917_v48 }
 0x4bc   : > { %v3332_v56 = vpop.f32.mrf.mxu0 }
 0x4bd   : > { %v3591_v34 = vadd.f32 %v3553_v50, %v3109_v24 }
 0x4be   : > { %v3557_v20 = vpop.f32.mrf.mxu1  ;;  %v3334_v62 = vpop.f32.mrf.mxu0 }
 0x4bf   : > { %3623 = vst.msk [vmem:[#allocation4 + $0xf0] sm:$0xff] %vm590_vm2, %v3591_v34  ;;  %v3558_v58 = vadd.f32 %v3557_v20, %v3332_v56 }
 0x4c0   : > { %v3559_v16 = vpop.f32.mrf.mxu1 }
 0x4c1   : > { %v3592_v25 = vadd.f32 %v3558_v58, %v3110_v14 }
 0x4c3   : > { %3624 = vst.msk [vmem:[#allocation4 + $0xf8] sm:$0xff] %vm590_vm2, %v3592_v25 }
 0x4c4 PF: > { %p6188_p13 = scmp.gt.s32.totalorder %s6184_s27, %s7988_s7 }
 0x4c6   : > { %3660 = sbr.rel (%p6188_p13) target bundleno = 1905 (0x771), region = 44 }
 0x4cb   : > { %v12904_v29 = vld [vmem:[#allocation76_spill] sm:$0xff]  ;;  %v12905_v33 = vld [vmem:[#allocation74_spill] sm:$0xff]  ;;  %v12916_v46 = vld [vmem:[#allocation75_spill] sm:$0xff]  ;;  %vm4781_vm12 = vcmask 7168  }
 0x4cc   : > { %v3693_v53 = vmax.f32 %v12905_v33, %v12904_v29  ;;  %v12906_v7 = vld [vmem:[#allocation80_spill] sm:$0xff]  ;;  %v12907_v26 = vld [vmem:[#allocation78_spill] sm:$0xff]  ;;  %v12917_v0 = vld [vmem:[#allocation79_spill] sm:$0xff] }
 0x4cd   : > { %v3698_v61 = vmax.f32 %v12907_v26, %v12906_v7  ;;  %v12908_v32 = vld [vmem:[#allocation84_spill] sm:$0xff]  ;;  %v12909_v44 = vld [vmem:[#allocation82_spill] sm:$0xff]  ;;  %v12918_v35 = vld [vmem:[#allocation83_spill] sm:$0xff] }
 0x4ce   : > { %v3703_v42 = vmax.f32 %v12909_v44, %v12908_v32  ;;  %v12910_v19 = vld [vmem:[#allocation88_spill] sm:$0xff]  ;;  %v12911_v41 = vld [vmem:[#allocation86_spill] sm:$0xff]  ;;  %v3694_v40 = vmax.f32 %v3693_v53, %v12916_v46  ;;  %v12919_v45 = vld [vmem:[#allocation87_spill] sm:$0xff] }
 0x4cf   : > { %v3708_v28 = vmax.f32 %v12911_v41, %v12910_v19  ;;  %v12912_v4 = vld [vmem:[#allocation92_spill] sm:$0xff]  ;;  %v12913_v23 = vld [vmem:[#allocation90_spill] sm:$0xff]  ;;  %v3699_v8 = vmax.f32 %v3698_v61, %v12917_v0  ;;  %v12920_v38 = vld [vmem:[#allocation77_spill] sm:$0xff] }
 0x4d0   : > { %v3713_v59 = vmax.f32 %v12913_v23, %v12912_v4  ;;  %v12914_v18 = vld [vmem:[#allocation96_spill] sm:$0xff]  ;;  %v12915_v55 = vld [vmem:[#allocation94_spill] sm:$0xff]  ;;  %v3704_v57 = vmax.f32 %v3703_v42, %v12918_v35  ;;  %v3695_v22 = vmax.f32 %v3694_v40, %v12920_v38  ;;  %v12921_v43 = vld [vmem:[#allocation85_spill] sm:$0xff] }
 0x4d1   : > { %v3718_v2 = vmax.f32 %v12915_v55, %v12914_v18  ;;  %v3709_v52 = vmax.f32 %v3708_v28, %v12919_v45  ;;  %v12922_v17 = vld [vmem:[#allocation91_spill] sm:$0xff]  ;;  %v12923_v39 = vld [vmem:[#allocation104_spill] sm:$0xff]  ;;  %v12924_v1 = vld [vmem:[#allocation102_spill] sm:$0xff] }
 0x4d2   : > { %v3705_v54 = vmax.f32 %v3704_v57, %v12921_v43  ;;  %v3714_v3 = vmax.f32 %v3713_v59, %v12922_v17  ;;  %v3728_v30 = vmax.f32 %v12924_v1, %v12923_v39  ;;  %v12925_v10 = vld [vmem:[#allocation100_spill] sm:$0xff]  ;;  %v12926_v63 = vld [vmem:[#allocation98_spill] sm:$0xff]  ;;  %3696 = vmax.xlane.f32.xlu0 %v3695_v22  ;;  %v12927_v15 = vld [vmem:[#allocation81_spill] sm:$0xff] }
 0x4d3   : > { %v3723_v36 = vmax.f32 %v12926_v63, %v12925_v10  ;;  %v3700_v5 = vmax.f32 %v3699_v8, %v12927_v15  ;;  %v12928_v47 = vld [vmem:[#allocation89_spill] sm:$0xff]  ;;  %v12929_v13 = vld [vmem:[#allocation95_spill] sm:$0xff]  ;;  %v12934_v9 = vld [vmem:[#allocation112_spill] sm:$0xff] }
 0x4d4   : > { %3706 = vmax.xlane.f32.xlu1 %v3705_v54  ;;  %v3710_v49 = vmax.f32 %v3709_v52, %v12928_v47  ;;  %v3719_v11 = vmax.f32 %v3718_v2, %v12929_v13  ;;  %v12930_v6 = vld [vmem:[#allocation93_spill] sm:$0xff]  ;;  %v12931_v48 = vld [vmem:[#allocation103_spill] sm:$0xff]  ;;  %v12935_v24 = vld [vmem:[#allocation110_spill] sm:$0xff] }
 0x4d5   : > { %v3715_v21 = vmax.f32 %v3714_v3, %v12930_v6  ;;  %v3729_v31 = vmax.f32 %v3728_v30, %v12931_v48  ;;  %v12932_v37 = vld [vmem:[#allocation99_spill] sm:$0xff]  ;;  %v12933_v51 = vld [vmem:[#allocation97_spill] sm:$0xff]  ;;  %v3738_v60 = vmax.f32 %v12935_v24, %v12934_v9  ;;  %v12936_v27 = vld [vmem:[#allocation108_spill] sm:$0xff] }
 0x4d6   : > { %v3724_v12 = vmax.f32 %v3723_v36, %v12932_v37  ;;  %3701 = vmax.xlane.f32.xlu0 %v3700_v5  ;;  %v3720_v50 = vmax.f32 %v3719_v11, %v12933_v51  ;;  %v12937_v56 = vld [vmem:[#allocation106_spill] sm:$0xff]  ;;  %v12938_v20 = vld [vmem:[#allocation105_spill] sm:$0xff]  ;;  %v12939_v14 = vld [vmem:[#allocation120_spill] sm:$0xff] }
 0x4d7   : > { %v3733_v34 = vmax.f32 %v12937_v56, %v12936_v27  ;;  %v3730_v62 = vmax.f32 %v3729_v31, %v12938_v20  ;;  %v12940_v58 = vld [vmem:[#allocation118_spill] sm:$0xff]  ;;  %v12941_v25 = vld [vmem:[#allocation116_spill] sm:$0xff]  ;;  %v12943_v42 = vld [vmem:[#allocation101_spill] sm:$0xff] }
 0x4d8   : > { %3711 = vmax.xlane.f32.xlu1 %v3710_v49  ;;  %v3748_v16 = vmax.f32 %v12940_v58, %v12939_v14  ;;  %v12942_v53 = vld [vmem:[#allocation114_spill] sm:$0xff]  ;;  %v3725_v28 = vmax.f32 %v3724_v12, %v12943_v42  ;;  %v12944_v59 = vld [vmem:[#allocation111_spill] sm:$0xff]  ;;  %v12947_v22 = vld [vmem:[#allocation128_spill] sm:$0xff]  ;;  %v7231_v14 = vmov 0  }
 0x4d9   : > { %v3743_v61 = vmax.f32 %v12942_v53, %v12941_v25  ;;  %v3739_v2 = vmax.f32 %v3738_v60, %v12944_v59  ;;  %v12945_v40 = vld [vmem:[#allocation107_spill] sm:$0xff]  ;;  %v12948_v54 = vld [vmem:[#allocation126_spill] sm:$0xff]  ;;  %v12950_v5 = vld [vmem:[#allocation113_spill] sm:$0xff]  ;;  %6758 = vset.pattern.permute.xlu1 %v7231_v14  ;;  %6759 = vset.pattern.permute.xlu0 %v7231_v14 }
 0x4da   : > { %3716 = vmax.xlane.f32.xlu0 %v3715_v21  ;;  %v3734_v8 = vmax.f32 %v3733_v34, %v12945_v40  ;;  %v12946_v57 = vld [vmem:[#allocation119_spill] sm:$0xff]  ;;  %v3758_v3 = vmax.f32 %v12948_v54, %v12947_v22  ;;  %v12951_v11 = vld [vmem:[#allocation109_spill] sm:$0xff]  ;;  %v12952_v31 = vld [vmem:[#allocation124_spill] sm:$0xff] }
 0x4db   : > { %v3749_v52 = vmax.f32 %v3748_v16, %v12946_v57  ;;  %v12949_v30 = vld [vmem:[#allocation115_spill] sm:$0xff]  ;;  %v3740_v49 = vmax.f32 %v3739_v2, %v12950_v5  ;;  %v12954_v60 = vld [vmem:[#allocation121_spill] sm:$0xff]  ;;  %v12956_v58 = vld [vmem:[#allocation136_spill] sm:$0xff] }
 0x4dc   : > { %3721 = vmax.xlane.f32.xlu1 %v3720_v50  ;;  %v3744_v36 = vmax.f32 %v3743_v61, %v12949_v30  ;;  %v3735_v21 = vmax.f32 %v3734_v8, %v12951_v11  ;;  %v12953_v50 = vld [vmem:[#allocation122_spill] sm:$0xff]  ;;  %v12955_v16 = vld [vmem:[#allocation127_spill] sm:$0xff]  ;;  %v12960_v8 = vld [vmem:[#allocation132_spill] sm:$0xff] }
 0x4dd   : > { %v3753_v12 = vmax.f32 %v12953_v50, %v12952_v31  ;;  %v3750_v34 = vmax.f32 %v3749_v52, %v12954_v60  ;;  %v3759_v57 = vmax.f32 %v3758_v3, %v12955_v16  ;;  %v12957_v22 = vld [vmem:[#allocation134_spill] sm:$0xff]  ;;  %v12962_v31 = vld [vmem:[#allocation129_spill] sm:$0xff]  ;;  %v12963_v53 = vld [vmem:[#allocation135_spill] sm:$0xff] }
 0x4de   : > { %3726 = vmax.xlane.f32.xlu0 %v3725_v28  ;;  %v3768_v54 = vmax.f32 %v12957_v22, %v12956_v58  ;;  %v12959_v28 = vld [vmem:[#allocation123_spill] sm:$0xff]  ;;  %v12961_v30 = vld [vmem:[#allocation130_spill] sm:$0xff]  ;;  %v12964_v5 = vld [vmem:[#allocation144_spill] sm:$0xff] }
 0x4df   : > { %v3754_v2 = vmax.f32 %v3753_v12, %v12959_v28  ;;  %v3763_v25 = vmax.f32 %v12961_v30, %v12960_v8  ;;  %v3760_v50 = vmax.f32 %v3759_v57, %v12962_v31  ;;  %v12965_v52 = vld [vmem:[#allocation142_spill] sm:$0xff]  ;;  %v12966_v3 = vld [vmem:[#allocation125_spill] sm:$0xff]  ;;  %v12968_v58 = vld [vmem:[#allocation140_spill] sm:$0xff] }
 0x4e0   : > { %3731 = vmax.xlane.f32.xlu1 %v3730_v62  ;;  %v12958_v62 = vld [vmem:[#allocation117_spill] sm:$0xff]  ;;  %v3769_v14 = vmax.f32 %v3768_v54, %v12963_v53  ;;  %v3778_v60 = vmax.f32 %v12965_v52, %v12964_v5  ;;  %v12972_v30 = vld [vmem:[#allocation156_spill] sm:$0xff]  ;;  %v12973_v57 = vld [vmem:[#allocation154_spill] sm:$0xff] }
 0x4e1   : > { %v3745_v61 = vmax.f32 %v3744_v36, %v12958_v62  ;;  %v3755_v22 = vmax.f32 %v3754_v2, %v12966_v3  ;;  %v12969_v36 = vld [vmem:[#allocation138_spill] sm:$0xff]  ;;  %v12970_v12 = vld [vmem:[#allocation137_spill] sm:$0xff]  ;;  %v12971_v62 = vld [vmem:[#allocation143_spill] sm:$0xff]  ;;  %v3793_v31 = vmax.f32 %v12973_v57, %v12972_v30 }
 0x4e2   : > { %3736 = vmax.xlane.f32.xlu0 %v3735_v21  ;;  %v3773_v16 = vmax.f32 %v12969_v36, %v12968_v58  ;;  %v3770_v28 = vmax.f32 %v3769_v14, %v12970_v12  ;;  %v3779_v8 = vmax.f32 %v3778_v60, %v12971_v62  ;;  %v12974_v54 = vld [vmem:[#allocation133_spill] sm:$0xff]  ;;  %v12976_v5 = vld [vmem:[#allocation148_spill] sm:$0xff]  ;;  %v12977_v2 = vld [vmem:[#allocation146_spill] sm:$0xff] }
 0x4e3   : > { %v3783_v53 = vmax.f32 %v12977_v2, %v12976_v5  ;;  %v12979_v3 = vld [vmem:[#allocation155_spill] sm:$0xff]  ;;  %v12980_v58 = vld [vmem:[#allocation160_spill] sm:$0xff]  ;;  %v12981_v14 = vld [vmem:[#allocation158_spill] sm:$0xff] }
 0x4e4   : > { %3741 = vmax.xlane.f32.xlu1 %v3740_v49  ;;  %v12967_v49 = vld [vmem:[#allocation131_spill] sm:$0xff]  ;;  %v3794_v36 = vmax.f32 %v3793_v31, %v12979_v3  ;;  %v3798_v12 = vmax.f32 %v12981_v14, %v12980_v58  ;;  %v12982_v60 = vld [vmem:[#allocation141_spill] sm:$0xff]  ;;  %v12984_v30 = vld [vmem:[#allocation152_spill] sm:$0xff] }
 0x4e5   : > { %v3764_v21 = vmax.f32 %v3763_v25, %v12967_v49  ;;  %v12978_v25 = vld [vmem:[#allocation145_spill] sm:$0xff]  ;;  %v12988_v2 = vld [vmem:[#allocation162_spill] sm:$0xff]  ;;  %v12992_v14 = vld [vmem:[#allocation168_spill] sm:$0xff] }
 0x4e6   : > { %3746 = vmax.xlane.f32.xlu0 %v3745_v61  ;;  %v3780_v49 = vmax.f32 %v3779_v8, %v12978_v25  ;;  %v12989_v8 = vld [vmem:[#allocation159_spill] sm:$0xff]  ;;  %v12990_v3 = vld [vmem:[#allocation149_spill] sm:$0xff] }
 0x4e7   : > { %v3765_v52 = vmax.f32 %v3764_v21, %v12974_v54  ;;  %v12985_v21 = vld [vmem:[#allocation150_spill] sm:$0xff]  ;;  %v12987_v54 = vld [vmem:[#allocation164_spill] sm:$0xff]  ;;  %v3799_v31 = vmax.f32 %v3798_v12, %v12989_v8  ;;  %v12998_v12 = vld [vmem:[#allocation167_spill] sm:$0xff] }
 0x4e8   : > { %3751 = vmax.xlane.f32.xlu1 %v3750_v34  ;;  %v12975_v34 = vld [vmem:[#allocation139_spill] sm:$0xff]  ;;  %v3788_v62 = vmax.f32 %v12985_v21, %v12984_v30  ;;  %v3803_v5 = vmax.f32 %v12988_v2, %v12987_v54  ;;  %v12999_v54 = vld [vmem:[#allocation172_spill] sm:$0xff] }
 0x4e9   : > { %v3774_v61 = vmax.f32 %v3773_v16, %v12975_v34  ;;  %v12986_v16 = vld [vmem:[#allocation157_spill] sm:$0xff]  ;;  %v12995_v30 = vld [vmem:[#allocation163_spill] sm:$0xff] }
 0x4ea   : > { %3756 = vmax.xlane.f32.xlu0 %v3755_v22  ;;  %v3795_v34 = vmax.f32 %v3794_v36, %v12986_v16  ;;  %v3804_v21 = vmax.f32 %v3803_v5, %v12995_v30  ;;  %v12996_v36 = vld [vmem:[#allocation153_spill] sm:$0xff] }
 0x4eb   : > { %v3775_v57 = vmax.f32 %v3774_v61, %v12982_v60  ;;  %v12993_v61 = vld [vmem:[#allocation166_spill] sm:$0xff] }
 0x4ec   : > { %3761 = vmax.xlane.f32.xlu1 %v3760_v50  ;;  %v12983_v50 = vld [vmem:[#allocation147_spill] sm:$0xff]  ;;  %v3808_v25 = vmax.f32 %v12993_v61, %v12992_v14 }
 0x4ed   : > { %v3784_v22 = vmax.f32 %v3783_v53, %v12983_v50  ;;  %v12994_v53 = vld [vmem:[#allocation161_spill] sm:$0xff] }
 0x4ee   : > { %3766 = vmax.xlane.f32.xlu0 %v3765_v52  ;;  %v3800_v50 = vmax.f32 %v3799_v31, %v12994_v53  ;;  %v13003_v31 = vld [vmem:[#allocation176_spill] sm:$0xff]  ;;  %v13004_v53 = vld [vmem:[#allocation174_spill] sm:$0xff] }
 0x4ef   : > { %v3785_v58 = vmax.f32 %v3784_v22, %v12990_v3  ;;  %v13000_v22 = vld [vmem:[#allocation170_spill] sm:$0xff]  ;;  %v3818_v5 = vmax.f32 %v13004_v53, %v13003_v31  ;;  %v13014_v31 = vld [vmem:[#allocation183_spill] sm:$0xff]  ;;  %v13015_v53 = vld [vmem:[#allocation188_spill] sm:$0xff] }
 0x4f0   : > { %3771 = vmax.xlane.f32.xlu1 %v3770_v28  ;;  %v12991_v28 = vld [vmem:[#allocation151_spill] sm:$0xff]  ;;  %v3813_v8 = vmax.f32 %v13000_v22, %v12999_v54  ;;  %v13011_v54 = vld [vmem:[#allocation184_spill] sm:$0xff]  ;;  %v10615_v3 = vld [vmem:[#allocation2 + $0x40] sm:$0xff] }
 0x4f1   : > { %v3789_v52 = vmax.f32 %v3788_v62, %v12991_v28  ;;  %v13001_v62 = vld [vmem:[#allocation169_spill] sm:$0xff]  ;;  %13093 = vst [vmem:[#allocation354_spill] sm:$0xff] %v10615_v3  ;;  %v13096_v28 = vld [vmem:[#allocation59_spill] sm:$0xff] }
 0x4f2   : > { %3776 = vmax.xlane.f32.xlu0 %v3775_v57  ;;  %v3809_v57 = vmax.f32 %v3808_v25, %v12998_v12  ;;  %v13009_v12 = vld [vmem:[#allocation177_spill] sm:$0xff] }
 0x4f3   : > { %v3790_v16 = vmax.f32 %v3789_v52, %v12996_v36 }
 0x4f4   : > { %3781 = vmax.xlane.f32.xlu1 %v3780_v49  ;;  %v12997_v49 = vld [vmem:[#allocation165_spill] sm:$0xff]  ;;  %v3810_v14 = vmax.f32 %v3809_v57, %v13001_v62  ;;  %v13012_v57 = vld [vmem:[#allocation182_spill] sm:$0xff] }
 0x4f5   : > { %v3805_v2 = vmax.f32 %v3804_v21, %v12997_v49  ;;  %v13007_v21 = vld [vmem:[#allocation180_spill] sm:$0xff]  ;;  %v13008_v49 = vld [vmem:[#allocation178_spill] sm:$0xff]  ;;  %v3828_v62 = vmax.f32 %v13012_v57, %v13011_v54  ;;  %v13022_v54 = vld [vmem:[#allocation191_spill] sm:$0xff] }
 0x4f6   : > { %3786 = vmax.xlane.f32.xlu0 %v3785_v58  ;;  %v13005_v58 = vld [vmem:[#allocation173_spill] sm:$0xff]  ;;  %v3823_v25 = vmax.f32 %v13008_v49, %v13007_v21  ;;  %v13018_v49 = vld [vmem:[#allocation187_spill] sm:$0xff]  ;;  %v13019_v21 = vld [vmem:[#allocation192_spill] sm:$0xff] }
 0x4f7   : > { %v13088_v57 = vld [vmem:[#allocation61_spill] sm:$0xff] }
 0x4f8   : > { %3796 = vmax.xlane.f32.xlu1 %v3795_v34  ;;  %v13002_v34 = vld [vmem:[#allocation171_spill] sm:$0xff] }
 0x4f9   : > { %v3814_v61 = vmax.f32 %v3813_v8, %v13002_v34  ;;  %v13013_v8 = vld [vmem:[#allocation181_spill] sm:$0xff] }
 0x4fa   : > { %3791 = vmax.xlane.f32.xlu0 %v3790_v16  ;;  %v13010_v16 = vld [vmem:[#allocation179_spill] sm:$0xff] }
 0x4fb   : > { %v3815_v52 = vmax.f32 %v3814_v61, %v13005_v58  ;;  %v13016_v61 = vld [vmem:[#allocation186_spill] sm:$0xff] }
 0x4fc   : > { %3801 = vmax.xlane.f32.xlu1 %v3800_v50  ;;  %v13006_v50 = vld [vmem:[#allocation175_spill] sm:$0xff]  ;;  %v3833_v58 = vmax.f32 %v13016_v61, %v13015_v53  ;;  %v13077_v61 = vld [vmem:[#allocation64_spill] sm:$0xff] }
 0x4fd   : > { %v3819_v30 = vmax.f32 %v3818_v5, %v13006_v50  ;;  %v13017_v5 = vld [vmem:[#allocation185_spill] sm:$0xff]  ;;  %v13079_v53 = vld [vmem:[#allocation31_spill] sm:$0xff] }
 0x4ff   : > { %v3820_v22 = vmax.f32 %v3819_v30, %v13009_v12  ;;  %v13020_v30 = vld [vmem:[#allocation190_spill] sm:$0xff] }
 0x500   : > { %3806 = vmax.xlane.f32.xlu1 %v3805_v2  ;;  %v3824_v2 = vmax.f32 %v3823_v25, %v13010_v16  ;;  %v3838_v12 = vmax.f32 %v13020_v30, %v13019_v21  ;;  %v13021_v25 = vld [vmem:[#allocation189_spill] sm:$0xff]  ;;  %v13081_v21 = vmov 0.0   ;;  %v13083_v30 = vld [vmem:[#allocation30_spill] sm:$0xff] }
 0x502   : > { %v3825_v34 = vmax.f32 %v3824_v2, %v13013_v8  ;;  %v13023_v2 = vld [vmem:[#allocation193_spill] sm:$0xff] }
 0x504   : > { %3811 = vmax.xlane.f32.xlu1 %v3810_v14  ;;  %v3829_v14 = vmax.f32 %v3828_v62, %v13014_v31  ;;  %v12157_v62 = vmov 0.0   ;;  %v10589_v31 = vld [vmem:[#allocation2 + $0x30] sm:$0xff] }
 0x505   : > { %5038 = vmatprep.subr.mxu0 %v12157_v62  ;;  %5263 = vmatprep.subr.mxu1 %v12157_v62  ;;  %13086 = vst [vmem:[#allocation350_spill] sm:$0xff] %v10589_v31 }
 0x506   : > { %v3830_v50 = vmax.f32 %v3829_v14, %v13017_v5  ;;  %v13030_v14 = vld [vmem:[#allocation22_spill] sm:$0xff]  ;;  %v10587_v5 = vld [vmem:[#allocation2 + $0x38] sm:$0xff] }
 0x507   : > { %13085 = vst [vmem:[#allocation349_spill] sm:$0xff] %v10587_v5 }
 0x508   : > { %3816 = vmax.xlane.f32.xlu1 %v3815_v52  ;;  %v3834_v52 = vmax.f32 %v3833_v58, %v13018_v49  ;;  %v13025_v58 = vld [vmem:[#allocation57_spill] sm:$0xff] }
 0x509   : > { %5264 = vmatpush1.msra.mxu1 %v13025_v58  ;;  %v13034_v58 = vld [vmem:[#allocation20_spill] sm:$0xff]  ;;  %v13074_v49 = vld [vmem:[#allocation65_spill] sm:$0xff] }
 0x50a   : > { %v3835_v16 = vmax.f32 %v3834_v52, %v13021_v25  ;;  %5265 = vmatprep.subr.mxu1 %v12157_v62  ;;  %v13031_v52 = vld [vmem:[#allocation54_spill] sm:$0xff]  ;;  %v10563_v25 = vld [vmem:[#allocation2 + $0x28] sm:$0xff] }
 0x50b   : > { %13078 = vst [vmem:[#allocation347_spill] sm:$0xff] %v10563_v25 }
 0x50c   : > { %3821 = vmax.xlane.f32.xlu1 %v3820_v22  ;;  %v3839_v22 = vmax.f32 %v3838_v12, %v13022_v54  ;;  %v13027_v12 = vld [vmem:[#allocation56_spill] sm:$0xff]  ;;  %v13073_v54 = vld [vmem:[#allocation33_spill] sm:$0xff] }
 0x50d   : > { %5266 = vmatpush1.msra.mxu1 %v13027_v12  ;;  %v13036_v12 = vld [vmem:[#allocation19_spill] sm:$0xff] }
 0x50e   : > { %v3840_v8 = vmax.f32 %v3839_v22, %v13023_v2  ;;  %5267 = vmatprep.subr.mxu1 %v12157_v62  ;;  %v13032_v22 = vld [vmem:[#allocation21_spill] sm:$0xff] }
 0x510   : > { %3826 = vmax.xlane.f32.xlu1 %v3825_v34  ;;  %v13024_v34 = vld [vmem:[#allocation25_spill] sm:$0xff] }
 0x511   : > { %5039 = vmatpush1.msra.mxu0 %v13024_v34  ;;  %v13033_v34 = vld [vmem:[#allocation53_spill] sm:$0xff] }
 0x512   : > { %5040 = vmatprep.subr.mxu0 %v12157_v62 }
 0x514   : > { %3831 = vmax.xlane.f32.xlu1 %v3830_v50  ;;  %v13026_v50 = vld [vmem:[#allocation24_spill] sm:$0xff] }
 0x515   : > { %5041 = vmatpush1.msra.mxu0 %v13026_v50  ;;  %v13035_v50 = vld [vmem:[#allocation52_spill] sm:$0xff] }
 0x516   : > { %5042 = vmatprep.subr.mxu0 %v12157_v62 }
 0x518   : > { %3836 = vmax.xlane.f32.xlu1 %v3835_v16  ;;  %v13028_v16 = vld [vmem:[#allocation23_spill] sm:$0xff] }
 0x519   : > { %5043 = vmatpush1.msra.mxu0 %v13028_v16  ;;  %v13037_v16 = vld [vmem:[#allocation51_spill] sm:$0xff] }
 0x51a   : > { %5044 = vmatprep.subr.mxu0 %v12157_v62 }
 0x51b   : > { %5045 = vmatpush1.msra.mxu0 %v13030_v14  ;;  %v13039_v14 = vld [vmem:[#allocation50_spill] sm:$0xff] }
 0x51c   : > { %3841 = vmax.xlane.f32.xlu1 %v3840_v8  ;;  %v13029_v8 = vld [vmem:[#allocation55_spill] sm:$0xff]  ;;  %5046 = vmatprep.subr.mxu0 %v12157_v62 }
 0x51d   : > { %5268 = vmatpush1.msra.mxu1 %v13029_v8  ;;  %5047 = vmatpush1.msra.mxu0 %v13032_v22  ;;  %v13038_v8 = vld [vmem:[#allocation18_spill] sm:$0xff]  ;;  %v13041_v22 = vld [vmem:[#allocation49_spill] sm:$0xff] }
 0x51e   : > { %5269 = vmatprep.subr.mxu1 %v12157_v62  ;;  %5048 = vmatprep.subr.mxu0 %v12157_v62 }
 0x51f   : > { %5270 = vmatpush1.msra.mxu1 %v13031_v52  ;;  %5049 = vmatpush1.msra.mxu0 %v13034_v58  ;;  %v13040_v52 = vld [vmem:[#allocation17_spill] sm:$0xff]  ;;  %v13043_v58 = vld [vmem:[#allocation48_spill] sm:$0xff] }
 0x520   : > { %5271 = vmatprep.subr.mxu1 %v12157_v62  ;;  %5050 = vmatprep.subr.mxu0 %v12157_v62 }
 0x521   : > { %5272 = vmatpush1.msra.mxu1 %v13033_v34  ;;  %5051 = vmatpush1.msra.mxu0 %v13036_v12  ;;  %v13042_v34 = vld [vmem:[#allocation16_spill] sm:$0xff]  ;;  %v13045_v12 = vld [vmem:[#allocation47_spill] sm:$0xff] }
 0x522   : > { %5273 = vmatprep.subr.mxu1 %v12157_v62  ;;  %5052 = vmatprep.subr.mxu0 %v12157_v62 }
 0x523   : > { %5274 = vmatpush1.msra.mxu1 %v13035_v50  ;;  %5053 = vmatpush1.msra.mxu0 %v13038_v8  ;;  %v13044_v50 = vld [vmem:[#allocation15_spill] sm:$0xff]  ;;  %v13047_v8 = vld [vmem:[#allocation46_spill] sm:$0xff] }
 0x524   : > { %5275 = vmatprep.subr.mxu1 %v12157_v62  ;;  %5054 = vmatprep.subr.mxu0 %v12157_v62 }
 0x525   : > { %5276 = vmatpush1.msra.mxu1 %v13037_v16  ;;  %5055 = vmatpush1.msra.mxu0 %v13040_v52  ;;  %v13046_v16 = vld [vmem:[#allocation14_spill] sm:$0xff]  ;;  %v13049_v52 = vld [vmem:[#allocation45_spill] sm:$0xff] }
 0x526   : > { %5277 = vmatprep.subr.mxu1 %v12157_v62  ;;  %5056 = vmatprep.subr.mxu0 %v12157_v62 }
 0x527   : > { %5278 = vmatpush1.msra.mxu1 %v13039_v14  ;;  %5057 = vmatpush1.msra.mxu0 %v13042_v34  ;;  %v13048_v14 = vld [vmem:[#allocation13_spill] sm:$0xff]  ;;  %v13051_v34 = vld [vmem:[#allocation44_spill] sm:$0xff] }
 0x528   : > { %5279 = vmatprep.subr.mxu1 %v12157_v62  ;;  %5058 = vmatprep.subr.mxu0 %v12157_v62 }
 0x529   : > { %5280 = vmatpush1.msra.mxu1 %v13041_v22  ;;  %5059 = vmatpush1.msra.mxu0 %v13044_v50  ;;  %v13050_v22 = vld [vmem:[#allocation12_spill] sm:$0xff]  ;;  %v13053_v50 = vld [vmem:[#allocation43_spill] sm:$0xff] }
 0x52a   : > { %5281 = vmatprep.subr.mxu1 %v12157_v62  ;;  %5060 = vmatprep.subr.mxu0 %v12157_v62 }
 0x52b   : > { %5282 = vmatpush1.msra.mxu1 %v13043_v58  ;;  %5061 = vmatpush1.msra.mxu0 %v13046_v16  ;;  %v13052_v58 = vld [vmem:[#allocation11_spill] sm:$0xff]  ;;  %v13055_v16 = vld [vmem:[#allocation42_spill] sm:$0xff] }
 0x52c   : > { %5283 = vmatprep.subr.mxu1 %v12157_v62  ;;  %5062 = vmatprep.subr.mxu0 %v12157_v62 }
 0x52d   : > { %5284 = vmatpush1.msra.mxu1 %v13045_v12  ;;  %5063 = vmatpush1.msra.mxu0 %v13048_v14  ;;  %v13054_v12 = vld [vmem:[#allocation10_spill] sm:$0xff]  ;;  %v13057_v14 = vld [vmem:[#allocation73_spill] sm:$0xff] }
 0x52e   : > { %5285 = vmatprep.subr.mxu1 %v12157_v62  ;;  %5064 = vmatprep.subr.mxu0 %v12157_v62 }
 0x52f   : > { %5286 = vmatpush1.msra.mxu1 %v13047_v8  ;;  %5065 = vmatpush1.msra.mxu0 %v13050_v22  ;;  %v13056_v8 = vld [vmem:[#allocation41_spill] sm:$0xff]  ;;  %v13059_v22 = vld [vmem:[#allocation72_spill] sm:$0xff] }
 0x530   : > { %5287 = vmatprep.subr.mxu1 %v12157_v62  ;;  %5066 = vmatprep.subr.mxu0 %v12157_v62 }
 0x531   : > { %5288 = vmatpush1.msra.mxu1 %v13049_v52  ;;  %5067 = vmatpush1.msra.mxu0 %v13052_v58  ;;  %v13058_v52 = vld [vmem:[#allocation40_spill] sm:$0xff]  ;;  %v13061_v58 = vld [vmem:[#allocation71_spill] sm:$0xff] }
 0x532   : > { %5289 = vmatprep.subr.mxu1 %v12157_v62  ;;  %5068 = vmatprep.subr.mxu0 %v12157_v62 }
 0x533   : > { %5290 = vmatpush1.msra.mxu1 %v13051_v34  ;;  %5069 = vmatpush1.msra.mxu0 %v13054_v12  ;;  %v13060_v34 = vld [vmem:[#allocation39_spill] sm:$0xff]  ;;  %v13063_v12 = vld [vmem:[#allocation70_spill] sm:$0xff] }
 0x534   : > { %5291 = vmatprep.subr.mxu1 %v12157_v62  ;;  %5070 = vmatprep.subr.mxu0 %v12157_v62 }
 0x535   : > { %5292 = vmatpush1.msra.mxu1 %v13053_v50  ;;  %5071 = vmatpush2.msra.mxu0 %v13056_v8  ;;  %v13062_v50 = vld [vmem:[#allocation38_spill] sm:$0xff]  ;;  %v13065_v8 = vld [vmem:[#allocation69_spill] sm:$0xff] }
 0x536   : > { %5293 = vmatprep.subr.mxu1 %v12157_v62  ;;  %5072 = vmatprep.subr.mxu0 %v12157_v62 }
 0x537   : > { %5294 = vmatpush1.msra.mxu1 %v13055_v16  ;;  %5073 = vmatpush2.msra.mxu0 %v13058_v52  ;;  %v13064_v16 = vld [vmem:[#allocation37_spill] sm:$0xff]  ;;  %v13067_v52 = vld [vmem:[#allocation68_spill] sm:$0xff] }
 0x538   : > { %5295 = vmatprep.subr.mxu1 %v12157_v62  ;;  %5074 = vmatprep.subr.mxu0 %v12157_v62 }
 0x539   : > { %5296 = vmatpush2.msra.mxu1 %v13057_v14  ;;  %5075 = vmatpush2.msra.mxu0 %v13060_v34  ;;  %v13066_v14 = vld [vmem:[#allocation36_spill] sm:$0xff] }
 0x53a   : > { %5297 = vmatprep.subr.mxu1 %v12157_v62  ;;  %5076 = vmatprep.subr.mxu0 %v12157_v62  ;;  %v10519_v34 = vld [vmem:[#allocation2 + $0x10] sm:$0xff] }
 0x53b   : > { %5298 = vmatpush2.msra.mxu1 %v13059_v22  ;;  %5077 = vmatpush2.msra.mxu0 %v13062_v50  ;;  %v10517_v22 = vld [vmem:[#allocation2] sm:$0xff]  ;;  %v13069_v50 = vld [vmem:[#allocation67_spill] sm:$0xff] }
 0x53c   : > { %5299 = vmatprep.subr.mxu1 %v12157_v62  ;;  %5078 = vmatprep.subr.mxu0 %v12157_v62 }
 0x53d   : > { %5300 = vmatpush2.msra.mxu1 %v13061_v58  ;;  %5079 = vmatpush2.msra.mxu0 %v13064_v16  ;;  %v13068_v58 = vld [vmem:[#allocation35_spill] sm:$0xff] }
 0x53e   : > { %5301 = vmatprep.subr.mxu1 %v12157_v62  ;;  %5080 = vmatprep.subr.mxu0 %v12157_v62 }
 0x53f   : > { %5302 = vmatpush2.msra.mxu1 %v13063_v12  ;;  %5081 = vmatpush2.msra.mxu0 %v13066_v14  ;;  %v13071_v14 = vld [vmem:[#allocation66_spill] sm:$0xff] }
 0x540   : > { %5303 = vmatprep.subr.mxu1 %v12157_v62  ;;  %5082 = vmatprep.subr.mxu0 %v12157_v62 }
 0x541   : > { %5304 = vmatpush2.msra.mxu1 %v13065_v8  ;;  %5083 = vmatpush2.msra.mxu0 %v13068_v58  ;;  %v13070_v8 = vld [vmem:[#allocation34_spill] sm:$0xff]  ;;  %v10535_v58 = vld [vmem:[#allocation2 + $0x8] sm:$0xff] }
 0x542   : > { %5305 = vmatprep.subr.mxu1 %v12157_v62  ;;  %5084 = vmatprep.subr.mxu0 %v12157_v62 }
 0x543   : > { %5306 = vmatpush2.msra.mxu1 %v13067_v52  ;;  %5085 = vmatpush2.msra.mxu0 %v13070_v8 }
 0x544   : > { %5307 = vmatprep.subr.mxu1 %v12157_v62  ;;  %5086 = vmatprep.subr.mxu0 %v12157_v62 }
 0x545   : > { %5308 = vmatpush2.msra.mxu1 %v13069_v50  ;;  %v10537_v50 = vld [vmem:[#allocation2 + $0x18] sm:$0xff]  ;;  %5087 = vmatpush2.msra.mxu0 %v13073_v54 }
 0x546   : > { %5309 = vmatprep.subr.mxu1 %v12157_v62  ;;  %13072 = vst [vmem:[#allocation345_spill] sm:$0xff] %v10537_v50  ;;  %5088 = vmatprep.subr.mxu0 %v12157_v62 }
 0x547   : > { %5310 = vmatpush2.msra.mxu1 %v13071_v14 }
 0x548   : > { %5311 = vmatprep.subr.mxu1 %v12157_v62 }
 0x549   : > { %5312 = vmatpush2.msra.mxu1 %v13074_v49  ;;  %v13075_v49 = vld [vmem:[#allocation32_spill] sm:$0xff] }
 0x54a   : > { %5313 = vmatprep.subr.mxu1 %v12157_v62  ;;  %5089 = vmatpush2.msra.mxu0 %v13075_v49 }
 0x54b   : > { %5314 = vmatpush2.msra.mxu1 %v13077_v61  ;;  %5090 = vmatprep.subr.mxu0 %v12157_v62  ;;  %v13084_v61 = vld [vmem:[#allocation62_spill] sm:$0xff] }
 0x54c   : > { %5315 = vmatprep.subr.mxu1 %v12157_v62  ;;  %5091 = vmatpush2.msra.mxu0 %v13079_v53 }
 0x54d   : > { %5092 = vmatprep.subr.mxu0 %v13081_v21 }
 0x54e   : > { %5093 = vmatpush2.msra.mxu0 %v13083_v30  ;;  %v13091_v30 = vld [vmem:[#allocation28_spill] sm:$0xff] }
 0x54f   : > { %5094 = vmatprep.subr.mxu0 %v13081_v21 }
 0x55b   : > { %v3697_v12 = vpop.xlane.xlu0 %3696 }
 0x55c   : > { %v10528_v52 = vmax.f32 %v10517_v22, %v3697_v12  ;;  %v10561_v12 = vld [vmem:[#allocation2 + $0x20] sm:$0xff] }
 0x55d   : > { %v3707_v16 = vpop.xlane.xlu1 %3706 }
 0x55e   : > { %v10531_v2 = vmax.f32 %v10519_v34, %v3707_v16  ;;  %5552 = vst.msk [vmem:[#allocation2] sm:$0xff] %vm4781_vm12, %v10528_v52  ;;  %3983 = vperm.xlu1 %6758, %v10528_v52  }
 0x55f   : > { %v3702_v16 = vpop.xlane.xlu0 %3701 }
 0x560   : > { %5554 = vst.msk [vmem:[#allocation2 + $0x10] sm:$0xff] %vm4781_vm12, %v10531_v2  ;;  %v10554_v14 = vmax.f32 %v10535_v58, %v3702_v16  ;;  %v13080_v16 = vld [vmem:[#allocation63_spill] sm:$0xff] }
 0x561   : > { %v3712_v54 = vpop.xlane.xlu1 %3711  ;;  %5316 = vmatpush2.msra.mxu1 %v13080_v16 }
 0x562   : > { %v10557_v8 = vmax.f32 %v10537_v50, %v3712_v54  ;;  %5553 = vst.msk [vmem:[#allocation2 + $0x8] sm:$0xff] %vm4781_vm12, %v10554_v14  ;;  %3988 = vperm.xlu0 %6759, %v10554_v14   ;;  %5317 = vmatprep.subr.mxu1 %v13081_v21 }
 0x563   : > { %v3717_v54 = vpop.xlane.xlu0 %3716  ;;  %5318 = vmatpush2.msra.mxu1 %v13084_v61 }
 0x564   : > { %13076 = vst [vmem:[#allocation346_spill] sm:$0xff] %v10557_v8  ;;  %5555 = vst.msk [vmem:[#allocation2 + $0x18] sm:$0xff] %vm4781_vm12, %v10557_v8  ;;  %v10580_v53 = vmax.f32 %v10561_v12, %v3717_v54  ;;  %5319 = vmatprep.subr.mxu1 %v13081_v21 }
 0x565   : > { %v3722_v62 = vpop.xlane.xlu1 %3721  ;;  %5320 = vmatpush2.msra.mxu1 %v13088_v57 }
 0x566   : > { %v10583_v49 = vmax.f32 %v10563_v25, %v3722_v62  ;;  %3993 = vperm.xlu0 %6759, %v10531_v2   ;;  %5556 = vst.msk [vmem:[#allocation2 + $0x20] sm:$0xff] %vm4781_vm12, %v10580_v53  ;;  %v13087_v62 = vld [vmem:[#allocation29_spill] sm:$0xff]  ;;  %5321 = vmatprep.subr.mxu1 %v13081_v21  ;;  %v10613_v25 = vld [vmem:[#allocation2 + $0x48] sm:$0xff] }
 0x567   : > { %5095 = vmatpush2.msra.mxu0 %v13087_v62  ;;  %v3727_v54 = vpop.xlane.xlu0 %3726  ;;  %13092 = vst [vmem:[#allocation353_spill] sm:$0xff] %v10613_v25  ;;  %v13094_v62 = vld [vmem:[#allocation60_spill] sm:$0xff] }
 0x568   : > { %13082 = vst [vmem:[#allocation348_spill] sm:$0xff] %v10583_v49  ;;  %5557 = vst.msk [vmem:[#allocation2 + $0x28] sm:$0xff] %vm4781_vm12, %v10583_v49  ;;  %5096 = vmatprep.subr.mxu0 %v13081_v21  ;;  %v10609_v16 = vmax.f32 %v10589_v31, %v3727_v54  ;;  %5322 = vmatpush2.msra.mxu1 %v13094_v62  ;;  %v13095_v62 = vld [vmem:[#allocation27_spill] sm:$0xff]  ;;  %v10641_v31 = vld [vmem:[#allocation2 + $0x50] sm:$0xff] }
 0x569   : > { %v3732_v61 = vpop.xlane.xlu1 %3731  ;;  %5097 = vmatpush2.msra.mxu0 %v13091_v30  ;;  %5323 = vmatprep.subr.mxu1 %v13081_v21  ;;  %13100 = vst [vmem:[#allocation358_spill] sm:$0xff] %v10641_v31 }
 0x56a   : > { %v10606_v36 = vmax.f32 %v10587_v5, %v3732_v61  ;;  %13090 = vst [vmem:[#allocation352_spill] sm:$0xff] %v10609_v16  ;;  %5098 = vmatprep.subr.mxu0 %v13081_v21  ;;  %3998 = vperm.xlu0 %6759, %v10557_v8   ;;  %5558 = vst.msk [vmem:[#allocation2 + $0x30] sm:$0xff] %vm4781_vm12, %v10609_v16  ;;  %v10639_v61 = vld [vmem:[#allocation2 + $0x58] sm:$0xff]  ;;  %v13101_v5 = vld [vmem:[#allocation26_spill] sm:$0xff] }
 0x56b   : > { %v3737_v54 = vpop.xlane.xlu0 %3736  ;;  %5099 = vmatpush2.msra.mxu0 %v13095_v62  ;;  %5324 = vmatpush2.msra.mxu1 %v13096_v28  ;;  %13099 = vst [vmem:[#allocation357_spill] sm:$0xff] %v10639_v61  ;;  %v13102_v8 = vld [vmem:[#allocation58_spill] sm:$0xff]  ;;  %v10660_v62 = vld [vmem:[#allocation2 + $0x68] sm:$0xff] }
 0x56c   : > { %13089 = vst [vmem:[#allocation351_spill] sm:$0xff] %v10606_v36  ;;  %5559 = vst.msk [vmem:[#allocation2 + $0x38] sm:$0xff] %vm4781_vm12, %v10606_v36  ;;  %v10635_v57 = vmax.f32 %v10615_v3, %v3737_v54  ;;  %5100 = vmatprep.subr.mxu0 %v13081_v21  ;;  %5325 = vmatprep.subr.mxu1 %v13081_v21  ;;  %v10662_v28 = vld [vmem:[#allocation2 + $0x60] sm:$0xff]  ;;  %v10700_v3 = vld [vmem:[#allocation2 + $0x88] sm:$0xff] }
 0x56d   : > { %v3742_v30 = vpop.xlane.xlu1 %3741  ;;  %5101 = vmatpush2.msra.mxu0 %v13101_v5  ;;  %5326 = vmatpush2.msra.mxu1 %v13102_v8  ;;  %13105 = vst [vmem:[#allocation361_spill] sm:$0xff] %v10660_v62  ;;  %13106 = vst [vmem:[#allocation362_spill] sm:$0xff] %v10662_v28 }
 0x56e   : > { %v10632_v60 = vmax.f32 %v10613_v25, %v3742_v30  ;;  %13098 = vst [vmem:[#allocation356_spill] sm:$0xff] %v10635_v57  ;;  %4003 = vperm.xlu0 %6759, %v10580_v53   ;;  %5560 = vst.msk [vmem:[#allocation2 + $0x40] sm:$0xff] %vm4781_vm12, %v10635_v57  ;;  %v10681_v30 = vld [vmem:[#allocation2 + $0x70] sm:$0xff] }
 0x56f   : > { %v3747_v54 = vpop.xlane.xlu0 %3746  ;;  %13110 = vst [vmem:[#allocation366_spill] sm:$0xff] %v10681_v30  ;;  %13115 = vst [vmem:[#allocation369_spill] sm:$0xff] %v10700_v3 }
 0x570   : > { %13097 = vst [vmem:[#allocation355_spill] sm:$0xff] %v10632_v60  ;;  %5561 = vst.msk [vmem:[#allocation2 + $0x48] sm:$0xff] %vm4781_vm12, %v10632_v60  ;;  %v10658_v8 = vmax.f32 %v10641_v31, %v3747_v54  ;;  %v13111_v31 = vld [vmem:[#allocation196_spill] sm:$0xff] }
 0x571   : > { %v3752_v21 = vpop.xlane.xlu1 %3751 }
 0x572   : > { %v10655_v5 = vmax.f32 %v10639_v61, %v3752_v21  ;;  %13104 = vst [vmem:[#allocation360_spill] sm:$0xff] %v10658_v8  ;;  %4008 = vperm.xlu0 %6759, %v10583_v49   ;;  %5562 = vst.msk [vmem:[#allocation2 + $0x50] sm:$0xff] %vm4781_vm12, %v10658_v8  ;;  %v10679_v49 = vld [vmem:[#allocation2 + $0x78] sm:$0xff]  ;;  %v13112_v61 = vld [vmem:[#allocation194_spill] sm:$0xff] }
 0x573   : > { %v3757_v54 = vpop.xlane.xlu0 %3756  ;;  %13109 = vst [vmem:[#allocation365_spill] sm:$0xff] %v10679_v49  ;;  %v3843_v59 = vmax.f32 %v13112_v61, %v13111_v31  ;;  %v13118_v61 = vld [vmem:[#allocation200_spill] sm:$0xff] }
 0x574   : > { %13103 = vst [vmem:[#allocation359_spill] sm:$0xff] %v10655_v5  ;;  %5563 = vst.msk [vmem:[#allocation2 + $0x58] sm:$0xff] %vm4781_vm12, %v10655_v5  ;;  %v10677_v50 = vmax.f32 %v10662_v28, %v3757_v54  ;;  %v13117_v28 = vld [vmem:[#allocation195_spill] sm:$0xff] }
 0x575   : > { %v3762_v21 = vpop.xlane.xlu1 %3761  ;;  %v3844_v31 = vmax.f32 %v3843_v59, %v13117_v28  ;;  %v10724_v59 = vld [vmem:[#allocation2 + $0x90] sm:$0xff] }
 0x576   : > { %v10674_v25 = vmax.f32 %v10660_v62, %v3762_v21  ;;  %13108 = vst [vmem:[#allocation364_spill] sm:$0xff] %v10677_v50  ;;  %4013 = vperm.xlu0 %6759, %v10609_v16   ;;  %5564 = vst.msk [vmem:[#allocation2 + $0x60] sm:$0xff] %vm4781_vm12, %v10677_v50  ;;  %v10702_v62 = vld [vmem:[#allocation2 + $0x80] sm:$0xff] }
 0x577   : > { %v3767_v9 = vpop.xlane.xlu0 %3766  ;;  %13116 = vst [vmem:[#allocation370_spill] sm:$0xff] %v10702_v62  ;;  %13123 = vst [vmem:[#allocation374_spill] sm:$0xff] %v10724_v59 }
 0x578   : > { %13107 = vst [vmem:[#allocation363_spill] sm:$0xff] %v10674_v25  ;;  %5565 = vst.msk [vmem:[#allocation2 + $0x68] sm:$0xff] %vm4781_vm12, %v10674_v25  ;;  %v10698_v16 = vmax.f32 %v10681_v30, %v3767_v9  ;;  %v13125_v30 = vld [vmem:[#allocation199_spill] sm:$0xff] }
 0x579   : > { %v3772_v54 = vpop.xlane.xlu1 %3771  ;;  %v10743_v9 = vld [vmem:[#allocation2 + $0xa8] sm:$0xff] }
 0x57a   : > { %v10695_v24 = vmax.f32 %v10679_v49, %v3772_v54  ;;  %13114 = vst [vmem:[#allocation368_spill] sm:$0xff] %v10698_v16  ;;  %4018 = vperm.xlu0 %6759, %v10606_v36   ;;  %v13119_v54 = vld [vmem:[#allocation198_spill] sm:$0xff]  ;;  %5566 = vst.msk [vmem:[#allocation2 + $0x70] sm:$0xff] %vm4781_vm12, %v10698_v16 }
 0x57b   : > { %v3848_v11 = vmax.f32 %v13119_v54, %v13118_v61  ;;  %v3777_v27 = vpop.xlane.xlu0 %3776  ;;  %v10722_v49 = vld [vmem:[#allocation2 + $0xa0] sm:$0xff]  ;;  %v13124_v61 = vld [vmem:[#allocation197_spill] sm:$0xff]  ;;  %13128 = vst [vmem:[#allocation377_spill] sm:$0xff] %v10743_v9 }
 0x57c   : > { %13113 = vst [vmem:[#allocation367_spill] sm:$0xff] %v10695_v24  ;;  %5567 = vst.msk [vmem:[#allocation2 + $0x78] sm:$0xff] %vm4781_vm12, %v10695_v24  ;;  %v10720_v21 = vmax.f32 %v10702_v62, %v3777_v27  ;;  %v3845_v54 = vmax.f32 %v3844_v31, %v13124_v61 }
 0x57d   : > { %v3782_v40 = vpop.xlane.xlu1 %3781  ;;  %13122 = vst [vmem:[#allocation373_spill] sm:$0xff] %v10722_v49 }
 0x57e   : > { %v10717_v36 = vmax.f32 %v10700_v3, %v3782_v40  ;;  %13121 = vst [vmem:[#allocation372_spill] sm:$0xff] %v10720_v21  ;;  %4023 = vperm.xlu0 %6759, %v10635_v57   ;;  %v3849_v40 = vmax.f32 %v3848_v11, %v13125_v30  ;;  %5568 = vst.msk [vmem:[#allocation2 + $0x80] sm:$0xff] %vm4781_vm12, %v10720_v21  ;;  %v10745_v3 = vld [vmem:[#allocation2 + $0x98] sm:$0xff] }
 0x57f   : > { %v3787_v56 = vpop.xlane.xlu0 %3786  ;;  %13129 = vst [vmem:[#allocation378_spill] sm:$0xff] %v10745_v3  ;;  %v13130_v11 = vld [vmem:[#allocation201_spill] sm:$0xff] }
 0x580   : > { %13120 = vst [vmem:[#allocation371_spill] sm:$0xff] %v10717_v36  ;;  %5569 = vst.msk [vmem:[#allocation2 + $0x88] sm:$0xff] %vm4781_vm12, %v10717_v36  ;;  %v10741_v31 = vmax.f32 %v10724_v59, %v3787_v56  ;;  %v3850_v27 = vmax.f32 %v3849_v40, %v13130_v11  ;;  %v10763_v40 = vld [vmem:[#allocation2 + $0xb0] sm:$0xff]  ;;  %v10787_v59 = vld [vmem:[#allocation2 + $0xc0] sm:$0xff] }
 0x581   : > { %v3797_v28 = vpop.xlane.xlu1 %3796  ;;  %13133 = vst [vmem:[#allocation381_spill] sm:$0xff] %v10763_v40  ;;  %13137 = vst [vmem:[#allocation385_spill] sm:$0xff] %v10787_v59 }
 0x582   : > { %v10738_v57 = vmax.f32 %v10722_v49, %v3797_v28  ;;  %13127 = vst [vmem:[#allocation376_spill] sm:$0xff] %v10741_v31  ;;  %4028 = vperm.xlu0 %6759, %v10632_v60   ;;  %3846 = vmax.xlane.f32.xlu1 %v3845_v54  ;;  %5570 = vst.msk [vmem:[#allocation2 + $0x90] sm:$0xff] %vm4781_vm12, %v10741_v31  ;;  %v10777_v49 = vld [vmem:[#allocation2 + $0xb8] sm:$0xff] }
 0x583   : > { %v3792_v30 = vpop.xlane.xlu0 %3791  ;;  %13135 = vst [vmem:[#allocation383_spill] sm:$0xff] %v10777_v49 }
 0x584   : > { %13126 = vst [vmem:[#allocation375_spill] sm:$0xff] %v10738_v57  ;;  %5572 = vst.msk [vmem:[#allocation2 + $0xa0] sm:$0xff] %vm4781_vm12, %v10738_v57  ;;  %v10761_v54 = vmax.f32 %v10745_v3, %v3792_v30 }
 0x585   : > { %v3802_v56 = vpop.xlane.xlu1 %3801 }
 0x586   : > { %v10758_v61 = vmax.f32 %v10743_v9, %v3802_v56  ;;  %13132 = vst [vmem:[#allocation380_spill] sm:$0xff] %v10761_v54  ;;  %4033 = vperm.xlu0 %6759, %v10658_v8   ;;  %3851 = vmax.xlane.f32.xlu1 %v3850_v27  ;;  %5571 = vst.msk [vmem:[#allocation2 + $0x98] sm:$0xff] %vm4781_vm12, %v10761_v54 }
 0x588   : > { %13131 = vst [vmem:[#allocation379_spill] sm:$0xff] %v10758_v61  ;;  %5573 = vst.msk [vmem:[#allocation2 + $0xa8] sm:$0xff] %vm4781_vm12, %v10758_v61 }
 0x589   : > { %v3807_v56 = vpop.xlane.xlu1 %3806 }
 0x58a   : > { %v10775_v30 = vmax.f32 %v10763_v40, %v3807_v56  ;;  %4038 = vperm.xlu0 %6759, %v10655_v5   ;;  %v10797_v40 = vld [vmem:[#allocation2 + $0xc8] sm:$0xff] }
 0x58b   : > { %13139 = vst [vmem:[#allocation387_spill] sm:$0xff] %v10797_v40 }
 0x58c   : > { %13134 = vst [vmem:[#allocation382_spill] sm:$0xff] %v10775_v30  ;;  %5574 = vst.msk [vmem:[#allocation2 + $0xb0] sm:$0xff] %vm4781_vm12, %v10775_v30 }
 0x58d   : > { %v3812_v62 = vpop.xlane.xlu1 %3811 }
 0x58e   : > { %v10785_v28 = vmax.f32 %v10777_v49, %v3812_v62  ;;  %4043 = vperm.xlu0 %6759, %v10677_v50   ;;  %v10807_v49 = vld [vmem:[#allocation2 + $0xd0] sm:$0xff]  ;;  %v10818_v50 = vld [vmem:[#allocation2 + $0xd8] sm:$0xff] }
 0x58f   : > { %13141 = vst [vmem:[#allocation389_spill] sm:$0xff] %v10807_v49  ;;  %13143 = vst [vmem:[#allocation391_spill] sm:$0xff] %v10818_v50 }
 0x590   : > { %13136 = vst [vmem:[#allocation384_spill] sm:$0xff] %v10785_v28  ;;  %5575 = vst.msk [vmem:[#allocation2 + $0xb8] sm:$0xff] %vm4781_vm12, %v10785_v28 }
 0x591   : > { %v3817_v9 = vpop.xlane.xlu1 %3816 }
 0x592   : > { %v10795_v27 = vmax.f32 %v10787_v59, %v3817_v9  ;;  %4048 = vperm.xlu0 %6759, %v10674_v25  }
 0x594   : > { %13138 = vst [vmem:[#allocation386_spill] sm:$0xff] %v10795_v27  ;;  %5576 = vst.msk [vmem:[#allocation2 + $0xc0] sm:$0xff] %vm4781_vm12, %v10795_v27 }
 0x595   : > { %v3822_v3 = vpop.xlane.xlu1 %3821 }
 0x596   : > { %v10805_v56 = vmax.f32 %v10797_v40, %v3822_v3  ;;  %4058 = vperm.xlu0 %6759, %v10695_v24   ;;  %v13218_v24 = vld [vmem:[#allocation156_spill] sm:$0xff] }
 0x597   : > { %4053 = vperm.xlu1 %6758, %v10698_v16   ;;  %v10829_v16 = vld [vmem:[#allocation2 + $0xe0] sm:$0xff] }
 0x598   : > { %13140 = vst [vmem:[#allocation388_spill] sm:$0xff] %v10805_v56  ;;  %5577 = vst.msk [vmem:[#allocation2 + $0xc8] sm:$0xff] %vm4781_vm12, %v10805_v56 }
 0x599   : > { %v3827_v62 = vpop.xlane.xlu1 %3826  ;;  %13145 = vst [vmem:[#allocation393_spill] sm:$0xff] %v10829_v16 }
 0x59a   : > { %v10816_v59 = vmax.f32 %v10807_v49, %v3827_v62  ;;  %4063 = vperm.xlu0 %6759, %v10720_v21   ;;  %v10840_v21 = vld [vmem:[#allocation2 + $0xe8] sm:$0xff] }
 0x59b   : > { %4078 = vperm.xlu1 %6758, %v10761_v54   ;;  %13147 = vst [vmem:[#allocation395_spill] sm:$0xff] %v10840_v21 }
 0x59c   : > { %13142 = vst [vmem:[#allocation390_spill] sm:$0xff] %v10816_v59  ;;  %5578 = vst.msk [vmem:[#allocation2 + $0xd0] sm:$0xff] %vm4781_vm12, %v10816_v59 }
 0x59d   : > { %v3832_v9 = vpop.xlane.xlu1 %3831 }
 0x59e   : > { %v10827_v40 = vmax.f32 %v10818_v50, %v3832_v9  ;;  %4068 = vperm.xlu0 %6759, %v10717_v36  }
 0x59f   : > { %4088 = vperm.xlu1 %6758, %v10758_v61  }
 0x5a0   : > { %13144 = vst [vmem:[#allocation392_spill] sm:$0xff] %v10827_v40  ;;  %5579 = vst.msk [vmem:[#allocation2 + $0xd8] sm:$0xff] %vm4781_vm12, %v10827_v40 }
 0x5a1   : > { %v3837_v3 = vpop.xlane.xlu1 %3836 }
 0x5a2   : > { %v10838_v49 = vmax.f32 %v10829_v16, %v3837_v3  ;;  %4073 = vperm.xlu0 %6759, %v10741_v31   ;;  %v13150_v3 = vsub.f32 %v10519_v34, %v10531_v2 }
 0x5a3   : > { %4098 = vperm.xlu1 %6758, %v10785_v28  }
 0x5a4   : > { %13146 = vst [vmem:[#allocation394_spill] sm:$0xff] %v10838_v49  ;;  %5580 = vst.msk [vmem:[#allocation2 + $0xe0] sm:$0xff] %vm4781_vm12, %v10838_v49  ;;  %v3921_v16 = vmul.f32 1.442695, %v13150_v3 }
 0x5a5   : > { %v3842_v62 = vpop.xlane.xlu1 %3841 }
 0x5a6   : > { %v10849_v50 = vmax.f32 %v10840_v21, %v3842_v62  ;;  %4083 = vperm.xlu0 %6759, %v10738_v57   ;;  %v13149_v62 = vsub.f32 %v10517_v22, %v10528_v52  ;;  %v13151_v21 = vsub.f32 %v10535_v58, %v10554_v14 }
 0x5a7   : > { %4108 = vperm.xlu1 %6758, %v10805_v56  }
 0x5a8   : > { %13148 = vst [vmem:[#allocation396_spill] sm:$0xff] %v10849_v50  ;;  %5581 = vst.msk [vmem:[#allocation2 + $0xe8] sm:$0xff] %vm4781_vm12, %v10849_v50  ;;  %v3917_v9 = vmul.f32 1.442695, %v13149_v62 }
 0x5aa   : > { %4093 = vperm.xlu0 %6759, %v10775_v30   ;;  %6760 = vpow2.f32 %v3917_v9 }
 0x5ab   : > { %4118 = vperm.xlu1 %6758, %v10827_v40   ;;  %v3919_v40 = vmul.f32 1.442695, %v13151_v21  ;;  %6762 = vpow2.f32 %v3921_v16 }
 0x5ad   : > { %6764 = vpow2.f32 %v3919_v40 }
 0x5ae   : > { %4103 = vperm.xlu0 %6759, %v10795_v27  }
 0x5af   : > { %4128 = vperm.xlu1 %6758, %v10849_v50   ;;  %v13152_v50 = vsub.f32 %v10561_v12, %v10580_v53 }
 0x5b1   : > { %v3925_v27 = vmul.f32 1.442695, %v13152_v50 }
 0x5b2   : > { %4113 = vperm.xlu0 %6759, %v10816_v59  }
 0x5b3   : > { %6766 = vpow2.f32 %v3925_v27 }
 0x5b6   : > { %4123 = vperm.xlu0 %6759, %v10838_v49  }
 0x5b7   : > { %v10887_v3 = vpop.eup %6760 }
 0x5b8   : > { %13153 = vst [vmem:[#allocation397_spill] sm:$0xff] %v10887_v3 }
 0x5d9   : > { %v3984_v59 = vpop.permute.xlu1 %3983 }
 0x5da   : > { %v4141_v49 = vsub.f32 %v12905_v33, %v3984_v59  ;;  %v4142_v30 = vsub.f32 %v12904_v29, %v3984_v59  ;;  %v4143_v22 = vsub.f32 %v12916_v46, %v3984_v59  ;;  %v4144_v52 = vsub.f32 %v12920_v38, %v3984_v59 }
 0x5dc   : > { %v4269_v2 = vmul.f32 1.442695, %v4141_v49  ;;  %v4271_v34 = vmul.f32 1.442695, %v4142_v30  ;;  %v4273_v58 = vmul.f32 1.442695, %v4143_v22 }
 0x5dd   : > { %v4275_v14 = vmul.f32 1.442695, %v4144_v52  ;;  %v3989_v21 = vpop.permute.xlu0 %3988 }
 0x5de   : > { %6768 = vpow2.f32 %v4269_v2  ;;  %v4145_v50 = vsub.f32 %v12907_v26, %v3989_v21  ;;  %v4146_v12 = vsub.f32 %v12906_v7, %v3989_v21  ;;  %v4147_v33 = vsub.f32 %v12917_v0, %v3989_v21 }
 0x5df   : > { %6770 = vpow2.f32 %v4271_v34  ;;  %v4148_v29 = vsub.f32 %v12927_v15, %v3989_v21 }
 0x5e0   : > { %6772 = vpow2.f32 %v4273_v58  ;;  %v4277_v46 = vmul.f32 1.442695, %v4145_v50  ;;  %v4279_v38 = vmul.f32 1.442695, %v4146_v12  ;;  %v4281_v53 = vmul.f32 1.442695, %v4147_v33 }
 0x5e1   : > { %6774 = vpow2.f32 %v4275_v14  ;;  %v4283_v49 = vmul.f32 1.442695, %v4148_v29  ;;  %v3994_v16 = vpop.permute.xlu0 %3993 }
 0x5e2   : > { %6776 = vpow2.f32 %v4277_v46  ;;  %v4149_v59 = vsub.f32 %v12909_v44, %v3994_v16  ;;  %v4150_v40 = vsub.f32 %v12908_v32, %v3994_v16  ;;  %v4151_v26 = vsub.f32 %v12918_v35, %v3994_v16 }
 0x5e3   : > { %6778 = vpow2.f32 %v4279_v38  ;;  %v4152_v7 = vsub.f32 %v12921_v43, %v3994_v16  ;;  %v10893_v43 = vpop.eup %6762 }
 0x5e4   : > { %6780 = vpow2.f32 %v4281_v53  ;;  %v4285_v0 = vmul.f32 1.442695, %v4149_v59  ;;  %v4287_v15 = vmul.f32 1.442695, %v4150_v40  ;;  %v4289_v30 = vmul.f32 1.442695, %v4151_v26  ;;  %v10895_v34 = vpop.eup %6764 }
 0x5e5   : > { %6782 = vpow2.f32 %v4283_v49  ;;  %v4291_v27 = vmul.f32 1.442695, %v4152_v7  ;;  %v3999_v9 = vpop.permute.xlu0 %3998  ;;  %13154 = vst [vmem:[#allocation398_spill] sm:$0xff] %v10893_v43  ;;  %13155 = vst [vmem:[#allocation399_spill] sm:$0xff] %v10895_v34  ;;  %v10897_v21 = vpop.eup %6766 }
 0x5e6   : > { %6784 = vpow2.f32 %v4285_v0  ;;  %v4153_v62 = vsub.f32 %v12911_v41, %v3999_v9  ;;  %v4154_v44 = vsub.f32 %v12910_v19, %v3999_v9  ;;  %v4155_v32 = vsub.f32 %v12919_v45, %v3999_v9  ;;  %13156 = vst [vmem:[#allocation400_spill] sm:$0xff] %v10897_v21 }
 0x5e7   : > { %6786 = vpow2.f32 %v4287_v15  ;;  %v4156_v35 = vsub.f32 %v12928_v47, %v3999_v9 }
 0x5e8   : > { %6788 = vpow2.f32 %v4289_v30  ;;  %v4293_v22 = vmul.f32 1.442695, %v4153_v62  ;;  %v4295_v52 = vmul.f32 1.442695, %v4154_v44  ;;  %v4297_v2 = vmul.f32 1.442695, %v4155_v32 }
 0x5e9   : > { %6790 = vpow2.f32 %v4291_v27  ;;  %v4299_v58 = vmul.f32 1.442695, %v4156_v35  ;;  %v4004_v14 = vpop.permute.xlu0 %4003 }
 0x5ea   : > { %6792 = vpow2.f32 %v4293_v22  ;;  %v4157_v19 = vsub.f32 %v12913_v23, %v4004_v14  ;;  %v4158_v41 = vsub.f32 %v12912_v4, %v4004_v14  ;;  %v4159_v45 = vsub.f32 %v12922_v17, %v4004_v14 }
 0x5eb   : > { %v6769_v47 = vpop.eup %6768  ;;  %6794 = vpow2.f32 %v4295_v52  ;;  %v4160_v50 = vsub.f32 %v12930_v6, %v4004_v14 }
 0x5ec   : > { %v6771_v12 = vpop.eup %6770  ;;  %6796 = vpow2.f32 %v4297_v2  ;;  %v4301_v33 = vmul.f32 1.442695, %v4157_v19  ;;  %v4303_v29 = vmul.f32 1.442695, %v4158_v41  ;;  %v4305_v46 = vmul.f32 1.442695, %v4159_v45 }
 0x5ed   : > { %v6773_v38 = vpop.eup %6772  ;;  %6798 = vpow2.f32 %v4299_v58  ;;  %v4307_v53 = vmul.f32 1.442695, %v4160_v50  ;;  %5102 = vmatprep.mubr.f32.mxu0 %v6771_v12  ;;  %v4009_v49 = vpop.permute.xlu0 %4008  ;;  %v4589_v16 = vadd.f32 %v6771_v12, %v6769_v47 }
 0x5ee   : > { %v6775_v23 = vpop.eup %6774  ;;  %6800 = vpow2.f32 %v4301_v33  ;;  %v4161_v4 = vsub.f32 %v12915_v55, %v4009_v49  ;;  %v4162_v17 = vsub.f32 %v12914_v18, %v4009_v49  ;;  %v4163_v59 = vsub.f32 %v12929_v13, %v4009_v49  ;;  %5103 = vmatmul.mubr.f32.vlgmr.msra.gmra.mxu0 %v6769_v47 }
 0x5ef   : > { %v6777_v6 = vpop.eup %6776  ;;  %6802 = vpow2.f32 %v4303_v29  ;;  %5327 = vmatprep.mubr.f32.mxu1 %v6775_v23  ;;  %v4164_v40 = vsub.f32 %v12933_v51, %v4009_v49  ;;  %v4590_v26 = vadd.f32 %v6773_v38, %v4589_v16 }
 0x5f0   : > { %v6779_v7 = vpop.eup %6778  ;;  %6804 = vpow2.f32 %v4305_v46  ;;  %v4309_v0 = vmul.f32 1.442695, %v4161_v4  ;;  %v4311_v15 = vmul.f32 1.442695, %v4162_v17  ;;  %v4313_v30 = vmul.f32 1.442695, %v4163_v59  ;;  %5328 = vmatmul.mubr.f32.vlgmr.msra.gmra.mxu1 %v6773_v38 }
 0x5f1   : > { %v6781_v27 = vpop.eup %6780  ;;  %6806 = vpow2.f32 %v4307_v53  ;;  %v4315_v55 = vmul.f32 1.442695, %v4164_v40  ;;  %5107 = vmatprep.mubr.f32.mxu0 %v6779_v7  ;;  %v4014_v18 = vpop.permute.xlu0 %4013  ;;  %v10907_v9 = vadd.f32 %v6775_v23, %v4590_v26  ;;  %v4594_v13 = vadd.f32 %v6779_v7, %v6777_v6  ;;  %v13157_v59 = vld [vmem:[#allocation106_spill] sm:$0xff]  ;;  %v13159_v26 = vld [vmem:[#allocation107_spill] sm:$0xff] }
 0x5f2   : > { %v6783_v62 = vpop.eup %6782  ;;  %6808 = vpow2.f32 %v4309_v0  ;;  %v4165_v44 = vsub.f32 %v12926_v63, %v4014_v18  ;;  %v4166_v51 = vsub.f32 %v12925_v10, %v4014_v18  ;;  %v4167_v32 = vsub.f32 %v12932_v37, %v4014_v18  ;;  %5108 = vmatmul.mubr.f32.gmra.mxu0 %v6777_v6 }
 0x5f3   : > { %v6785_v35 = vpop.eup %6784  ;;  %6810 = vpow2.f32 %v4311_v15  ;;  %5332 = vmatprep.mubr.f32.mxu1 %v6783_v62  ;;  %v4168_v22 = vsub.f32 %v12943_v42, %v4014_v18  ;;  %v4595_v52 = vadd.f32 %v6781_v27, %v4594_v13  ;;  %v13160_v15 = vld [vmem:[#allocation109_spill] sm:$0xff] }
 0x5f4   : > { %v6787_v2 = vpop.eup %6786  ;;  %6812 = vpow2.f32 %v4313_v30  ;;  %v4317_v58 = vmul.f32 1.442695, %v4165_v44  ;;  %v4319_v14 = vmul.f32 1.442695, %v4166_v51  ;;  %v4321_v19 = vmul.f32 1.442695, %v4167_v32  ;;  %5333 = vmatmul.mubr.f32.gmra.mxu1 %v6781_v27 }
 0x5f5   : > { %v6789_v41 = vpop.eup %6788  ;;  %6814 = vpow2.f32 %v4315_v55  ;;  %v4323_v63 = vmul.f32 1.442695, %v4168_v22  ;;  %5112 = vmatprep.mubr.f32.mxu0 %v6787_v2  ;;  %v4019_v10 = vpop.permute.xlu0 %4018  ;;  %v4599_v45 = vadd.f32 %v6787_v2, %v6785_v35  ;;  %v10913_v37 = vadd.f32 %v6783_v62, %v4595_v52  ;;  %v13161_v2 = vld [vmem:[#allocation110_spill] sm:$0xff] }
 0x5f6   : > { %v6791_v47 = vpop.eup %6790  ;;  %6816 = vpow2.f32 %v4317_v58  ;;  %v4169_v50 = vsub.f32 %v12924_v1, %v4019_v10  ;;  %v4170_v42 = vsub.f32 %v12923_v39, %v4019_v10  ;;  %v4171_v12 = vsub.f32 %v12931_v48, %v4019_v10  ;;  %5113 = vmatmul.mubr.f32.gmra.mxu0 %v6785_v35 }
 0x5f7   : > { %v6793_v33 = vpop.eup %6792  ;;  %6818 = vpow2.f32 %v4319_v14  ;;  %5337 = vmatprep.mubr.f32.mxu1 %v6791_v47  ;;  %v4172_v29 = vsub.f32 %v12938_v20, %v4019_v10  ;;  %v4600_v46 = vadd.f32 %v6789_v41, %v4599_v45  ;;  %v13158_v20 = vld [vmem:[#allocation108_spill] sm:$0xff]  ;;  %v13164_v45 = vld [vmem:[#allocation113_spill] sm:$0xff] }
 0x5f8   : > { %v6795_v38 = vpop.eup %6794  ;;  %6820 = vpow2.f32 %v4321_v19  ;;  %v4325_v53 = vmul.f32 1.442695, %v4169_v50  ;;  %v4327_v49 = vmul.f32 1.442695, %v4170_v42  ;;  %v4329_v16 = vmul.f32 1.442695, %v4171_v12  ;;  %5338 = vmatmul.mubr.f32.gmra.mxu1 %v6789_v41 }
 0x5f9   : > { %v6797_v23 = vpop.eup %6796  ;;  %6822 = vpow2.f32 %v4323_v63  ;;  %v4331_v1 = vmul.f32 1.442695, %v4172_v29  ;;  %5117 = vmatprep.mubr.f32.mxu0 %v6795_v38  ;;  %v4024_v39 = vpop.permute.xlu0 %4023  ;;  %v10919_v4 = vadd.f32 %v6791_v47, %v4600_v46  ;;  %v4604_v48 = vadd.f32 %v6795_v38, %v6793_v33  ;;  %v13162_v14 = vld [vmem:[#allocation112_spill] sm:$0xff]  ;;  %v13163_v41 = vld [vmem:[#allocation111_spill] sm:$0xff] }
 0x5fa   : > { %v6799_v17 = vpop.eup %6798  ;;  %6824 = vpow2.f32 %v4325_v53  ;;  %v4173_v6 = vsub.f32 %v13157_v59, %v4024_v39  ;;  %v4174_v40 = vsub.f32 %v13158_v20, %v4024_v39  ;;  %v4175_v7 = vsub.f32 %v13159_v26, %v4024_v39  ;;  %5118 = vmatmul.mubr.f32.gmra.mxu0 %v6793_v33  ;;  %v13167_v59 = vld [vmem:[#allocation115_spill] sm:$0xff] }
 0x5fb   : > { %v6801_v0 = vpop.eup %6800  ;;  %6826 = vpow2.f32 %v4327_v49  ;;  %5342 = vmatprep.mubr.f32.mxu1 %v6799_v17  ;;  %v4176_v30 = vsub.f32 %v13160_v15, %v4024_v39  ;;  %v4605_v27 = vadd.f32 %v6797_v23, %v4604_v48  ;;  %v13166_v48 = vld [vmem:[#allocation116_spill] sm:$0xff] }
 0x5fc   : > { %v6803_v55 = vpop.eup %6802  ;;  %6828 = vpow2.f32 %v4329_v16  ;;  %v4333_v18 = vmul.f32 1.442695, %v4173_v6  ;;  %v4335_v13 = vmul.f32 1.442695, %v4174_v40  ;;  %v4337_v62 = vmul.f32 1.442695, %v4175_v7  ;;  %5343 = vmatmul.mubr.f32.gmra.mxu1 %v6797_v23 }
 0x5fd   : > { %v6805_v44 = vpop.eup %6804  ;;  %6830 = vpow2.f32 %v4331_v1  ;;  %v4339_v51 = vmul.f32 1.442695, %v4176_v30  ;;  %5122 = vmatprep.mubr.f32.mxu0 %v6803_v55  ;;  %v4029_v32 = vpop.permute.xlu0 %4028  ;;  %v10925_v35 = vadd.f32 %v6799_v17, %v4605_v27  ;;  %v4609_v22 = vadd.f32 %v6803_v55, %v6801_v0  ;;  %v13165_v1 = vld [vmem:[#allocation114_spill] sm:$0xff]  ;;  %v13168_v40 = vld [vmem:[#allocation117_spill] sm:$0xff] }
 0x5fe   : > { %v6807_v52 = vpop.eup %6806  ;;  %6832 = vpow2.f32 %v4333_v18  ;;  %v4177_v58 = vsub.f32 %v13161_v2, %v4029_v32  ;;  %v4178_v19 = vsub.f32 %v13162_v14, %v4029_v32  ;;  %v4179_v63 = vsub.f32 %v13163_v41, %v4029_v32  ;;  %5123 = vmatmul.mubr.f32.gmra.mxu0 %v6801_v0  ;;  %v13172_v41 = vld [vmem:[#allocation121_spill] sm:$0xff] }
 0x5ff   : > { %v6809_v10 = vpop.eup %6808  ;;  %6834 = vpow2.f32 %v4335_v13  ;;  %5347 = vmatprep.mubr.f32.mxu1 %v6807_v52  ;;  %v4180_v47 = vsub.f32 %v13164_v45, %v4029_v32  ;;  %v4610_v50 = vadd.f32 %v6805_v44, %v4609_v22  ;;  %v13169_v32 = vld [vmem:[#allocation118_spill] sm:$0xff] }
 0x600   : > { %v6811_v42 = vpop.eup %6810  ;;  %6836 = vpow2.f32 %v4337_v62  ;;  %v4341_v12 = vmul.f32 1.442695, %v4177_v58  ;;  %v4343_v33 = vmul.f32 1.442695, %v4178_v19  ;;  %v4345_v29 = vmul.f32 1.442695, %v4179_v63  ;;  %5348 = vmatmul.mubr.f32.gmra.mxu1 %v6805_v44 }
 0x601   : > { %v6813_v46 = vpop.eup %6812  ;;  %6838 = vpow2.f32 %v4339_v51  ;;  %v4347_v38 = vmul.f32 1.442695, %v4180_v47  ;;  %v4034_v53 = vpop.permute.xlu0 %4033  ;;  %5127 = vmatprep.mubr.f32.mxu0 %v6811_v42  ;;  %v4614_v49 = vadd.f32 %v6811_v42, %v6809_v10  ;;  %v10931_v16 = vadd.f32 %v6807_v52, %v4610_v50  ;;  %v13170_v52 = vld [vmem:[#allocation120_spill] sm:$0xff]  ;;  %v13171_v58 = vld [vmem:[#allocation119_spill] sm:$0xff] }
 0x602   : > { %v6815_v23 = vpop.eup %6814  ;;  %6840 = vpow2.f32 %v4341_v12  ;;  %v4181_v39 = vsub.f32 %v13165_v1, %v4034_v53  ;;  %v4182_v17 = vsub.f32 %v13166_v48, %v4034_v53  ;;  %v4183_v6 = vsub.f32 %v13167_v59, %v4034_v53  ;;  %5128 = vmatmul.mubr.f32.gmra.mxu0 %v6809_v10  ;;  %v13174_v1 = vld [vmem:[#allocation124_spill] sm:$0xff]  ;;  %v13175_v48 = vld [vmem:[#allocation123_spill] sm:$0xff] }
 0x603   : > { %v6817_v20 = vpop.eup %6816  ;;  %6842 = vpow2.f32 %v4343_v33  ;;  %v4184_v26 = vsub.f32 %v13168_v40, %v4034_v53  ;;  %5352 = vmatprep.mubr.f32.mxu1 %v6815_v23  ;;  %v4615_v7 = vadd.f32 %v6813_v46, %v4614_v49  ;;  %v13173_v49 = vld [vmem:[#allocation122_spill] sm:$0xff]  ;;  %v10948_v59 = vld [vmem:[#allocation2 + $0xf0] sm:$0xff]  ;;  %v13178_v40 = vld [vmem:[#allocation346_spill] sm:$0xff] }
 0x604   : > { %v6819_v0 = vpop.eup %6818  ;;  %6844 = vpow2.f32 %v4345_v29  ;;  %v4349_v15 = vmul.f32 1.442695, %v4181_v39  ;;  %v4351_v30 = vmul.f32 1.442695, %v4182_v17  ;;  %v4353_v27 = vmul.f32 1.442695, %v4183_v6  ;;  %5353 = vmatmul.mubr.f32.gmra.mxu1 %v6813_v46 }
 0x605   : > { %v6821_v55 = vpop.eup %6820  ;;  %6846 = vpow2.f32 %v4347_v38  ;;  %v4355_v18 = vmul.f32 1.442695, %v4184_v26  ;;  %v4039_v13 = vpop.permute.xlu0 %4038  ;;  %5132 = vmatprep.mubr.f32.mxu0 %v6819_v0  ;;  %v10937_v62 = vadd.f32 %v6815_v23, %v4615_v7  ;;  %v4619_v44 = vadd.f32 %v6819_v0, %v6817_v20  ;;  %13176 = vst [vmem:[#allocation401_spill] sm:$0xff] %v10948_v59  ;;  %v13180_v0 = vld [vmem:[#allocation125_spill] sm:$0xff] }
 0x606   : > { %v6823_v51 = vpop.eup %6822  ;;  %6848 = vpow2.f32 %v4349_v15  ;;  %v4185_v22 = vsub.f32 %v13169_v32, %v4039_v13  ;;  %v4186_v2 = vsub.f32 %v13170_v52, %v4039_v13  ;;  %v4187_v14 = vsub.f32 %v13171_v58, %v4039_v13  ;;  %5133 = vmatmul.mubr.f32.gmra.mxu0 %v6817_v20  ;;  %v13177_v20 = vld [vmem:[#allocation345_spill] sm:$0xff] }
 0x607   : > { %v6825_v19 = vpop.eup %6824  ;;  %6850 = vpow2.f32 %v4351_v30  ;;  %v4188_v63 = vsub.f32 %v13172_v41, %v4039_v13  ;;  %5357 = vmatprep.mubr.f32.mxu1 %v6823_v51  ;;  %v4620_v10 = vadd.f32 %v6821_v55, %v4619_v44  ;;  %v13179_v26 = vsub.f32 %v13177_v20, %v13178_v40  ;;  %v13183_v41 = vld [vmem:[#allocation128_spill] sm:$0xff] }
 0x608   : > { %v6827_v45 = vpop.eup %6826  ;;  %6852 = vpow2.f32 %v4353_v27  ;;  %v4357_v47 = vmul.f32 1.442695, %v4185_v22  ;;  %v4359_v50 = vmul.f32 1.442695, %v4186_v2  ;;  %v4361_v42 = vmul.f32 1.442695, %v4187_v14  ;;  %5358 = vmatmul.mubr.f32.gmra.mxu1 %v6821_v55 }
 0x609   : > { %v6829_v12 = vpop.eup %6828  ;;  %6854 = vpow2.f32 %v4355_v18  ;;  %v4363_v33 = vmul.f32 1.442695, %v4188_v63  ;;  %v4044_v29 = vpop.permute.xlu0 %4043  ;;  %5137 = vmatprep.mubr.f32.mxu0 %v6827_v45  ;;  %v4624_v46 = vadd.f32 %v6827_v45, %v6825_v19  ;;  %v10943_v38 = vadd.f32 %v6823_v51, %v4620_v10  ;;  %v13182_v14 = vld [vmem:[#allocation126_spill] sm:$0xff]  ;;  %v13184_v10 = vld [vmem:[#allocation127_spill] sm:$0xff]  ;;  %v13188_v40 = vld [vmem:[#allocation136_spill] sm:$0xff] }
 0x60a   : > { %v6831_v53 = vpop.eup %6830  ;;  %6856 = vpow2.f32 %v4357_v47  ;;  %v4189_v23 = vsub.f32 %v13173_v49, %v4044_v29  ;;  %v4190_v39 = vsub.f32 %v13174_v1, %v4044_v29  ;;  %v4191_v17 = vsub.f32 %v13175_v48, %v4044_v29  ;;  %5138 = vmatmul.mubr.f32.gmra.mxu0 %v6825_v19  ;;  %v10966_v47 = vld [vmem:[#allocation2 + $0xf8] sm:$0xff] }
 0x60b   : > { %v6833_v6 = vpop.eup %6832  ;;  %v3923_v7 = vmul.f32 1.442695, %v13179_v26  ;;  %6858 = vpow2.f32 %v4359_v50  ;;  %v4192_v15 = vsub.f32 %v13180_v0, %v4044_v29  ;;  %5362 = vmatprep.mubr.f32.mxu1 %v6831_v53  ;;  %v3847_v30 = vpop.xlane.xlu1 %3846  ;;  %v4625_v27 = vadd.f32 %v6829_v12, %v4624_v46  ;;  %13185 = vst [vmem:[#allocation346_spill] sm:$0xff] %v10966_v47 }
 0x60c   : > { %v6835_v55 = vpop.eup %6834  ;;  %6860 = vpow2.f32 %v4361_v42  ;;  %v4365_v18 = vmul.f32 1.442695, %v4189_v23  ;;  %v4367_v13 = vmul.f32 1.442695, %v4190_v39  ;;  %v4369_v44 = vmul.f32 1.442695, %v4191_v17  ;;  %5363 = vmatmul.mubr.f32.gmra.mxu1 %v6829_v12 }
 0x60d   : > { %v10954_v51 = vpop.eup %6836  ;;  %6862 = vpow2.f32 %v4363_v33  ;;  %v4371_v32 = vmul.f32 1.442695, %v4192_v15  ;;  %v10957_v22 = vmax.f32 %v10948_v59, %v3847_v30  ;;  %v4049_v52 = vpop.permute.xlu0 %4048  ;;  %5142 = vmatprep.mubr.f32.mxu0 %v6835_v55  ;;  %v10959_v2 = vadd.f32 %v6831_v53, %v4625_v27  ;;  %v13186_v12 = vld [vmem:[#allocation129_spill] sm:$0xff] }
 0x60e   : > { %v10961_v58 = vpop.eup %6838  ;;  %6864 = vpow2.f32 %v4365_v18  ;;  %v4193_v19 = vsub.f32 %v13182_v14, %v4049_v52  ;;  %v4194_v63 = vsub.f32 %v13183_v41, %v4049_v52  ;;  %v4195_v45 = vsub.f32 %v13184_v10, %v4049_v52  ;;  %5143 = vmatmul.mubr.f32.gmra.mxu0 %v6833_v6  ;;  %v13189_v30 = vld [vmem:[#allocation137_spill] sm:$0xff]  ;;  %v13191_v14 = vld [vmem:[#allocation132_spill] sm:$0xff]  ;;  %v13192_v41 = vld [vmem:[#allocation131_spill] sm:$0xff] }
 0x60f   : > { %13181 = vst [vmem:[#allocation345_spill] sm:$0xff] %v10957_v22  ;;  %v10968_v50 = vpop.eup %6840  ;;  %6866 = vpow2.f32 %v4367_v13  ;;  %5582 = vst.msk [vmem:[#allocation2 + $0xf0] sm:$0xff] %vm4781_vm12, %v10957_v22  ;;  %v4196_v33 = vsub.f32 %v13186_v12, %v4049_v52  ;;  %5367 = vmatprep.mubr.f32.mxu1 %v10961_v58  ;;  %4133 = vperm.xlu0 %6759, %v10957_v22   ;;  %v3852_v29 = vpop.xlane.xlu1 %3851  ;;  %v10977_v46 = vadd.f32 %v6835_v55, %v6833_v6  ;;  %v13190_v13 = vld [vmem:[#allocation130_spill] sm:$0xff]  ;;  %v13193_v12 = vld [vmem:[#allocation133_spill] sm:$0xff] }
 0x610   : > { %v10979_v53 = vpop.eup %6842  ;;  %6868 = vpow2.f32 %v4369_v44  ;;  %v4373_v49 = vmul.f32 1.442695, %v4193_v19  ;;  %v4375_v23 = vmul.f32 1.442695, %v4194_v63  ;;  %5368 = vmatmul.mubr.f32.gmra.mxu1 %v10954_v51  ;;  %v4377_v39 = vmul.f32 1.442695, %v4195_v45 }
 0x611   : > { %v10982_v1 = vpop.eup %6844  ;;  %6870 = vpow2.f32 %v4371_v32  ;;  %v10985_v48 = vmax.f32 %v10966_v47, %v3852_v29  ;;  %v4059_v17 = vpop.permute.xlu0 %4058  ;;  %5147 = vmatprep.mubr.f32.mxu0 %v10979_v53  ;;  %v4379_v6 = vmul.f32 1.442695, %v4196_v33 }
 0x612   : > { %v10988_v20 = vpop.eup %6846  ;;  %6872 = vpow2.f32 %v3923_v7  ;;  %v4202_v26 = vsub.f32 %v13188_v40, %v4059_v17  ;;  %5148 = vmatmul.mubr.f32.gmra.mxu0 %v10968_v50  ;;  %v4204_v27 = vsub.f32 %v13189_v30, %v4059_v17 }
 0x613   : > { %13187 = vst [vmem:[#allocation402_spill] sm:$0xff] %v10985_v48  ;;  %v10992_v0 = vpop.eup %6848  ;;  %6874 = vpow2.f32 %v4373_v49  ;;  %5583 = vst.msk [vmem:[#allocation2 + $0xf8] sm:$0xff] %vm4781_vm12, %v10985_v48  ;;  %5372 = vmatprep.mubr.f32.mxu1 %v10988_v20  ;;  %4853 = vperm.xlu0 %6759, %v10895_v34   ;;  %v4054_v7 = vpop.permute.xlu1 %4053  ;;  %v13194_v49 = vld [vmem:[#allocation134_spill] sm:$0xff] }
 0x614   : > { %v11001_v55 = vpop.eup %6850  ;;  %6876 = vpow2.f32 %v4375_v23  ;;  %4138 = vperm.xlu1 %6758, %v10985_v48   ;;  %5373 = vmatmul.mubr.f32.gmra.mxu1 %v10982_v1  ;;  %v4197_v44 = vsub.f32 %v13190_v13, %v4054_v7  ;;  %v4391_v52 = vmul.f32 1.442695, %v4202_v26  ;;  %v4198_v19 = vsub.f32 %v13191_v14, %v4054_v7  ;;  %v13195_v26 = vld [vmem:[#allocation135_spill] sm:$0xff]  ;;  %v13196_v14 = vld [vmem:[#allocation140_spill] sm:$0xff] }
 0x615   : > { %v11005_v18 = vpop.eup %6852  ;;  %6878 = vpow2.f32 %v4377_v39  ;;  %5152 = vmatprep.mubr.f32.mxu0 %v11001_v55  ;;  %v4199_v63 = vsub.f32 %v13192_v41, %v4054_v7  ;;  %v4395_v45 = vmul.f32 1.442695, %v4204_v27  ;;  %v4200_v33 = vsub.f32 %v13193_v12, %v4054_v7 }
 0x616   : > { %v11009_v32 = vpop.eup %6854  ;;  %6880 = vpow2.f32 %v4379_v6  ;;  %5153 = vmatmul.mubr.f32.gmra.mxu0 %v10992_v0  ;;  %v4201_v23 = vsub.f32 %v13194_v49, %v4059_v17  ;;  %v4381_v39 = vmul.f32 1.442695, %v4197_v44  ;;  %v4064_v6 = vpop.permute.xlu0 %4063  ;;  %v4203_v30 = vsub.f32 %v13195_v26, %v4059_v17  ;;  %v13197_v49 = vld [vmem:[#allocation141_spill] sm:$0xff] }
 0x617   : > { %v11014_v10 = vpop.eup %6856  ;;  %5377 = vmatprep.mubr.f32.mxu1 %v11009_v32  ;;  %4868 = vperm.xlu0 %6759, %v10897_v21   ;;  %v4383_v27 = vmul.f32 1.442695, %v4198_v19  ;;  %6882 = vpow2.f32 %v4391_v52  ;;  %v4385_v13 = vmul.f32 1.442695, %v4199_v63  ;;  %v4206_v41 = vsub.f32 %v13196_v14, %v4064_v6 }
 0x618   : > { %v11019_v29 = vpop.eup %6858  ;;  %4848 = vperm.xlu1 %6758, %v10887_v3   ;;  %5378 = vmatmul.mubr.f32.gmra.mxu1 %v11005_v18  ;;  %6884 = vpow2.f32 %v4395_v45  ;;  %v4387_v12 = vmul.f32 1.442695, %v4200_v33  ;;  %v4208_v42 = vsub.f32 %v13197_v49, %v4064_v6  ;;  %v4389_v19 = vmul.f32 1.442695, %v4201_v23  ;;  %v13198_v33 = vld [vmem:[#allocation138_spill] sm:$0xff] }
 0x619   : > { %v11024_v40 = vpop.eup %6860  ;;  %5157 = vmatprep.mubr.f32.mxu0 %v11019_v29  ;;  %6886 = vpow2.f32 %v4381_v39  ;;  %v4393_v63 = vmul.f32 1.442695, %v4203_v30  ;;  %v4205_v26 = vsub.f32 %v13198_v33, %v4064_v6  ;;  %v4399_v14 = vmul.f32 1.442695, %v4206_v41  ;;  %v13200_v30 = vld [vmem:[#allocation139_spill] sm:$0xff]  ;;  %v13201_v41 = vld [vmem:[#allocation144_spill] sm:$0xff] }
 0x61a   : > { %v11028_v7 = vpop.eup %6862  ;;  %5158 = vmatmul.mubr.f32.gmra.mxu0 %v11014_v10  ;;  %6888 = vpow2.f32 %v4383_v27  ;;  %v4069_v49 = vpop.permute.xlu0 %4068  ;;  %v4403_v39 = vmul.f32 1.442695, %v4208_v42  ;;  %v4207_v27 = vsub.f32 %v13200_v30, %v4064_v6  ;;  %v13202_v42 = vld [vmem:[#allocation142_spill] sm:$0xff]  ;;  %v13203_v30 = vld [vmem:[#allocation145_spill] sm:$0xff] }
 0x61b   : > { %v11032_v44 = vpop.eup %6864  ;;  %5382 = vmatprep.mubr.f32.mxu1 %v11028_v7  ;;  %6890 = vpow2.f32 %v4385_v13  ;;  %v4210_v33 = vsub.f32 %v13201_v41, %v4069_v49  ;;  %v4209_v59 = vsub.f32 %v13202_v42, %v4069_v49  ;;  %v4079_v6 = vpop.permute.xlu1 %4078  ;;  %v4212_v48 = vsub.f32 %v13203_v30, %v4069_v49 }
 0x61c   : > { %v11036_v17 = vpop.eup %6866  ;;  %4858 = vperm.xlu1 %6758, %v10893_v43   ;;  %5383 = vmatmul.mubr.f32.gmra.mxu1 %v11024_v40  ;;  %6892 = vpow2.f32 %v4387_v12  ;;  %v4397_v12 = vmul.f32 1.442695, %v4205_v26  ;;  %v4401_v47 = vmul.f32 1.442695, %v4207_v27  ;;  %v13205_v26 = vld [vmem:[#allocation150_spill] sm:$0xff]  ;;  %v13207_v27 = vld [vmem:[#allocation151_spill] sm:$0xff] }
 0x61d   : > { %v11040_v52 = vpop.eup %6868  ;;  %5162 = vmatprep.mubr.f32.mxu0 %v11036_v17  ;;  %6894 = vpow2.f32 %v4389_v19  ;;  %v4407_v41 = vmul.f32 1.442695, %v4210_v33  ;;  %v4405_v42 = vmul.f32 1.442695, %v4209_v59  ;;  %v4411_v30 = vmul.f32 1.442695, %v4212_v48 }
 0x61e   : > { %v11043_v45 = vpop.eup %6870  ;;  %5163 = vmatmul.mubr.f32.gmra.mxu0 %v11032_v44  ;;  %6896 = vpow2.f32 %v4393_v63  ;;  %v13204_v63 = vld [vmem:[#allocation143_spill] sm:$0xff]  ;;  %v4074_v34 = vpop.permute.xlu0 %4073  ;;  %v13208_v33 = vld [vmem:[#allocation148_spill] sm:$0xff] }
 0x61f   : > { %v11047_v23 = vpop.eup %6872  ;;  %5387 = vmatprep.mubr.f32.mxu1 %v11043_v45  ;;  %6898 = vpow2.f32 %v4399_v14  ;;  %v4211_v21 = vsub.f32 %v13204_v63, %v4069_v49  ;;  %v4217_v14 = vsub.f32 %v13205_v26, %v4079_v6  ;;  %v4219_v49 = vsub.f32 %v13207_v27, %v4079_v6  ;;  %v13209_v26 = vld [vmem:[#allocation146_spill] sm:$0xff] }
 0x620   : > { %13199 = vst [vmem:[#allocation403_spill] sm:$0xff] %v11047_v23  ;;  %v11050_v15 = vpop.eup %6874  ;;  %4863 = vperm.xlu1 %6758, %v11047_v23   ;;  %5388 = vmatmul.mubr.f32.gmra.mxu1 %v11040_v52  ;;  %6900 = vpow2.f32 %v4403_v39  ;;  %v13206_v39 = vld [vmem:[#allocation152_spill] sm:$0xff]  ;;  %v4213_v61 = vsub.f32 %v13209_v26, %v4074_v34 }
 0x621   : > { %v11055_v13 = vpop.eup %6876  ;;  %6902 = vpow2.f32 %v4397_v12  ;;  %v4218_v57 = vsub.f32 %v13206_v39, %v4079_v6  ;;  %v4409_v63 = vmul.f32 1.442695, %v4211_v21  ;;  %v4214_v12 = vsub.f32 %v13208_v33, %v4074_v34  ;;  %v11084_v39 = vpop.permute.xlu1 %4088  ;;  %v13212_v33 = vld [vmem:[#allocation147_spill] sm:$0xff] }
 0x622   : > { %v11058_v22 = vpop.eup %6878  ;;  %5167 = vmatprep.mubr.f32.mxu0 %v11055_v13  ;;  %6904 = vpow2.f32 %v4401_v47  ;;  %v4421_v59 = vmul.f32 1.442695, %v4217_v14  ;;  %v13210_v47 = vld [vmem:[#allocation149_spill] sm:$0xff]  ;;  %v4215_v54 = vsub.f32 %v13212_v33, %v4074_v34  ;;  %v4084_v3 = vpop.permute.xlu0 %4083 }
 0x623   : > { %v11062_v19 = vpop.eup %6880  ;;  %5168 = vmatmul.mubr.f32.gmra.mxu0 %v11050_v15  ;;  %6906 = vpow2.f32 %v4407_v41  ;;  %v4423_v48 = vmul.f32 1.442695, %v4218_v57  ;;  %v4216_v27 = vsub.f32 %v13210_v47, %v4074_v34  ;;  %v4425_v41 = vmul.f32 1.442695, %v4219_v49  ;;  %v13214_v47 = vld [vmem:[#allocation158_spill] sm:$0xff] }
 0x624   : > { %5392 = vmatprep.mubr.f32.mxu1 %v11062_v19  ;;  %v11070_v56 = vpop.eup %6882  ;;  %6908 = vpow2.f32 %v4405_v42  ;;  %v13213_v42 = vld [vmem:[#allocation153_spill] sm:$0xff]  ;;  %v4415_v57 = vmul.f32 1.442695, %v4214_v12  ;;  %v4225_v49 = vsub.f32 %v13214_v47, %v11084_v39  ;;  %v4417_v47 = vmul.f32 1.442695, %v4215_v54 }
 0x625   : > { %5393 = vmatmul.mubr.f32.gmra.mxu1 %v11058_v22  ;;  %v11073_v28 = vpop.eup %6884  ;;  %6910 = vpow2.f32 %v4411_v30  ;;  %v4220_v26 = vsub.f32 %v13213_v42, %v4079_v6  ;;  %v13215_v6 = vld [vmem:[#allocation160_spill] sm:$0xff]  ;;  %v4419_v33 = vmul.f32 1.442695, %v4216_v27  ;;  %v4222_v8 = vsub.f32 %v13218_v24, %v4084_v3  ;;  %v13219_v27 = vld [vmem:[#allocation154_spill] sm:$0xff]  ;;  %v13221_v54 = vld [vmem:[#allocation157_spill] sm:$0xff] }
 0x626   : > { %v11076_v23 = vpop.eup %6886  ;;  %6912 = vpow2.f32 %v4409_v63  ;;  %v4413_v63 = vmul.f32 1.442695, %v4213_v61  ;;  %v4226_v12 = vsub.f32 %v13215_v6, %v11084_v39  ;;  %v4221_v6 = vsub.f32 %v13219_v27, %v4084_v3  ;;  %v13222_v24 = vld [vmem:[#allocation155_spill] sm:$0xff] }
 0x627   : > { %v11079_v31 = vpop.eup %6888  ;;  %6914 = vpow2.f32 %v4421_v59  ;;  %v13217_v59 = vld [vmem:[#allocation159_spill] sm:$0xff]  ;;  %v4427_v61 = vmul.f32 1.442695, %v4220_v26  ;;  %v4224_v5 = vsub.f32 %v13221_v54, %v4084_v3  ;;  %v4431_v60 = vmul.f32 1.442695, %v4222_v8 }
 0x628   : > { %v11082_v43 = vpop.eup %6890  ;;  %5172 = vmatprep.mubr.f32.mxu0 %v11079_v31  ;;  %6916 = vpow2.f32 %v4423_v48  ;;  %v4227_v36 = vsub.f32 %v13217_v59, %v11084_v39  ;;  %v4437_v48 = vmul.f32 1.442695, %v4225_v49  ;;  %v4099_v59 = vpop.permute.xlu1 %4098  ;;  %v4429_v11 = vmul.f32 1.442695, %v4221_v6 }
 0x629   : > { %v11088_v21 = vpop.eup %6892  ;;  %5173 = vmatmul.mubr.f32.gmra.mxu0 %v11076_v23  ;;  %6918 = vpow2.f32 %v4425_v41  ;;  %v4439_v41 = vmul.f32 1.442695, %v4226_v12 }
 0x62a   : > { %13211 = vst [vmem:[#allocation404_spill] sm:$0xff] %v11088_v21  ;;  %v11092_v14 = vpop.eup %6894  ;;  %5397 = vmatprep.mubr.f32.mxu1 %v11088_v21  ;;  %5177 = vmatprep.mubr.f32.mxu0 %v11070_v56  ;;  %6920 = vpow2.f32 %v4415_v57  ;;  %v4441_v26 = vmul.f32 1.442695, %v4227_v36  ;;  %v4223_v57 = vsub.f32 %v13222_v24, %v4084_v3  ;;  %v13226_v3 = vld [vmem:[#allocation168_spill] sm:$0xff]  ;;  %v13229_v24 = vld [vmem:[#allocation169_spill] sm:$0xff] }
 0x62b   : > { %v11097_v30 = vpop.eup %6896  ;;  %5398 = vmatmul.mubr.f32.gmra.mxu1 %v11082_v43  ;;  %6922 = vpow2.f32 %v4413_v63  ;;  %v13224_v63 = vld [vmem:[#allocation161_spill] sm:$0xff]  ;;  %v4236_v6 = vsub.f32 %v13229_v24, %v4099_v59 }
 0x62c   : > { %v11102_v34 = vpop.eup %6898  ;;  %5402 = vmatprep.mubr.f32.mxu1 %v11073_v28  ;;  %6924 = vpow2.f32 %v4419_v33  ;;  %v4228_v27 = vsub.f32 %v13224_v63, %v11084_v39  ;;  %v13225_v33 = vld [vmem:[#allocation166_spill] sm:$0xff]  ;;  %v13228_v39 = vld [vmem:[#allocation167_spill] sm:$0xff]  ;;  %v4433_v63 = vmul.f32 1.442695, %v4223_v57 }
 0x62d   : > { %v11107_v42 = vpop.eup %6900  ;;  %5178 = vmatmul.mubr.f32.gmra.mxu0 %v11092_v14  ;;  %6926 = vpow2.f32 %v4417_v47  ;;  %v4233_v54 = vsub.f32 %v13225_v33, %v4099_v59  ;;  %v4234_v47 = vsub.f32 %v13226_v3, %v4099_v59 }
 0x62e   : > { %13216 = vst [vmem:[#allocation405_spill] sm:$0xff] %v11107_v42  ;;  %5182 = vmatprep.mubr.f32.mxu0 %v11102_v34  ;;  %v11116_v25 = vpop.eup %6902  ;;  %6928 = vpow2.f32 %v4427_v61  ;;  %v4435_v61 = vmul.f32 1.442695, %v4224_v5  ;;  %v4634_v5 = vadd.f32 %v10979_v53, %v10968_v50  ;;  %v4459_v50 = vmul.f32 1.442695, %v4236_v6 }
 0x62f   : > { %5403 = vmatmul.mubr.f32.gmra.mxu1 %v11097_v30  ;;  %13220 = vst [vmem:[#allocation406_spill] sm:$0xff] %v11116_v25  ;;  %v11122_v49 = vpop.eup %6904  ;;  %6930 = vpow2.f32 %v4437_v48  ;;  %v4235_v48 = vsub.f32 %v13228_v39, %v4099_v59  ;;  %v4453_v3 = vmul.f32 1.442695, %v4233_v54  ;;  %v13231_v39 = vld [vmem:[#allocation162_spill] sm:$0xff] }
 0x630   : > { %5407 = vmatprep.mubr.f32.mxu1 %v11107_v42  ;;  %13223 = vst [vmem:[#allocation407_spill] sm:$0xff] %v11122_v49  ;;  %v11126_v12 = vpop.eup %6906  ;;  %v4094_v42 = vpop.permute.xlu0 %4093  ;;  %6932 = vpow2.f32 %v4439_v41  ;;  %v13230_v41 = vld [vmem:[#allocation164_spill] sm:$0xff] }
 0x631   : > { %5183 = vmatmul.mubr.f32.gmra.mxu0 %v11116_v25  ;;  %v11131_v36 = vpop.eup %6908  ;;  %6934 = vpow2.f32 %v4441_v26  ;;  %v11146_v26 = vpop.permute.xlu1 %4108  ;;  %v4229_v59 = vsub.f32 %v13231_v39, %v4094_v42  ;;  %v4457_v21 = vmul.f32 1.442695, %v4235_v48  ;;  %v13234_v39 = vld [vmem:[#allocation174_spill] sm:$0xff]  ;;  %v4635_v25 = vadd.f32 %v10982_v1, %v4634_v5 }
 0x632   : > { %5187 = vmatprep.mubr.f32.mxu0 %v11126_v12  ;;  %v11135_v8 = vpop.eup %6910  ;;  %6936 = vpow2.f32 %v4431_v60  ;;  %v4455_v60 = vmul.f32 1.442695, %v4234_v47 }
 0x633   : > { %5408 = vmatmul.mubr.f32.gmra.mxu1 %v11122_v49  ;;  %13227 = vst [vmem:[#allocation408_spill] sm:$0xff] %v11135_v8  ;;  %v11140_v33 = vpop.eup %6912  ;;  %v4230_v49 = vsub.f32 %v13230_v41, %v4094_v42  ;;  %6938 = vpow2.f32 %v4429_v11  ;;  %v13233_v11 = vld [vmem:[#allocation163_spill] sm:$0xff]  ;;  %v4445_v48 = vmul.f32 1.442695, %v4229_v59  ;;  %v11175_v1 = vadd.f32 %v10988_v20, %v4635_v25  ;;  %v13237_v25 = vld [vmem:[#allocation172_spill] sm:$0xff] }
 0x634   : > { %5412 = vmatprep.mubr.f32.mxu1 %v11135_v8  ;;  %v11151_v57 = vpop.eup %6914  ;;  %6940 = vpow2.f32 %v4435_v61  ;;  %v4231_v53 = vsub.f32 %v13233_v11, %v4094_v42  ;;  %v4241_v8 = vsub.f32 %v13234_v39, %v11146_v26  ;;  %v13235_v61 = vld [vmem:[#allocation176_spill] sm:$0xff]  ;;  %v11166_v6 = vpop.permute.xlu0 %4103 }
 0x635   : > { %5188 = vmatmul.mubr.f32.gmra.mxu0 %v11131_v36  ;;  %v11154_v41 = vpop.eup %6916  ;;  %6942 = vpow2.f32 %v4433_v63  ;;  %v4238_v20 = vsub.f32 %v13237_v25, %v11166_v6  ;;  %v11204_v39 = vpop.permute.xlu1 %4118 }
 0x636   : > { %4592 = vadd.xlane.f32.xlu0 %v10907_v9  ;;  %v4443_v9 = vmul.f32 1.442695, %v4228_v27  ;;  %v13232_v27 = vld [vmem:[#allocation165_spill] sm:$0xff]  ;;  %v11157_v54 = vpop.eup %6918  ;;  %v4449_v59 = vmul.f32 1.442695, %v4231_v53 }
 0x637   : > { %5413 = vmatmul.mubr.f32.gmra.mxu1 %v11140_v33  ;;  %v4232_v24 = vsub.f32 %v13232_v27, %v4094_v42  ;;  %v11162_v47 = vpop.eup %6920  ;;  %v4242_v27 = vsub.f32 %v13235_v61, %v11146_v26  ;;  %v4630_v42 = vadd.f32 %v10954_v51, %v10977_v46 }
 0x638   : > { %6944 = vpow2.f32 %v4443_v9  ;;  %v11171_v63 = vpop.eup %6922  ;;  %5192 = vmatprep.mubr.f32.mxu0 %v11162_v47  ;;  %v4639_v9 = vadd.f32 %v11001_v55, %v10992_v0  ;;  %v4649_v55 = vadd.f32 %v11036_v17, %v11032_v44 }
 0x639   : > { %6946 = vpow2.f32 %v4453_v3  ;;  %v11179_v5 = vpop.eup %6924  ;;  %5193 = vmatmul.mubr.f32.gmra.mxu0 %v11171_v63  ;;  %v11185_v51 = vadd.f32 %v10961_v58, %v4630_v42  ;;  %v4471_v58 = vmul.f32 1.442695, %v4242_v27 }
 0x63a   : > { %4602 = vadd.xlane.f32.xlu0 %v10919_v4  ;;  %v4447_v4 = vmul.f32 1.442695, %v4230_v49  ;;  %6948 = vpow2.f32 %v4455_v60  ;;  %v4451_v49 = vmul.f32 1.442695, %v4232_v24  ;;  %v11187_v46 = vpop.eup %6926  ;;  %5417 = vmatprep.mubr.f32.mxu1 %v11179_v5  ;;  %v4640_v0 = vadd.f32 %v11005_v18, %v4639_v9  ;;  %v13238_v24 = vld [vmem:[#allocation170_spill] sm:$0xff]  ;;  %v13239_v18 = vld [vmem:[#allocation173_spill] sm:$0xff] }
 0x63b   : > { %6950 = vpow2.f32 %v4457_v21  ;;  %5197 = vmatprep.mubr.f32.mxu0 %v11154_v41  ;;  %v11196_v21 = vpop.eup %6928  ;;  %v4469_v60 = vmul.f32 1.442695, %v4241_v8  ;;  %v4237_v11 = vsub.f32 %v13238_v24, %v11166_v6  ;;  %5418 = vmatmul.mubr.f32.gmra.mxu1 %v11187_v46  ;;  %v4240_v44 = vsub.f32 %v13239_v18, %v11166_v6  ;;  %v13245_v24 = vld [vmem:[#allocation180_spill] sm:$0xff] }
 0x63c   : > { %6952 = vpow2.f32 %v4447_v4  ;;  %v11202_v53 = vpop.eup %6930  ;;  %5422 = vmatprep.mubr.f32.mxu1 %v11196_v21  ;;  %v11210_v17 = vadd.f32 %v11009_v32, %v4640_v0  ;;  %v4650_v8 = vadd.f32 %v11040_v52, %v4649_v55  ;;  %v13241_v32 = vld [vmem:[#allocation177_spill] sm:$0xff] }
 0x63d   : > { %6954 = vpow2.f32 %v4445_v48  ;;  %v11213_v4 = vpop.eup %6932  ;;  %5198 = vmatmul.mubr.f32.gmra.mxu0 %v11151_v57  ;;  %v4644_v48 = vadd.f32 %v11019_v29, %v11014_v10  ;;  %v4244_v52 = vsub.f32 %v13241_v32, %v11146_v26  ;;  %v4461_v10 = vmul.f32 1.442695, %v4237_v11  ;;  %v4114_v29 = vpop.permute.xlu0 %4113 }
 0x63e   : > { %4607 = vadd.xlane.f32.xlu0 %v10925_v35  ;;  %v13236_v35 = vld [vmem:[#allocation175_spill] sm:$0xff]  ;;  %6956 = vpow2.f32 %v4451_v49  ;;  %v11221_v42 = vpop.eup %6934  ;;  %v4463_v49 = vmul.f32 1.442695, %v4238_v20  ;;  %v11226_v9 = vadd.f32 %v11043_v45, %v4650_v8  ;;  %v4467_v25 = vmul.f32 1.442695, %v4240_v44 }
 0x63f   : > { %v4243_v3 = vsub.f32 %v13236_v35, %v11146_v26  ;;  %6958 = vpow2.f32 %v4449_v59  ;;  %v11228_v35 = vpop.eup %6936  ;;  %5423 = vmatmul.mubr.f32.gmra.mxu1 %v11157_v54  ;;  %v13244_v45 = vld [vmem:[#allocation183_spill] sm:$0xff]  ;;  %v4645_v55 = vadd.f32 %v11024_v40, %v4644_v48  ;;  %v4246_v11 = vsub.f32 %v13245_v24, %v4114_v29  ;;  %v13248_v48 = vld [vmem:[#allocation181_spill] sm:$0xff] }
 0x640   : > { %6960 = vpow2.f32 %v4459_v50  ;;  %v11236_v26 = vpop.eup %6938  ;;  %v4251_v50 = vsub.f32 %v13244_v45, %v11204_v39  ;;  %5202 = vmatprep.mubr.f32.mxu0 %v11228_v35  ;;  %v4248_v32 = vsub.f32 %v13248_v48, %v4114_v29 }
 0x641   : > { %v4473_v61 = vmul.f32 1.442695, %v4243_v3  ;;  %6962 = vpow2.f32 %v4469_v60  ;;  %v11241_v20 = vpop.eup %6940  ;;  %5203 = vmatmul.mubr.f32.gmra.mxu0 %v11236_v26 }
 0x642   : > { %4617 = vadd.xlane.f32.xlu0 %v10937_v62  ;;  %v13240_v62 = vld [vmem:[#allocation171_spill] sm:$0xff]  ;;  %6964 = vpow2.f32 %v4471_v58  ;;  %v11248_v60 = vpop.eup %6942  ;;  %v4475_v58 = vmul.f32 1.442695, %v4244_v52  ;;  %5427 = vmatprep.mubr.f32.mxu1 %v11241_v20 }
 0x643   : > { %v4239_v27 = vsub.f32 %v13240_v62, %v11166_v6  ;;  %v13242_v6 = vld [vmem:[#allocation182_spill] sm:$0xff]  ;;  %6966 = vpow2.f32 %v4473_v61  ;;  %5207 = vmatprep.mubr.f32.mxu0 %v11213_v4  ;;  %5428 = vmatmul.mubr.f32.gmra.mxu1 %v11248_v60  ;;  %v11260_v61 = vpop.permute.xlu1 %4128  ;;  %v13247_v62 = vld [vmem:[#allocation179_spill] sm:$0xff] }
 0x644   : > { %4597 = vadd.xlane.f32.xlu1 %v10913_v37  ;;  %v4249_v3 = vsub.f32 %v13242_v6, %v11204_v39  ;;  %v13243_v37 = vld [vmem:[#allocation184_spill] sm:$0xff]  ;;  %6968 = vpow2.f32 %v4463_v49  ;;  %v11267_v49 = vpop.permute.xlu0 %4123 }
 0x645   : > { %v4250_v59 = vsub.f32 %v13243_v37, %v11204_v39  ;;  %v4465_v0 = vmul.f32 1.442695, %v4239_v27  ;;  %v11253_v18 = vpop.eup %6944  ;;  %6970 = vpow2.f32 %v4461_v10  ;;  %v4247_v27 = vsub.f32 %v13247_v62, %v4114_v29  ;;  %5208 = vmatmul.mubr.f32.gmra.mxu0 %v11202_v53 }
 0x646   : > { %4627 = vadd.xlane.f32.xlu0 %v10959_v2  ;;  %v4654_v2 = vadd.f32 %v11055_v13, %v11050_v15  ;;  %v4485_v44 = vmul.f32 1.442695, %v4249_v3  ;;  %v11258_v15 = vpop.eup %6946  ;;  %v4489_v13 = vmul.f32 1.442695, %v4251_v50  ;;  %6972 = vpow2.f32 %v4467_v25  ;;  %5432 = vmatprep.mubr.f32.mxu1 %v11253_v18  ;;  %v13250_v50 = vld [vmem:[#allocation190_spill] sm:$0xff] }
 0x647   : > { %v4487_v8 = vmul.f32 1.442695, %v4250_v59  ;;  %v11265_v52 = vpop.eup %6948  ;;  %6974 = vpow2.f32 %v4465_v0  ;;  %v4664_v3 = vadd.f32 %v11092_v14, %v11070_v56  ;;  %v13249_v59 = vld [vmem:[#allocation185_spill] sm:$0xff]  ;;  %5433 = vmatmul.mubr.f32.gmra.mxu1 %v11221_v42  ;;  %v4481_v14 = vmul.f32 1.442695, %v4247_v27  ;;  %v13255_v27 = vld [vmem:[#allocation187_spill] sm:$0xff] }
 0x648   : > { %4612 = vadd.xlane.f32.xlu1 %v10931_v16  ;;  %v13246_v16 = vld [vmem:[#allocation178_spill] sm:$0xff]  ;;  %v4655_v6 = vadd.f32 %v11058_v22, %v4654_v2  ;;  %v11275_v37 = vpop.eup %6950  ;;  %6976 = vpow2.f32 %v4475_v58  ;;  %v4252_v10 = vsub.f32 %v13249_v59, %v11204_v39  ;;  %v4483_v0 = vmul.f32 1.442695, %v4248_v32  ;;  %v13252_v39 = vld [vmem:[#allocation188_spill] sm:$0xff] }
 0x649   : > { %v4245_v40 = vsub.f32 %v13246_v16, %v4114_v29  ;;  %v4479_v29 = vmul.f32 1.442695, %v4246_v11  ;;  %v11279_v45 = vpop.eup %6952  ;;  %6978 = vpow2.f32 %v4485_v44  ;;  %v4665_v24 = vadd.f32 %v11097_v30, %v4664_v3  ;;  %v13253_v16 = vld [vmem:[#allocation189_spill] sm:$0xff] }
 0x64a   : > { %4637 = vadd.xlane.f32.xlu0 %v11175_v1  ;;  %v4646_v1 = vadd.f32 %v11028_v7, %v4645_v55  ;;  %v13251_v7 = vld [vmem:[#allocation192_spill] sm:$0xff]  ;;  %v11286_v56 = vpop.eup %6954  ;;  %6980 = vpow2.f32 %v4487_v8  ;;  %v4254_v55 = vsub.f32 %v13252_v39, %v11267_v49  ;;  %5212 = vmatprep.mubr.f32.mxu0 %v11279_v45  ;;  %v4656_v58 = vadd.f32 %v11062_v19, %v4655_v6  ;;  %v13254_v19 = vld [vmem:[#allocation186_spill] sm:$0xff] }
 0x64b   : > { %v4258_v25 = vsub.f32 %v13251_v7, %v11260_v61  ;;  %v4477_v22 = vmul.f32 1.442695, %v4245_v40  ;;  %v11291_v2 = vpop.eup %6956  ;;  %6982 = vpow2.f32 %v4489_v13  ;;  %5213 = vmatmul.mubr.f32.gmra.mxu0 %v11286_v56  ;;  %v4674_v11 = vadd.f32 %v11131_v36, %v11126_v12 }
 0x64c   : > { %4622 = vadd.xlane.f32.xlu1 %v10943_v38  ;;  %v4257_v38 = vsub.f32 %v13250_v50, %v11260_v61  ;;  %v11299_v44 = vpop.eup %6958  ;;  %v4491_v8 = vmul.f32 1.442695, %v4252_v10  ;;  %6984 = vpow2.f32 %v4479_v29  ;;  %v4256_v40 = vsub.f32 %v13253_v16, %v11267_v49  ;;  %5437 = vmatprep.mubr.f32.mxu1 %v11291_v2  ;;  %v13257_v10 = vld [vmem:[#allocation193_spill] sm:$0xff] }
 0x64d   : > { %5217 = vmatprep.mubr.f32.mxu0 %v11265_v52  ;;  %v11305_v13 = vpop.eup %6960  ;;  %6986 = vpow2.f32 %v4477_v22  ;;  %v4253_v30 = vsub.f32 %v13254_v19, %v11267_v49  ;;  %5438 = vmatmul.mubr.f32.gmra.mxu1 %v11299_v44  ;;  %v4659_v12 = vadd.f32 %v11079_v31, %v11076_v23  ;;  %v4503_v62 = vmul.f32 1.442695, %v4258_v25  ;;  %v13259_v25 = vld [vmem:[#allocation408_spill] sm:$0xff] }
 0x64e   : > { %4647 = vadd.xlane.f32.xlu0 %v4646_v1  ;;  %v11312_v36 = vpop.eup %6962  ;;  %6988 = vpow2.f32 %v4483_v0  ;;  %v4255_v48 = vsub.f32 %v13255_v27, %v11267_v49  ;;  %v4495_v32 = vmul.f32 1.442695, %v4254_v55  ;;  %5442 = vmatprep.mubr.f32.mxu1 %v11305_v13  ;;  %v4666_v6 = vadd.f32 %v11073_v28, %v4665_v24  ;;  %v13256_v49 = vld [vmem:[#allocation191_spill] sm:$0xff] }
 0x64f   : > { %v11317_v1 = vpop.eup %6964  ;;  %6990 = vpow2.f32 %v4481_v14  ;;  %5218 = vmatmul.mubr.f32.gmra.mxu0 %v11258_v15  ;;  %v4675_v31 = vadd.f32 %v11140_v33, %v4674_v11  ;;  %v4684_v23 = vadd.f32 %v11154_v41, %v11151_v57  ;;  %v4259_v59 = vsub.f32 %v13256_v49, %v11260_v61  ;;  %v13258_v33 = vld [vmem:[#allocation406_spill] sm:$0xff] }
 0x650   : > { %4632 = vadd.xlane.f32.xlu1 %v11185_v51  ;;  %v4501_v51 = vmul.f32 1.442695, %v4257_v38  ;;  %v11325_v3 = vpop.eup %6966  ;;  %6992 = vpow2.f32 %v4491_v8  ;;  %v4260_v29 = vsub.f32 %v13257_v10, %v11260_v61  ;;  %v4499_v50 = vmul.f32 1.442695, %v4256_v40 }
 0x651   : > { %v11331_v38 = vpop.eup %6968  ;;  %5443 = vmatmul.mubr.f32.gmra.mxu1 %v11275_v37  ;;  %v4660_v28 = vadd.f32 %v11082_v43, %v4659_v12  ;;  %v4669_v57 = vadd.f32 %v13258_v33, %v11102_v34  ;;  %v4497_v7 = vmul.f32 1.442695, %v4255_v48  ;;  %v4676_v22 = vadd.f32 %v13259_v25, %v4675_v31 }
 0x652   : > { %4657 = vadd.xlane.f32.xlu0 %v4656_v58  ;;  %6994 = vpow2.f32 %v4501_v51  ;;  %v11337_v41 = vpop.eup %6970  ;;  %5222 = vmatprep.mubr.f32.mxu0 %v11331_v38  ;;  %v4685_v43 = vadd.f32 %v11157_v54, %v4684_v23  ;;  %v4694_v34 = vadd.f32 %v11213_v4, %v11202_v53  ;;  %v4505_v0 = vmul.f32 1.442695, %v4259_v59  ;;  %v13261_v54 = vld [vmem:[#allocation407_spill] sm:$0xff] }
 0x653   : > { %6996 = vpow2.f32 %v4495_v32  ;;  %v11340_v61 = vpop.eup %6972  ;;  %5223 = vmatmul.mubr.f32.gmra.mxu0 %v11337_v41  ;;  %v4507_v39 = vmul.f32 1.442695, %v4260_v29  ;;  %v4670_v24 = vadd.f32 %v13261_v54, %v4669_v57  ;;  %v4679_v53 = vadd.f32 %v11171_v63, %v11162_v47  ;;  %v13262_v47 = vld [vmem:[#allocation405_spill] sm:$0xff] }
 0x654   : > { %4642 = vadd.xlane.f32.xlu1 %v11210_v17  ;;  %v4493_v17 = vmul.f32 1.442695, %v4253_v30  ;;  %6998 = vpow2.f32 %v4503_v62  ;;  %v11348_v14 = vpop.eup %6974  ;;  %5447 = vmatprep.mubr.f32.mxu1 %v11340_v61  ;;  %v4686_v8 = vadd.f32 %v11196_v21, %v4685_v43  ;;  %v4695_v16 = vadd.f32 %v11221_v42, %v4694_v34  ;;  %v13264_v34 = vld [vmem:[#allocation196_spill] sm:$0xff] }
 0x655   : > { %7000 = vpow2.f32 %v4499_v50  ;;  %5227 = vmatprep.mubr.f32.mxu0 %v11317_v1  ;;  %v6977_v55 = vpop.eup %6976  ;;  %5448 = vmatmul.mubr.f32.gmra.mxu1 %v11348_v14  ;;  %v4704_v40 = vadd.f32 %v11265_v52, %v11258_v15  ;;  %v4671_v63 = vadd.f32 %v13262_v47, %v4670_v24  ;;  %v4680_v30 = vadd.f32 %v11187_v46, %v4679_v53 }
 0x656   : > { %4667 = vadd.xlane.f32.xlu0 %v4666_v6  ;;  %7002 = vpow2.f32 %v4493_v17  ;;  %v6979_v4 = vpop.eup %6978  ;;  %5452 = vmatprep.mubr.f32.mxu1 %v6977_v55  ;;  %v4689_v12 = vadd.f32 %v11236_v26, %v11228_v35  ;;  %v4696_v15 = vadd.f32 %v11253_v18, %v4695_v16  ;;  %v4714_v62 = vadd.f32 %v11317_v1, %v11312_v36 }
 0x657   : > { %v6981_v11 = vpop.eup %6980  ;;  %7004 = vpow2.f32 %v4497_v7  ;;  %5228 = vmatmul.mubr.f32.gmra.mxu0 %v11312_v36  ;;  %v4705_v52 = vadd.f32 %v11275_v37, %v4704_v40  ;;  %v4681_v46 = vadd.f32 %v11179_v5, %v4680_v30  ;;  %v4699_v26 = vadd.f32 %v11286_v56, %v11279_v45  ;;  %v13269_v40 = vld [vmem:[#allocation199_spill] sm:$0xff] }
 0x658   : > { %4652 = vadd.xlane.f32.xlu1 %v11226_v9  ;;  %v13260_v9 = vld [vmem:[#allocation404_spill] sm:$0xff]  ;;  %v6983_v51 = vpop.eup %6982  ;;  %7006 = vpow2.f32 %v4507_v39  ;;  %v4690_v35 = vadd.f32 %v11248_v60, %v4689_v12  ;;  %v4715_v36 = vadd.f32 %v11325_v3, %v4714_v62  ;;  %v4724_v1 = vadd.f32 %v6981_v11, %v6979_v4 }
 0x659   : > { %v4661_v58 = vadd.f32 %v13260_v9, %v4660_v28  ;;  %v6985_v19 = vpop.eup %6984  ;;  %7008 = vpow2.f32 %v4505_v0  ;;  %5453 = vmatmul.mubr.f32.gmra.mxu1 %v11325_v3  ;;  %v4706_v37 = vadd.f32 %v11305_v13, %v4705_v52  ;;  %v4700_v60 = vadd.f32 %v11299_v44, %v4699_v26  ;;  %v13265_v0 = vld [vmem:[#allocation195_spill] sm:$0xff] }
 0x65a   : > { %4677 = vadd.xlane.f32.xlu0 %v4676_v22  ;;  %v6987_v21 = vpop.eup %6986  ;;  %5232 = vmatprep.mubr.f32.mxu0 %v6985_v19  ;;  %v4691_v5 = vadd.f32 %v11241_v20, %v4690_v35  ;;  %v4709_v45 = vadd.f32 %v11337_v41, %v11331_v38  ;;  %v4716_v13 = vadd.f32 %v6977_v55, %v4715_v36  ;;  %v13263_v22 = vld [vmem:[#allocation194_spill] sm:$0xff]  ;;  %v13266_v55 = vld [vmem:[#allocation197_spill] sm:$0xff] }
 0x65b   : > { %v6989_v42 = vpop.eup %6988  ;;  %5233 = vmatmul.mubr.f32.gmra.mxu0 %v6987_v21  ;;  %v4725_v23 = vadd.f32 %v6983_v51, %v4724_v1  ;;  %v4701_v10 = vadd.f32 %v11291_v2, %v4700_v60  ;;  %v4719_v44 = vadd.f32 %v6987_v21, %v6985_v19  ;;  %v13270_v19 = vld [vmem:[#allocation201_spill] sm:$0xff]  ;;  %v13274_v60 = vld [vmem:[#allocation349_spill] sm:$0xff] }
 0x65c   : > { %4662 = vadd.xlane.f32.xlu1 %v4661_v58  ;;  %v6991_v27 = vpop.eup %6990  ;;  %5457 = vmatprep.mubr.f32.mxu1 %v6989_v42  ;;  %v4710_v20 = vadd.f32 %v11348_v14, %v4709_v45  ;;  %v13275_v45 = vld [vmem:[#allocation351_spill] sm:$0xff] }
 0x65d   : > { %5237 = vmatprep.mubr.f32.mxu0 %v6981_v11  ;;  %v6993_v48 = vpop.eup %6992  ;;  %5458 = vmatmul.mubr.f32.gmra.mxu1 %v6991_v27  ;;  %v4720_v28 = vadd.f32 %v6991_v27, %v4719_v44  ;;  %v13281_v44 = vld [vmem:[#allocation352_spill] sm:$0xff] }
 0x65e   : > { %4687 = vadd.xlane.f32.xlu0 %v4686_v8  ;;  %5462 = vmatprep.mubr.f32.mxu1 %v6993_v48  ;;  %v4726_v50 = vadd.f32 %v6993_v48, %v4725_v23  ;;  %v4711_v17 = vadd.f32 %v11340_v61, %v4710_v20  ;;  %v13268_v8 = vld [vmem:[#allocation200_spill] sm:$0xff]  ;;  %v13280_v20 = vld [vmem:[#allocation350_spill] sm:$0xff] }
 0x65f   : > { %v6995_v32 = vpop.eup %6994  ;;  %5238 = vmatmul.mubr.f32.gmra.mxu0 %v6979_v4  ;;  %v4721_v41 = vadd.f32 %v6989_v42, %v4720_v28  ;;  %v13267_v4 = vld [vmem:[#allocation198_spill] sm:$0xff] }
 0x660   : > { %4672 = vadd.xlane.f32.xlu1 %v4671_v63  ;;  %v6997_v18 = vpop.eup %6996 }
 0x661   : > { %v6999_v6 = vpop.eup %6998  ;;  %5242 = vmatprep.mubr.f32.mxu0 %v6997_v18  ;;  %5463 = vmatmul.mubr.f32.gmra.mxu1 %v6983_v51 }
 0x662   : > { %4697 = vadd.xlane.f32.xlu0 %v4696_v15  ;;  %v7001_v31 = vpop.eup %7000  ;;  %v4734_v3 = vadd.f32 %v6999_v6, %v6995_v32 }
 0x663   : > { %v7003_v56 = vpop.eup %7002  ;;  %5467 = vmatprep.mubr.f32.mxu1 %v7001_v31 }
 0x664   : > { %4682 = vadd.xlane.f32.xlu1 %v4681_v46  ;;  %5243 = vmatmul.mubr.f32.gmra.mxu0 %v7003_v56  ;;  %v7005_v49 = vpop.eup %7004  ;;  %v4729_v33 = vadd.f32 %v7003_v56, %v6997_v18  ;;  %v13271_v18 = vld [vmem:[#allocation347_spill] sm:$0xff]  ;;  %v13276_v56 = vsub.f32 %v13274_v60, %v13275_v45  ;;  %v4817_v45 = vld [vmem:[#allocation4 + $0x18] sm:$0xff] }
 0x665   : > { %5247 = vmatprep.mubr.f32.mxu0 %v6999_v6  ;;  %v7007_v59 = vpop.eup %7006  ;;  %5468 = vmatmul.mubr.f32.gmra.mxu1 %v7005_v49 }
 0x666   : > { %4707 = vadd.xlane.f32.xlu0 %v4706_v37  ;;  %v7009_v29 = vpop.eup %7008  ;;  %5472 = vmatprep.mubr.f32.mxu1 %v7007_v59  ;;  %v4730_v2 = vadd.f32 %v7005_v49, %v4729_v33  ;;  %v13272_v37 = vld [vmem:[#allocation348_spill] sm:$0xff]  ;;  %v13278_v49 = vld [vmem:[#allocation355_spill] sm:$0xff]  ;;  %v13283_v33 = vld [vmem:[#allocation357_spill] sm:$0xff] }
 0x667   : > { %v4735_v38 = vadd.f32 %v7009_v29, %v4734_v3  ;;  %v13273_v36 = vsub.f32 %v13271_v18, %v13272_v37  ;;  %v13277_v3 = vld [vmem:[#allocation353_spill] sm:$0xff]  ;;  %v13298_v37 = vld [vmem:[#allocation362_spill] sm:$0xff] }
 0x668   : > { %4692 = vadd.xlane.f32.xlu1 %v4691_v5  ;;  %5248 = vmatmul.mubr.f32.gmra.mxu0 %v6995_v32  ;;  %v4731_v7 = vadd.f32 %v7001_v31, %v4730_v2 }
 0x669   : > { %5473 = vmatmul.mubr.f32.gmra.mxu1 %v7009_v29  ;;  %v4736_v57 = vadd.f32 %v7007_v59, %v4735_v38  ;;  %v3927_v1 = vmul.f32 1.442695, %v13273_v36  ;;  %v13279_v59 = vsub.f32 %v13277_v3, %v13278_v49  ;;  %v13282_v29 = vsub.f32 %v13280_v20, %v13281_v44  ;;  %v13299_v36 = vld [vmem:[#allocation364_spill] sm:$0xff]  ;;  %v13302_v3 = vld [vmem:[#allocation371_spill] sm:$0xff]  ;;  %v4525_v44 = vld [vmem:[#allocation3] sm:$0xff] }
 0x66a   : > { %4717 = vadd.xlane.f32.xlu0 %v4716_v13  ;;  %v3931_v13 = vmul.f32 1.442695, %v13276_v56 }
 0x66c   : > { %4702 = vadd.xlane.f32.xlu1 %v4701_v10  ;;  %v3935_v10 = vmul.f32 1.442695, %v13279_v59 }
 0x66e   : > { %4727 = vadd.xlane.f32.xlu0 %v4726_v50  ;;  %v3929_v50 = vmul.f32 1.442695, %v13282_v29 }
 0x670   : > { %4712 = vadd.xlane.f32.xlu1 %v4711_v17  ;;  %v4814_v17 = vld [vmem:[#allocation4] sm:$0xff] }
 0x672   : > { %4737 = vadd.xlane.f32.xlu0 %v4736_v57  ;;  %v13284_v57 = vld [vmem:[#allocation359_spill] sm:$0xff] }
 0x674   : > { %4722 = vadd.xlane.f32.xlu1 %v4721_v41  ;;  %v13285_v41 = vsub.f32 %v13283_v33, %v13284_v57 }
 0x676   : > { %v3939_v2 = vmul.f32 1.442695, %v13285_v41 }
 0x678   : > { %4732 = vadd.xlane.f32.xlu1 %v4731_v7 }
 0x68a   : > { %v4134_v25 = vpop.permute.xlu0 %4133 }
 0x68b   : > { %v4261_v43 = vsub.f32 %v13263_v22, %v4134_v25  ;;  %v4262_v14 = vsub.f32 %v13264_v34, %v4134_v25  ;;  %v4263_v39 = vsub.f32 %v13265_v0, %v4134_v25  ;;  %v4264_v9 = vsub.f32 %v13266_v55, %v4134_v25  ;;  %v13286_v22 = vld [vmem:[#allocation354_spill] sm:$0xff] }
 0x68d   : > { %v4509_v61 = vmul.f32 1.442695, %v4261_v43  ;;  %v4511_v58 = vmul.f32 1.442695, %v4262_v14  ;;  %v4513_v54 = vmul.f32 1.442695, %v4263_v39 }
 0x68e   : > { %v4515_v24 = vmul.f32 1.442695, %v4264_v9  ;;  %v13287_v43 = vld [vmem:[#allocation356_spill] sm:$0xff]  ;;  %v4854_v0 = vpop.permute.xlu0 %4853  ;;  %v4815_v9 = vld [vmem:[#allocation4 + $0x8] sm:$0xff] }
 0x68f   : > { %7010 = vpow2.f32 %v4509_v61  ;;  %v4139_v53 = vpop.permute.xlu1 %4138  ;;  %v13288_v34 = vsub.f32 %v13286_v22, %v13287_v43 }
 0x690   : > { %7012 = vpow2.f32 %v4511_v58  ;;  %v4265_v11 = vsub.f32 %v13267_v4, %v4139_v53  ;;  %v4266_v16 = vsub.f32 %v13268_v8, %v4139_v53  ;;  %v4267_v51 = vsub.f32 %v13269_v40, %v4139_v53 }
 0x691   : > { %7014 = vpow2.f32 %v4513_v54  ;;  %v4268_v47 = vsub.f32 %v13270_v19, %v4139_v53  ;;  %v3933_v14 = vmul.f32 1.442695, %v13288_v34  ;;  %v13289_v54 = vld [vmem:[#allocation361_spill] sm:$0xff]  ;;  %v13292_v19 = vld [vmem:[#allocation358_spill] sm:$0xff] }
 0x692   : > { %7016 = vpow2.f32 %v4515_v24  ;;  %v4517_v63 = vmul.f32 1.442695, %v4265_v11  ;;  %v4519_v30 = vmul.f32 1.442695, %v4266_v16  ;;  %v4521_v12 = vmul.f32 1.442695, %v4267_v51 }
 0x693   : > { %v4523_v21 = vmul.f32 1.442695, %v4268_v47  ;;  %v4849_v38 = vpop.permute.xlu1 %4848  ;;  %v13290_v24 = vld [vmem:[#allocation363_spill] sm:$0xff]  ;;  %v13293_v47 = vld [vmem:[#allocation360_spill] sm:$0xff]  ;;  %v13307_v34 = vld [vmem:[#allocation397_spill] sm:$0xff] }
 0x694   : > { %7018 = vpow2.f32 %v4517_v63  ;;  %v5006_v39 = vmul.f32 %v4849_v38, %v4814_v17  ;;  %v13291_v53 = vsub.f32 %v13289_v54, %v13290_v24  ;;  %v13294_v63 = vsub.f32 %v13292_v19, %v13293_v47  ;;  %v13304_v17 = vld [vmem:[#allocation366_spill] sm:$0xff]  ;;  %v4527_v54 = vld [vmem:[#allocation3 + $0x10] sm:$0xff] }
 0x695   : > { %7020 = vpow2.f32 %v4519_v30 }
 0x696   : > { %7022 = vpow2.f32 %v4521_v12  ;;  %v3943_v4 = vmul.f32 1.442695, %v13291_v53  ;;  %v3937_v30 = vmul.f32 1.442695, %v13294_v63  ;;  %v5007_v12 = vmul.f32 %v4854_v0, %v4815_v9  ;;  %v13308_v0 = vld [vmem:[#allocation378_spill] sm:$0xff] }
 0x697   : > { %7024 = vpow2.f32 %v4523_v21  ;;  %v4859_v11 = vpop.permute.xlu1 %4858 }
 0x698   : > { %7026 = vpow2.f32 %v3927_v1  ;;  %v13300_v1 = vsub.f32 %v13298_v37, %v13299_v36 }
 0x699   : > { %7028 = vpow2.f32 %v3931_v13 }
 0x69a   : > { %7030 = vpow2.f32 %v3935_v10  ;;  %v4869_v10 = vpop.permute.xlu0 %4868 }
 0x69b   : > { %7032 = vpow2.f32 %v3929_v50 }
 0x69c   : > { %v7011_v42 = vpop.eup %7010  ;;  %7034 = vpow2.f32 %v3939_v2 }
 0x69d   : > { %v7013_v15 = vpop.eup %7012  ;;  %7036 = vpow2.f32 %v3933_v14  ;;  %v4557_v14 = vmul.f32 %v13307_v34, %v4525_v44  ;;  %v4526_v34 = vld [vmem:[#allocation3 + $0x8] sm:$0xff] }
 0x69e   : > { %v7015_v52 = vpop.eup %7014  ;;  %5252 = vmatprep.mubr.f32.mxu0 %v7013_v15  ;;  %v4739_v62 = vadd.f32 %v7013_v15, %v7011_v42  ;;  %7038 = vpow2.f32 %v3943_v4 }
 0x69f   : > { %v7017_v27 = vpop.eup %7016  ;;  %5253 = vmatmul.mubr.f32.gmra.mxu0 %v7011_v42  ;;  %v4816_v42 = vld [vmem:[#allocation4 + $0x10] sm:$0xff]  ;;  %7040 = vpow2.f32 %v3937_v30 }
 0x6a0   : > { %5477 = vmatprep.mubr.f32.mxu1 %v7017_v27  ;;  %v4740_v48 = vadd.f32 %v7015_v52, %v4739_v62  ;;  %v13295_v62 = vld [vmem:[#allocation365_spill] sm:$0xff] }
 0x6a1   : > { %v7019_v46 = vpop.eup %7018  ;;  %5478 = vmatmul.mubr.f32.gmra.mxu1 %v7015_v52 }
 0x6a2   : > { %v7021_v35 = vpop.eup %7020  ;;  %v4741_v26 = vadd.f32 %v7017_v27, %v4740_v48  ;;  %v13296_v27 = vld [vmem:[#allocation367_spill] sm:$0xff] }
 0x6a3   : > { %v7023_v32 = vpop.eup %7022  ;;  %5257 = vmatprep.mubr.f32.mxu0 %v7021_v35  ;;  %v4744_v6 = vadd.f32 %v7021_v35, %v7019_v46  ;;  %v13297_v48 = vsub.f32 %v13295_v62, %v13296_v27  ;;  %v13316_v62 = vld [vmem:[#allocation379_spill] sm:$0xff] }
 0x6a4   : > { %v7025_v31 = vpop.eup %7024  ;;  %5258 = vmatmul.mubr.f32.gmra.mxu0 %v7019_v46  ;;  %4742 = vadd.xlane.f32.xlu1 %v4741_v26 }
 0x6a5   : > { %5482 = vmatprep.mubr.f32.mxu1 %v7025_v31  ;;  %v4745_v5 = vadd.f32 %v7023_v32, %v4744_v6  ;;  %v11413_v16 = vpop.eup %7026  ;;  %v3947_v46 = vmul.f32 1.442695, %v13297_v48  ;;  %v3941_v6 = vmul.f32 1.442695, %v13300_v1 }
 0x6a6   : > { %5483 = vmatmul.mubr.f32.gmra.mxu1 %v7023_v32  ;;  %v11423_v26 = vpop.eup %7028 }
 0x6a7   : > { %v4746_v23 = vadd.f32 %v7025_v31, %v4745_v5  ;;  %v5008_v31 = vmul.f32 %v4859_v11, %v4816_v42  ;;  %v4864_v5 = vpop.permute.xlu1 %4863  ;;  %7042 = vpow2.f32 %v3947_v46  ;;  %v11433_v29 = vpop.eup %7030 }
 0x6a8   : > { %7044 = vpow2.f32 %v3941_v6  ;;  %v5009_v41 = vmul.f32 %v4864_v5, %v4817_v45  ;;  %v13318_v6 = vld [vmem:[#allocation374_spill] sm:$0xff] }
 0x6a9   : > { %4747 = vadd.xlane.f32.xlu0 %v4746_v23  ;;  %v13301_v23 = vld [vmem:[#allocation369_spill] sm:$0xff] }
 0x6aa   : > { %v13303_v49 = vsub.f32 %v13301_v23, %v13302_v3  ;;  %v13321_v23 = vld [vmem:[#allocation403_spill] sm:$0xff] }
 0x6ac   : > { %v3951_v59 = vmul.f32 1.442695, %v13303_v49 }
 0x6ae   : > { %v5104_v28 = vpop.f32.mrf.mxu0  ;;  %7046 = vpow2.f32 %v3951_v59  ;;  %v13322_v59 = vld [vmem:[#allocation383_spill] sm:$0xff] }
 0x6b0   : > { %v5329_v7 = vpop.f32.mrf.mxu1  ;;  %v5106_v25 = vpop.f32.mrf.mxu0 }
 0x6b1   : > { %v5330_v55 = vadd.f32 %v5329_v7, %v5104_v28  ;;  %v13305_v28 = vld [vmem:[#allocation368_spill] sm:$0xff]  ;;  %v11440_v7 = vpop.eup %7032  ;;  %v4818_v25 = vld [vmem:[#allocation4 + $0x20] sm:$0xff] }
 0x6b2   : > { %v5331_v61 = vpop.f32.mrf.mxu1  ;;  %v5109_v58 = vpop.f32.mrf.mxu0  ;;  %v13306_v33 = vsub.f32 %v13304_v17, %v13305_v28  ;;  %v5010_v47 = vmul.f32 %v4869_v10, %v4818_v25  ;;  %v13323_v10 = vld [vmem:[#allocation384_spill] sm:$0xff] }
 0x6b3   : > { %v5488_v8 = vadd.f32 %v5330_v55, %v5006_v39  ;;  %v13309_v39 = vld [vmem:[#allocation380_spill] sm:$0xff]  ;;  %v11447_v24 = vpop.eup %7034 }
 0x6b4   : > { %v5334_v40 = vpop.f32.mrf.mxu1  ;;  %v5111_v51 = vpop.f32.mrf.mxu0  ;;  %v3945_v57 = vmul.f32 1.442695, %v13306_v33  ;;  %v13310_v55 = vsub.f32 %v13308_v0, %v13309_v39 }
 0x6b5   : > { %5520 = vst.msk [vmem:[#allocation4] sm:$0xff] %vm590_vm2, %v5488_v8  ;;  %v5335_v21 = vadd.f32 %v5334_v40, %v5109_v58  ;;  %4873 = vperm.xlu1 %6758, %v11413_v16   ;;  %v13311_v8 = vld [vmem:[#allocation370_spill] sm:$0xff]  ;;  %v13312_v40 = vld [vmem:[#allocation372_spill] sm:$0xff]  ;;  %v11454_v30 = vpop.eup %7036 }
 0x6b6   : > { %v5336_v15 = vpop.f32.mrf.mxu1  ;;  %v5114_v52 = vpop.f32.mrf.mxu0  ;;  %v3955_v9 = vmul.f32 1.442695, %v13310_v55  ;;  %7048 = vpow2.f32 %v3945_v57  ;;  %v13313_v51 = vsub.f32 %v13311_v8, %v13312_v40 }
 0x6b7   : > { %v5489_v35 = vadd.f32 %v5335_v21, %v5007_v12  ;;  %v13314_v21 = vld [vmem:[#allocation398_spill] sm:$0xff] }
 0x6b8   : > { %v5339_v32 = vpop.f32.mrf.mxu1  ;;  %v5116_v18 = vpop.f32.mrf.mxu0  ;;  %v3949_v19 = vmul.f32 1.442695, %v13313_v51  ;;  %v4559_v42 = vmul.f32 %v13314_v21, %v4527_v54  ;;  %7050 = vpow2.f32 %v3955_v9  ;;  %v13328_v9 = vld [vmem:[#allocation387_spill] sm:$0xff] }
 0x6b9   : > { %5521 = vst.msk [vmem:[#allocation4 + $0x8] sm:$0xff] %vm590_vm2, %v5489_v35  ;;  %v5340_v60 = vadd.f32 %v5339_v32, %v5114_v52  ;;  %4883 = vperm.xlu1 %6758, %v11423_v26   ;;  %v13315_v52 = vld [vmem:[#allocation377_spill] sm:$0xff]  ;;  %v4528_v32 = vld [vmem:[#allocation3 + $0x18] sm:$0xff]  ;;  %v11462_v18 = vpop.eup %7038  ;;  %v13331_v51 = vld [vmem:[#allocation399_spill] sm:$0xff] }
 0x6ba   : > { %v5341_v56 = vpop.f32.mrf.mxu1  ;;  %v5119_v13 = vpop.f32.mrf.mxu0  ;;  %v13317_v27 = vsub.f32 %v13315_v52, %v13316_v62  ;;  %7052 = vpow2.f32 %v3949_v19  ;;  %v4560_v3 = vmul.f32 %v13321_v23, %v4528_v32  ;;  %v4558_v19 = vmul.f32 %v13331_v51, %v4526_v34  ;;  %v4529_v52 = vld [vmem:[#allocation3 + $0x20] sm:$0xff]  ;;  %v13335_v32 = vld [vmem:[#allocation391_spill] sm:$0xff]  ;;  %v13338_v23 = vld [vmem:[#allocation400_spill] sm:$0xff] }
 0x6bb   : > { %v5490_v20 = vadd.f32 %v5340_v60, %v5008_v31  ;;  %v13319_v31 = vld [vmem:[#allocation376_spill] sm:$0xff]  ;;  %v11471_v56 = vpop.eup %7040 }
 0x6bc   : > { %v5344_v50 = vpop.f32.mrf.mxu1  ;;  %v5121_v38 = vpop.f32.mrf.mxu0  ;;  %v3959_v48 = vmul.f32 1.442695, %v13317_v27  ;;  %v13320_v5 = vsub.f32 %v13318_v6, %v13319_v31  ;;  %v4534_v31 = vld [vmem:[#allocation3 + $0x48] sm:$0xff] }
 0x6bd   : > { %5522 = vst.msk [vmem:[#allocation4 + $0x10] sm:$0xff] %vm590_vm2, %v5490_v20  ;;  %v5345_v2 = vadd.f32 %v5344_v50, %v5119_v13  ;;  %4893 = vperm.xlu1 %6758, %v11433_v29   ;;  %v13324_v20 = vsub.f32 %v13322_v59, %v13323_v10  ;;  %v4530_v38 = vld [vmem:[#allocation3 + $0x28] sm:$0xff]  ;;  %v11479_v17 = vpop.eup %7042 }
 0x6be   : > { %v5346_v22 = vpop.f32.mrf.mxu1  ;;  %v5124_v43 = vpop.f32.mrf.mxu0  ;;  %v3953_v60 = vmul.f32 1.442695, %v13320_v5  ;;  %7054 = vpow2.f32 %v3959_v48  ;;  %v4562_v39 = vmul.f32 %v11413_v16, %v4530_v38  ;;  %v13333_v16 = vld [vmem:[#allocation382_spill] sm:$0xff]  ;;  %v4531_v38 = vld [vmem:[#allocation3 + $0x30] sm:$0xff] }
 0x6bf   : > { %v5491_v61 = vadd.f32 %v5345_v2, %v5009_v41  ;;  %4878 = vperm.xlu0 %6759, %v11440_v7   ;;  %v4593_v58 = vpop.xlane.xlu0 %4592  ;;  %v3963_v44 = vmul.f32 1.442695, %v13324_v20  ;;  %v13325_v41 = vld [vmem:[#allocation373_spill] sm:$0xff]  ;;  %v13326_v2 = vld [vmem:[#allocation375_spill] sm:$0xff]  ;;  %v13340_v59 = vld [vmem:[#allocation386_spill] sm:$0xff] }
 0x6c0   : > { %v5349_v53 = vpop.f32.mrf.mxu1  ;;  %v4749_v4 = vadd.f32 %v4593_v58, %v4557_v14  ;;  %v5126_v11 = vpop.f32.mrf.mxu0  ;;  %v13327_v25 = vsub.f32 %v13325_v41, %v13326_v2  ;;  %7056 = vpow2.f32 %v3953_v60  ;;  %v4566_v41 = vmul.f32 %v11433_v29, %v4534_v31  ;;  %v13345_v29 = vld [vmem:[#allocation389_spill] sm:$0xff]  ;;  %v13352_v31 = vld [vmem:[#allocation394_spill] sm:$0xff] }
 0x6c1   : > { %5523 = vst.msk [vmem:[#allocation4 + $0x18] sm:$0xff] %vm590_vm2, %v5491_v61  ;;  %v5350_v63 = vadd.f32 %v5349_v53, %v5124_v43  ;;  %4903 = vperm.xlu1 %6758, %v11447_v24   ;;  %v11487_v14 = vpop.eup %7044  ;;  %7058 = vpow2.f32 %v3963_v44  ;;  %v13329_v61 = vld [vmem:[#allocation388_spill] sm:$0xff] }
 0x6c2   : > { %4782 = vst.msk [vmem:[#allocation3] sm:$0xff] %vm4781_vm12, %v4749_v4  ;;  %v5351_v12 = vpop.f32.mrf.mxu1  ;;  %v5129_v15 = vpop.f32.mrf.mxu0  ;;  %v3957_v22 = vmul.f32 1.442695, %v13327_v25  ;;  %v13330_v58 = vsub.f32 %v13328_v9, %v13329_v61  ;;  %v4532_v4 = vld [vmem:[#allocation3 + $0x38] sm:$0xff]  ;;  %v13342_v25 = vld [vmem:[#allocation395_spill] sm:$0xff] }
 0x6c3   : > { %v5492_v46 = vadd.f32 %v5350_v63, %v5010_v47  ;;  %4888 = vperm.xlu0 %6759, %v11454_v30   ;;  %v4603_v35 = vpop.xlane.xlu0 %4602  ;;  %v11495_v11 = vpop.eup %7046  ;;  %v13332_v63 = vld [vmem:[#allocation381_spill] sm:$0xff] }
 0x6c4   : > { %v4751_v37 = vadd.f32 %v4603_v35, %v4559_v42  ;;  %v5354_v36 = vpop.f32.mrf.mxu1  ;;  %v5131_v1 = vpop.f32.mrf.mxu0  ;;  %v3967_v54 = vmul.f32 1.442695, %v13330_v58  ;;  %7060 = vpow2.f32 %v3957_v22  ;;  %v13334_v12 = vsub.f32 %v13332_v63, %v13333_v16  ;;  %v13343_v22 = vld [vmem:[#allocation396_spill] sm:$0xff] }
 0x6c5   : > { %5524 = vst.msk [vmem:[#allocation4 + $0x20] sm:$0xff] %vm590_vm2, %v5492_v46  ;;  %v11468_v45 = vadd.f32 %v5354_v36, %v5129_v15  ;;  %4913 = vperm.xlu1 %6758, %v11462_v18   ;;  %v11504_v62 = vpop.eup %7048  ;;  %v4564_v46 = vmul.f32 %v11423_v26, %v4532_v4  ;;  %v13339_v26 = vld [vmem:[#allocation385_spill] sm:$0xff]  ;;  %v13344_v34 = vsub.f32 %v13342_v25, %v13343_v22  ;;  %v13346_v4 = vld [vmem:[#allocation390_spill] sm:$0xff] }
 0x6c6   : > { %4784 = vst.msk [vmem:[#allocation3 + $0x10] sm:$0xff] %vm4781_vm12, %v4751_v37  ;;  %v5356_v13 = vpop.f32.mrf.mxu1  ;;  %v5134_v49 = vpop.f32.mrf.mxu0  ;;  %v3961_v21 = vmul.f32 1.442695, %v13334_v12  ;;  %7062 = vpow2.f32 %v3967_v54  ;;  %v13336_v37 = vld [vmem:[#allocation392_spill] sm:$0xff]  ;;  %v13341_v10 = vsub.f32 %v13339_v26, %v13340_v59  ;;  %v4563_v54 = vmul.f32 %v11440_v7, %v4531_v38  ;;  %v13354_v22 = vld [vmem:[#allocation401_spill] sm:$0xff] }
 0x6c7   : > { %4898 = vperm.xlu0 %6759, %v11471_v56   ;;  %v4608_v50 = vpop.xlane.xlu0 %4607  ;;  %v13337_v36 = vsub.f32 %v13335_v32, %v13336_v37  ;;  %v11512_v5 = vpop.eup %7050  ;;  %v4540_v38 = vld [vmem:[#allocation3 + $0x78] sm:$0xff] }
 0x6c8   : > { %v4752_v28 = vadd.f32 %v4608_v50, %v4560_v3  ;;  %v5359_v33 = vpop.f32.mrf.mxu1  ;;  %v5136_v57 = vpop.f32.mrf.mxu0  ;;  %v4561_v3 = vmul.f32 %v13338_v23, %v4529_v52  ;;  %7064 = vpow2.f32 %v3961_v21  ;;  %v3965_v20 = vmul.f32 1.442695, %v13341_v10  ;;  %v13349_v52 = vld [vmem:[#allocation402_spill] sm:$0xff] }
 0x6c9   : > { %v11484_v43 = vadd.f32 %v5359_v33, %v5134_v49  ;;  %4923 = vperm.xlu1 %6758, %v11479_v17   ;;  %v3971_v1 = vmul.f32 1.442695, %v13337_v36 }
 0x6ca   : > { %4785 = vst.msk [vmem:[#allocation3 + $0x18] sm:$0xff] %vm4781_vm12, %v4752_v28  ;;  %v5361_v0 = vpop.f32.mrf.mxu1  ;;  %v5139_v55 = vpop.f32.mrf.mxu0 }
 0x6cb   : > { %4908 = vperm.xlu0 %6759, %v11487_v14   ;;  %v4618_v53 = vpop.xlane.xlu0 %4617  ;;  %v11522_v28 = vpop.eup %7052  ;;  %7066 = vpow2.f32 %v3971_v1  ;;  %v3975_v0 = vmul.f32 1.442695, %v13344_v34  ;;  %v13355_v34 = vld [vmem:[#allocation345_spill] sm:$0xff] }
 0x6cc   : > { %v4754_v8 = vadd.f32 %v4618_v53, %v4562_v39  ;;  %v5364_v40 = vpop.f32.mrf.mxu1  ;;  %v5141_v47 = vpop.f32.mrf.mxu0  ;;  %7068 = vpow2.f32 %v3965_v20 }
 0x6cd   : > { %v11501_v42 = vadd.f32 %v5364_v40, %v5139_v55  ;;  %4933 = vperm.xlu1 %6758, %v11495_v11   ;;  %v4598_v15 = vpop.xlane.xlu1 %4597  ;;  %v4536_v55 = vld [vmem:[#allocation3 + $0x58] sm:$0xff]  ;;  %v11530_v9 = vpop.eup %7054  ;;  %v4533_v47 = vld [vmem:[#allocation3 + $0x40] sm:$0xff]  ;;  %7070 = vpow2.f32 %v3975_v0  ;;  %v13356_v0 = vsub.f32 %v13354_v22, %v13355_v34 }
 0x6ce   : > { %4787 = vst.msk [vmem:[#allocation3 + $0x28] sm:$0xff] %vm4781_vm12, %v4754_v8  ;;  %v4750_v27 = vadd.f32 %v4598_v15, %v4558_v19  ;;  %v5366_v48 = vpop.f32.mrf.mxu1  ;;  %v5144_v35 = vpop.f32.mrf.mxu0  ;;  %v13347_v8 = vsub.f32 %v13345_v29, %v13346_v4  ;;  %v4568_v7 = vmul.f32 %v11447_v24, %v4536_v55  ;;  %v13348_v15 = vld [vmem:[#allocation346_spill] sm:$0xff]  ;;  %v4565_v1 = vmul.f32 %v11454_v30, %v4533_v47  ;;  %v13351_v24 = vld [vmem:[#allocation393_spill] sm:$0xff]  ;;  %v4548_v22 = vld [vmem:[#allocation3 + $0xb8] sm:$0xff] }
 0x6cf   : > { %4918 = vperm.xlu0 %6759, %v11504_v62   ;;  %v4628_v6 = vpop.xlane.xlu0 %4627  ;;  %v11540_v63 = vpop.eup %7056 }
 0x6d0   : > { %4783 = vst.msk [vmem:[#allocation3 + $0x8] sm:$0xff] %vm4781_vm12, %v4750_v27  ;;  %v4756_v60 = vadd.f32 %v4628_v6, %v4564_v46  ;;  %v5369_v13 = vpop.f32.mrf.mxu1  ;;  %v5146_v49 = vpop.f32.mrf.mxu0  ;;  %v3969_v40 = vmul.f32 1.442695, %v13347_v8  ;;  %v13350_v27 = vsub.f32 %v13348_v15, %v13349_v52  ;;  %v4542_v8 = vld [vmem:[#allocation3 + $0x88] sm:$0xff] }
 0x6d1   : > { %v11519_v44 = vadd.f32 %v5369_v13, %v5144_v35  ;;  %4943 = vperm.xlu1 %6758, %v11512_v5   ;;  %v4613_v50 = vpop.xlane.xlu1 %4612  ;;  %v4538_v35 = vld [vmem:[#allocation3 + $0x68] sm:$0xff]  ;;  %v11548_v32 = vpop.eup %7058  ;;  %v4535_v49 = vld [vmem:[#allocation3 + $0x50] sm:$0xff] }
 0x6d2   : > { %4789 = vst.msk [vmem:[#allocation3 + $0x38] sm:$0xff] %vm4781_vm12, %v4756_v60  ;;  %v4753_v33 = vadd.f32 %v4613_v50, %v4561_v3  ;;  %v5371_v57 = vpop.f32.mrf.mxu1  ;;  %v5149_v2 = vpop.f32.mrf.mxu0  ;;  %v3979_v48 = vmul.f32 1.442695, %v13350_v27  ;;  %7072 = vpow2.f32 %v3969_v40  ;;  %v13353_v60 = vsub.f32 %v13351_v24, %v13352_v31  ;;  %v4541_v31 = vld [vmem:[#allocation3 + $0x80] sm:$0xff] }
 0x6d3   : > { %4928 = vperm.xlu0 %6759, %v11522_v28   ;;  %v4638_v39 = vpop.xlane.xlu0 %4637  ;;  %v11558_v26 = vpop.eup %7060  ;;  %v4570_v30 = vmul.f32 %v11462_v18, %v4538_v35  ;;  %v3977_v18 = vmul.f32 1.442695, %v13356_v0  ;;  %v4544_v35 = vld [vmem:[#allocation3 + $0x98] sm:$0xff] }
 0x6d4   : > { %4786 = vst.msk [vmem:[#allocation3 + $0x20] sm:$0xff] %vm4781_vm12, %v4753_v33  ;;  %v4758_v61 = vadd.f32 %v4638_v39, %v4566_v41  ;;  %v5374_v58 = vpop.f32.mrf.mxu1  ;;  %v5151_v53 = vpop.f32.mrf.mxu0  ;;  %v3973_v13 = vmul.f32 1.442695, %v13353_v60  ;;  %7074 = vpow2.f32 %v3979_v48  ;;  %v4574_v48 = vmul.f32 %v11495_v11, %v4542_v8  ;;  %v4550_v8 = vld [vmem:[#allocation3 + $0xc8] sm:$0xff] }
 0x6d5   : > { %v11537_v51 = vadd.f32 %v5374_v58, %v5149_v2  ;;  %4953 = vperm.xlu1 %6758, %v11530_v9   ;;  %v4623_v19 = vpop.xlane.xlu1 %4622  ;;  %v11563_v33 = vpop.eup %7062  ;;  %v4567_v2 = vmul.f32 %v11471_v56, %v4535_v49  ;;  %v4572_v56 = vmul.f32 %v11479_v17, %v4540_v38  ;;  %v4576_v49 = vmul.f32 %v11512_v5, %v4544_v35 }
 0x6d6   : > { %4791 = vst.msk [vmem:[#allocation3 + $0x48] sm:$0xff] %vm4781_vm12, %v4758_v61  ;;  %v4755_v16 = vadd.f32 %v4623_v19, %v4563_v54  ;;  %v5376_v12 = vpop.f32.mrf.mxu1  ;;  %v5154_v21 = vpop.f32.mrf.mxu0  ;;  %7076 = vpow2.f32 %v3973_v13  ;;  %v4537_v61 = vld [vmem:[#allocation3 + $0x60] sm:$0xff] }
 0x6d7   : > { %4938 = vperm.xlu0 %6759, %v11540_v63   ;;  %v4648_v46 = vpop.xlane.xlu0 %4647  ;;  %v11573_v58 = vpop.eup %7064  ;;  %7078 = vpow2.f32 %v3977_v18 }
 0x6d8   : > { %4788 = vst.msk [vmem:[#allocation3 + $0x30] sm:$0xff] %vm4781_vm12, %v4755_v16  ;;  %v4760_v37 = vadd.f32 %v4648_v46, %v4568_v7  ;;  %v5379_v36 = vpop.f32.mrf.mxu1  ;;  %v5156_v6 = vpop.f32.mrf.mxu0  ;;  %v4569_v16 = vmul.f32 %v11487_v14, %v4537_v61 }
 0x6d9   : > { %v11555_v23 = vadd.f32 %v5379_v36, %v5154_v21  ;;  %4963 = vperm.xlu1 %6758, %v11548_v32   ;;  %v4633_v3 = vpop.xlane.xlu1 %4632  ;;  %v11578_v40 = vpop.eup %7066  ;;  %v4539_v21 = vld [vmem:[#allocation3 + $0x70] sm:$0xff] }
 0x6da   : > { %4793 = vst.msk [vmem:[#allocation3 + $0x58] sm:$0xff] %vm4781_vm12, %v4760_v37  ;;  %v4757_v59 = vadd.f32 %v4633_v3, %v4565_v1  ;;  %v5381_v10 = vpop.f32.mrf.mxu1  ;;  %v5159_v20 = vpop.f32.mrf.mxu0  ;;  %v4571_v1 = vmul.f32 %v11504_v62, %v4539_v21  ;;  %v4546_v62 = vld [vmem:[#allocation3 + $0xa8] sm:$0xff] }
 0x6db   : > { %4948 = vperm.xlu0 %6759, %v11558_v26   ;;  %v4658_v50 = vpop.xlane.xlu0 %4657  ;;  %v11585_v15 = vpop.eup %7068 }
 0x6dc   : > { %4790 = vst.msk [vmem:[#allocation3 + $0x40] sm:$0xff] %vm4781_vm12, %v4757_v59  ;;  %v4762_v57 = vadd.f32 %v4658_v50, %v4570_v30  ;;  %v5384_v41 = vpop.f32.mrf.mxu1  ;;  %v5161_v25 = vpop.f32.mrf.mxu0  ;;  %v4573_v50 = vmul.f32 %v11522_v28, %v4541_v31 }
 0x6dd   : > { %v11570_v39 = vadd.f32 %v5384_v41, %v5159_v20  ;;  %4973 = vperm.xlu1 %6758, %v11563_v33   ;;  %v4643_v55 = vpop.xlane.xlu1 %4642  ;;  %v11590_v37 = vpop.eup %7070 }
 0x6de   : > { %4795 = vst.msk [vmem:[#allocation3 + $0x68] sm:$0xff] %vm4781_vm12, %v4762_v57  ;;  %v4759_v54 = vadd.f32 %v4643_v55, %v4567_v2  ;;  %v5386_v53 = vpop.f32.mrf.mxu1  ;;  %v5164_v29 = vpop.f32.mrf.mxu0  ;;  %v4543_v57 = vld [vmem:[#allocation3 + $0x90] sm:$0xff]  ;;  %v4578_v2 = vmul.f32 %v11530_v9, %v4546_v62  ;;  %v4545_v55 = vld [vmem:[#allocation3 + $0xa0] sm:$0xff]  ;;  %v4580_v9 = vmul.f32 %v11548_v32, %v4548_v22 }
 0x6df   : > { %4958 = vperm.xlu0 %6759, %v11573_v58   ;;  %v4668_v4 = vpop.xlane.xlu0 %4667  ;;  %v11595_v60 = vpop.eup %7072  ;;  %v4575_v28 = vmul.f32 %v11540_v63, %v4543_v57  ;;  %v4551_v57 = vld [vmem:[#allocation3 + $0xd0] sm:$0xff] }
 0x6e0   : > { %4792 = vst.msk [vmem:[#allocation3 + $0x50] sm:$0xff] %vm4781_vm12, %v4759_v54  ;;  %v4764_v19 = vadd.f32 %v4668_v4, %v4572_v56  ;;  %v5389_v47 = vpop.f32.mrf.mxu1  ;;  %v5166_v12 = vpop.f32.mrf.mxu0 }
 0x6e1   : > { %v11582_v7 = vadd.f32 %v5389_v47, %v5164_v29  ;;  %4983 = vperm.xlu1 %6758, %v11578_v40   ;;  %v4653_v17 = vpop.xlane.xlu1 %4652  ;;  %v11602_v30 = vpop.eup %7074 }
 0x6e2   : > { %4797 = vst.msk [vmem:[#allocation3 + $0x78] sm:$0xff] %vm4781_vm12, %v4764_v19  ;;  %v4761_v52 = vadd.f32 %v4653_v17, %v4569_v16  ;;  %v5391_v27 = vpop.f32.mrf.mxu1  ;;  %v4577_v16 = vmul.f32 %v11558_v26, %v4545_v55  ;;  %v4547_v17 = vld [vmem:[#allocation3 + $0xb0] sm:$0xff] }
 0x6e3   : > { %4968 = vperm.xlu0 %6759, %v11585_v15   ;;  %v4678_v46 = vpop.xlane.xlu0 %4677  ;;  %v5169_v14 = vpop.f32.mrf.mxu0  ;;  %v4582_v27 = vmul.f32 %v11563_v33, %v4550_v8  ;;  %v4579_v26 = vmul.f32 %v11573_v58, %v4547_v17 }
 0x6e4   : > { %4794 = vst.msk [vmem:[#allocation3 + $0x60] sm:$0xff] %vm4781_vm12, %v4761_v52  ;;  %v4766_v36 = vadd.f32 %v4678_v46, %v4574_v48  ;;  %v11607_v41 = vpop.eup %7076 }
 0x6e5   : > { %v5394_v6 = vpop.f32.mrf.mxu1  ;;  %4993 = vperm.xlu1 %6758, %v11590_v37   ;;  %v4663_v24 = vpop.xlane.xlu1 %4662 }
 0x6e6   : > { %4799 = vst.msk [vmem:[#allocation3 + $0x88] sm:$0xff] %vm4781_vm12, %v4766_v36  ;;  %v11598_v11 = vadd.f32 %v5394_v6, %v5169_v14  ;;  %v4763_v13 = vadd.f32 %v4663_v24, %v4571_v1  ;;  %v5171_v3 = vpop.f32.mrf.mxu0  ;;  %v11614_v61 = vpop.eup %7078  ;;  %v4552_v14 = vld [vmem:[#allocation3 + $0xd8] sm:$0xff]  ;;  %v4549_v24 = vld [vmem:[#allocation3 + $0xc0] sm:$0xff] }
 0x6e7   : > { %4978 = vperm.xlu0 %6759, %v11595_v60   ;;  %v5396_v59 = vpop.f32.mrf.mxu1  ;;  %v4688_v10 = vpop.xlane.xlu0 %4687  ;;  %v4584_v33 = vmul.f32 %v11578_v40, %v4552_v14  ;;  %v4581_v58 = vmul.f32 %v11585_v15, %v4549_v24  ;;  %v4553_v15 = vld [vmem:[#allocation3 + $0xe0] sm:$0xff] }
 0x6e8   : > { %4796 = vst.msk [vmem:[#allocation3 + $0x70] sm:$0xff] %vm4781_vm12, %v4763_v13  ;;  %v4768_v20 = vadd.f32 %v4688_v10, %v4576_v49  ;;  %v4554_v10 = vld [vmem:[#allocation3 + $0xe8] sm:$0xff] }
 0x6e9   : > { %5003 = vperm.xlu1 %6758, %v11602_v30   ;;  %v4673_v38 = vpop.xlane.xlu1 %4672  ;;  %v5174_v34 = vpop.f32.mrf.mxu0  ;;  %v4586_v40 = vmul.f32 %v11590_v37, %v4554_v10 }
 0x6ea   : > { %4801 = vst.msk [vmem:[#allocation3 + $0x98] sm:$0xff] %vm4781_vm12, %v4768_v20  ;;  %v4765_v5 = vadd.f32 %v4673_v38, %v4573_v50 }
 0x6eb   : > { %4988 = vperm.xlu0 %6759, %v11607_v41   ;;  %v4698_v25 = vpop.xlane.xlu0 %4697  ;;  %v5399_v54 = vpop.f32.mrf.mxu1 }
 0x6ec   : > { %4798 = vst.msk [vmem:[#allocation3 + $0x80] sm:$0xff] %vm4781_vm12, %v4765_v5  ;;  %v4770_v0 = vadd.f32 %v4698_v25, %v4578_v2  ;;  %v5176_v53 = vpop.f32.mrf.mxu0  ;;  %v11618_v29 = vadd.f32 %v5399_v54, %v5174_v34 }
 0x6ed   : > { %v4683_v18 = vpop.xlane.xlu1 %4682  ;;  %v5401_v19 = vpop.f32.mrf.mxu1 }
 0x6ee   : > { %4803 = vst.msk [vmem:[#allocation3 + $0xa8] sm:$0xff] %vm4781_vm12, %v4770_v0  ;;  %v4767_v56 = vadd.f32 %v4683_v18, %v4575_v28  ;;  %v5179_v47 = vpop.f32.mrf.mxu0  ;;  %v4583_v18 = vmul.f32 %v11595_v60, %v4551_v57 }
 0x6ef   : > { %4998 = vperm.xlu0 %6759, %v11614_v61   ;;  %v4708_v4 = vpop.xlane.xlu0 %4707  ;;  %v5404_v21 = vpop.f32.mrf.mxu1 }
 0x6f0   : > { %4800 = vst.msk [vmem:[#allocation3 + $0x90] sm:$0xff] %vm4781_vm12, %v4767_v56  ;;  %v4772_v63 = vadd.f32 %v4708_v4, %v4580_v9  ;;  %v5181_v52 = vpop.f32.mrf.mxu0  ;;  %v11625_v48 = vadd.f32 %v5404_v21, %v5179_v47  ;;  %v4585_v56 = vmul.f32 %v11607_v41, %v4553_v15 }
 0x6f1   : > { %v4693_v12 = vpop.xlane.xlu1 %4692  ;;  %v5406_v35 = vpop.f32.mrf.mxu1 }
 0x6f2   : > { %4805 = vst.msk [vmem:[#allocation3 + $0xb8] sm:$0xff] %vm4781_vm12, %v4772_v63  ;;  %v4769_v32 = vadd.f32 %v4693_v12, %v4577_v16  ;;  %v5184_v36 = vpop.f32.mrf.mxu0 }
 0x6f3   : > { %v4718_v46 = vpop.xlane.xlu0 %4717  ;;  %v5409_v31 = vpop.f32.mrf.mxu1 }
 0x6f4   : > { %4802 = vst.msk [vmem:[#allocation3 + $0xa0] sm:$0xff] %vm4781_vm12, %v4769_v32  ;;  %v4774_v1 = vadd.f32 %v4718_v46, %v4582_v27  ;;  %v5186_v13 = vpop.f32.mrf.mxu0  ;;  %v11631_v49 = vadd.f32 %v5409_v31, %v5184_v36 }
 0x6f5   : > { %v4703_v6 = vpop.xlane.xlu1 %4702  ;;  %v5411_v62 = vpop.f32.mrf.mxu1 }
 0x6f6   : > { %4807 = vst.msk [vmem:[#allocation3 + $0xc8] sm:$0xff] %vm4781_vm12, %v4774_v1  ;;  %v4771_v3 = vadd.f32 %v4703_v6, %v4579_v26  ;;  %v5189_v20 = vpop.f32.mrf.mxu0 }
 0x6f7   : > { %v4728_v59 = vpop.xlane.xlu0 %4727  ;;  %v5414_v5 = vpop.f32.mrf.mxu1 }
 0x6f8   : > { %4804 = vst.msk [vmem:[#allocation3 + $0xb0] sm:$0xff] %vm4781_vm12, %v4771_v3  ;;  %v4776_v50 = vadd.f32 %v4728_v59, %v4584_v33  ;;  %v5191_v2 = vpop.f32.mrf.mxu0  ;;  %v11637_v22 = vadd.f32 %v5414_v5, %v5189_v20 }
 0x6f9   : > { %v4713_v38 = vpop.xlane.xlu1 %4712  ;;  %v5416_v0 = vpop.f32.mrf.mxu1 }
 0x6fa   : > { %4809 = vst.msk [vmem:[#allocation3 + $0xd8] sm:$0xff] %vm4781_vm12, %v4776_v50  ;;  %v4773_v25 = vadd.f32 %v4713_v38, %v4581_v58  ;;  %v5194_v53 = vpop.f32.mrf.mxu0 }
 0x6fb   : > { %v4738_v34 = vpop.xlane.xlu0 %4737  ;;  %v5419_v9 = vpop.f32.mrf.mxu1 }
 0x6fc   : > { %4806 = vst.msk [vmem:[#allocation3 + $0xc0] sm:$0xff] %vm4781_vm12, %v4773_v25  ;;  %v4778_v28 = vadd.f32 %v4738_v34, %v4586_v40  ;;  %v5196_v4 = vpop.f32.mrf.mxu0  ;;  %v11644_v19 = vadd.f32 %v5419_v9, %v5194_v53 }
 0x6fd   : > { %v4723_v55 = vpop.xlane.xlu1 %4722  ;;  %v5421_v47 = vpop.f32.mrf.mxu1 }
 0x6fe   : > { %4811 = vst.msk [vmem:[#allocation3 + $0xe8] sm:$0xff] %vm4781_vm12, %v4778_v28  ;;  %v4775_v54 = vadd.f32 %v4723_v55, %v4583_v18  ;;  %v5199_v63 = vpop.f32.mrf.mxu0 }
 0x6ff   : > { %v5424_v60 = vpop.f32.mrf.mxu1 }
 0x700   : > { %4808 = vst.msk [vmem:[#allocation3 + $0xd0] sm:$0xff] %vm4781_vm12, %v4775_v54  ;;  %v5201_v16 = vpop.f32.mrf.mxu0  ;;  %v11647_v12 = vadd.f32 %v5424_v60, %v5199_v63 }
 0x701   : > { %v4733_v37 = vpop.xlane.xlu1 %4732  ;;  %v5426_v17 = vpop.f32.mrf.mxu1 }
 0x702   : > { %v4777_v8 = vadd.f32 %v4733_v37, %v4585_v56  ;;  %v5204_v21 = vpop.f32.mrf.mxu0  ;;  %v4555_v37 = vld [vmem:[#allocation3 + $0xf0] sm:$0xff] }
 0x703   : > { %v5429_v52 = vpop.f32.mrf.mxu1  ;;  %v4587_v63 = vmul.f32 %v11614_v61, %v4555_v37  ;;  %v4824_v37 = vld [vmem:[#allocation4 + $0x50] sm:$0xff] }
 0x704   : > { %4810 = vst.msk [vmem:[#allocation3 + $0xe0] sm:$0xff] %vm4781_vm12, %v4777_v8  ;;  %v5206_v32 = vpop.f32.mrf.mxu0  ;;  %v11649_v27 = vadd.f32 %v5429_v52, %v5204_v21  ;;  %v4556_v52 = vld [vmem:[#allocation3 + $0xf8] sm:$0xff] }
 0x705   : > { %v5431_v41 = vpop.f32.mrf.mxu1  ;;  %v4819_v32 = vld [vmem:[#allocation4 + $0x28] sm:$0xff] }
 0x706   : > { %v5209_v46 = vpop.f32.mrf.mxu0 }
 0x707   : > { %v5434_v14 = vpop.f32.mrf.mxu1 }
 0x708   : > { %v5211_v35 = vpop.f32.mrf.mxu0  ;;  %v11651_v36 = vadd.f32 %v5434_v14, %v5209_v46  ;;  %v4588_v46 = vmul.f32 %v11602_v30, %v4556_v52 }
 0x709   : > { %v5436_v1 = vpop.f32.mrf.mxu1 }
 0x70b   : > { %v5214_v26 = vpop.f32.mrf.mxu0 }
 0x70d   : > { %v5439_v6 = vpop.f32.mrf.mxu1  ;;  %v5216_v24 = vpop.f32.mrf.mxu0 }
 0x70e   : > { %v11653_v31 = vadd.f32 %v5439_v6, %v5214_v26  ;;  %v4821_v6 = vld [vmem:[#allocation4 + $0x38] sm:$0xff] }
 0x70f   : > { %v5441_v13 = vpop.f32.mrf.mxu1  ;;  %v11655_v3 = vpop.f32.mrf.mxu0 }
 0x711   : > { %v11657_v33 = vpop.f32.mrf.mxu1  ;;  %v5221_v59 = vpop.f32.mrf.mxu0 }
 0x712   : > { %v4823_v59 = vld [vmem:[#allocation4 + $0x48] sm:$0xff] }
 0x713   : > { %v5446_v10 = vpop.f32.mrf.mxu1  ;;  %v5224_v62 = vpop.f32.mrf.mxu0 }
 0x715   : > { %v5449_v20 = vpop.f32.mrf.mxu1  ;;  %v5226_v50 = vpop.f32.mrf.mxu0 }
 0x716   : > { %v11659_v58 = vadd.f32 %v5449_v20, %v5224_v62  ;;  %v4820_v62 = vld [vmem:[#allocation4 + $0x30] sm:$0xff] }
 0x717   : > { %v5451_v38 = vpop.f32.mrf.mxu1  ;;  %v11661_v57 = vpop.f32.mrf.mxu0 }
 0x719   : > { %v11663_v5 = vpop.f32.mrf.mxu1  ;;  %v5231_v2 = vpop.f32.mrf.mxu0 }
 0x71a   : > { %v4825_v2 = vld [vmem:[#allocation4 + $0x58] sm:$0xff] }
 0x71b   : > { %v5456_v25 = vpop.f32.mrf.mxu1  ;;  %v5234_v40 = vpop.f32.mrf.mxu0 }
 0x71d   : > { %v5459_v34 = vpop.f32.mrf.mxu1  ;;  %v5236_v0 = vpop.f32.mrf.mxu0 }
 0x71e   : > { %v11665_v28 = vadd.f32 %v5459_v34, %v5234_v40 }
 0x71f   : > { %v5461_v18 = vpop.f32.mrf.mxu1  ;;  %v11667_v55 = vpop.f32.mrf.mxu0 }
 0x721   : > { %v11669_v15 = vpop.f32.mrf.mxu1  ;;  %v5241_v54 = vpop.f32.mrf.mxu0 }
 0x722   : > { %v4827_v54 = vld [vmem:[#allocation4 + $0x68] sm:$0xff] }
 0x723   : > { %v5466_v53 = vpop.f32.mrf.mxu1 }
 0x724   : > { %v11671_v56 = vpop.f32.mrf.mxu0 }
 0x725   : > { %v11673_v9 = vpop.f32.mrf.mxu1 }
 0x726   : > { %v5246_v4 = vpop.f32.mrf.mxu0 }
 0x727   : > { %v5471_v8 = vpop.f32.mrf.mxu1 }
 0x728   : > { %v11675_v47 = vpop.f32.mrf.mxu0 }
 0x729   : > { %v11678_v16 = vpop.f32.mrf.mxu1 }
 0x72a   : > { %v5251_v17 = vpop.f32.mrf.mxu0 }
 0x72b   : > { %v5476_v41 = vpop.f32.mrf.mxu1 }
 0x72d   : > { %v4743_v60 = vpop.xlane.xlu1 %4742 }
 0x72e   : > { %v4779_v21 = vadd.f32 %v4743_v60, %v4587_v63  ;;  %v4829_v60 = vld [vmem:[#allocation4 + $0x78] sm:$0xff] }
 0x730   : > { %4812 = vst.msk [vmem:[#allocation3 + $0xf0] sm:$0xff] %vm4781_vm12, %v4779_v21  ;;  %v4826_v21 = vld [vmem:[#allocation4 + $0x60] sm:$0xff] }
 0x731   : > { %v4874_v14 = vpop.permute.xlu1 %4873 }
 0x732   : > { %v4748_v35 = vpop.xlane.xlu0 %4747  ;;  %v5011_v1 = vmul.f32 %v4874_v14, %v4819_v32 }
 0x733   : > { %v4780_v26 = vadd.f32 %v4748_v35, %v4588_v46  ;;  %v4831_v46 = vld [vmem:[#allocation4 + $0x88] sm:$0xff]  ;;  %v4828_v35 = vld [vmem:[#allocation4 + $0x70] sm:$0xff] }
 0x734   : > { %v5493_v24 = vadd.f32 %v11468_v45, %v5011_v1  ;;  %v4822_v45 = vld [vmem:[#allocation4 + $0x40] sm:$0xff] }
 0x735   : > { %4813 = vst.msk [vmem:[#allocation3 + $0xf8] sm:$0xff] %vm4781_vm12, %v4780_v26  ;;  %v4884_v61 = vpop.permute.xlu1 %4883 }
 0x736   : > { %5525 = vst.msk [vmem:[#allocation4 + $0x28] sm:$0xff] %vm590_vm2, %v5493_v24  ;;  %v5013_v13 = vmul.f32 %v4884_v61, %v4821_v6  ;;  %v4833_v24 = vld [vmem:[#allocation4 + $0x98] sm:$0xff] }
 0x738   : > { %v5495_v10 = vadd.f32 %v11501_v42, %v5013_v13  ;;  %v4830_v13 = vld [vmem:[#allocation4 + $0x80] sm:$0xff] }
 0x739   : > { %v4894_v20 = vpop.permute.xlu1 %4893 }
 0x73a   : > { %5527 = vst.msk [vmem:[#allocation4 + $0x38] sm:$0xff] %vm590_vm2, %v5495_v10  ;;  %v4879_v30 = vpop.permute.xlu0 %4878  ;;  %v5015_v50 = vmul.f32 %v4894_v20, %v4823_v59  ;;  %v4835_v20 = vld [vmem:[#allocation4 + $0xa8] sm:$0xff] }
 0x73b   : > { %v5012_v38 = vmul.f32 %v4879_v30, %v4820_v62 }
 0x73c   : > { %v5497_v25 = vadd.f32 %v11537_v51, %v5015_v50  ;;  %v4832_v50 = vld [vmem:[#allocation4 + $0x90] sm:$0xff] }
 0x73d   : > { %v5494_v40 = vadd.f32 %v11484_v43, %v5012_v38  ;;  %v4904_v34 = vpop.permute.xlu1 %4903 }
 0x73e   : > { %5529 = vst.msk [vmem:[#allocation4 + $0x48] sm:$0xff] %vm590_vm2, %v5497_v25  ;;  %v4889_v0 = vpop.permute.xlu0 %4888  ;;  %v5017_v18 = vmul.f32 %v4904_v34, %v4825_v2  ;;  %v4834_v34 = vld [vmem:[#allocation4 + $0xa0] sm:$0xff] }
 0x73f   : > { %5526 = vst.msk [vmem:[#allocation4 + $0x30] sm:$0xff] %vm590_vm2, %v5494_v40  ;;  %v5014_v42 = vmul.f32 %v4889_v0, %v4822_v45  ;;  %v4837_v45 = vld [vmem:[#allocation4 + $0xb8] sm:$0xff] }
 0x740   : > { %v5499_v53 = vadd.f32 %v11570_v39, %v5017_v18 }
 0x741   : > { %v5496_v4 = vadd.f32 %v11519_v44, %v5014_v42  ;;  %v4914_v8 = vpop.permute.xlu1 %4913 }
 0x742   : > { %5531 = vst.msk [vmem:[#allocation4 + $0x58] sm:$0xff] %vm590_vm2, %v5499_v53  ;;  %v4899_v51 = vpop.permute.xlu0 %4898  ;;  %v5019_v63 = vmul.f32 %v4914_v8, %v4827_v54  ;;  %v4839_v53 = vld [vmem:[#allocation4 + $0xc8] sm:$0xff] }
 0x743   : > { %5528 = vst.msk [vmem:[#allocation4 + $0x40] sm:$0xff] %vm590_vm2, %v5496_v4  ;;  %v5016_v43 = vmul.f32 %v4899_v51, %v4824_v37  ;;  %v4836_v4 = vld [vmem:[#allocation4 + $0xb0] sm:$0xff] }
 0x744   : > { %v5501_v17 = vadd.f32 %v11598_v11, %v5019_v63  ;;  %v4841_v63 = vld [vmem:[#allocation4 + $0xd8] sm:$0xff] }
 0x745   : > { %v5498_v52 = vadd.f32 %v11555_v23, %v5016_v43  ;;  %v4924_v32 = vpop.permute.xlu1 %4923 }
 0x746   : > { %5533 = vst.msk [vmem:[#allocation4 + $0x68] sm:$0xff] %vm590_vm2, %v5501_v17  ;;  %v4909_v39 = vpop.permute.xlu0 %4908  ;;  %v5021_v41 = vmul.f32 %v4924_v32, %v4829_v60  ;;  %v4838_v60 = vld [vmem:[#allocation4 + $0xc0] sm:$0xff] }
 0x747   : > { %5530 = vst.msk [vmem:[#allocation4 + $0x50] sm:$0xff] %vm590_vm2, %v5498_v52  ;;  %v5018_v44 = vmul.f32 %v4909_v39, %v4826_v21 }
 0x748   : > { %v5503_v14 = vadd.f32 %v11625_v48, %v5021_v41  ;;  %v4840_v41 = vld [vmem:[#allocation4 + $0xd0] sm:$0xff] }
 0x749   : > { %v5500_v1 = vadd.f32 %v11582_v7, %v5018_v44  ;;  %v4934_v26 = vpop.permute.xlu1 %4933  ;;  %v4843_v44 = vld [vmem:[#allocation4 + $0xe8] sm:$0xff] }
 0x74a   : > { %5535 = vst.msk [vmem:[#allocation4 + $0x78] sm:$0xff] %vm590_vm2, %v5503_v14  ;;  %v4919_v11 = vpop.permute.xlu0 %4918  ;;  %v5023_v6 = vmul.f32 %v4934_v26, %v4831_v46 }
 0x74b   : > { %5532 = vst.msk [vmem:[#allocation4 + $0x60] sm:$0xff] %vm590_vm2, %v5500_v1  ;;  %v5020_v23 = vmul.f32 %v4919_v11, %v4828_v35 }
 0x74c   : > { %v5505_v61 = vadd.f32 %v11637_v22, %v5023_v6 }
 0x74d   : > { %v5502_v59 = vadd.f32 %v11618_v29, %v5020_v23  ;;  %v4944_v10 = vpop.permute.xlu1 %4943 }
 0x74e   : > { %5537 = vst.msk [vmem:[#allocation4 + $0x88] sm:$0xff] %vm590_vm2, %v5505_v61  ;;  %v4929_v48 = vpop.permute.xlu0 %4928  ;;  %v5025_v62 = vmul.f32 %v4944_v10, %v4833_v24  ;;  %v4842_v61 = vld [vmem:[#allocation4 + $0xe0] sm:$0xff] }
 0x74f   : > { %5534 = vst.msk [vmem:[#allocation4 + $0x70] sm:$0xff] %vm590_vm2, %v5502_v59  ;;  %v5022_v7 = vmul.f32 %v4929_v48, %v4830_v13 }
 0x750   : > { %v5507_v30 = vadd.f32 %v11647_v12, %v5025_v62  ;;  %v5445_v12 = vadd.f32 %v11657_v33, %v11655_v3 }
 0x751   : > { %v5504_v38 = vadd.f32 %v11631_v49, %v5022_v7  ;;  %v4954_v2 = vpop.permute.xlu1 %4953 }
 0x752   : > { %5539 = vst.msk [vmem:[#allocation4 + $0x98] sm:$0xff] %vm590_vm2, %v5507_v30  ;;  %v4939_v22 = vpop.permute.xlu0 %4938  ;;  %v5027_v25 = vmul.f32 %v4954_v2, %v4835_v20  ;;  %v4844_v30 = vld [vmem:[#allocation4 + $0xf0] sm:$0xff] }
 0x753   : > { %5536 = vst.msk [vmem:[#allocation4 + $0x80] sm:$0xff] %vm590_vm2, %v5504_v38  ;;  %v5024_v29 = vmul.f32 %v4939_v22, %v4832_v50 }
 0x754   : > { %v5509_v40 = vadd.f32 %v11651_v36, %v5027_v25 }
 0x755   : > { %v5506_v0 = vadd.f32 %v11644_v19, %v5024_v29  ;;  %v4964_v18 = vpop.permute.xlu1 %4963  ;;  %v5455_v19 = vadd.f32 %v11663_v5, %v11661_v57 }
 0x756   : > { %5541 = vst.msk [vmem:[#allocation4 + $0xa8] sm:$0xff] %vm590_vm2, %v5509_v40  ;;  %v4949_v49 = vpop.permute.xlu0 %4948  ;;  %v5029_v42 = vmul.f32 %v4964_v18, %v4837_v45 }
 0x757   : > { %5538 = vst.msk [vmem:[#allocation4 + $0x90] sm:$0xff] %vm590_vm2, %v5506_v0  ;;  %v5026_v54 = vmul.f32 %v4949_v49, %v4834_v34 }
 0x758   : > { %v5511_v37 = vadd.f32 %v5445_v12, %v5029_v42 }
 0x759   : > { %v5508_v8 = vadd.f32 %v11649_v27, %v5026_v54  ;;  %v4974_v36 = vpop.permute.xlu1 %4973  ;;  %v5465_v27 = vadd.f32 %v11669_v15, %v11667_v55  ;;  %v5475_v55 = vadd.f32 %v11678_v16, %v11675_v47  ;;  %v5470_v47 = vadd.f32 %v11673_v9, %v11671_v56 }
 0x75a   : > { %5543 = vst.msk [vmem:[#allocation4 + $0xb8] sm:$0xff] %vm590_vm2, %v5511_v37  ;;  %v4959_v51 = vpop.permute.xlu0 %4958  ;;  %v5031_v3 = vmul.f32 %v4974_v36, %v4839_v53 }
 0x75b   : > { %5540 = vst.msk [vmem:[#allocation4 + $0xa0] sm:$0xff] %vm590_vm2, %v5508_v8  ;;  %v5028_v33 = vmul.f32 %v4959_v51, %v4836_v4 }
 0x75c   : > { %v5513_v43 = vadd.f32 %v5455_v19, %v5031_v3 }
 0x75d   : > { %v5510_v17 = vadd.f32 %v11653_v31, %v5028_v33  ;;  %v4984_v21 = vpop.permute.xlu1 %4983 }
 0x75e   : > { %5545 = vst.msk [vmem:[#allocation4 + $0xc8] sm:$0xff] %vm590_vm2, %v5513_v43  ;;  %v4969_v52 = vpop.permute.xlu0 %4968  ;;  %v5033_v57 = vmul.f32 %v4984_v21, %v4841_v63 }
 0x75f   : > { %5542 = vst.msk [vmem:[#allocation4 + $0xb0] sm:$0xff] %vm590_vm2, %v5510_v17  ;;  %v5030_v5 = vmul.f32 %v4969_v52, %v4838_v60  ;;  %v5254_v32 = vpop.f32.mrf.mxu0 }
 0x760   : > { %v5515_v39 = vadd.f32 %v5465_v27, %v5033_v57 }
 0x761   : > { %v5512_v46 = vadd.f32 %v11659_v58, %v5030_v5  ;;  %v5479_v14 = vpop.f32.mrf.mxu1  ;;  %v5256_v35 = vpop.f32.mrf.mxu0  ;;  %v4845_v58 = vld [vmem:[#allocation4 + $0xf8] sm:$0xff] }
 0x762   : > { %5547 = vst.msk [vmem:[#allocation4 + $0xd8] sm:$0xff] %vm590_vm2, %v5515_v39  ;;  %v4979_v31 = vpop.permute.xlu0 %4978  ;;  %v4994_v1 = vpop.permute.xlu1 %4993  ;;  %v5480_v2 = vadd.f32 %v5479_v14, %v5254_v32 }
 0x763   : > { %5544 = vst.msk [vmem:[#allocation4 + $0xc0] sm:$0xff] %vm590_vm2, %v5512_v46  ;;  %v5481_v15 = vpop.f32.mrf.mxu1  ;;  %v5032_v26 = vmul.f32 %v4979_v31, %v4840_v41  ;;  %v5035_v11 = vmul.f32 %v4994_v1, %v4843_v44 }
 0x764   : > { %v5259_v6 = vpop.f32.mrf.mxu0 }
 0x765   : > { %v5514_v23 = vadd.f32 %v11665_v28, %v5032_v26  ;;  %v5517_v24 = vadd.f32 %v5475_v55, %v5035_v11 }
 0x766   : > { %v5484_v13 = vpop.f32.mrf.mxu1  ;;  %v5261_v59 = vpop.f32.mrf.mxu0 }
 0x767   : > { %5546 = vst.msk [vmem:[#allocation4 + $0xd0] sm:$0xff] %vm590_vm2, %v5514_v23  ;;  %5549 = vst.msk [vmem:[#allocation4 + $0xe8] sm:$0xff] %vm590_vm2, %v5517_v24  ;;  %v4989_v10 = vpop.permute.xlu0 %4988  ;;  %v5004_v48 = vpop.permute.xlu1 %5003  ;;  %v5485_v16 = vadd.f32 %v5484_v13, %v5259_v6 }
 0x768   : > { %v5486_v62 = vpop.f32.mrf.mxu1  ;;  %v5034_v7 = vmul.f32 %v4989_v10, %v4842_v61  ;;  %v5037_v20 = vmul.f32 %v5004_v48, %v4845_v58 }
 0x76a   : > { %v5516_v28 = vadd.f32 %v5470_v47, %v5034_v7  ;;  %v5519_v50 = vadd.f32 %v5485_v16, %v5037_v20 }
 0x76b   : > { %v4999_v38 = vpop.permute.xlu0 %4998 }
 0x76c   : > { %5548 = vst.msk [vmem:[#allocation4 + $0xe0] sm:$0xff] %vm590_vm2, %v5516_v28  ;;  %5551 = vst.msk [vmem:[#allocation4 + $0xf8] sm:$0xff] %vm590_vm2, %v5519_v50  ;;  %v5036_v22 = vmul.f32 %v4999_v38, %v4844_v30 }
 0x76e   : > { %v5518_v25 = vadd.f32 %v5480_v2, %v5036_v22 }
 0x770   : > { %5550 = vst.msk [vmem:[#allocation4 + $0xf0] sm:$0xff] %vm590_vm2, %v5518_v25 }
 0x771 PF: > { %p6189_p0 = scmp.ne.s32.totalorder %s7312_s25, 1 }
 0x773   : > { %5587 = sbr.rel (%p6189_p0) target bundleno = 2115 (0x843), region = 48 }
 0x778   : > { %v5590_v56 = vld [vmem:[#allocation3 + $0x10] sm:$0xff]  ;;  %v5588_v9 = vld [vmem:[#allocation3] sm:$0xff]  ;;  %v5591_v29 = vld [vmem:[#allocation3 + $0x18] sm:$0xff]  ;;  %v7233_v45 = vmov 0  }
 0x779   : > { %7081 = vset.pattern.permute.xlu1 %v7233_v45  ;;  %7080 = vset.pattern.permute.xlu0 %v7233_v45  ;;  %7082 = vrcp.f32 %v5590_v56  ;;  %v5589_v40 = vld [vmem:[#allocation3 + $0x8] sm:$0xff]  ;;  %v5592_v0 = vld [vmem:[#allocation3 + $0x20] sm:$0xff]  ;;  %v5595_v18 = vld [vmem:[#allocation3 + $0x38] sm:$0xff] }
 0x77a   : > { %7084 = vrcp.f32 %v5588_v9  ;;  %v5593_v34 = vld [vmem:[#allocation3 + $0x28] sm:$0xff]  ;;  %v5594_v12 = vld [vmem:[#allocation3 + $0x30] sm:$0xff]  ;;  %v5596_v42 = vld [vmem:[#allocation3 + $0x40] sm:$0xff] }
 0x77b   : > { %7086 = vrcp.f32 %v5591_v29  ;;  %v5597_v49 = vld [vmem:[#allocation3 + $0x48] sm:$0xff]  ;;  %v5599_v4 = vld [vmem:[#allocation3 + $0x58] sm:$0xff]  ;;  %v5598_v36 = vld [vmem:[#allocation3 + $0x50] sm:$0xff] }
 0x77c   : > { %7088 = vrcp.f32 %v5589_v40  ;;  %v5601_v51 = vld [vmem:[#allocation3 + $0x68] sm:$0xff]  ;;  %v5600_v33 = vld [vmem:[#allocation3 + $0x60] sm:$0xff]  ;;  %v5603_v43 = vld [vmem:[#allocation3 + $0x78] sm:$0xff] }
 0x77d   : > { %7090 = vrcp.f32 %v5593_v34  ;;  %v5602_v17 = vld [vmem:[#allocation3 + $0x70] sm:$0xff]  ;;  %v5605_v27 = vld [vmem:[#allocation3 + $0x88] sm:$0xff]  ;;  %v5604_v57 = vld [vmem:[#allocation3 + $0x80] sm:$0xff] }
 0x77e   : > { %7092 = vrcp.f32 %v5592_v0  ;;  %v5607_v32 = vld [vmem:[#allocation3 + $0x98] sm:$0xff]  ;;  %v5606_v41 = vld [vmem:[#allocation3 + $0x90] sm:$0xff]  ;;  %v5609_v46 = vld [vmem:[#allocation3 + $0xa8] sm:$0xff] }
 0x77f   : > { %7094 = vrcp.f32 %v5595_v18  ;;  %v5608_v35 = vld [vmem:[#allocation3 + $0xa0] sm:$0xff]  ;;  %v5611_v1 = vld [vmem:[#allocation3 + $0xb8] sm:$0xff]  ;;  %v5610_v15 = vld [vmem:[#allocation3 + $0xb0] sm:$0xff] }
 0x780   : > { %7096 = vrcp.f32 %v5594_v12  ;;  %v5613_v11 = vld [vmem:[#allocation3 + $0xc8] sm:$0xff]  ;;  %v5612_v23 = vld [vmem:[#allocation3 + $0xc0] sm:$0xff]  ;;  %v5615_v61 = vld [vmem:[#allocation3 + $0xd8] sm:$0xff] }
 0x781   : > { %7098 = vrcp.f32 %v5597_v49  ;;  %v5614_v13 = vld [vmem:[#allocation3 + $0xd0] sm:$0xff]  ;;  %v5617_v10 = vld [vmem:[#allocation3 + $0xe8] sm:$0xff]  ;;  %v5616_v47 = vld [vmem:[#allocation3 + $0xe0] sm:$0xff] }
 0x782   : > { %7100 = vrcp.f32 %v5596_v42  ;;  %v5619_v62 = vld [vmem:[#allocation3 + $0xf8] sm:$0xff]  ;;  %v5618_v20 = vld [vmem:[#allocation3 + $0xf0] sm:$0xff]  ;;  %v5652_v29 = vld [vmem:[#allocation4] sm:$0xff] }
 0x783   : > { %7102 = vrcp.f32 %v5599_v4  ;;  %v5654_v9 = vld [vmem:[#allocation4 + $0x10] sm:$0xff]  ;;  %v5655_v18 = vld [vmem:[#allocation4 + $0x18] sm:$0xff]  ;;  %v5653_v12 = vld [vmem:[#allocation4 + $0x8] sm:$0xff] }
 0x784   : > { %7104 = vrcp.f32 %v5598_v36  ;;  %v5656_v4 = vld [vmem:[#allocation4 + $0x20] sm:$0xff] }
 0x785   : > { %7106 = vrcp.f32 %v5601_v51 }
 0x786   : > { %v7083_v54 = vpop.eup %7082  ;;  %7108 = vrcp.f32 %v5600_v33  ;;  %v5658_v33 = vld [vmem:[#allocation4 + $0x30] sm:$0xff] }
 0x787   : > { %v7085_v53 = vpop.eup %7084  ;;  %5696 = vperm.xlu1 %7081, %v7083_v54   ;;  %7110 = vrcp.f32 %v5603_v43 }
 0x788   : > { %v7087_v37 = vpop.eup %7086  ;;  %5686 = vperm.xlu0 %7080, %v7085_v53   ;;  %7112 = vrcp.f32 %v5602_v17 }
 0x789   : > { %v7089_v8 = vpop.eup %7088  ;;  %7114 = vrcp.f32 %v5605_v27  ;;  %v5660_v27 = vld [vmem:[#allocation4 + $0x40] sm:$0xff] }
 0x78a   : > { %v7091_v19 = vpop.eup %7090  ;;  %7116 = vrcp.f32 %v5604_v57 }
 0x78b   : > { %5701 = vperm.xlu1 %7081, %v7087_v37   ;;  %v7093_v3 = vpop.eup %7092  ;;  %7118 = vrcp.f32 %v5607_v32  ;;  %v5657_v37 = vld [vmem:[#allocation4 + $0x28] sm:$0xff] }
 0x78c   : > { %5691 = vperm.xlu0 %7080, %v7089_v8   ;;  %v7095_v63 = vpop.eup %7094  ;;  %7120 = vrcp.f32 %v5606_v41  ;;  %v5662_v41 = vld [vmem:[#allocation4 + $0x50] sm:$0xff] }
 0x78d   : > { %v7097_v60 = vpop.eup %7096  ;;  %7122 = vrcp.f32 %v5609_v46 }
 0x78e   : > { %v7099_v21 = vpop.eup %7098  ;;  %7124 = vrcp.f32 %v5608_v35 }
 0x78f   : > { %5711 = vperm.xlu1 %7081, %v7091_v19   ;;  %v7101_v52 = vpop.eup %7100  ;;  %7126 = vrcp.f32 %v5611_v1  ;;  %v5664_v1 = vld [vmem:[#allocation4 + $0x60] sm:$0xff] }
 0x790   : > { %5706 = vperm.xlu0 %7080, %v7093_v3   ;;  %v7103_v5 = vpop.eup %7102  ;;  %7128 = vrcp.f32 %v5610_v15  ;;  %v5659_v3 = vld [vmem:[#allocation4 + $0x38] sm:$0xff] }
 0x791   : > { %v7105_v39 = vpop.eup %7104  ;;  %7130 = vrcp.f32 %v5613_v11 }
 0x792   : > { %v7107_v44 = vpop.eup %7106  ;;  %7132 = vrcp.f32 %v5612_v23  ;;  %v5666_v23 = vld [vmem:[#allocation4 + $0x70] sm:$0xff] }
 0x793   : > { %5721 = vperm.xlu1 %7081, %v7095_v63   ;;  %v7109_v14 = vpop.eup %7108  ;;  %7134 = vrcp.f32 %v5615_v61 }
 0x794   : > { %5716 = vperm.xlu0 %7080, %v7097_v60   ;;  %v7111_v31 = vpop.eup %7110  ;;  %7136 = vrcp.f32 %v5614_v13 }
 0x795   : > { %v7113_v55 = vpop.eup %7112  ;;  %7138 = vrcp.f32 %v5617_v10  ;;  %v5668_v10 = vld [vmem:[#allocation4 + $0x80] sm:$0xff] }
 0x796   : > { %v7115_v26 = vpop.eup %7114  ;;  %7140 = vrcp.f32 %v5616_v47 }
 0x797   : > { %5731 = vperm.xlu1 %7081, %v7099_v21   ;;  %v7117_v6 = vpop.eup %7116  ;;  %7142 = vrcp.f32 %v5619_v62  ;;  %v5661_v21 = vld [vmem:[#allocation4 + $0x48] sm:$0xff] }
 0x798   : > { %5726 = vperm.xlu0 %7080, %v7101_v52   ;;  %v7119_v24 = vpop.eup %7118  ;;  %7144 = vrcp.f32 %v5618_v20  ;;  %v5670_v20 = vld [vmem:[#allocation4 + $0x90] sm:$0xff] }
 0x799   : > { %v7121_v58 = vpop.eup %7120 }
 0x79a   : > { %v7123_v59 = vpop.eup %7122 }
 0x79b   : > { %5741 = vperm.xlu1 %7081, %v7103_v5   ;;  %v7125_v48 = vpop.eup %7124 }
 0x79c   : > { %5736 = vperm.xlu0 %7080, %v7105_v39   ;;  %v7127_v16 = vpop.eup %7126  ;;  %v5663_v39 = vld [vmem:[#allocation4 + $0x58] sm:$0xff] }
 0x79d   : > { %v7129_v7 = vpop.eup %7128 }
 0x79e   : > { %v7131_v30 = vpop.eup %7130 }
 0x79f   : > { %5751 = vperm.xlu1 %7081, %v7107_v44   ;;  %v7133_v28 = vpop.eup %7132 }
 0x7a0   : > { %5746 = vperm.xlu0 %7080, %v7109_v14   ;;  %v7135_v50 = vpop.eup %7134 }
 0x7a1   : > { %v7137_v38 = vpop.eup %7136 }
 0x7a2   : > { %v7139_v2 = vpop.eup %7138 }
 0x7a3   : > { %5761 = vperm.xlu1 %7081, %v7111_v31   ;;  %v7141_v22 = vpop.eup %7140  ;;  %v5665_v31 = vld [vmem:[#allocation4 + $0x68] sm:$0xff] }
 0x7a4   : > { %5756 = vperm.xlu0 %7080, %v7113_v55   ;;  %v7143_v25 = vpop.eup %7142 }
 0x7a5   : > { %v7145_v56 = vpop.eup %7144 }
 0x7a7   : > { %5771 = vperm.xlu1 %7081, %v7115_v26  }
 0x7a8   : > { %5766 = vperm.xlu0 %7080, %v7117_v6   ;;  %v5667_v6 = vld [vmem:[#allocation4 + $0x78] sm:$0xff] }
 0x7ab   : > { %5781 = vperm.xlu1 %7081, %v7119_v24  }
 0x7ac   : > { %5776 = vperm.xlu0 %7080, %v7121_v58  }
 0x7af   : > { %5791 = vperm.xlu1 %7081, %v7123_v59   ;;  %v5669_v59 = vld [vmem:[#allocation4 + $0x88] sm:$0xff] }
 0x7b0   : > { %5786 = vperm.xlu0 %7080, %v7125_v48  }
 0x7b3   : > { %5801 = vperm.xlu1 %7081, %v7127_v16  }
 0x7b4   : > { %5796 = vperm.xlu0 %7080, %v7129_v7   ;;  %v5671_v7 = vld [vmem:[#allocation4 + $0x98] sm:$0xff] }
 0x7b7   : > { %5811 = vperm.xlu1 %7081, %v7131_v30  }
 0x7b8   : > { %5806 = vperm.xlu0 %7080, %v7133_v28  }
 0x7bb   : > { %5821 = vperm.xlu1 %7081, %v7135_v50  }
 0x7bc   : > { %5816 = vperm.xlu0 %7080, %v7137_v38  }
 0x7bf   : > { %5831 = vperm.xlu1 %7081, %v7139_v2   ;;  %v5673_v2 = vld [vmem:[#allocation4 + $0xa8] sm:$0xff] }
 0x7c0   : > { %5826 = vperm.xlu0 %7080, %v7141_v22   ;;  %v5672_v22 = vld [vmem:[#allocation4 + $0xa0] sm:$0xff] }
 0x7c3   : > { %5841 = vperm.xlu1 %7081, %v7143_v25  }
 0x7c4   : > { %5836 = vperm.xlu0 %7080, %v7145_v56  }
 0x802   : > { %v5697_v45 = vpop.permute.xlu1 %5696 }
 0x803   : > { %v5846_v40 = vmul.f32 %v5697_v45, %v5654_v9  ;;  %v5687_v34 = vpop.permute.xlu0 %5686  ;;  %v5675_v45 = vld [vmem:[#allocation4 + $0xb8] sm:$0xff] }
 0x804   : > { %v5844_v0 = vmul.f32 %v5687_v34, %v5652_v29 }
 0x805   : > { %5878 = vst.msk [vmem:[%s7332_s1 + $0x10] sm:$0xff] %vm590_vm2, %v5846_v40  ;;  %v5674_v40 = vld [vmem:[#allocation4 + $0xb0] sm:$0xff] }
 0x806   : > { %5876 = vst.msk [vmem:[%s7332_s1] sm:$0xff] %vm590_vm2, %v5844_v0  ;;  %v5702_v49 = vpop.permute.xlu1 %5701 }
 0x807   : > { %v5847_v42 = vmul.f32 %v5702_v49, %v5655_v18  ;;  %v5692_v54 = vpop.permute.xlu0 %5691  ;;  %v5677_v49 = vld [vmem:[#allocation4 + $0xc8] sm:$0xff] }
 0x808   : > { %v5845_v53 = vmul.f32 %v5692_v54, %v5653_v12 }
 0x809   : > { %5879 = vst.msk [vmem:[%s7332_s1 + $0x18] sm:$0xff] %vm590_vm2, %v5847_v42  ;;  %v5676_v42 = vld [vmem:[#allocation4 + $0xc0] sm:$0xff] }
 0x80a   : > { %5877 = vst.msk [vmem:[%s7332_s1 + $0x8] sm:$0xff] %vm590_vm2, %v5845_v53  ;;  %v5712_v8 = vpop.permute.xlu1 %5711 }
 0x80b   : > { %v5849_v36 = vmul.f32 %v5712_v8, %v5657_v37  ;;  %v5707_v19 = vpop.permute.xlu0 %5706  ;;  %v5679_v8 = vld [vmem:[#allocation4 + $0xd8] sm:$0xff] }
 0x80c   : > { %v5848_v51 = vmul.f32 %v5707_v19, %v5656_v4 }
 0x80d   : > { %5881 = vst.msk [vmem:[%s7332_s1 + $0x28] sm:$0xff] %vm590_vm2, %v5849_v36  ;;  %v5678_v36 = vld [vmem:[#allocation4 + $0xd0] sm:$0xff] }
 0x80e   : > { %5880 = vst.msk [vmem:[%s7332_s1 + $0x20] sm:$0xff] %vm590_vm2, %v5848_v51  ;;  %v5722_v63 = vpop.permute.xlu1 %5721 }
 0x80f   : > { %v5851_v43 = vmul.f32 %v5722_v63, %v5659_v3  ;;  %v5717_v60 = vpop.permute.xlu0 %5716  ;;  %v5681_v63 = vld [vmem:[#allocation4 + $0xe8] sm:$0xff] }
 0x810   : > { %v5850_v17 = vmul.f32 %v5717_v60, %v5658_v33 }
 0x811   : > { %5883 = vst.msk [vmem:[%s7332_s1 + $0x38] sm:$0xff] %vm590_vm2, %v5851_v43  ;;  %v5680_v43 = vld [vmem:[#allocation4 + $0xe0] sm:$0xff] }
 0x812   : > { %5882 = vst.msk [vmem:[%s7332_s1 + $0x30] sm:$0xff] %vm590_vm2, %v5850_v17  ;;  %v5732_v52 = vpop.permute.xlu1 %5731 }
 0x813   : > { %v5853_v57 = vmul.f32 %v5732_v52, %v5661_v21  ;;  %v5727_v5 = vpop.permute.xlu0 %5726  ;;  %v5683_v52 = vld [vmem:[#allocation4 + $0xf8] sm:$0xff] }
 0x814   : > { %v5852_v32 = vmul.f32 %v5727_v5, %v5660_v27 }
 0x815   : > { %5885 = vst.msk [vmem:[%s7332_s1 + $0x48] sm:$0xff] %vm590_vm2, %v5853_v57  ;;  %v5682_v57 = vld [vmem:[#allocation4 + $0xf0] sm:$0xff] }
 0x816   : > { %5884 = vst.msk [vmem:[%s7332_s1 + $0x40] sm:$0xff] %vm590_vm2, %v5852_v32  ;;  %v5742_v44 = vpop.permute.xlu1 %5741 }
 0x817   : > { %v5855_v46 = vmul.f32 %v5742_v44, %v5663_v39  ;;  %v5737_v14 = vpop.permute.xlu0 %5736 }
 0x818   : > { %v5854_v35 = vmul.f32 %v5737_v14, %v5662_v41 }
 0x819   : > { %5887 = vst.msk [vmem:[%s7332_s1 + $0x58] sm:$0xff] %vm590_vm2, %v5855_v46 }
 0x81a   : > { %5886 = vst.msk [vmem:[%s7332_s1 + $0x50] sm:$0xff] %vm590_vm2, %v5854_v35  ;;  %v5752_v55 = vpop.permute.xlu1 %5751 }
 0x81b   : > { %v5857_v15 = vmul.f32 %v5752_v55, %v5665_v31  ;;  %v5747_v26 = vpop.permute.xlu0 %5746 }
 0x81c   : > { %v5856_v11 = vmul.f32 %v5747_v26, %v5664_v1 }
 0x81d   : > { %5889 = vst.msk [vmem:[%s7332_s1 + $0x68] sm:$0xff] %vm590_vm2, %v5857_v15 }
 0x81e   : > { %5888 = vst.msk [vmem:[%s7332_s1 + $0x60] sm:$0xff] %vm590_vm2, %v5856_v11  ;;  %v5762_v24 = vpop.permute.xlu1 %5761 }
 0x81f   : > { %v5859_v61 = vmul.f32 %v5762_v24, %v5667_v6  ;;  %v5757_v58 = vpop.permute.xlu0 %5756 }
 0x820   : > { %v5858_v13 = vmul.f32 %v5757_v58, %v5666_v23 }
 0x821   : > { %5891 = vst.msk [vmem:[%s7332_s1 + $0x78] sm:$0xff] %vm590_vm2, %v5859_v61 }
 0x822   : > { %5890 = vst.msk [vmem:[%s7332_s1 + $0x70] sm:$0xff] %vm590_vm2, %v5858_v13  ;;  %v5772_v48 = vpop.permute.xlu1 %5771 }
 0x823   : > { %v5861_v47 = vmul.f32 %v5772_v48, %v5669_v59  ;;  %v5767_v16 = vpop.permute.xlu0 %5766 }
 0x824   : > { %v5860_v62 = vmul.f32 %v5767_v16, %v5668_v10 }
 0x825   : > { %5893 = vst.msk [vmem:[%s7332_s1 + $0x88] sm:$0xff] %vm590_vm2, %v5861_v47 }
 0x826   : > { %5892 = vst.msk [vmem:[%s7332_s1 + $0x80] sm:$0xff] %vm590_vm2, %v5860_v62  ;;  %v5782_v30 = vpop.permute.xlu1 %5781 }
 0x827   : > { %v5863_v28 = vmul.f32 %v5782_v30, %v5671_v7  ;;  %v5777_v50 = vpop.permute.xlu0 %5776 }
 0x828   : > { %v5862_v38 = vmul.f32 %v5777_v50, %v5670_v20 }
 0x829   : > { %5895 = vst.msk [vmem:[%s7332_s1 + $0x98] sm:$0xff] %vm590_vm2, %v5863_v28 }
 0x82a   : > { %5894 = vst.msk [vmem:[%s7332_s1 + $0x90] sm:$0xff] %vm590_vm2, %v5862_v38  ;;  %v5792_v25 = vpop.permute.xlu1 %5791 }
 0x82b   : > { %v5865_v56 = vmul.f32 %v5792_v25, %v5673_v2  ;;  %v5787_v9 = vpop.permute.xlu0 %5786 }
 0x82c   : > { %v5864_v29 = vmul.f32 %v5787_v9, %v5672_v22 }
 0x82d   : > { %5897 = vst.msk [vmem:[%s7332_s1 + $0xa8] sm:$0xff] %vm590_vm2, %v5865_v56 }
 0x82e   : > { %5896 = vst.msk [vmem:[%s7332_s1 + $0xa0] sm:$0xff] %vm590_vm2, %v5864_v29  ;;  %v5802_v34 = vpop.permute.xlu1 %5801 }
 0x82f   : > { %v5867_v0 = vmul.f32 %v5802_v34, %v5675_v45  ;;  %v5797_v18 = vpop.permute.xlu0 %5796 }
 0x830   : > { %v5866_v12 = vmul.f32 %v5797_v18, %v5674_v40 }
 0x831   : > { %5899 = vst.msk [vmem:[%s7332_s1 + $0xb8] sm:$0xff] %vm590_vm2, %v5867_v0 }
 0x832   : > { %5898 = vst.msk [vmem:[%s7332_s1 + $0xb0] sm:$0xff] %vm590_vm2, %v5866_v12  ;;  %v5812_v54 = vpop.permute.xlu1 %5811 }
 0x833   : > { %v5869_v53 = vmul.f32 %v5812_v54, %v5677_v49  ;;  %v5807_v37 = vpop.permute.xlu0 %5806 }
 0x834   : > { %v5868_v4 = vmul.f32 %v5807_v37, %v5676_v42 }
 0x835   : > { %5901 = vst.msk [vmem:[%s7332_s1 + $0xc8] sm:$0xff] %vm590_vm2, %v5869_v53 }
 0x836   : > { %5900 = vst.msk [vmem:[%s7332_s1 + $0xc0] sm:$0xff] %vm590_vm2, %v5868_v4  ;;  %v5822_v19 = vpop.permute.xlu1 %5821 }
 0x837   : > { %v5871_v51 = vmul.f32 %v5822_v19, %v5679_v8  ;;  %v5817_v3 = vpop.permute.xlu0 %5816 }
 0x838   : > { %v5870_v33 = vmul.f32 %v5817_v3, %v5678_v36 }
 0x839   : > { %5903 = vst.msk [vmem:[%s7332_s1 + $0xd8] sm:$0xff] %vm590_vm2, %v5871_v51 }
 0x83a   : > { %5902 = vst.msk [vmem:[%s7332_s1 + $0xd0] sm:$0xff] %vm590_vm2, %v5870_v33  ;;  %v5832_v60 = vpop.permute.xlu1 %5831 }
 0x83b   : > { %v5873_v17 = vmul.f32 %v5832_v60, %v5681_v63  ;;  %v5827_v21 = vpop.permute.xlu0 %5826 }
 0x83c   : > { %v5872_v27 = vmul.f32 %v5827_v21, %v5680_v43 }
 0x83d   : > { %5905 = vst.msk [vmem:[%s7332_s1 + $0xe8] sm:$0xff] %vm590_vm2, %v5873_v17 }
 0x83e   : > { %5904 = vst.msk [vmem:[%s7332_s1 + $0xe0] sm:$0xff] %vm590_vm2, %v5872_v27  ;;  %v5842_v5 = vpop.permute.xlu1 %5841 }
 0x83f   : > { %v5875_v32 = vmul.f32 %v5842_v5, %v5683_v52  ;;  %v5837_v39 = vpop.permute.xlu0 %5836 }
 0x840   : > { %v5874_v41 = vmul.f32 %v5837_v39, %v5682_v57 }
 0x841   : > { %5907 = vst.msk [vmem:[%s7332_s1 + $0xf8] sm:$0xff] %vm590_vm2, %v5875_v32 }
 0x842   : > { %5906 = vst.msk [vmem:[%s7332_s1 + $0xf0] sm:$0xff] %vm590_vm2, %v5874_v41 }
 0x843 PF: > { %s30_s13 = sadd.s32 1, %s7222_s13   ;;  %s13357_s10 = smov %s7214_s12 }
 0x844   : > { %p27_p1 = scmp.ge.s32.totalorder %s30_s13, 10   ;;  %s13358_s11 = smov %s7218_s2 }
 0x845   : > { %s13359_s12 = smov %s13362_s14  ;;  %s13360_s2 = smov %s13366_s15 }
 0x846   :  { %29 = sbr.rel (!%p27_p1) target bundleno = 38 (0x26), region = 84 }

</bundles_post_ra>
